<compile_context>
chip_gen: v5e
topology: v5e:2x2
jax: 0.10.0
libtpu: 0.0.40
codegen_flags: <defaults>
</compile_context>

<pallas_src>
import jax
import jax.numpy as jnp
from jax.experimental import pallas as pl
from jax.experimental.pallas import tpu as pltpu


# --------------------------------------------------------------------------
# Kernel 1: image branch, run once per forward.
#   images (B, C, H*W) --global-avg-pool--> (B, C)
#   --w_stem_proj (C, 768) [= w_stem @ w_proj, folded, exact]--> img_proj (B, 768)
#   --W_img (768, V) + b_fusion--> img_logits (B, V)
# C is tiny (3), so the (B,C)@(C,768) map is done as C VPU broadcast-FMAs
# instead of a K=C MXU matmul (which would pad K to 128).
# --------------------------------------------------------------------------
def image_logits_kernel(img_ref, w_sp_ref, b_proj_ref, w_img_ref, b_fus_ref,
                        out_ref):
    pooled = jnp.mean(img_ref[...], axis=-1)                       # (B, C) f32
    w_sp = w_sp_ref[...]                                           # (C, 768) f32
    B = pooled.shape[0]
    H = w_sp.shape[1]
    proj = jnp.broadcast_to(b_proj_ref[...], (B, H))               # bias in f32
    for c in range(w_sp.shape[0]):                                 # static, C iters
        proj = proj + pooled[:, c:c + 1] * w_sp[c:c + 1, :]
    # Image half of the fusion GEMM, hoisted out of the fusion grid.
    # bf16 MXU inputs, f32 accumulation; bias add stays in f32.
    logits = jnp.dot(proj.astype(jnp.bfloat16), w_img_ref[...],
                     preferred_element_type=jnp.float32) + b_fus_ref[...]
    out_ref[...] = logits.astype(out_ref.dtype)                    # (B, V) f32


def image_logits(images_bc_hw, w_stem_proj, b_proj, w_img_bf16, b_fusion):
    B = images_bc_hw.shape[0]
    V = w_img_bf16.shape[1]
    return pl.pallas_call(
        image_logits_kernel,
        out_shape=jax.ShapeDtypeStruct((B, V), jnp.float32),
        in_specs=[pl.BlockSpec(memory_space=pltpu.MemorySpace.VMEM)] * 5,
        out_specs=pl.BlockSpec(memory_space=pltpu.MemorySpace.VMEM),
    )(images_bc_hw, w_stem_proj, b_proj, w_img_bf16, b_fusion)


# --------------------------------------------------------------------------
# Kernel 2: fusion.
#   out[b, t, :] = ReLU( text[b, t] @ W_txt + img_logits[b] )
# (img_logits already contains img_proj @ W_img + b_fusion.)
# One (bb*T, 768) @ (768, tv) bf16 matmul per grid step; f32 accumulation,
# f32 add + ReLU, f32 output.  Dropout: eval-mode identity.
# --------------------------------------------------------------------------
def fusion_kernel(text_ref, w_txt_ref, img_logits_ref, out_ref):
    bb, T, H = text_ref.shape
    txt = text_ref[...].reshape(bb * T, H)                         # bf16
    logits = jnp.dot(txt, w_txt_ref[...],
                     preferred_element_type=jnp.float32)           # (bb*T, tv) f32
    logits = logits.reshape(bb, T, -1) + img_logits_ref[...]       # (bb,1,tv) bcast
    out_ref[...] = jnp.maximum(logits, 0.0).astype(out_ref.dtype)


def _pick_bb(B, T, target_rows=256):
    """Largest divisor of B with bb*T <= target_rows; prefer >=2 grid steps."""
    best = 1
    for d in range(1, B + 1):
        if B % d == 0 and d * T <= target_rows:
            best = d
    if best == B and B >= 2:                   # keep >=2 parallel steps (v7x 2 TCs)
        for d in range(B - 1, 0, -1):
            if B % d == 0:
                best = d
                break
    return best


def fusion(text_feats_bf16, w_txt_bf16, img_logits_b1v, *, tv_max=2048):
    B, T, H = text_feats_bf16.shape
    V = w_txt_bf16.shape[1]

    bb = _pick_bb(B, T)
    tv = V if V <= tv_max else tv_max
    while V % tv != 0 or tv % 128 != 0:        # keep lane-dense, evenly dividing tiles
        tv //= 2
    tv = max(tv, min(V, 128))

    grid = (B // bb, V // tv)
    return pl.pallas_call(
        fusion_kernel,
        out_shape=jax.ShapeDtypeStruct((B, T, V), jnp.float32),
        grid=grid,
        in_specs=[
            pl.BlockSpec((bb, T, H), lambda i, j: (i, 0, 0)),   # text tile
            pl.BlockSpec((H, tv), lambda i, j: (0, j)),         # W_txt vocab tile
            pl.BlockSpec((bb, 1, tv), lambda i, j: (i, 0, j)),  # per-batch img logits
        ],
        out_specs=pl.BlockSpec((bb, T, tv), lambda i, j: (i, 0, j)),
        compiler_params=pltpu.CompilerParams(
            dimension_semantics=("parallel", "parallel")),
    )(text_feats_bf16, w_txt_bf16, img_logits_b1v)


# --------------------------------------------------------------------------
# Full forward (glue in plain JAX, hot paths in Pallas)
# --------------------------------------------------------------------------
def multimodal_forward(images_nchw, input_ids, attention_mask, params):
    B, C, H_img, W_img = images_nchw.shape
    images_bc_hw = images_nchw.reshape(B, C, H_img * W_img)        # NCHW -> (B, C, H*W)

    HID = params["w_proj"].shape[1]
    V = params["w_fusion"].shape[1]

    # Fold the two stacked linear maps (stem 3->2048, projection 2048->768):
    # exact since there is no nonlinearity between them.  (C, 768) -- tiny.
    w_stem_proj = params["w_stem"] @ params["w_proj"]              # (C, 768) f32
    b_proj = params["b_proj"].reshape(1, HID)

    # Split W_fusion to realize concat([image_projection, text], -1) @ W_fusion.
    w_img = params["w_fusion"][:HID].astype(jnp.bfloat16)          # (768, V)
    w_txt = params["w_fusion"][HID:].astype(jnp.bfloat16)          # (768, V)
    b_fus = params["b_fusion"].reshape(1, V).astype(jnp.float32)

    # Kernel 1: image branch -> per-batch additive logits (B, V).
    img_logits = image_logits(images_bc_hw, w_stem_proj, b_proj, w_img, b_fus)
    img_logits_b1v = img_logits.reshape(B, 1, V)

    # Text decoder stand-in: token embedding gated by attention_mask (glue).
    text_feats = params["emb"][input_ids] * attention_mask[..., None].astype(jnp.float32)
    text_feats = text_feats.astype(jnp.bfloat16)                   # bf16 MXU input

    # Kernel 2: fusion Linear(1536, vocab) + ReLU (+ eval-mode Dropout).
    return fusion(text_feats, w_txt, img_logits_b1v)


if __name__ == "__main__":
    key = jax.random.PRNGKey(0)
    ks = jax.random.split(key, 8)

    # Small shapes consistent with the module's forward.
    B, C, H, W = 2, 3, 16, 16        # images: NCHW
    T = 8                            # sequence length
    HID = 768                        # text hidden size / projection output
    IMG_FEAT = 2048                  # ResNet50 feature width
    VOCAB = 512                      # len(tokenizer)

    images = jax.random.normal(ks[0], (B, C, H, W), dtype=jnp.float32)
    input_ids = jax.random.randint(ks[1], (B, T), 0, VOCAB, dtype=jnp.int32)
    attention_mask = jnp.ones((B, T), dtype=jnp.int32)

    params = {
        # synthetic deterministic parameters
        "w_stem":   jax.random.normal(ks[2], (C, IMG_FEAT), jnp.float32) * 0.02,
        "w_proj":   jax.random.normal(ks[3], (IMG_FEAT, HID), jnp.float32) * 0.02,
        "b_proj":   (jax.random.normal(ks[4], (1, HID), jnp.float32) * 0.02),
        "emb":      jax.random.normal(ks[5], (VOCAB, HID), jnp.float32) * 0.02,
        "w_fusion": jax.random.normal(ks[6], (2 * HID, VOCAB), jnp.float32) * 0.02,
        "b_fusion": jax.random.normal(ks[7], (VOCAB,), jnp.float32) * 0.02,
    }

    out = multimodal_forward(images, input_ids, attention_mask, params)
    out = jax.block_until_ready(out)
    assert out.shape == (B, T, VOCAB), out.shape
    assert bool(jnp.all(out >= 0.0))  # ReLU output is non-negative
    print("KERNEL_OK")
</pallas_src>

<mosaic_0001>
module attributes {stable_mosaic.version = 11 : i64} {
  func.func @image_logits_kernel(%arg0: memref<2x3x256xf32, #tpu.memory_space<vmem>>, %arg1: memref<3x768xf32, #tpu.memory_space<vmem>>, %arg2: memref<1x768xf32, #tpu.memory_space<vmem>>, %arg3: memref<768x512xbf16, #tpu.memory_space<vmem>>, %arg4: memref<1x512xf32, #tpu.memory_space<vmem>>, %arg5: memref<2x512xf32, #tpu.memory_space<vmem>>) attributes {dimension_semantics = [], scalar_prefetch = 0 : i64, scratch_operands = 0 : i64, tpu.core_type = #tpu.core_type<tc>} {
    %c0 = arith.constant 0 : index
    %c0_0 = arith.constant 0 : index
    %c0_1 = arith.constant 0 : index
    %0 = vector.load %arg0[%c0, %c0_0, %c0_1] : memref<2x3x256xf32, #tpu.memory_space<vmem>>, vector<2x3x256xf32>
    %cst = arith.constant dense<0.000000e+00> : vector<2x3xf32>
    %1 = vector.multi_reduction <add>, %0, %cst [2] : vector<2x3x256xf32> to vector<2x3xf32>
    %cst_2 = arith.constant 2.560000e+02 : f32
    %2 = vector.broadcast %cst_2 : f32 to vector<2x3xf32>
    %3 = arith.divf %1, %2 : vector<2x3xf32>
    %c0_3 = arith.constant 0 : index
    %c0_4 = arith.constant 0 : index
    %4 = vector.load %arg1[%c0_3, %c0_4] : memref<3x768xf32, #tpu.memory_space<vmem>>, vector<3x768xf32>
    %c0_5 = arith.constant 0 : index
    %c0_6 = arith.constant 0 : index
    %5 = vector.load %arg2[%c0_5, %c0_6] : memref<1x768xf32, #tpu.memory_space<vmem>>, vector<1x768xf32>
    %6 = vector.shape_cast %5 : vector<1x768xf32> to vector<1x768xf32>
    %7 = vector.broadcast %6 : vector<1x768xf32> to vector<2x768xf32>
    %8 = vector.extract_strided_slice %3 {offsets = [0, 0], sizes = [2, 1], strides = [1, 1]} : vector<2x3xf32> to vector<2x1xf32>
    %9 = vector.extract_strided_slice %4 {offsets = [0, 0], sizes = [1, 768], strides = [1, 1]} : vector<3x768xf32> to vector<1x768xf32>
    %10 = vector.broadcast %8 : vector<2x1xf32> to vector<2x768xf32>
    %11 = vector.broadcast %9 : vector<1x768xf32> to vector<2x768xf32>
    %12 = arith.mulf %10, %11 : vector<2x768xf32>
    %13 = arith.addf %7, %12 : vector<2x768xf32>
    %14 = vector.extract_strided_slice %3 {offsets = [0, 1], sizes = [2, 1], strides = [1, 1]} : vector<2x3xf32> to vector<2x1xf32>
    %15 = vector.extract_strided_slice %4 {offsets = [1, 0], sizes = [1, 768], strides = [1, 1]} : vector<3x768xf32> to vector<1x768xf32>
    %16 = vector.broadcast %14 : vector<2x1xf32> to vector<2x768xf32>
    %17 = vector.broadcast %15 : vector<1x768xf32> to vector<2x768xf32>
    %18 = arith.mulf %16, %17 : vector<2x768xf32>
    %19 = arith.addf %13, %18 : vector<2x768xf32>
    %20 = vector.extract_strided_slice %3 {offsets = [0, 2], sizes = [2, 1], strides = [1, 1]} : vector<2x3xf32> to vector<2x1xf32>
    %21 = vector.extract_strided_slice %4 {offsets = [2, 0], sizes = [1, 768], strides = [1, 1]} : vector<3x768xf32> to vector<1x768xf32>
    %22 = vector.broadcast %20 : vector<2x1xf32> to vector<2x768xf32>
    %23 = vector.broadcast %21 : vector<1x768xf32> to vector<2x768xf32>
    %24 = arith.mulf %22, %23 : vector<2x768xf32>
    %25 = arith.addf %19, %24 : vector<2x768xf32>
    %26 = arith.truncf %25 : vector<2x768xf32> to vector<2x768xbf16>
    %c0_7 = arith.constant 0 : index
    %c0_8 = arith.constant 0 : index
    %27 = vector.load %arg3[%c0_7, %c0_8] : memref<768x512xbf16, #tpu.memory_space<vmem>>, vector<768x512xbf16>
    %cst_9 = arith.constant dense<0.000000e+00> : vector<2x512xf32>
    %28 = tpu.matmul %26, %27, %cst_9 {dimension_numbers = #tpu.dot_dimension_numbers<[1], [0], [0], [1], [0, 0, 1, 1], [], []>} : vector<2x768xbf16>, vector<768x512xbf16>, vector<2x512xf32> -> vector<2x512xf32>
    %c0_10 = arith.constant 0 : index
    %c0_11 = arith.constant 0 : index
    %29 = vector.load %arg4[%c0_10, %c0_11] : memref<1x512xf32, #tpu.memory_space<vmem>>, vector<1x512xf32>
    %30 = vector.broadcast %29 : vector<1x512xf32> to vector<2x512xf32>
    %31 = arith.addf %28, %30 : vector<2x512xf32>
    %c0_12 = arith.constant 0 : index
    %c0_13 = arith.constant 0 : index
    %32 = vector.load %arg5[%c0_12, %c0_13] : memref<2x512xf32, #tpu.memory_space<vmem>>, vector<2x512xf32>
    tpu.vector_store %arg5[%c0_12, %c0_13], %31 {strides = array<i32>} : memref<2x512xf32, #tpu.memory_space<vmem>>, vector<2x512xf32>,
    return
  }
}

</mosaic_0001>

<bundles_post_ra>
// kernel: tpu_custom_call.1
= control target key start
LH: loop header
LB: loop body
LE: loop exit
PB: predicated region body
PF: predicated region fallthrough
CT: control target
= control target key end

     0   :  { %10 = vsyncpa [#allocation3], 0  ;;  %s14798_s0 = inlined_call_operand.vmem [shape: f32[2,3,256], index: 0, kind: input, shape index: {}]   ;;  %s14799_s1 = inlined_call_operand.vmem [shape: f32[3,768], index: 1, kind: input, shape index: {}]   ;;  %s14800_s2 = inlined_call_operand.hbm [shape: f32[1,768], index: 2, kind: input, shape index: {}]   ;;  %s14801_s3 = inlined_call_operand.hbm [shape: bf16[768,512], index: 3, kind: input, shape index: {}]   ;;  %s14802_s4 = inlined_call_operand.vmem [shape: f32[1,512], index: 4, kind: input, shape index: {}]   ;;  %s14803_s5 = inlined_call_operand.hbm [shape: f32[2,512], index: 5, kind: output, shape index: {}]  }
   0x1   :  { %11 = vsyncpa [#allocation6], 0 }
   0x2   :  { %12 = vsyncpa [#allocation4], 0  ;;  %s22_s20 = sshll.u32 %s14800_s2, 4  ;;  %s9121_s21 = smov [#allocation2]   ;;  %s23_s20 = int_to_ptr.hbm [resolvable:$true] %s22_s20 }
   0x3   :  { %s24_s22 = sshll.u32 %s9121_s21, 4  ;;  %s32_s25 = sshll.u32 %s14801_s3, 4  ;;  %s25_s22 = int_to_ptr.vmem [resolvable:$true] %s24_s22  ;;  %s33_s25 = int_to_ptr.hbm [resolvable:$true] %s32_s25 }
   0x4   :  { %27 = dma.hbm_to_vmem [thread:$0]  %s23_s20, 96, %s25_s22, [#allocation3]  }
   0x5   :  { %s9122_s26 = smov [#allocation5]   ;;  %s9123_s28 = smov 256  }
   0x6   :  { %s34_s27 = sshll.u32 %s9122_s26, 4  ;;  %s9124_s29 = smov 16   ;;  %s35_s27 = int_to_ptr.vmem [resolvable:$true] %s34_s27 }
   0x7   :  { %40 = dma.hbm_to_vmem [thread:$0]  %s33_s25, 24576, %s35_s27, [#allocation6], %s9123_s28, %s9123_s28, %s9124_s29  }
   0x8   :  { %9115 = dma.done.wait [#allocation3], 96  }
   0x9   :  { %9116 = vsyncadd [#allocation3], 4294967200 }
   0xa   :  { %9117 = dma.done.wait [#allocation6], 24576  }
   0xb   :  { %9118 = vsyncadd [#allocation6], 4294942720  ;;  %v14804_v0 = vlaneseq  ;;  %v9178_v4 = vld [vmem:[%s14799_s1] sm:$0x77]  ;;  %v52_v6 = vld [vmem:[%s14798_s0 + $0x8] sm:$0x77] }
   0xc   :  { %v51_v5 = vld [vmem:[%s14798_s0] sm:$0x77]  ;;  %v108_v7 = vperm.slane %v9178_v4, 0  ;;  %59 = vst [vmem:[#allocation1 + $0x10] ss:$2 sm:$0xff] %v52_v6  ;;  %vm66_vm0 = vcmask 1042432  }
   0xd   :  { %v9165_v1 = vshrl.u32 %v14804_v0, 7  ;;  %55 = vst [vmem:[#allocation1] ss:$2 sm:$0xff] %v51_v5  ;;  %v109_v23 = vperm.slane %v9178_v4, 4  ;;  %v9241_v29 = vld [vmem:[%s14799_s1 + $0x8] sm:$0x77] }
   0xe   :  { %v9188_v8 = vperm.slane %v108_v7, 0  ;;  %v110_v30 = vperm.slane %v9241_v29, 0  ;;  %v111_v36 = vperm.slane %v9241_v29, 4  ;;  %v9288_v38 = vld [vmem:[%s14799_s1 + $0x10] sm:$0x77]  ;;  %v2189_v44 = vperm.slane %v9178_v4, 1 }
   0xf   :  { %15163 = vst [vmem:[#allocation11_spill] sm:$0xff] %v9165_v1  ;;  %8763 = vset.pattern.permute.xlu1 %v9165_v1  ;;  %v9169_v2 = vadd.s32 16, %v9165_v1  ;;  %v9172_v3 = vadd.s32 32, %v9165_v1  ;;  %v9193_v13 = vadd.s32 8, %v9165_v1  ;;  %v9196_v17 = vadd.s32 24, %v9165_v1  ;;  %s7785_s18 = sshll.u32 %s14803_s5, 4  ;;  %s7786_s18 = int_to_ptr.hbm [resolvable:$true] %s7785_s18 }
  0x10   :  { %v9203_v21 = vadd.s32 40, %v9165_v1  ;;  %v9206_v22 = vadd.s32 48, %v9165_v1  ;;  %v9215_v24 = vadd.s32 56, %v9165_v1  ;;  %v9218_v25 = vadd.s32 64, %v9165_v1 }
  0x11   :  { %15164 = vst [vmem:[#allocation12_spill] sm:$0xff] %v9169_v2  ;;  %8765 = vset.pattern.permute.xlu2 %v9169_v2  ;;  %8767 = vset.pattern.permute.xlu0 %v9172_v3  ;;  %v9220_v26 = vperm.slane %v109_v23, 0  ;;  %v9226_v27 = vadd.s32 72, %v9165_v1  ;;  %v9232_v28 = vadd.s32 80, %v9165_v1  ;;  %v9247_v31 = vadd.s32 88, %v9165_v1 }
  0x12   :  { %15165 = vst [vmem:[#allocation13_spill] sm:$0xff] %v9172_v3  ;;  %v9250_v32 = vadd.s32 96, %v9165_v1  ;;  %v9252_v33 = vperm.slane %v110_v30, 0  ;;  %v9261_v34 = vadd.s32 104, %v9165_v1  ;;  %v9264_v35 = vadd.s32 112, %v9165_v1 }
  0x13   :  { %15166 = vst [vmem:[#allocation14_spill] sm:$0xff] %v9193_v13  ;;  %v60_v15 = vld.sshfl [vmem:[#allocation1 + $0x10] sm:$0xff pattern:$0x75316420]  ;;  %v9273_v37 = vperm.slane %v111_v36, 0  ;;  %v112_v39 = vperm.slane %v9288_v38, 0 }
  0x14   :  { %v56_v9 = vld.sshfl [vmem:[#allocation1] sm:$0xff pattern:$0x75316420]  ;;  %v57_v10 = vld.sshfl [vmem:[#allocation1 + $0x8] sm:$0xff pattern:$0x75316420] }
  0x15   :  { %v67_v11 = vsel %vm66_vm0, %v56_v9, 0.0  ;;  %v68_v12 = vsel %vm66_vm0, %v57_v10, 0.0  ;;  %v61_v16 = vld.sshfl [vmem:[#allocation1 + $0x18] sm:$0xff pattern:$0x75316420]  ;;  %15167 = vst [vmem:[#allocation15_spill] sm:$0xff] %v9196_v17 }
  0x16   :  { %v69_v14 = vadd.f32 %v68_v12, %v67_v11  ;;  %v72_v18 = vsel %vm66_vm0, %v60_v15, 0.0  ;;  %v73_v19 = vsel %vm66_vm0, %v61_v16, 0.0  ;;  %15168 = vst [vmem:[#allocation16_spill] sm:$0xff] %v9203_v21  ;;  %v9293_v40 = vperm.slane %v112_v39, 0 }
  0x17   :  { %136 = vperm.xlu1 %8763, %v9188_v8   ;;  %v74_v20 = vadd.f32 %v73_v19, %v72_v18  ;;  %15169 = vst [vmem:[#allocation17_spill] sm:$0xff] %v9206_v22  ;;  %v113_v41 = vperm.slane %v9288_v38, 4  ;;  %v9320_v43 = vadd.s32 120, %v9165_v1  ;;  %v9338_v45 = vperm.slane %v2189_v44, 1 }
  0x18   :  { %70 = vadd.xlane.f32.xlu0 %v69_v14  ;;  %15170 = vst [vmem:[#allocation18_spill] sm:$0xff] %v9215_v24  ;;  %v2190_v46 = vperm.slane %v9178_v4, 5  ;;  %v2191_v48 = vperm.slane %v9241_v29, 1  ;;  %v2192_v50 = vperm.slane %v9241_v29, 5  ;;  %v2193_v52 = vperm.slane %v9288_v38, 1 }
  0x19   :  { %148 = vperm.xlu2 %8765, %v9188_v8   ;;  %15171 = vst [vmem:[#allocation19_spill] sm:$0xff] %v9218_v25  ;;  %v9308_v42 = vperm.slane %v113_v41, 0  ;;  %v2194_v54 = vperm.slane %v9288_v38, 5  ;;  %v4238_v6 = vperm.slane %v9178_v4, 6  ;;  %v4239_v41 = vperm.slane %v9241_v29, 2 }
  0x1a   :  { %15172 = vst [vmem:[#allocation20_spill] sm:$0xff] %v9226_v27  ;;  %v9347_v47 = vperm.slane %v2190_v46, 1  ;;  %v9356_v49 = vperm.slane %v2191_v48, 1  ;;  %v9371_v51 = vperm.slane %v2192_v50, 1  ;;  %v9386_v53 = vperm.slane %v2193_v52, 1 }
  0x1b   :  { %15173 = vst [vmem:[#allocation21_spill] sm:$0xff] %v9232_v28  ;;  %v9404_v55 = vperm.slane %v2194_v54, 1  ;;  %v9513_v46 = vperm.slane %v4239_v41, 2  ;;  %vm1769_vm2 = vcmask 130112   ;;  %vm1773_vm3 = vcmask 195712  }
  0x1c   :  { %15174 = vst [vmem:[#allocation22_spill] sm:$0xff] %v9247_v31  ;;  %vm1777_vm4 = vcmask 261312   ;;  %vm1781_vm5 = vcmask 326912   ;;  %vm1785_vm6 = vcmask 392512   ;;  %vm1789_vm7 = vcmask 458112  }
  0x1d   :  { %15175 = vst [vmem:[#allocation23_spill] sm:$0xff] %v9250_v32  ;;  %vm1793_vm8 = vcmask 523712   ;;  %vm1797_vm9 = vcmask 589312   ;;  %vm1801_vm10 = vcmask 654912   ;;  %vm1805_vm11 = vcmask 720512  }
  0x1e   :  { %15176 = vst [vmem:[#allocation24_spill] sm:$0xff] %v9261_v34  ;;  %vm1809_vm12 = vcmask 786112   ;;  %vm1813_vm13 = vcmask 851712   ;;  %vm1817_vm14 = vcmask 917312   ;;  %vm1821_vm15 = vcmask 982912  }
  0x1f   :  { %8764 = vset.pattern.permute.xlu1 %v9193_v13  ;;  %15177 = vst [vmem:[#allocation25_spill] sm:$0xff] %v9264_v35  ;;  %vm1825_vm0 = vcmask 1048512  }
  0x20   :  { %75 = vadd.xlane.f32.xlu0 %v74_v20  ;;  %15178 = vst [vmem:[#allocation26_spill] sm:$0xff] %v9320_v43 }
  0x21   :  { %8766 = vset.pattern.permute.xlu2 %v9196_v17  ;;  %15179 = vst [vmem:[#allocation27_spill] sm:$0xff] %v9338_v45 }
  0x22   :  { %15180 = vst [vmem:[#allocation28_spill] sm:$0xff] %v9347_v47 }
  0x23   :  { %15181 = vst [vmem:[#allocation29_spill] sm:$0xff] %v9356_v49 }
  0x24   :  { %15182 = vst [vmem:[#allocation30_spill] sm:$0xff] %v9371_v51 }
  0x25   :  { %15183 = vst [vmem:[#allocation31_spill] sm:$0xff] %v9386_v53 }
  0x26   :  { %15184 = vst [vmem:[#allocation32_spill] sm:$0xff] %v9404_v55 }
  0x27   :  { %142 = vperm.xlu1 %8764, %v9188_v8   ;;  %15203 = vst [vmem:[#allocation51_spill] sm:$0xff] %v9513_v46 }
  0x29   :  { %154 = vperm.xlu2 %8766, %v9188_v8  }
  0x2f   :  { %8768 = vset.pattern.permute.xlu1 %v9203_v21 }
  0x31   :  { %8769 = vset.pattern.permute.xlu2 %v9206_v22 }
  0x34   :  { %160 = vperm.xlu0 %8767, %v9188_v8  }
  0x37   :  { %166 = vperm.xlu1 %8768, %v9188_v8  }
  0x39   :  { %172 = vperm.xlu2 %8769, %v9188_v8  }
  0x3c   :  { %256 = vperm.xlu0 %8767, %v9220_v26  }
  0x3f   :  { %8770 = vset.pattern.permute.xlu1 %v9215_v24 }
  0x41   :  { %8771 = vset.pattern.permute.xlu2 %v9218_v25 }
  0x44   :  { %8786 = vset.pattern.permute.xlu0 %v9226_v27 }
  0x47   :  { %178 = vperm.xlu1 %8770, %v9188_v8  }
  0x49   :  { %184 = vperm.xlu2 %8771, %v9188_v8  }
  0x4c   :  { %286 = vperm.xlu0 %8786, %v9220_v26  }
  0x4f   :  { %8772 = vset.pattern.permute.xlu1 %v9226_v27 }
  0x51   :  { %8773 = vset.pattern.permute.xlu2 %v9232_v28 }
  0x54   :  { %8795 = vset.pattern.permute.xlu0 %v9196_v17 }
  0x57   :  { %190 = vperm.xlu1 %8772, %v9188_v8  }
  0x59   :  { %196 = vperm.xlu2 %8773, %v9188_v8  }
  0x5c   :  { %346 = vperm.xlu0 %8795, %v9252_v33  }
  0x5f   :  { %8774 = vset.pattern.permute.xlu1 %v9247_v31 }
  0x61   :  { %8775 = vset.pattern.permute.xlu2 %v9250_v32 }
  0x64   :  { %8800 = vset.pattern.permute.xlu0 %v9218_v25 }
  0x67   :  { %202 = vperm.xlu1 %8774, %v9188_v8  }
  0x69   :  { %208 = vperm.xlu2 %8775, %v9188_v8  }
  0x6c   :  { %376 = vperm.xlu0 %8800, %v9252_v33  }
  0x6f   :  { %8776 = vset.pattern.permute.xlu1 %v9261_v34 }
  0x71   :  { %8777 = vset.pattern.permute.xlu2 %v9264_v35 }
  0x73   :  { %v9415_v56 = vpop.permute.xlu2 %148 }
  0x74   :  { %8809 = vset.pattern.permute.xlu0 %v9169_v2 }
  0x77   :  { %214 = vperm.xlu1 %8776, %v9188_v8  }
  0x79   :  { %220 = vperm.xlu2 %8777, %v9188_v8  }
  0x7c   :  { %436 = vperm.xlu0 %8809, %v9273_v37  }
  0x7f   :  { %8778 = vset.pattern.permute.xlu1 %v9165_v1 }
  0x81   :  { %8779 = vset.pattern.permute.xlu2 %v9193_v13 }
  0x83   :  { %v9420_v57 = vpop.permute.xlu2 %154 }
  0x84   :  { %8814 = vset.pattern.permute.xlu0 %v9215_v24  ;;  %15185 = vst [vmem:[#allocation33_spill] sm:$0xff] %v9420_v57 }
  0x87   :  { %232 = vperm.xlu1 %8778, %v9220_v26  }
  0x89   :  { %238 = vperm.xlu2 %8779, %v9220_v26   ;;  %v9433_v60 = vpop.permute.xlu1 %136 }
  0x8a   :  { %15188 = vst [vmem:[#allocation36_spill] sm:$0xff] %v9433_v60 }
  0x8b   :  { %v9523_v52 = vpop.xlane.xlu0 %70 }
  0x8c   :  { %466 = vperm.xlu0 %8814, %v9273_v37  }
  0x8f   :  { %8780 = vset.pattern.permute.xlu1 %v9169_v2 }
  0x91   :  { %8781 = vset.pattern.permute.xlu2 %v9196_v17 }
  0x93   :  { %v9425_v58 = vpop.permute.xlu2 %172  ;;  %v9535_v0 = vpop.xlane.xlu0 %75 }
  0x94   :  { %8823 = vset.pattern.permute.xlu0 %v9193_v13  ;;  %15186 = vst [vmem:[#allocation34_spill] sm:$0xff] %v9425_v58 }
  0x95   :  { %15206 = vst [vmem:[#allocation54_spill] sm:$0xff] %v9535_v0 }
  0x97   :  { %244 = vperm.xlu1 %8780, %v9220_v26  }
  0x99   :  { %250 = vperm.xlu2 %8781, %v9220_v26   ;;  %v9440_v62 = vpop.permute.xlu1 %142 }
  0x9c   :  { %526 = vperm.xlu0 %8823, %v9293_v40  }
  0x9f   :  { %8782 = vset.pattern.permute.xlu1 %v9203_v21 }
  0xa1   :  { %8783 = vset.pattern.permute.xlu2 %v9206_v22 }
  0xa3   :  { %v9430_v59 = vpop.permute.xlu2 %184 }
  0xa4   :  { %8828 = vset.pattern.permute.xlu0 %v9206_v22  ;;  %15187 = vst [vmem:[#allocation35_spill] sm:$0xff] %v9430_v59 }
  0xa7   :  { %262 = vperm.xlu1 %8782, %v9220_v26  }
  0xa9   :  { %268 = vperm.xlu2 %8783, %v9220_v26   ;;  %v9447_v5 = vpop.permute.xlu1 %166 }
  0xaa   :  { %15191 = vst [vmem:[#allocation39_spill] sm:$0xff] %v9447_v5 }
  0xac   :  { %556 = vperm.xlu0 %8828, %v9293_v40  }
  0xaf   :  { %8784 = vset.pattern.permute.xlu1 %v9215_v24 }
  0xb1   :  { %8785 = vset.pattern.permute.xlu2 %v9218_v25 }
  0xb3   :  { %v9437_v61 = vpop.permute.xlu2 %196 }
  0xb4   :  { %8837 = vset.pattern.permute.xlu0 %v9165_v1  ;;  %15189 = vst [vmem:[#allocation37_spill] sm:$0xff] %v9437_v61 }
  0xb7   :  { %274 = vperm.xlu1 %8784, %v9220_v26  }
  0xb9   :  { %280 = vperm.xlu2 %8785, %v9220_v26   ;;  %v9457_v9 = vpop.permute.xlu1 %178 }
  0xbc   :  { %616 = vperm.xlu0 %8837, %v9308_v42  }
  0xbf   :  { %8787 = vset.pattern.permute.xlu1 %v9232_v28 }
  0xc1   :  { %8788 = vset.pattern.permute.xlu2 %v9247_v31 }
  0xc3   :  { %v9444_v63 = vpop.permute.xlu2 %208 }
  0xc4   :  { %8842 = vset.pattern.permute.xlu0 %v9203_v21  ;;  %15190 = vst [vmem:[#allocation38_spill] sm:$0xff] %v9444_v63 }
  0xc7   :  { %292 = vperm.xlu1 %8787, %v9220_v26  }
  0xc9   :  { %298 = vperm.xlu2 %8788, %v9220_v26   ;;  %v9464_v11 = vpop.permute.xlu1 %190 }
  0xca   :  { %15193 = vst [vmem:[#allocation41_spill] sm:$0xff] %v9464_v11 }
  0xcc   :  { %646 = vperm.xlu0 %8842, %v9308_v42  }
  0xcf   :  { %8789 = vset.pattern.permute.xlu1 %v9250_v32 }
  0xd1   :  { %8790 = vset.pattern.permute.xlu2 %v9261_v34 }
  0xd3   :  { %v9452_v7 = vpop.permute.xlu2 %220 }
  0xd4   :  { %8843 = vset.pattern.permute.xlu0 %v9320_v43 }
  0xd7   :  { %304 = vperm.xlu1 %8789, %v9220_v26  }
  0xd9   :  { %310 = vperm.xlu2 %8790, %v9220_v26   ;;  %v9471_v14 = vpop.permute.xlu1 %202 }
  0xda   :  { %15194 = vst [vmem:[#allocation42_spill] sm:$0xff] %v9471_v14 }
  0xdc   :  { %226 = vperm.xlu0 %8843, %v9188_v8   ;;  %v9454_v8 = vperm.slane %v4238_v6, 2 }
  0xde   :  { %15192 = vst [vmem:[#allocation40_spill] sm:$0xff] %v9454_v8 }
  0xdf   :  { %8791 = vset.pattern.permute.xlu1 %v9320_v43 }
  0xe1   :  { %8792 = vset.pattern.permute.xlu2 %v9165_v1 }
  0xe3   :  { %v9461_v10 = vpop.permute.xlu2 %238 }
  0xe4   :  { %706 = vperm.xlu0 %8843, %v9308_v42  }
  0xe7   :  { %322 = vperm.xlu1 %8791, %v9220_v26  }
  0xe9   :  { %328 = vperm.xlu2 %8792, %v9252_v33   ;;  %v9478_v16 = vpop.permute.xlu1 %214 }
  0xea   :  { %15195 = vst [vmem:[#allocation43_spill] sm:$0xff] %v9478_v16 }
  0xec   :  { %8852 = vset.pattern.permute.xlu0 %v9232_v28 }
  0xef   :  { %8793 = vset.pattern.permute.xlu1 %v9193_v13 }
  0xf1   :  { %8794 = vset.pattern.permute.xlu2 %v9169_v2 }
  0xf3   :  { %v9468_v12 = vpop.permute.xlu2 %250 }
  0xf4   :  { %676 = vperm.xlu0 %8852, %v9308_v42  }
  0xf7   :  { %334 = vperm.xlu1 %8793, %v9252_v33  }
  0xf9   :  { %340 = vperm.xlu2 %8794, %v9252_v33   ;;  %v9485_v19 = vpop.permute.xlu1 %232 }
  0xfa   :  { %15197 = vst [vmem:[#allocation45_spill] sm:$0xff] %v9485_v19 }
  0xfc   :  { %2277 = vperm.xlu0 %8852, %v9338_v45  }
  0xff   :  { %8796 = vset.pattern.permute.xlu1 %v9172_v3 }
 0x101   :  { %8797 = vset.pattern.permute.xlu2 %v9203_v21 }
 0x103   :  { %v9475_v15 = vpop.permute.xlu2 %268 }
 0x104   :  { %8875 = vset.pattern.permute.xlu0 %v9226_v27 }
 0x107   :  { %352 = vperm.xlu1 %8796, %v9252_v33  }
 0x109   :  { %358 = vperm.xlu2 %8797, %v9252_v33   ;;  %v9492_v23 = vpop.permute.xlu1 %244 }
 0x10a   :  { %15199 = vst [vmem:[#allocation47_spill] sm:$0xff] %v9492_v23 }
 0x10c   :  { %2367 = vperm.xlu0 %8875, %v9347_v47  }
 0x10f   :  { %8798 = vset.pattern.permute.xlu1 %v9206_v22 }
 0x111   :  { %8799 = vset.pattern.permute.xlu2 %v9215_v24 }
 0x113   :  { %v9482_v18 = vpop.permute.xlu2 %280 }
 0x114   :  { %8884 = vset.pattern.permute.xlu0 %v9196_v17  ;;  %15196 = vst [vmem:[#allocation44_spill] sm:$0xff] %v9482_v18 }
 0x117   :  { %364 = vperm.xlu1 %8798, %v9252_v33  }
 0x119   :  { %370 = vperm.xlu2 %8799, %v9252_v33   ;;  %v9499_v36 = vpop.permute.xlu1 %262 }
 0x11a   :  { %15201 = vst [vmem:[#allocation49_spill] sm:$0xff] %v9499_v36 }
 0x11c   :  { %2427 = vperm.xlu0 %8884, %v9356_v49  }
 0x11f   :  { %8801 = vset.pattern.permute.xlu1 %v9226_v27 }
 0x121   :  { %8802 = vset.pattern.permute.xlu2 %v9232_v28 }
 0x123   :  { %v9489_v20 = vpop.permute.xlu2 %298 }
 0x124   :  { %8889 = vset.pattern.permute.xlu0 %v9218_v25  ;;  %15198 = vst [vmem:[#allocation46_spill] sm:$0xff] %v9489_v20 }
 0x127   :  { %382 = vperm.xlu1 %8801, %v9252_v33  }
 0x129   :  { %388 = vperm.xlu2 %8802, %v9252_v33   ;;  %v9506_v39 = vpop.permute.xlu1 %274 }
 0x12c   :  { %2457 = vperm.xlu0 %8889, %v9356_v49  }
 0x12f   :  { %8803 = vset.pattern.permute.xlu1 %v9247_v31 }
 0x131   :  { %8804 = vset.pattern.permute.xlu2 %v9250_v32 }
 0x133   :  { %v9496_v30 = vpop.permute.xlu2 %310 }
 0x134   :  { %8898 = vset.pattern.permute.xlu0 %v9169_v2  ;;  %15200 = vst [vmem:[#allocation48_spill] sm:$0xff] %v9496_v30 }
 0x137   :  { %394 = vperm.xlu1 %8803, %v9252_v33  }
 0x139   :  { %400 = vperm.xlu2 %8804, %v9252_v33   ;;  %v9516_v48 = vpop.permute.xlu1 %292 }
 0x13c   :  { %2517 = vperm.xlu0 %8898, %v9371_v51  }
 0x13f   :  { %8805 = vset.pattern.permute.xlu1 %v9264_v35 }
 0x141   :  { %8806 = vset.pattern.permute.xlu2 %v9320_v43 }
 0x144   :  { %8903 = vset.pattern.permute.xlu0 %v9215_v24 }
 0x147   :  { %412 = vperm.xlu1 %8805, %v9252_v33  }
 0x149   :  { %418 = vperm.xlu2 %8806, %v9252_v33   ;;  %v9525_v54 = vpop.permute.xlu1 %304 }
 0x14c   :  { %2547 = vperm.xlu0 %8903, %v9371_v51  }
 0x14f   :  { %8807 = vset.pattern.permute.xlu1 %v9165_v1 }
 0x151   :  { %8808 = vset.pattern.permute.xlu2 %v9193_v13 }
 0x154   :  { %8912 = vset.pattern.permute.xlu0 %v9193_v13 }
 0x157   :  { %424 = vperm.xlu1 %8807, %v9273_v37  }
 0x159   :  { %430 = vperm.xlu2 %8808, %v9273_v37   ;;  %v9532_v41 = vpop.permute.xlu1 %322 }
 0x15a   :  { %15205 = vst [vmem:[#allocation53_spill] sm:$0xff] %v9532_v41 }
 0x15c   :  { %2607 = vperm.xlu0 %8912, %v9386_v53  }
 0x15f   :  { %8810 = vset.pattern.permute.xlu1 %v9196_v17 }
 0x161   :  { %8811 = vset.pattern.permute.xlu2 %v9172_v3 }
 0x164   :  { %8917 = vset.pattern.permute.xlu0 %v9206_v22 }
 0x167   :  { %442 = vperm.xlu1 %8810, %v9273_v37  }
 0x169   :  { %448 = vperm.xlu2 %8811, %v9273_v37  }
 0x16c   :  { %2637 = vperm.xlu0 %8917, %v9386_v53  }
 0x16f   :  { %8812 = vset.pattern.permute.xlu1 %v9203_v21 }
 0x171   :  { %8813 = vset.pattern.permute.xlu2 %v9206_v22 }
 0x174   :  { %8918 = vset.pattern.permute.xlu0 %v9165_v1 }
 0x177   :  { %454 = vperm.xlu1 %8812, %v9273_v37  }
 0x179   :  { %460 = vperm.xlu2 %8813, %v9273_v37  }
 0x17c   :  { %2217 = vperm.xlu0 %8918, %v9338_v45  }
 0x17f   :  { %8815 = vset.pattern.permute.xlu1 %v9218_v25 }
 0x181   :  { %8816 = vset.pattern.permute.xlu2 %v9226_v27 }
 0x184   :  { %2697 = vperm.xlu0 %8918, %v9404_v55  }
 0x187   :  { %472 = vperm.xlu1 %8815, %v9273_v37  }
 0x189   :  { %478 = vperm.xlu2 %8816, %v9273_v37  }
 0x18c   :  { %8927 = vset.pattern.permute.xlu0 %v9203_v21 }
 0x18f   :  { %8817 = vset.pattern.permute.xlu1 %v9232_v28 }
 0x191   :  { %8818 = vset.pattern.permute.xlu2 %v9247_v31 }
 0x194   :  { %2247 = vperm.xlu0 %8927, %v9338_v45  }
 0x197   :  { %484 = vperm.xlu1 %8817, %v9273_v37  }
 0x199   :  { %490 = vperm.xlu2 %8818, %v9273_v37  }
 0x19c   :  { %2727 = vperm.xlu0 %8927, %v9404_v55  }
 0x19f   :  { %8819 = vset.pattern.permute.xlu1 %v9261_v34 }
 0x1a1   :  { %8820 = vset.pattern.permute.xlu2 %v9264_v35 }
 0x1a4   :  { %8932 = vset.pattern.permute.xlu0 %v9320_v43 }
 0x1a7   :  { %502 = vperm.xlu1 %8819, %v9273_v37  }
 0x1a9   :  { %508 = vperm.xlu2 %8820, %v9273_v37  }
 0x1ac   :  { %2307 = vperm.xlu0 %8932, %v9338_v45   ;;  %v9544_v45 = vpop.permute.xlu0 %160 }
 0x1ad   :  { %15209 = vst [vmem:[#allocation57_spill] sm:$0xff] %v9544_v45 }
 0x1af   :  { %8821 = vset.pattern.permute.xlu1 %v9320_v43 }
 0x1b1   :  { %8822 = vset.pattern.permute.xlu2 %v9165_v1 }
 0x1b4   :  { %2787 = vperm.xlu0 %8932, %v9404_v55  }
 0x1b7   :  { %514 = vperm.xlu1 %8821, %v9273_v37  }
 0x1b9   :  { %520 = vperm.xlu2 %8822, %v9293_v40  }
 0x1bc   :  { %8941 = vset.pattern.permute.xlu0 %v9172_v3 }
 0x1bf   :  { %8824 = vset.pattern.permute.xlu1 %v9169_v2 }
 0x1c1   :  { %8825 = vset.pattern.permute.xlu2 %v9196_v17 }
 0x1c4   :  { %2337 = vperm.xlu0 %8941, %v9347_v47  }
 0x1c7   :  { %532 = vperm.xlu1 %8824, %v9293_v40  }
 0x1c9   :  { %538 = vperm.xlu2 %8825, %v9293_v40  }
 0x1cc   :  { %4385 = vperm.xlu0 %8941, %v9454_v8  }
 0x1cf   :  { %8826 = vset.pattern.permute.xlu1 %v9172_v3 }
 0x1d1   :  { %8827 = vset.pattern.permute.xlu2 %v9203_v21 }
 0x1d4   :  { %8964 = vset.pattern.permute.xlu0 %v9226_v27 }
 0x1d7   :  { %544 = vperm.xlu1 %8826, %v9293_v40  }
 0x1d9   :  { %550 = vperm.xlu2 %8827, %v9293_v40  }
 0x1dc   :  { %4415 = vperm.xlu0 %8964, %v9454_v8  }
 0x1df   :  { %8829 = vset.pattern.permute.xlu1 %v9215_v24 }
 0x1e1   :  { %8830 = vset.pattern.permute.xlu2 %v9218_v25 }
 0x1e4   :  { %8965 = vset.pattern.permute.xlu0 %v9264_v35 }
 0x1e7   :  { %562 = vperm.xlu1 %8829, %v9293_v40  }
 0x1e9   :  { %568 = vperm.xlu2 %8830, %v9293_v40  }
 0x1ec   :  { %316 = vperm.xlu0 %8965, %v9220_v26   ;;  %v9503_v26 = vpop.permute.xlu2 %328 }
 0x1ef   :  { %8831 = vset.pattern.permute.xlu1 %v9226_v27 }
 0x1f1   :  { %8832 = vset.pattern.permute.xlu2 %v9232_v28 }
 0x1f4   :  { %2397 = vperm.xlu0 %8965, %v9347_v47   ;;  %v9511_v44 = vpop.permute.xlu2 %340  ;;  %v9541_v47 = vpop.permute.xlu1 %334 }
 0x1f5   :  { %15202 = vst [vmem:[#allocation50_spill] sm:$0xff] %v9511_v44 }
 0x1f6   :  { %15208 = vst [vmem:[#allocation56_spill] sm:$0xff] %v9541_v47 }
 0x1f7   :  { %574 = vperm.xlu1 %8831, %v9293_v40  }
 0x1f9   :  { %580 = vperm.xlu2 %8832, %v9293_v40  }
 0x1fc   :  { %4445 = vperm.xlu0 %8965, %v9454_v8   ;;  %v9520_v50 = vpop.permute.xlu2 %358  ;;  %v9550_v20 = vpop.permute.xlu1 %352 }
 0x1fd   :  { %15210 = vst [vmem:[#allocation58_spill] sm:$0xff] %v9550_v20 }
 0x1ff   :  { %8833 = vset.pattern.permute.xlu1 %v9250_v32 }
 0x201   :  { %8834 = vset.pattern.permute.xlu2 %v9261_v34 }
 0x204   :  { %8974 = vset.pattern.permute.xlu0 %v9196_v17  ;;  %v9529_v6 = vpop.permute.xlu2 %370  ;;  %v9559_v47 = vpop.permute.xlu1 %364 }
 0x205   :  { %15204 = vst [vmem:[#allocation52_spill] sm:$0xff] %v9529_v6 }
 0x206   :  { %15211 = vst [vmem:[#allocation59_spill] sm:$0xff] %v9559_v47 }
 0x207   :  { %592 = vperm.xlu1 %8833, %v9293_v40  }
 0x209   :  { %598 = vperm.xlu2 %8834, %v9293_v40  }
 0x20c   :  { %4475 = vperm.xlu0 %8974, %v9513_v46   ;;  %v9538_v8 = vpop.permute.xlu2 %388 }
 0x20d   :  { %15207 = vst [vmem:[#allocation55_spill] sm:$0xff] %v9538_v8  ;;  %v9554_v8 = vpop.permute.xlu0 %256 }
 0x20f   :  { %8835 = vset.pattern.permute.xlu1 %v9264_v35 }
 0x211   :  { %8836 = vset.pattern.permute.xlu2 %v9320_v43 }
 0x214   :  { %8979 = vset.pattern.permute.xlu0 %v9218_v25  ;;  %v9547_v6 = vpop.permute.xlu2 %400 }
 0x217   :  { %604 = vperm.xlu1 %8835, %v9293_v40  }
 0x219   :  { %610 = vperm.xlu2 %8836, %v9293_v40  }
 0x21c   :  { %4505 = vperm.xlu0 %8979, %v9513_v46   ;;  %v9556_v0 = vpop.permute.xlu2 %418 }
 0x21f   :  { %8838 = vset.pattern.permute.xlu1 %v9193_v13 }
 0x221   :  { %8839 = vset.pattern.permute.xlu2 %v9169_v2 }
 0x224   :  { %8980 = vset.pattern.permute.xlu0 %v9261_v34  ;;  %v9563_v18 = vpop.permute.xlu2 %430 }
 0x227   :  { %622 = vperm.xlu1 %8838, %v9308_v42  }
 0x229   :  { %628 = vperm.xlu2 %8839, %v9308_v42  }
 0x22c   :  { %406 = vperm.xlu0 %8980, %v9252_v33   ;;  %v9572_v33 = vpop.permute.xlu2 %448 }
 0x22d   :  { %15212 = vst [vmem:[#allocation60_spill] sm:$0xff] %v9572_v33 }
 0x22f   :  { %8840 = vset.pattern.permute.xlu1 %v9196_v17  ;;  %v9565_v17 = vpop.permute.xlu0 %286 }
 0x231   :  { %8841 = vset.pattern.permute.xlu2 %v9172_v3  ;;  %v9568_v3 = vpop.permute.xlu1 %382 }
 0x234   :  { %2487 = vperm.xlu0 %8980, %v9356_v49   ;;  %v4240_v49 = vperm.slane %v9241_v29, 6  ;;  %v9582_v23 = vpop.permute.xlu2 %460  ;;  %v9125_v29 = vmov 256.0  }
 0x235   :  { %15213 = vst [vmem:[#allocation61_spill] sm:$0xff] %v9582_v23  ;;  %9038 = vrcp.f32 %v9125_v29 }
 0x236   :  { %v9584_v63 = vperm.slane %v4240_v49, 2 }
 0x237   :  { %634 = vperm.xlu1 %8840, %v9308_v42   ;;  %v9575_v20 = vpop.permute.xlu0 %346 }
 0x238   :  { %15214 = vst [vmem:[#allocation62_spill] sm:$0xff] %v9584_v63 }
 0x239   :  { %640 = vperm.xlu2 %8841, %v9308_v42   ;;  %v9577_v36 = vpop.permute.xlu1 %394 }
 0x23c   :  { %4535 = vperm.xlu0 %8980, %v9513_v46   ;;  %v9593_v45 = vpop.permute.xlu2 %478 }
 0x23d   :  { %15215 = vst [vmem:[#allocation63_spill] sm:$0xff] %v9593_v45 }
 0x23f   :  { %8844 = vset.pattern.permute.xlu1 %v9206_v22  ;;  %v9590_v11 = vpop.permute.xlu0 %376 }
 0x241   :  { %8845 = vset.pattern.permute.xlu2 %v9215_v24  ;;  %v9587_v46 = vpop.permute.xlu1 %412 }
 0x244   :  { %8989 = vset.pattern.permute.xlu0 %v9169_v2 }
 0x247   :  { %652 = vperm.xlu1 %8844, %v9308_v42   ;;  %v9600_v49 = vpop.permute.xlu0 %436 }
 0x248   :  { %15217 = vst [vmem:[#allocation65_spill] sm:$0xff] %v9600_v49 }
 0x249   :  { %658 = vperm.xlu2 %8845, %v9308_v42   ;;  %v9596_v2 = vpop.permute.xlu1 %424 }
 0x24a   :  { %15216 = vst [vmem:[#allocation64_spill] sm:$0xff] %v9596_v2 }
 0x24c   :  { %4565 = vperm.xlu0 %8989, %v9584_v63  }
 0x24f   :  { %8846 = vset.pattern.permute.xlu1 %v9218_v25  ;;  %v9602_v25 = vpop.permute.xlu2 %490  ;;  %v9611_v43 = vpop.permute.xlu0 %466 }
 0x250   :  { %15218 = vst [vmem:[#allocation66_spill] sm:$0xff] %v9602_v25 }
 0x251   :  { %8847 = vset.pattern.permute.xlu2 %v9226_v27  ;;  %v9039_v27 = vpop.eup %9038  ;;  %v9605_v23 = vpop.permute.xlu1 %442  ;;  %15221 = vst [vmem:[#allocation69_spill] sm:$0xff] %v9611_v43 }
 0x252   :  { %15219 = vst [vmem:[#allocation67_spill] sm:$0xff] %v9605_v23  ;;  %v78_v45 = vmul.f32 256.0, %v9039_v27  ;;  %vm82_vm1 = vweird.f32 %v9039_v27 }
 0x254   :  { %8994 = vset.pattern.permute.xlu0 %v9215_v24  ;;  %v79_v29 = vsub.f32 1.0, %v78_v45 }
 0x256   :  { %v80_v25 = vmul.f32 %v9039_v27, %v79_v29 }
 0x257   :  { %664 = vperm.xlu1 %8846, %v9308_v42   ;;  %v9609_v2 = vpop.permute.xlu2 %508  ;;  %v9621_v49 = vpop.permute.xlu0 %526 }
 0x258   :  { %15220 = vst [vmem:[#allocation68_spill] sm:$0xff] %v9609_v2  ;;  %v81_v33 = vadd.f32 %v9039_v27, %v80_v25 }
 0x259   :  { %670 = vperm.xlu2 %8847, %v9308_v42   ;;  %v9614_v24 = vpop.permute.xlu1 %454  ;;  %15224 = vst [vmem:[#allocation72_spill] sm:$0xff] %v9621_v49 }
 0x25a   :  { %15222 = vst [vmem:[#allocation70_spill] sm:$0xff] %v9614_v24  ;;  %v9627_v45 = vsel %vm82_vm1, %v9039_v27, %v81_v33  ;;  %vm2168_vm1 = vcmask 1041409  }
 0x25b   :  { %v9633_v29 = vmul.f32 %v9627_v45, %v9523_v52  ;;  %v14861_v52 = vmov 0  }
 0x25c   :  { %4595 = vperm.xlu0 %8994, %v9584_v63  }
 0x25d   :  { %15225 = vst [vmem:[#allocation73_spill] sm:$0xff] %v9633_v29 }
 0x25f   :  { %8848 = vset.pattern.permute.xlu1 %v9247_v31  ;;  %v9618_v23 = vpop.permute.xlu2 %520 }
 0x260   :  { %15223 = vst [vmem:[#allocation71_spill] sm:$0xff] %v9618_v23 }
 0x261   :  { %8849 = vset.pattern.permute.xlu2 %v9250_v32  ;;  %v9623_v2 = vpop.permute.xlu1 %472 }
 0x264   :  { %8995 = vset.pattern.permute.xlu0 %v9250_v32 }
 0x267   :  { %682 = vperm.xlu1 %8848, %v9308_v42   ;;  %v9629_v43 = vpop.permute.xlu2 %538 }
 0x269   :  { %688 = vperm.xlu2 %8849, %v9308_v42   ;;  %v9636_v25 = vpop.permute.xlu1 %484 }
 0x26c   :  { %496 = vperm.xlu0 %8995, %v9273_v37  }
 0x26f   :  { %8850 = vset.pattern.permute.xlu1 %v9261_v34  ;;  %v9640_v34 = vperm.slane %v9633_v29, 0  ;;  %v9645_v27 = vpop.permute.xlu2 %550 }
 0x270   :  { %15226 = vst [vmem:[#allocation74_spill] sm:$0xff] %v9645_v27 }
 0x271   :  { %8851 = vset.pattern.permute.xlu2 %v9264_v35  ;;  %v9642_v35 = vpop.permute.xlu0 %556  ;;  %v804_v37 = vmul.f32 %v9433_v60, %v9640_v34  ;;  %v805_v33 = vmul.f32 %v9440_v62, %v9640_v34  ;;  %v806_v32 = vmul.f32 %v9415_v56, %v9640_v34  ;;  %v807_v60 = vmul.f32 %v9420_v57, %v9640_v34 }
 0x272   :  { %v810_v57 = vmul.f32 %v9425_v58, %v9640_v34 }
 0x274   :  { %2577 = vperm.xlu0 %8995, %v9371_v51  }
 0x277   :  { %694 = vperm.xlu1 %8850, %v9308_v42   ;;  %v9658_v29 = vpop.permute.xlu2 %568 }
 0x278   :  { %15228 = vst [vmem:[#allocation76_spill] sm:$0xff] %v9658_v29 }
 0x279   :  { %700 = vperm.xlu2 %8851, %v9308_v42   ;;  %v9652_v42 = vpop.permute.xlu1 %502  ;;  %v9656_v51 = vpop.permute.xlu0 %616 }
 0x27a   :  { %15227 = vst [vmem:[#allocation75_spill] sm:$0xff] %v9656_v51 }
 0x27c   :  { %4625 = vperm.xlu0 %8995, %v9584_v63  }
 0x27f   :  { %8853 = vset.pattern.permute.xlu1 %v14861_v52 }
 0x280   :  { %1189 = vperm.xlu1 %8853, %v804_v37   ;;  %v4241_v37 = vperm.slane %v9288_v38, 2 }
 0x281   :  { %8854 = vset.pattern.permute.xlu2 %v14861_v52  ;;  %v9664_v27 = vpop.permute.xlu1 %514  ;;  %v9668_v52 = vpop.permute.xlu2 %580 }
 0x282   :  { %1192 = vperm.xlu2 %8854, %v805_v33   ;;  %15229 = vst [vmem:[#allocation77_spill] sm:$0xff] %v9664_v27  ;;  %v809_v33 = vmul.f32 %v9447_v5, %v9640_v34  ;;  %v9672_v63 = vpop.permute.xlu0 %646  ;;  %v9674_v29 = vperm.slane %v4241_v37, 2  ;;  %v812_v27 = vmul.f32 %v9430_v59, %v9640_v34 }
 0x283   :  { %15230 = vst [vmem:[#allocation78_spill] sm:$0xff] %v9668_v52 }
 0x284   :  { %9004 = vset.pattern.permute.xlu0 %v9193_v13  ;;  %15231 = vst [vmem:[#allocation79_spill] sm:$0xff] %v9674_v29 }
 0x288   :  { %1195 = vperm.xlu1 %8853, %v806_v32  }
 0x289   :  { %v9678_v32 = vpop.permute.xlu1 %532  ;;  %v9683_v13 = vpop.permute.xlu2 %598 }
 0x28a   :  { %1198 = vperm.xlu2 %8854, %v807_v60   ;;  %15232 = vst [vmem:[#allocation80_spill] sm:$0xff] %v9678_v32  ;;  %v811_v60 = vmul.f32 %v9457_v9, %v9640_v34  ;;  %v9687_v5 = vpop.permute.xlu0 %226 }
 0x28b   :  { %15233 = vst [vmem:[#allocation81_spill] sm:$0xff] %v9683_v13 }
 0x28c   :  { %4655 = vperm.xlu0 %9004, %v9674_v29  }
 0x290   :  { %1204 = vperm.xlu1 %8853, %v809_v33   ;;  %v814_v33 = vmul.f32 %v9437_v61, %v9640_v34  ;;  %v820_v61 = vmul.f32 %v9485_v19, %v9640_v34 }
 0x291   :  { %v9689_v37 = vpop.permute.xlu1 %544  ;;  %v9698_v32 = vpop.permute.xlu2 %610 }
 0x292   :  { %1207 = vperm.xlu2 %8854, %v810_v57   ;;  %v815_v57 = vmul.f32 %v9471_v14, %v9640_v34  ;;  %v9700_v59 = vpop.permute.xlu0 %706 }
 0x294   :  { %9009 = vset.pattern.permute.xlu0 %v9206_v22 }
 0x298   :  { %1210 = vperm.xlu1 %8853, %v811_v60   ;;  %v817_v60 = vmul.f32 %v9478_v16, %v9640_v34 }
 0x299   :  { %v9696_v58 = vpop.permute.xlu1 %562 }
 0x29a   :  { %1213 = vperm.xlu2 %8854, %v812_v27   ;;  %v818_v27 = vmul.f32 %v9452_v7, %v9640_v34  ;;  %v9712_v14 = vpop.permute.xlu0 %676 }
 0x29b   :  { %15235 = vst [vmem:[#allocation83_spill] sm:$0xff] %v9712_v14  ;;  %v824_v14 = vmul.f32 %v9554_v8, %v9640_v34 }
 0x29c   :  { %4685 = vperm.xlu0 %9009, %v9674_v29  }
 0x2a0   :  { %1219 = vperm.xlu1 %8853, %v814_v33   ;;  %v9710_v33 = vpop.permute.xlu2 %628 }
 0x2a1   :  { %v9707_v22 = vpop.permute.xlu1 %574  ;;  %15234 = vst [vmem:[#allocation82_spill] sm:$0xff] %v9710_v33 }
 0x2a2   :  { %1222 = vperm.xlu2 %8854, %v815_v57   ;;  %v821_v57 = vmul.f32 %v9461_v10, %v9640_v34 }
 0x2a4   :  { %9010 = vset.pattern.permute.xlu0 %v9247_v31  ;;  %v9725_v31 = vpop.permute.xlu0 %2277 }
 0x2a5   :  { %15237 = vst [vmem:[#allocation85_spill] sm:$0xff] %v9725_v31 }
 0x2a8   :  { %1228 = vperm.xlu1 %8853, %v817_v60   ;;  %v9721_v60 = vpop.permute.xlu2 %640 }
 0x2a9   :  { %v9718_v16 = vpop.permute.xlu1 %592  ;;  %15236 = vst [vmem:[#allocation84_spill] sm:$0xff] %v9721_v60 }
 0x2aa   :  { %1231 = vperm.xlu2 %8854, %v818_v27   ;;  %v823_v27 = vmul.f32 %v9468_v12, %v9640_v34 }
 0x2ac   :  { %586 = vperm.xlu0 %9010, %v9293_v40   ;;  %v826_v40 = vmul.f32 %v9475_v15, %v9640_v34  ;;  %v9738_v60 = vpop.permute.xlu0 %2367 }
 0x2ad   :  { %15240 = vst [vmem:[#allocation88_spill] sm:$0xff] %v9738_v60 }
 0x2b0   :  { %1237 = vperm.xlu1 %8853, %v820_v61   ;;  %v9732_v61 = vpop.permute.xlu2 %658 }
 0x2b1   :  { %v9729_v19 = vpop.permute.xlu1 %604  ;;  %15239 = vst [vmem:[#allocation87_spill] sm:$0xff] %v9732_v61 }
 0x2b2   :  { %1240 = vperm.xlu2 %8854, %v821_v57   ;;  %15238 = vst [vmem:[#allocation86_spill] sm:$0xff] %v9729_v19  ;;  %v827_v57 = vmul.f32 %v9506_v39, %v9640_v34 }
 0x2b4   :  { %2667 = vperm.xlu0 %9010, %v9386_v53   ;;  %v830_v53 = vmul.f32 %v9516_v48, %v9640_v34  ;;  %v9751_v19 = vpop.permute.xlu0 %2427 }
 0x2b5   :  { %15244 = vst [vmem:[#allocation92_spill] sm:$0xff] %v9751_v19 }
 0x2b8   :  { %1246 = vperm.xlu1 %8853, %v823_v27   ;;  %v9743_v27 = vpop.permute.xlu2 %670 }
 0x2b9   :  { %v9740_v31 = vpop.permute.xlu1 %622  ;;  %15242 = vst [vmem:[#allocation90_spill] sm:$0xff] %v9743_v27 }
 0x2ba   :  { %1249 = vperm.xlu2 %8854, %v824_v14   ;;  %15241 = vst [vmem:[#allocation89_spill] sm:$0xff] %v9740_v31  ;;  %v829_v14 = vmul.f32 %v9565_v17, %v9640_v34  ;;  %v833_v31 = vmul.f32 %v9496_v30, %v9640_v34  ;;  %v836_v30 = vmul.f32 %v9503_v26, %v9640_v34 }
 0x2bc   :  { %4715 = vperm.xlu0 %9010, %v9674_v29  }
 0x2c0   :  { %1255 = vperm.xlu1 %8853, %v826_v40   ;;  %v4237_v40 = vperm.slane %v9178_v4, 2  ;;  %v9769_v4 = vpop.permute.xlu0 %2457 }
 0x2c1   :  { %v9749_v61 = vpop.permute.xlu1 %634  ;;  %15246 = vst [vmem:[#allocation94_spill] sm:$0xff] %v9769_v4 }
 0x2c2   :  { %1258 = vperm.xlu2 %8854, %v827_v57   ;;  %15243 = vst [vmem:[#allocation91_spill] sm:$0xff] %v9749_v61  ;;  %v832_v57 = vmul.f32 %v9525_v54, %v9640_v34  ;;  %v9759_v60 = vperm.slane %v4237_v40, 2 }
 0x2c3   :  { %v9755_v29 = vpop.permute.xlu2 %688 }
 0x2c4   :  { %9015 = vset.pattern.permute.xlu0 %v9165_v1  ;;  %15245 = vst [vmem:[#allocation93_spill] sm:$0xff] %v9759_v60  ;;  %v835_v1 = vmul.f32 %v9532_v41, %v9640_v34 }
 0x2c8   :  { %1264 = vperm.xlu1 %8853, %v829_v14   ;;  %v9784_v4 = vpop.permute.xlu0 %2517 }
 0x2c9   :  { %v9763_v14 = vpop.permute.xlu1 %652  ;;  %15249 = vst [vmem:[#allocation97_spill] sm:$0xff] %v9784_v4 }
 0x2ca   :  { %1267 = vperm.xlu2 %8854, %v830_v53   ;;  %v4242_v53 = vperm.slane %v9288_v38, 6  ;;  %v838_v38 = vmul.f32 %v9511_v44, %v9640_v34 }
 0x2cc   :  { %4265 = vperm.xlu0 %9015, %v9759_v60   ;;  %v9773_v40 = vperm.slane %v4242_v53, 2  ;;  %v839_v53 = vmul.f32 %v9575_v20, %v9640_v34 }
 0x2ce   :  { %15247 = vst [vmem:[#allocation95_spill] sm:$0xff] %v9773_v40 }
 0x2d0   :  { %1273 = vperm.xlu1 %8853, %v832_v57   ;;  %v9797_v44 = vpop.permute.xlu0 %2547 }
 0x2d1   :  { %v9777_v57 = vpop.permute.xlu1 %664  ;;  %15251 = vst [vmem:[#allocation99_spill] sm:$0xff] %v9797_v44 }
 0x2d2   :  { %1276 = vperm.xlu2 %8854, %v833_v31  }
 0x2d3   :  { %v9767_v19 = vpop.permute.xlu2 %700 }
 0x2d4   :  { %4745 = vperm.xlu0 %9015, %v9773_v40  }
 0x2d8   :  { %1282 = vperm.xlu1 %8853, %v835_v1  }
 0x2d9   :  { %v9788_v41 = vpop.permute.xlu1 %682 }
 0x2da   :  { %1285 = vperm.xlu2 %8854, %v836_v30   ;;  %v841_v30 = vmul.f32 %v9520_v50, %v9640_v34 }
 0x2dc   :  { %v9780_v31 = vpop.permute.xlu2 %1192  ;;  %9020 = vset.pattern.permute.xlu0 %v9203_v21  ;;  %v9808_v21 = vpop.permute.xlu0 %2607 }
 0x2dd   :  { %15248 = vst [vmem:[#allocation96_spill] sm:$0xff] %v9780_v31  ;;  %v842_v31 = vmul.f32 %v9559_v47, %v9640_v34 }
 0x2de   :  { %15254 = vst [vmem:[#allocation102_spill] sm:$0xff] %v9808_v21 }
 0x2e0   :  { %1291 = vperm.xlu1 %8853, %v838_v38  }
 0x2e2   :  { %1294 = vperm.xlu2 %8854, %v839_v53   ;;  %v844_v53 = vmul.f32 %v9590_v11, %v9640_v34 }
 0x2e4   :  { %v9791_v1 = vpop.permute.xlu2 %1198  ;;  %4295 = vperm.xlu0 %9020, %v9759_v60  }
 0x2e5   :  { %15250 = vst [vmem:[#allocation98_spill] sm:$0xff] %v9791_v1  ;;  %v845_v1 = vmul.f32 %v9568_v3, %v9640_v34 }
 0x2e8   :  { %1300 = vperm.xlu1 %8853, %v841_v30  }
 0x2e9   :  { %v9799_v4 = vpop.permute.xlu1 %694 }
 0x2ea   :  { %15252 = vst [vmem:[#allocation100_spill] sm:$0xff] %v9799_v4  ;;  %1303 = vperm.xlu2 %8854, %v842_v31   ;;  %v847_v31 = vmul.f32 %v9577_v36, %v9640_v34 }
 0x2ec   :  { %v9802_v38 = vpop.permute.xlu2 %1207  ;;  %4775 = vperm.xlu0 %9020, %v9773_v40  }
 0x2ed   :  { %15253 = vst [vmem:[#allocation101_spill] sm:$0xff] %v9802_v38  ;;  %v848_v38 = vmul.f32 %v9547_v6, %v9640_v34 }
 0x2f0   :  { %1309 = vperm.xlu1 %8853, %v844_v53   ;;  %v9822_v53 = vpop.permute.xlu0 %2637 }
 0x2f1   :  { %15258 = vst [vmem:[#allocation106_spill] sm:$0xff] %v9822_v53 }
 0x2f2   :  { %v9810_v47 = vpop.permute.xlu1 %1189  ;;  %1312 = vperm.xlu2 %8854, %v845_v1   ;;  %v850_v1 = vmul.f32 %v9587_v46, %v9640_v34 }
 0x2f3   :  { %15255 = vst [vmem:[#allocation103_spill] sm:$0xff] %v9810_v47 }
 0x2f4   :  { %v9813_v30 = vpop.permute.xlu2 %1213  ;;  %9025 = vset.pattern.permute.xlu0 %v9232_v28 }
 0x2f5   :  { %15256 = vst [vmem:[#allocation104_spill] sm:$0xff] %v9813_v30  ;;  %v851_v30 = vmul.f32 %v9556_v0, %v9640_v34 }
 0x2f8   :  { %1318 = vperm.xlu1 %8853, %v847_v31  }
 0x2fa   :  { %v9819_v44 = vpop.permute.xlu1 %1195  ;;  %1321 = vperm.xlu2 %8854, %v848_v38   ;;  %v853_v38 = vmul.f32 %v9563_v18, %v9640_v34 }
 0x2fb   :  { %15257 = vst [vmem:[#allocation105_spill] sm:$0xff] %v9819_v44  ;;  %v9837_v44 = vpop.permute.xlu0 %2217 }
 0x2fc   :  { %v9824_v47 = vpop.permute.xlu2 %1222  ;;  %2757 = vperm.xlu0 %9025, %v9404_v55   ;;  %15262 = vst [vmem:[#allocation110_spill] sm:$0xff] %v9837_v44 }
 0x2fd   :  { %15259 = vst [vmem:[#allocation107_spill] sm:$0xff] %v9824_v47  ;;  %v15263_v47 = vld [vmem:[#allocation65_spill] sm:$0xff] }
 0x2fe   :  { %v854_v53 = vmul.f32 %v15263_v47, %v9640_v34 }
 0x300   :  { %1327 = vperm.xlu1 %8853, %v850_v1  }
 0x302   :  { %v9830_v21 = vpop.permute.xlu1 %1204  ;;  %1330 = vperm.xlu2 %8854, %v851_v30   ;;  %v15266_v30 = vld [vmem:[#allocation60_spill] sm:$0xff] }
 0x303   :  { %15260 = vst [vmem:[#allocation108_spill] sm:$0xff] %v9830_v21  ;;  %v856_v21 = vmul.f32 %v15266_v30, %v9640_v34  ;;  %v9850_v55 = vpop.permute.xlu0 %2697 }
 0x304   :  { %v9833_v31 = vpop.permute.xlu2 %1231  ;;  %4325 = vperm.xlu0 %9025, %v9759_v60   ;;  %15267 = vst [vmem:[#allocation60_spill] sm:$0xff] %v9850_v55 }
 0x305   :  { %15261 = vst [vmem:[#allocation109_spill] sm:$0xff] %v9833_v31  ;;  %v857_v31 = vmul.f32 %v9614_v24, %v9640_v34 }
 0x308   :  { %1336 = vperm.xlu1 %8853, %v853_v38  }
 0x30a   :  { %v9841_v28 = vpop.permute.xlu1 %1210  ;;  %1339 = vperm.xlu2 %8854, %v854_v53   ;;  %v15270_v53 = vld [vmem:[#allocation69_spill] sm:$0xff] }
 0x30b   :  { %15264 = vst [vmem:[#allocation65_spill] sm:$0xff] %v9841_v28  ;;  %v859_v28 = vmul.f32 %v15270_v53, %v9640_v34  ;;  %v9861_v4 = vpop.permute.xlu0 %2247 }
 0x30c   :  { %v9844_v1 = vpop.permute.xlu2 %1240  ;;  %4805 = vperm.xlu0 %9025, %v9773_v40   ;;  %15271 = vst [vmem:[#allocation114_spill] sm:$0xff] %v9861_v4 }
 0x30d   :  { %15265 = vst [vmem:[#allocation111_spill] sm:$0xff] %v9844_v1  ;;  %v860_v1 = vmul.f32 %v9623_v2, %v9640_v34 }
 0x310   :  { %1345 = vperm.xlu1 %8853, %v856_v21   ;;  %v15273_v21 = vld [vmem:[#allocation26_spill] sm:$0xff] }
 0x312   :  { %v9852_v44 = vpop.permute.xlu1 %1219  ;;  %1348 = vperm.xlu2 %8854, %v857_v31   ;;  %v862_v31 = vmul.f32 %v9636_v25, %v9640_v34 }
 0x313   :  { %15268 = vst [vmem:[#allocation112_spill] sm:$0xff] %v9852_v44 }
 0x314   :  { %v9855_v38 = vpop.permute.xlu2 %1249  ;;  %9030 = vset.pattern.permute.xlu0 %v15273_v21 }
 0x315   :  { %15269 = vst [vmem:[#allocation113_spill] sm:$0xff] %v9855_v38  ;;  %v15275_v38 = vld [vmem:[#allocation66_spill] sm:$0xff] }
 0x316   :  { %v863_v55 = vmul.f32 %v15275_v38, %v9640_v34 }
 0x318   :  { %1354 = vperm.xlu1 %8853, %v859_v28   ;;  %v9875_v28 = vpop.permute.xlu0 %2727 }
 0x319   :  { %15277 = vst [vmem:[#allocation117_spill] sm:$0xff] %v9875_v28 }
 0x31a   :  { %v9863_v24 = vpop.permute.xlu1 %1228  ;;  %1357 = vperm.xlu2 %8854, %v860_v1   ;;  %v865_v1 = vmul.f32 %v9652_v42, %v9640_v34 }
 0x31b   :  { %15272 = vst [vmem:[#allocation115_spill] sm:$0xff] %v9863_v24 }
 0x31c   :  { %v9866_v44 = vpop.permute.xlu2 %1258  ;;  %4355 = vperm.xlu0 %9030, %v9759_v60   ;;  %v15283_v60 = vld [vmem:[#allocation57_spill] sm:$0xff] }
 0x31d   :  { %15274 = vst [vmem:[#allocation116_spill] sm:$0xff] %v9866_v44  ;;  %v15279_v44 = vld [vmem:[#allocation68_spill] sm:$0xff]  ;;  %v808_v28 = vmul.f32 %v15283_v60, %v9640_v34 }
 0x31e   :  { %v866_v4 = vmul.f32 %v15279_v44, %v9640_v34 }
 0x320   :  { %1363 = vperm.xlu1 %8853, %v862_v31  }
 0x322   :  { %v9872_v53 = vpop.permute.xlu1 %1237  ;;  %1366 = vperm.xlu2 %8854, %v863_v55   ;;  %v868_v55 = vmul.f32 %v9618_v23, %v9640_v34 }
 0x323   :  { %15276 = vst [vmem:[#allocation66_spill] sm:$0xff] %v9872_v53  ;;  %v9890_v53 = vpop.permute.xlu0 %2307 }
 0x324   :  { %v9877_v24 = vpop.permute.xlu2 %1267  ;;  %4835 = vperm.xlu0 %9030, %v9773_v40   ;;  %15282 = vst [vmem:[#allocation120_spill] sm:$0xff] %v9890_v53  ;;  %v872_v40 = vmul.f32 %v9689_v37, %v9640_v34 }
 0x325   :  { %15278 = vst [vmem:[#allocation118_spill] sm:$0xff] %v9877_v24  ;;  %v869_v24 = vmul.f32 %v9621_v49, %v9640_v34 }
 0x328   :  { %1372 = vperm.xlu1 %8853, %v865_v1  }
 0x32a   :  { %v9883_v21 = vpop.permute.xlu1 %1246  ;;  %1375 = vperm.xlu2 %8854, %v866_v4   ;;  %v15285_v4 = vmov 0  }
 0x32b   :  { %15280 = vst [vmem:[#allocation68_spill] sm:$0xff] %v9883_v21  ;;  %v9905_v53 = vpop.permute.xlu0 %2787 }
 0x32c   :  { %v9886_v31 = vpop.permute.xlu2 %1276  ;;  %9035 = vset.pattern.permute.xlu0 %v15285_v4  ;;  %15287 = vst [vmem:[#allocation122_spill] sm:$0xff] %v9905_v53 }
 0x32d   :  { %15281 = vst [vmem:[#allocation119_spill] sm:$0xff] %v9886_v31  ;;  %1201 = vperm.xlu0 %9035, %v808_v28   ;;  %v871_v31 = vmul.f32 %v9629_v43, %v9640_v34  ;;  %v874_v28 = vmul.f32 %v9642_v35, %v9640_v34 }
 0x330   :  { %1381 = vperm.xlu1 %8853, %v868_v55   ;;  %v15288_v55 = vld [vmem:[#allocation41_spill] sm:$0xff] }
 0x331   :  { %v813_v49 = vmul.f32 %v15288_v55, %v9640_v34 }
 0x332   :  { %v9896_v1 = vpop.permute.xlu1 %1255  ;;  %1384 = vperm.xlu2 %8854, %v869_v24  }
 0x333   :  { %15284 = vst [vmem:[#allocation57_spill] sm:$0xff] %v9896_v1  ;;  %v15291_v1 = vld [vmem:[#allocation38_spill] sm:$0xff] }
 0x334   :  { %v9899_v21 = vpop.permute.xlu2 %1285  ;;  %v816_v53 = vmul.f32 %v15291_v1, %v9640_v34 }
 0x335   :  { %15286 = vst [vmem:[#allocation121_spill] sm:$0xff] %v9899_v21  ;;  %1216 = vperm.xlu0 %9035, %v813_v49   ;;  %v875_v21 = vmul.f32 %v9696_v58, %v9640_v34  ;;  %v877_v49 = vmul.f32 %v9707_v22, %v9640_v34 }
 0x338   :  { %1390 = vperm.xlu1 %8853, %v871_v31   ;;  %v9919_v31 = vpop.permute.xlu0 %2337 }
 0x339   :  { %15292 = vst [vmem:[#allocation38_spill] sm:$0xff] %v9919_v31 }
 0x33a   :  { %v9909_v23 = vpop.permute.xlu1 %1264  ;;  %1393 = vperm.xlu2 %8854, %v872_v40  }
 0x33b   :  { %15289 = vst [vmem:[#allocation41_spill] sm:$0xff] %v9909_v23 }
 0x33c   :  { %v9911_v24 = vpop.permute.xlu2 %1294 }
 0x33d   :  { %15290 = vst [vmem:[#allocation123_spill] sm:$0xff] %v9911_v24  ;;  %1225 = vperm.xlu0 %9035, %v816_v53   ;;  %v878_v24 = vmul.f32 %v9668_v52, %v9640_v34  ;;  %v880_v53 = vmul.f32 %v9718_v16, %v9640_v34 }
 0x340   :  { %1399 = vperm.xlu1 %8853, %v874_v28   ;;  %v819_v28 = vmul.f32 %v9687_v5, %v9640_v34  ;;  %v9933_v31 = vpop.permute.xlu0 %4385 }
 0x341   :  { %15296 = vst [vmem:[#allocation127_spill] sm:$0xff] %v9933_v31 }
 0x342   :  { %v9921_v4 = vpop.permute.xlu1 %1273  ;;  %1402 = vperm.xlu2 %8854, %v875_v21  }
 0x343   :  { %15293 = vst [vmem:[#allocation124_spill] sm:$0xff] %v9921_v4 }
 0x344   :  { %v9923_v40 = vpop.permute.xlu2 %1303 }
 0x345   :  { %15294 = vst [vmem:[#allocation125_spill] sm:$0xff] %v9923_v40  ;;  %1234 = vperm.xlu0 %9035, %v819_v28   ;;  %v881_v40 = vmul.f32 %v9683_v13, %v9640_v34 }
 0x348   :  { %1408 = vperm.xlu1 %8853, %v877_v49   ;;  %v15298_v49 = vld [vmem:[#allocation47_spill] sm:$0xff]  ;;  %v9947_v28 = vpop.permute.xlu0 %4415 }
 0x349   :  { %v822_v4 = vmul.f32 %v15298_v49, %v9640_v34  ;;  %15301 = vst [vmem:[#allocation130_spill] sm:$0xff] %v9947_v28 }
 0x34a   :  { %v9931_v23 = vpop.permute.xlu1 %1282  ;;  %1411 = vperm.xlu2 %8854, %v878_v24  }
 0x34b   :  { %15295 = vst [vmem:[#allocation126_spill] sm:$0xff] %v9931_v23  ;;  %v884_v23 = vmul.f32 %v9656_v51, %v9640_v34 }
 0x34c   :  { %v9935_v21 = vpop.permute.xlu2 %1312 }
 0x34d   :  { %15297 = vst [vmem:[#allocation128_spill] sm:$0xff] %v9935_v21  ;;  %1243 = vperm.xlu0 %9035, %v822_v4   ;;  %v883_v21 = vmul.f32 %v9698_v32, %v9640_v34  ;;  %v886_v4 = vmul.f32 %v9710_v33, %v9640_v34 }
 0x350   :  { %1417 = vperm.xlu1 %8853, %v880_v53   ;;  %v15302_v53 = vld [vmem:[#allocation49_spill] sm:$0xff] }
 0x351   :  { %v825_v31 = vmul.f32 %v15302_v53, %v9640_v34 }
 0x352   :  { %v9943_v52 = vpop.permute.xlu1 %1291  ;;  %1420 = vperm.xlu2 %8854, %v881_v40  }
 0x353   :  { %15299 = vst [vmem:[#allocation47_spill] sm:$0xff] %v9943_v52  ;;  %v887_v52 = vmul.f32 %v9749_v61, %v9640_v34 }
 0x354   :  { %v9945_v24 = vpop.permute.xlu2 %1321 }
 0x355   :  { %15300 = vst [vmem:[#allocation129_spill] sm:$0xff] %v9945_v24  ;;  %1252 = vperm.xlu0 %9035, %v825_v31   ;;  %v9961_v24 = vpop.permute.xlu0 %316  ;;  %v889_v31 = vmul.f32 %v9672_v63, %v9640_v34 }
 0x358   :  { %1426 = vperm.xlu1 %8853, %v883_v21   ;;  %v15305_v21 = vld [vmem:[#allocation44_spill] sm:$0xff] }
 0x359   :  { %v828_v28 = vmul.f32 %v15305_v21, %v9640_v34 }
 0x35a   :  { %v9955_v13 = vpop.permute.xlu1 %1300  ;;  %1429 = vperm.xlu2 %8854, %v884_v23  }
 0x35b   :  { %15303 = vst [vmem:[#allocation49_spill] sm:$0xff] %v9955_v13  ;;  %v15308_v13 = vld [vmem:[#allocation46_spill] sm:$0xff] }
 0x35c   :  { %v9957_v40 = vpop.permute.xlu2 %1330  ;;  %v831_v61 = vmul.f32 %v15308_v13, %v9640_v34 }
 0x35d   :  { %15304 = vst [vmem:[#allocation131_spill] sm:$0xff] %v9957_v40  ;;  %1261 = vperm.xlu0 %9035, %v828_v28   ;;  %v890_v40 = vmul.f32 %v9763_v14, %v9640_v34  ;;  %v892_v28 = vmul.f32 %v9777_v57, %v9640_v34 }
 0x360   :  { %1435 = vperm.xlu1 %8853, %v886_v4   ;;  %v9977_v4 = vpop.permute.xlu0 %2397 }
 0x361   :  { %15309 = vst [vmem:[#allocation46_spill] sm:$0xff] %v9977_v4 }
 0x362   :  { %v9967_v51 = vpop.permute.xlu1 %1309  ;;  %1438 = vperm.xlu2 %8854, %v887_v52  }
 0x363   :  { %15306 = vst [vmem:[#allocation44_spill] sm:$0xff] %v9967_v51 }
 0x364   :  { %v9969_v23 = vpop.permute.xlu2 %1339 }
 0x365   :  { %15307 = vst [vmem:[#allocation132_spill] sm:$0xff] %v9969_v23  ;;  %1270 = vperm.xlu0 %9035, %v831_v61   ;;  %v893_v23 = vmul.f32 %v9743_v27, %v9640_v34  ;;  %v895_v61 = vmul.f32 %v9788_v41, %v9640_v34 }
 0x368   :  { %1444 = vperm.xlu1 %8853, %v889_v31   ;;  %v834_v31 = vmul.f32 %v9961_v24, %v9640_v34  ;;  %v9991_v4 = vpop.permute.xlu0 %4445 }
 0x369   :  { %15313 = vst [vmem:[#allocation136_spill] sm:$0xff] %v9991_v4  ;;  %v898_v4 = vmul.f32 %v9767_v19, %v9640_v34 }
 0x36a   :  { %v9979_v33 = vpop.permute.xlu1 %1318  ;;  %1447 = vperm.xlu2 %8854, %v890_v40  }
 0x36b   :  { %15310 = vst [vmem:[#allocation133_spill] sm:$0xff] %v9979_v33 }
 0x36c   :  { %v9981_v52 = vpop.permute.xlu2 %1348 }
 0x36d   :  { %15311 = vst [vmem:[#allocation134_spill] sm:$0xff] %v9981_v52  ;;  %1279 = vperm.xlu0 %9035, %v834_v31   ;;  %v896_v52 = vmul.f32 %v9755_v29, %v9640_v34  ;;  %v15318_v31 = vld [vmem:[#allocation54_spill] sm:$0xff] }
 0x370   :  { %1453 = vperm.xlu1 %8853, %v892_v28   ;;  %v15315_v28 = vld [vmem:[#allocation56_spill] sm:$0xff] }
 0x371   :  { %v837_v33 = vmul.f32 %v15315_v28, %v9640_v34  ;;  %v15321_v28 = vld [vmem:[#allocation58_spill] sm:$0xff] }
 0x372   :  { %v9989_v51 = vpop.permute.xlu1 %1327  ;;  %1456 = vperm.xlu2 %8854, %v893_v23  }
 0x373   :  { %15312 = vst [vmem:[#allocation135_spill] sm:$0xff] %v9989_v51  ;;  %v10007_v51 = vmul.f32 %v9627_v45, %v15318_v31 }
 0x374   :  { %v9993_v40 = vpop.permute.xlu2 %1357 }
 0x375   :  { %15314 = vst [vmem:[#allocation137_spill] sm:$0xff] %v9993_v40  ;;  %1288 = vperm.xlu0 %9035, %v837_v33   ;;  %v10009_v40 = vpop.permute.xlu0 %4475  ;;  %v10018_v33 = vperm.slane %v10007_v51, 0 }
 0x376   :  { %15319 = vst [vmem:[#allocation54_spill] sm:$0xff] %v10007_v51 }
 0x377   :  { %15320 = vst [vmem:[#allocation140_spill] sm:$0xff] %v10009_v40  ;;  %v901_v31 = vmul.f32 %v9440_v62, %v10018_v33  ;;  %v15325_v40 = vld [vmem:[#allocation52_spill] sm:$0xff]  ;;  %v15328_v62 = vld [vmem:[#allocation39_spill] sm:$0xff] }
 0x378   :  { %1462 = vperm.xlu1 %8853, %v895_v61   ;;  %v899_v61 = vmul.f32 %v9700_v59, %v9640_v34 }
 0x37a   :  { %v10001_v27 = vpop.permute.xlu1 %1336  ;;  %1465 = vperm.xlu2 %8854, %v896_v52  }
 0x37b   :  { %15316 = vst [vmem:[#allocation138_spill] sm:$0xff] %v10001_v27  ;;  %v840_v27 = vmul.f32 %v15321_v28, %v9640_v34  ;;  %v843_v28 = vmul.f32 %v15325_v40, %v9640_v34 }
 0x37c   :  { %v10003_v23 = vpop.permute.xlu2 %1366 }
 0x37d   :  { %15317 = vst [vmem:[#allocation139_spill] sm:$0xff] %v10003_v23  ;;  %1297 = vperm.xlu0 %9035, %v840_v27   ;;  %v10026_v23 = vpop.permute.xlu0 %4505  ;;  %v904_v27 = vmul.f32 %v15283_v60, %v10018_v33  ;;  %v15332_v60 = vld [vmem:[#allocation35_spill] sm:$0xff] }
 0x37e   :  { %15324 = vst [vmem:[#allocation143_spill] sm:$0xff] %v10026_v23 }
 0x380   :  { %1471 = vperm.xlu1 %8853, %v898_v4   ;;  %v902_v4 = vmul.f32 %v9415_v56, %v10018_v33  ;;  %v15329_v56 = vld [vmem:[#allocation55_spill] sm:$0xff] }
 0x382   :  { %v10020_v52 = vpop.permute.xlu1 %1345  ;;  %1474 = vperm.xlu2 %8854, %v899_v61  }
 0x383   :  { %15322 = vst [vmem:[#allocation141_spill] sm:$0xff] %v10020_v52  ;;  %v905_v52 = vmul.f32 %v15328_v62, %v10018_v33 }
 0x384   :  { %v10022_v45 = vpop.permute.xlu2 %1375 }
 0x385   :  { %15323 = vst [vmem:[#allocation142_spill] sm:$0xff] %v10022_v45  ;;  %1306 = vperm.xlu0 %9035, %v843_v28   ;;  %v10038_v45 = vpop.permute.xlu0 %406  ;;  %v907_v28 = vmul.f32 %v9457_v9, %v10018_v33  ;;  %v15337_v9 = vld [vmem:[#allocation42_spill] sm:$0xff] }
 0x388   :  { %1480 = vperm.xlu1 %8853, %v901_v31   ;;  %v846_v31 = vmul.f32 %v15329_v56, %v9640_v34 }
 0x38a   :  { %v10032_v51 = vpop.permute.xlu1 %1354  ;;  %1483 = vperm.xlu2 %8854, %v902_v4  }
 0x38b   :  { %15326 = vst [vmem:[#allocation52_spill] sm:$0xff] %v10032_v51 }
 0x38c   :  { %v10034_v61 = vpop.permute.xlu2 %1384 }
 0x38d   :  { %15327 = vst [vmem:[#allocation144_spill] sm:$0xff] %v10034_v61  ;;  %1315 = vperm.xlu0 %9035, %v846_v31   ;;  %v908_v61 = vmul.f32 %v15332_v60, %v10018_v33  ;;  %v10052_v51 = vpop.permute.xlu0 %2487  ;;  %v15336_v31 = vld [vmem:[#allocation37_spill] sm:$0xff]  ;;  %v15338_v60 = vld [vmem:[#allocation64_spill] sm:$0xff] }
 0x38e   :  { %15333 = vst [vmem:[#allocation35_spill] sm:$0xff] %v10052_v51  ;;  %v852_v51 = vmul.f32 %v15338_v60, %v9640_v34 }
 0x390   :  { %1489 = vperm.xlu1 %8853, %v904_v27   ;;  %v849_v27 = vmul.f32 %v10038_v45, %v9640_v34 }
 0x392   :  { %v10044_v23 = vpop.permute.xlu1 %1363  ;;  %1492 = vperm.xlu2 %8854, %v905_v52  }
 0x393   :  { %15330 = vst [vmem:[#allocation39_spill] sm:$0xff] %v10044_v23  ;;  %v911_v23 = vmul.f32 %v15337_v9, %v10018_v33 }
 0x394   :  { %v10046_v4 = vpop.permute.xlu2 %1393 }
 0x395   :  { %15331 = vst [vmem:[#allocation145_spill] sm:$0xff] %v10046_v4  ;;  %1324 = vperm.xlu0 %9035, %v849_v27   ;;  %v910_v4 = vmul.f32 %v15336_v31, %v10018_v33  ;;  %v15342_v27 = vld [vmem:[#allocation43_spill] sm:$0xff]  ;;  %v914_v31 = vmul.f32 %v9452_v7, %v10018_v33  ;;  %v15348_v7 = vld [vmem:[#allocation61_spill] sm:$0xff] }
 0x398   :  { %1498 = vperm.xlu1 %8853, %v907_v28   ;;  %v10066_v28 = vpop.permute.xlu0 %4535 }
 0x399   :  { %15339 = vst [vmem:[#allocation37_spill] sm:$0xff] %v10066_v28 }
 0x39a   :  { %v10056_v62 = vpop.permute.xlu1 %1372  ;;  %1501 = vperm.xlu2 %8854, %v908_v61  }
 0x39b   :  { %15334 = vst [vmem:[#allocation146_spill] sm:$0xff] %v10056_v62 }
 0x39c   :  { %v10058_v52 = vpop.permute.xlu2 %1402 }
 0x39d   :  { %15335 = vst [vmem:[#allocation147_spill] sm:$0xff] %v10058_v52  ;;  %1333 = vperm.xlu0 %9035, %v852_v51   ;;  %v913_v52 = vmul.f32 %v15342_v27, %v10018_v33  ;;  %v15347_v51 = vld [vmem:[#allocation45_spill] sm:$0xff]  ;;  %v917_v27 = vmul.f32 %v9461_v10, %v10018_v33  ;;  %v15352_v10 = vld [vmem:[#allocation63_spill] sm:$0xff] }
 0x3a0   :  { %1507 = vperm.xlu1 %8853, %v910_v4   ;;  %v15343_v4 = vld [vmem:[#allocation67_spill] sm:$0xff]  ;;  %v10078_v62 = vpop.permute.xlu0 %4565 }
 0x3a1   :  { %v855_v9 = vmul.f32 %v15343_v4, %v9640_v34  ;;  %15344 = vst [vmem:[#allocation43_spill] sm:$0xff] %v10078_v62 }
 0x3a2   :  { %v10068_v56 = vpop.permute.xlu1 %1381  ;;  %1510 = vperm.xlu2 %8854, %v911_v23  }
 0x3a3   :  { %15340 = vst [vmem:[#allocation42_spill] sm:$0xff] %v10068_v56 }
 0x3a4   :  { %v10070_v61 = vpop.permute.xlu2 %1411 }
 0x3a5   :  { %15341 = vst [vmem:[#allocation148_spill] sm:$0xff] %v10070_v61  ;;  %1342 = vperm.xlu0 %9035, %v855_v9   ;;  %v916_v61 = vmul.f32 %v15347_v51, %v10018_v33  ;;  %v919_v9 = vmul.f32 %v9468_v12, %v10018_v33  ;;  %v920_v51 = vmul.f32 %v9554_v8, %v10018_v33 }
 0x3a6   :  { %v923_v12 = vmul.f32 %v9506_v39, %v10018_v33  ;;  %v15358_v39 = vld [vmem:[#allocation77_spill] sm:$0xff] }
 0x3a8   :  { %1516 = vperm.xlu1 %8853, %v913_v52   ;;  %v858_v52 = vmul.f32 %v15348_v7, %v9640_v34  ;;  %v10090_v56 = vpop.permute.xlu0 %4595 }
 0x3a9   :  { %15349 = vst [vmem:[#allocation45_spill] sm:$0xff] %v10090_v56 }
 0x3aa   :  { %v10080_v60 = vpop.permute.xlu1 %1390  ;;  %1519 = vperm.xlu2 %8854, %v914_v31  }
 0x3ab   :  { %15345 = vst [vmem:[#allocation67_spill] sm:$0xff] %v10080_v60 }
 0x3ac   :  { %v10082_v23 = vpop.permute.xlu2 %1420 }
 0x3ad   :  { %15346 = vst [vmem:[#allocation149_spill] sm:$0xff] %v10082_v23  ;;  %1351 = vperm.xlu0 %9035, %v858_v52   ;;  %v922_v52 = vmul.f32 %v9475_v15, %v10018_v33  ;;  %v926_v15 = vmul.f32 %v9516_v48, %v10018_v33  ;;  %v15363_v48 = vld [vmem:[#allocation80_spill] sm:$0xff] }
 0x3b0   :  { %1525 = vperm.xlu1 %8853, %v916_v61   ;;  %v861_v61 = vmul.f32 %v15352_v10, %v9640_v34  ;;  %v10102_v23 = vpop.permute.xlu0 %496 }
 0x3b1   :  { %v864_v8 = vmul.f32 %v10102_v23, %v9640_v34 }
 0x3b2   :  { %v10092_v28 = vpop.permute.xlu1 %1399  ;;  %1528 = vperm.xlu2 %8854, %v917_v27  }
 0x3b3   :  { %15350 = vst [vmem:[#allocation61_spill] sm:$0xff] %v10092_v28 }
 0x3b4   :  { %v10094_v31 = vpop.permute.xlu2 %1429 }
 0x3b5   :  { %15351 = vst [vmem:[#allocation150_spill] sm:$0xff] %v10094_v31  ;;  %1360 = vperm.xlu0 %9035, %v861_v61   ;;  %v925_v61 = vmul.f32 %v9565_v17, %v10018_v33  ;;  %v15362_v17 = vld [vmem:[#allocation48_spill] sm:$0xff] }
 0x3b8   :  { %1534 = vperm.xlu1 %8853, %v919_v9   ;;  %v10116_v31 = vpop.permute.xlu0 %2577 }
 0x3b9   :  { %15356 = vst [vmem:[#allocation153_spill] sm:$0xff] %v10116_v31 }
 0x3ba   :  { %v10104_v60 = vpop.permute.xlu1 %1408  ;;  %1537 = vperm.xlu2 %8854, %v920_v51  }
 0x3bb   :  { %15353 = vst [vmem:[#allocation63_spill] sm:$0xff] %v10104_v60 }
 0x3bc   :  { %v10106_v27 = vpop.permute.xlu2 %1438 }
 0x3bd   :  { %15354 = vst [vmem:[#allocation151_spill] sm:$0xff] %v10106_v27  ;;  %1369 = vperm.xlu0 %9035, %v864_v8   ;;  %v928_v8 = vmul.f32 %v9525_v54, %v10018_v33  ;;  %v932_v54 = vmul.f32 %v9503_v26, %v10018_v33  ;;  %v15373_v26 = vld [vmem:[#allocation76_spill] sm:$0xff] }
 0x3c0   :  { %1543 = vperm.xlu1 %8853, %v922_v52   ;;  %v867_v52 = vmul.f32 %v15358_v39, %v9640_v34 }
 0x3c2   :  { %v10114_v9 = vpop.permute.xlu1 %1417  ;;  %1546 = vperm.xlu2 %8854, %v923_v12  }
 0x3c3   :  { %15355 = vst [vmem:[#allocation152_spill] sm:$0xff] %v10114_v9  ;;  %v929_v9 = vmul.f32 %v15362_v17, %v10018_v33 }
 0x3c4   :  { %v10118_v51 = vpop.permute.xlu2 %1447 }
 0x3c5   :  { %15357 = vst [vmem:[#allocation154_spill] sm:$0xff] %v10118_v51  ;;  %1378 = vperm.xlu0 %9035, %v867_v52   ;;  %v10132_v51 = vpop.permute.xlu0 %4625  ;;  %v15366_v52 = vld [vmem:[#allocation53_spill] sm:$0xff] }
 0x3c6   :  { %15361 = vst [vmem:[#allocation156_spill] sm:$0xff] %v10132_v51 }
 0x3c8   :  { %1552 = vperm.xlu1 %8853, %v925_v61   ;;  %v870_v61 = vmul.f32 %v15363_v48, %v9640_v34 }
 0x3ca   :  { %v10126_v27 = vpop.permute.xlu1 %1426  ;;  %1555 = vperm.xlu2 %8854, %v926_v15  }
 0x3cb   :  { %15359 = vst [vmem:[#allocation77_spill] sm:$0xff] %v10126_v27 }
 0x3cc   :  { %v10128_v12 = vpop.permute.xlu2 %1456 }
 0x3cd   :  { %15360 = vst [vmem:[#allocation155_spill] sm:$0xff] %v10128_v12  ;;  %1387 = vperm.xlu0 %9035, %v870_v61   ;;  %v931_v12 = vmul.f32 %v15366_v52, %v10018_v33  ;;  %v10144_v27 = vpop.permute.xlu0 %4655  ;;  %v15371_v61 = vld [vmem:[#allocation50_spill] sm:$0xff]  ;;  %v935_v52 = vmul.f32 %v9575_v20, %v10018_v33 }
 0x3ce   :  { %15367 = vst [vmem:[#allocation53_spill] sm:$0xff] %v10144_v27 }
 0x3d0   :  { %1561 = vperm.xlu1 %8853, %v928_v8   ;;  %v15368_v8 = vld [vmem:[#allocation74_spill] sm:$0xff] }
 0x3d1   :  { %v873_v17 = vmul.f32 %v15368_v8, %v9640_v34 }
 0x3d2   :  { %v10138_v60 = vpop.permute.xlu1 %1435  ;;  %1564 = vperm.xlu2 %8854, %v929_v9  }
 0x3d3   :  { %15364 = vst [vmem:[#allocation48_spill] sm:$0xff] %v10138_v60 }
 0x3d4   :  { %v10140_v15 = vpop.permute.xlu2 %1465 }
 0x3d5   :  { %15365 = vst [vmem:[#allocation80_spill] sm:$0xff] %v10140_v15  ;;  %1396 = vperm.xlu0 %9035, %v873_v17   ;;  %v934_v15 = vmul.f32 %v15371_v61, %v10018_v33  ;;  %v10156_v60 = vpop.permute.xlu0 %4685  ;;  %v937_v17 = vmul.f32 %v9520_v50, %v10018_v33  ;;  %v15376_v61 = vld [vmem:[#allocation59_spill] sm:$0xff]  ;;  %v941_v50 = vmul.f32 %v9568_v3, %v10018_v33 }
 0x3d6   :  { %15372 = vst [vmem:[#allocation50_spill] sm:$0xff] %v10156_v60 }
 0x3d8   :  { %1570 = vperm.xlu1 %8853, %v931_v12   ;;  %v876_v12 = vmul.f32 %v15373_v26, %v9640_v34 }
 0x3da   :  { %v10150_v28 = vpop.permute.xlu1 %1444  ;;  %1573 = vperm.xlu2 %8854, %v932_v54  }
 0x3db   :  { %15369 = vst [vmem:[#allocation74_spill] sm:$0xff] %v10150_v28  ;;  %v938_v28 = vmul.f32 %v15376_v61, %v10018_v33 }
 0x3dc   :  { %v10152_v9 = vpop.permute.xlu2 %1474 }
 0x3dd   :  { %15370 = vst [vmem:[#allocation157_spill] sm:$0xff] %v10152_v9  ;;  %1405 = vperm.xlu0 %9035, %v876_v12   ;;  %v10168_v9 = vpop.permute.xlu0 %586  ;;  %v940_v12 = vmul.f32 %v9590_v11, %v10018_v33  ;;  %v15382_v11 = vld [vmem:[#allocation89_spill] sm:$0xff] }
 0x3de   :  { %v879_v20 = vmul.f32 %v10168_v9, %v9640_v34  ;;  %v885_v3 = vmul.f32 %v15382_v11, %v9640_v34 }
 0x3e0   :  { %1579 = vperm.xlu1 %8853, %v934_v15  }
 0x3e2   :  { %v10162_v27 = vpop.permute.xlu1 %1453  ;;  %1582 = vperm.xlu2 %8854, %v935_v52  }
 0x3e3   :  { %15374 = vst [vmem:[#allocation76_spill] sm:$0xff] %v10162_v27  ;;  %v15379_v27 = vld [vmem:[#allocation86_spill] sm:$0xff] }
 0x3e4   :  { %v10164_v54 = vpop.permute.xlu2 %1483  ;;  %v882_v61 = vmul.f32 %v15379_v27, %v9640_v34 }
 0x3e5   :  { %15375 = vst [vmem:[#allocation158_spill] sm:$0xff] %v10164_v54  ;;  %1414 = vperm.xlu0 %9035, %v879_v20   ;;  %v944_v20 = vmul.f32 %v9547_v6, %v10018_v33 }
 0x3e8   :  { %1588 = vperm.xlu1 %8853, %v937_v17  }
 0x3ea   :  { %v10174_v15 = vpop.permute.xlu1 %1462  ;;  %1591 = vperm.xlu2 %8854, %v938_v28   ;;  %v943_v28 = vmul.f32 %v9577_v36, %v10018_v33  ;;  %v15385_v36 = vld [vmem:[#allocation84_spill] sm:$0xff] }
 0x3eb   :  { %15377 = vst [vmem:[#allocation59_spill] sm:$0xff] %v10174_v15  ;;  %v888_v6 = vmul.f32 %v15385_v36, %v9640_v34 }
 0x3ec   :  { %v10176_v52 = vpop.permute.xlu2 %1492 }
 0x3ed   :  { %15378 = vst [vmem:[#allocation159_spill] sm:$0xff] %v10176_v52  ;;  %1423 = vperm.xlu0 %9035, %v882_v61   ;;  %v947_v61 = vmul.f32 %v9556_v0, %v10018_v33 }
 0x3f0   :  { %1597 = vperm.xlu1 %8853, %v940_v12  }
 0x3f2   :  { %v10184_v17 = vpop.permute.xlu1 %1471  ;;  %1600 = vperm.xlu2 %8854, %v941_v50   ;;  %v946_v50 = vmul.f32 %v9587_v46, %v10018_v33  ;;  %v15388_v46 = vld [vmem:[#allocation87_spill] sm:$0xff] }
 0x3f3   :  { %15380 = vst [vmem:[#allocation86_spill] sm:$0xff] %v10184_v17  ;;  %v891_v0 = vmul.f32 %v15388_v46, %v9640_v34 }
 0x3f4   :  { %v10186_v54 = vpop.permute.xlu2 %1501 }
 0x3f5   :  { %15381 = vst [vmem:[#allocation160_spill] sm:$0xff] %v10186_v54  ;;  %1432 = vperm.xlu0 %9035, %v885_v3   ;;  %v15392_v54 = vld [vmem:[#allocation83_spill] sm:$0xff] }
 0x3f8   :  { %1606 = vperm.xlu1 %8853, %v943_v28  }
 0x3fa   :  { %1609 = vperm.xlu2 %8854, %v944_v20   ;;  %v10194_v12 = vpop.permute.xlu1 %1480  ;;  %v949_v20 = vmul.f32 %v9563_v18, %v10018_v33 }
 0x3fb   :  { %15383 = vst [vmem:[#allocation89_spill] sm:$0xff] %v10194_v12 }
 0x3fc   :  { %v10196_v52 = vpop.permute.xlu2 %1510 }
 0x3fd   :  { %15384 = vst [vmem:[#allocation161_spill] sm:$0xff] %v10196_v52  ;;  %1441 = vperm.xlu0 %9035, %v888_v6   ;;  %v950_v52 = vmul.f32 %v15263_v47, %v10018_v33  ;;  %v15390_v6 = vld [vmem:[#allocation70_spill] sm:$0xff]  ;;  %v894_v47 = vmul.f32 %v15392_v54, %v9640_v34 }
 0x400   :  { %1615 = vperm.xlu1 %8853, %v946_v50  }
 0x402   :  { %1618 = vperm.xlu2 %8854, %v947_v61   ;;  %v10208_v3 = vpop.permute.xlu1 %1489  ;;  %v952_v61 = vmul.f32 %v15266_v30, %v10018_v33  ;;  %v15395_v30 = vld [vmem:[#allocation100_spill] sm:$0xff] }
 0x403   :  { %15387 = vst [vmem:[#allocation162_spill] sm:$0xff] %v10208_v3 }
 0x404   :  { %v10204_v28 = vpop.permute.xlu2 %1519 }
 0x405   :  { %15386 = vst [vmem:[#allocation84_spill] sm:$0xff] %v10204_v28  ;;  %1450 = vperm.xlu0 %9035, %v891_v0   ;;  %v953_v28 = vmul.f32 %v15390_v6, %v10018_v33  ;;  %v897_v6 = vmul.f32 %v15395_v30, %v9640_v34 }
 0x408   :  { %1624 = vperm.xlu1 %8853, %v949_v20  }
 0x40a   :  { %1627 = vperm.xlu2 %8854, %v950_v52   ;;  %v10220_v18 = vpop.permute.xlu1 %1498  ;;  %v15394_v52 = vld [vmem:[#allocation69_spill] sm:$0xff] }
 0x40b   :  { %15391 = vst [vmem:[#allocation70_spill] sm:$0xff] %v10220_v18  ;;  %v955_v0 = vmul.f32 %v15394_v52, %v10018_v33  ;;  %v15398_v52 = vld [vmem:[#allocation36_spill] sm:$0xff] }
 0x40c   :  { %v10214_v50 = vpop.permute.xlu2 %1528 }
 0x40d   :  { %15389 = vst [vmem:[#allocation87_spill] sm:$0xff] %v10214_v50  ;;  %1459 = vperm.xlu0 %9035, %v894_v47   ;;  %v956_v50 = vmul.f32 %v9623_v2, %v10018_v33  ;;  %v959_v47 = vmul.f32 %v15275_v38, %v10018_v33  ;;  %v900_v2 = vmul.f32 %v15398_v52, %v10018_v33 }
 0x410   :  { %1633 = vperm.xlu1 %8853, %v952_v61  }
 0x412   :  { %1636 = vperm.xlu2 %8854, %v953_v28   ;;  %v10232_v3 = vpop.permute.xlu1 %1507  ;;  %v958_v28 = vmul.f32 %v9636_v25, %v10018_v33  ;;  %v15401_v25 = vld [vmem:[#allocation33_spill] sm:$0xff] }
 0x413   :  { %15396 = vst [vmem:[#allocation69_spill] sm:$0xff] %v10232_v3  ;;  %v903_v38 = vmul.f32 %v15401_v25, %v10018_v33  ;;  %v967_v25 = vmul.f32 %v9629_v43, %v10018_v33  ;;  %v971_v43 = vmul.f32 %v9696_v58, %v10018_v33  ;;  %v915_v58 = vmul.f32 %v9687_v5, %v10018_v33 }
 0x414   :  { %v10224_v20 = vpop.permute.xlu2 %1537  ;;  %v979_v5 = vmul.f32 %v9698_v32, %v10018_v33  ;;  %v15425_v32 = vld [vmem:[#allocation91_spill] sm:$0xff] }
 0x415   :  { %15393 = vst [vmem:[#allocation83_spill] sm:$0xff] %v10224_v20  ;;  %1468 = vperm.xlu0 %9035, %v897_v6   ;;  %v962_v6 = vmul.f32 %v15279_v44, %v10018_v33 }
 0x418   :  { %1642 = vperm.xlu1 %8853, %v955_v0  }
 0x41a   :  { %1645 = vperm.xlu2 %8854, %v956_v50   ;;  %v10242_v0 = vpop.permute.xlu1 %1516  ;;  %v961_v50 = vmul.f32 %v9652_v42, %v10018_v33  ;;  %v15406_v42 = vld [vmem:[#allocation34_spill] sm:$0xff] }
 0x41b   :  { %15399 = vst [vmem:[#allocation36_spill] sm:$0xff] %v10242_v0  ;;  %v906_v44 = vmul.f32 %v15406_v42, %v10018_v33 }
 0x41c   :  { %v10234_v61 = vpop.permute.xlu2 %1546 }
 0x41d   :  { %15397 = vst [vmem:[#allocation100_spill] sm:$0xff] %v10234_v61  ;;  %1477 = vperm.xlu0 %9035, %v900_v2  }
 0x420   :  { %1651 = vperm.xlu1 %8853, %v958_v28  }
 0x422   :  { %1654 = vperm.xlu2 %8854, %v959_v47   ;;  %v15403_v47 = vld [vmem:[#allocation71_spill] sm:$0xff]  ;;  %v10256_v2 = vpop.permute.xlu1 %1525 }
 0x423   :  { %v964_v52 = vmul.f32 %v15403_v47, %v10018_v33  ;;  %15404 = vst [vmem:[#allocation71_spill] sm:$0xff] %v10256_v2 }
 0x424   :  { %v10244_v34 = vpop.permute.xlu2 %1555 }
 0x425   :  { %15400 = vst [vmem:[#allocation163_spill] sm:$0xff] %v10244_v34  ;;  %1486 = vperm.xlu0 %9035, %v903_v38   ;;  %v15405_v34 = vld [vmem:[#allocation72_spill] sm:$0xff]  ;;  %v968_v38 = vmul.f32 %v9689_v37, %v10018_v33  ;;  %v912_v37 = vmul.f32 %v15291_v1, %v10018_v33 }
 0x426   :  { %v965_v61 = vmul.f32 %v15405_v34, %v10018_v33  ;;  %v909_v34 = vmul.f32 %v15288_v55, %v10018_v33  ;;  %v973_v55 = vmul.f32 %v9707_v22, %v10018_v33  ;;  %v15417_v22 = vld [vmem:[#allocation81_spill] sm:$0xff] }
 0x428   :  { %1660 = vperm.xlu1 %8853, %v961_v50  }
 0x42a   :  { %1663 = vperm.xlu2 %8854, %v962_v6   ;;  %v10264_v6 = vpop.permute.xlu0 %2667  ;;  %v10270_v47 = vpop.permute.xlu1 %1534 }
 0x42b   :  { %15408 = vst [vmem:[#allocation34_spill] sm:$0xff] %v10264_v6 }
 0x42c   :  { %v10252_v28 = vpop.permute.xlu2 %1564  ;;  %15409 = vst [vmem:[#allocation164_spill] sm:$0xff] %v10270_v47 }
 0x42d   :  { %15402 = vst [vmem:[#allocation33_spill] sm:$0xff] %v10252_v28  ;;  %1495 = vperm.xlu0 %9035, %v906_v44   ;;  %v15506_v28 = vld [vmem:[#allocation73_spill] sm:$0xff] }
 0x430   :  { %1669 = vperm.xlu1 %8853, %v964_v52  }
 0x432   :  { %1672 = vperm.xlu2 %8854, %v965_v61   ;;  %v970_v61 = vmul.f32 %v9642_v35, %v10018_v33  ;;  %v10278_v42 = vpop.permute.xlu0 %4715  ;;  %v10284_v44 = vpop.permute.xlu1 %1543  ;;  %v15414_v35 = vld [vmem:[#allocation78_spill] sm:$0xff] }
 0x433   :  { %15411 = vst [vmem:[#allocation166_spill] sm:$0xff] %v10278_v42 }
 0x434   :  { %v10262_v50 = vpop.permute.xlu2 %1573  ;;  %15412 = vst [vmem:[#allocation167_spill] sm:$0xff] %v10284_v44 }
 0x435   :  { %15407 = vst [vmem:[#allocation72_spill] sm:$0xff] %v10262_v50  ;;  %1504 = vperm.xlu0 %9035, %v909_v34   ;;  %v15489_v50 = vld [vmem:[#allocation28_spill] sm:$0xff] }
 0x438   :  { %1678 = vperm.xlu1 %8853, %v967_v25  }
 0x43a   :  { %1681 = vperm.xlu2 %8854, %v968_v38   ;;  %v10288_v25 = vpop.permute.xlu0 %4265  ;;  %v974_v38 = vmul.f32 %v15414_v35, %v10018_v33  ;;  %v10296_v1 = vpop.permute.xlu1 %1552 }
 0x43b   :  { %15413 = vst [vmem:[#allocation168_spill] sm:$0xff] %v10288_v25 }
 0x43c   :  { %v10276_v52 = vpop.permute.xlu2 %1582  ;;  %15416 = vst [vmem:[#allocation169_spill] sm:$0xff] %v10296_v1 }
 0x43d   :  { %15410 = vst [vmem:[#allocation165_spill] sm:$0xff] %v10276_v52  ;;  %1513 = vperm.xlu0 %9035, %v912_v37   ;;  %v918_v37 = vmul.f32 %v15298_v49, %v10018_v33  ;;  %v15480_v52 = vld [vmem:[#allocation24_spill] sm:$0xff] }
 0x440   :  { %1687 = vperm.xlu1 %8853, %v970_v61   ;;  %v976_v61 = vmul.f32 %v9718_v16, %v10018_v33  ;;  %v15421_v16 = vld [vmem:[#allocation75_spill] sm:$0xff] }
 0x442   :  { %1690 = vperm.xlu2 %8854, %v971_v43   ;;  %v977_v43 = vmul.f32 %v15417_v22, %v10018_v33  ;;  %v10304_v35 = vpop.permute.xlu0 %4745 }
 0x443   :  { %15418 = vst [vmem:[#allocation81_spill] sm:$0xff] %v10304_v35 }
 0x444   :  { %v10292_v34 = vpop.permute.xlu2 %1591 }
 0x445   :  { %15415 = vst [vmem:[#allocation78_spill] sm:$0xff] %v10292_v34  ;;  %1522 = vperm.xlu0 %9035, %v915_v58   ;;  %v980_v58 = vmul.f32 %v15421_v16, %v10018_v33  ;;  %v985_v16 = vmul.f32 %v9672_v63, %v10018_v33  ;;  %v15431_v63 = vld [vmem:[#allocation90_spill] sm:$0xff] }
 0x448   :  { %1696 = vperm.xlu1 %8853, %v973_v55  }
 0x44a   :  { %1699 = vperm.xlu2 %8854, %v974_v38   ;;  %v10310_v38 = vpop.permute.xlu1 %1561  ;;  %v10316_v22 = vpop.permute.xlu0 %4295 }
 0x44b   :  { %15420 = vst [vmem:[#allocation171_spill] sm:$0xff] %v10310_v38 }
 0x44c   :  { %v10306_v55 = vpop.permute.xlu2 %1600  ;;  %15422 = vst [vmem:[#allocation75_spill] sm:$0xff] %v10316_v22 }
 0x44d   :  { %15419 = vst [vmem:[#allocation170_spill] sm:$0xff] %v10306_v55  ;;  %1531 = vperm.xlu0 %9035, %v918_v37   ;;  %v983_v55 = vmul.f32 %v15425_v32, %v10018_v33  ;;  %v989_v32 = vmul.f32 %v15431_v63, %v10018_v33 }
 0x450   :  { %1705 = vperm.xlu1 %8853, %v976_v61   ;;  %v921_v61 = vmul.f32 %v15302_v53, %v10018_v33 }
 0x452   :  { %1708 = vperm.xlu2 %8854, %v977_v43   ;;  %v15424_v43 = vld [vmem:[#allocation82_spill] sm:$0xff]  ;;  %v10324_v34 = vpop.permute.xlu1 %1570  ;;  %v10328_v53 = vpop.permute.xlu0 %4775 }
 0x453   :  { %v982_v37 = vmul.f32 %v15424_v43, %v10018_v33  ;;  %15426 = vst [vmem:[#allocation82_spill] sm:$0xff] %v10324_v34  ;;  %v927_v43 = vmul.f32 %v15308_v13, %v10018_v33 }
 0x454   :  { %v10318_v49 = vpop.permute.xlu2 %1609  ;;  %15427 = vst [vmem:[#allocation91_spill] sm:$0xff] %v10328_v53 }
 0x455   :  { %1540 = vperm.xlu0 %9035, %v921_v61   ;;  %15423 = vst [vmem:[#allocation172_spill] sm:$0xff] %v10318_v49  ;;  %v986_v61 = vmul.f32 %v9763_v14, %v10018_v33  ;;  %v930_v14 = vmul.f32 %v9961_v24, %v10018_v33  ;;  %v994_v24 = vmul.f32 %v9767_v19, %v10018_v33  ;;  %v15443_v19 = vld [vmem:[#allocation14_spill] sm:$0xff] }
 0x458   :  { %1714 = vperm.xlu1 %8853, %v979_v5   ;;  %v924_v5 = vmul.f32 %v15305_v21, %v10018_v33 }
 0x45a   :  { %1717 = vperm.xlu2 %8854, %v980_v58   ;;  %v10340_v21 = vpop.permute.xlu0 %2757 }
 0x45b   :  { %15430 = vst [vmem:[#allocation175_spill] sm:$0xff] %v10340_v21 }
 0x45c   :  { %v10332_v58 = vpop.permute.xlu2 %1618 }
 0x45d   :  { %1549 = vperm.xlu0 %9035, %v924_v5   ;;  %15428 = vst [vmem:[#allocation173_spill] sm:$0xff] %v10332_v58 }
 0x460   :  { %1723 = vperm.xlu1 %8853, %v982_v37   ;;  %v10338_v37 = vpop.permute.xlu1 %1579 }
 0x461   :  { %15429 = vst [vmem:[#allocation174_spill] sm:$0xff] %v10338_v37 }
 0x462   :  { %1726 = vperm.xlu2 %8854, %v983_v55   ;;  %v988_v55 = vmul.f32 %v9777_v57, %v10018_v33  ;;  %v992_v57 = vmul.f32 %v9755_v29, %v10018_v33  ;;  %v15439_v29 = vld [vmem:[#allocation58_spill] sm:$0xff] }
 0x464   :  { %v10346_v5 = vpop.permute.xlu2 %1627 }
 0x465   :  { %1558 = vperm.xlu0 %9035, %v927_v43   ;;  %15432 = vst [vmem:[#allocation90_spill] sm:$0xff] %v10346_v5  ;;  %v15435_v43 = vld [vmem:[#allocation56_spill] sm:$0xff] }
 0x466   :  { %v933_v63 = vmul.f32 %v15435_v43, %v10018_v33  ;;  %v15444_v5 = vld [vmem:[#allocation12_spill] sm:$0xff] }
 0x468   :  { %1732 = vperm.xlu1 %8853, %v985_v16   ;;  %v10350_v13 = vpop.permute.xlu1 %1588  ;;  %v10352_v16 = vpop.permute.xlu0 %4325 }
 0x469   :  { %15433 = vst [vmem:[#allocation176_spill] sm:$0xff] %v10350_v13  ;;  %v15459_v13 = vld [vmem:[#allocation17_spill] sm:$0xff] }
 0x46a   :  { %1735 = vperm.xlu2 %8854, %v986_v61   ;;  %15434 = vst [vmem:[#allocation177_spill] sm:$0xff] %v10352_v16  ;;  %v991_v61 = vmul.f32 %v9788_v41, %v10018_v33  ;;  %v995_v41 = vmul.f32 %v9700_v59, %v10018_v33 }
 0x46d   :  { %1567 = vperm.xlu0 %9035, %v930_v14  }
 0x470   :  { %1741 = vperm.xlu1 %8853, %v988_v55   ;;  %v10360_v55 = vpop.permute.xlu2 %1636  ;;  %v10366_v14 = vpop.permute.xlu0 %4805 }
 0x471   :  { %15436 = vst [vmem:[#allocation56_spill] sm:$0xff] %v10360_v55  ;;  %v939_v55 = vmul.f32 %v15325_v40, %v10018_v33  ;;  %v15451_v40 = vld [vmem:[#allocation15_spill] sm:$0xff] }
 0x472   :  { %1744 = vperm.xlu2 %8854, %v989_v32   ;;  %v10364_v32 = vpop.permute.xlu1 %1597  ;;  %15438 = vst [vmem:[#allocation179_spill] sm:$0xff] %v10366_v14 }
 0x473   :  { %15437 = vst [vmem:[#allocation178_spill] sm:$0xff] %v10364_v32 }
 0x475   :  { %1576 = vperm.xlu0 %9035, %v933_v63  }
 0x478   :  { %1750 = vperm.xlu1 %8853, %v991_v61   ;;  %v936_v61 = vmul.f32 %v15439_v29, %v10018_v33  ;;  %v10372_v43 = vpop.permute.xlu2 %1645 }
 0x479   :  { %15440 = vst [vmem:[#allocation58_spill] sm:$0xff] %v10372_v43 }
 0x47a   :  { %1753 = vperm.xlu2 %8854, %v992_v57   ;;  %v10374_v57 = vpop.permute.xlu0 %4355  ;;  %v10376_v63 = vpop.permute.xlu1 %1606 }
 0x47b   :  { %15441 = vst [vmem:[#allocation180_spill] sm:$0xff] %v10374_v57 }
 0x47c   :  { %15442 = vst [vmem:[#allocation181_spill] sm:$0xff] %v10376_v63 }
 0x47d   :  { %1585 = vperm.xlu0 %9035, %v936_v61  }
 0x480   :  { %1759 = vperm.xlu1 %8853, %v994_v24   ;;  %v10382_v59 = vpop.permute.xlu2 %1654  ;;  %v15446_v24 = vld [vmem:[#allocation27_spill] sm:$0xff] }
 0x481   :  { %15445 = vst [vmem:[#allocation182_spill] sm:$0xff] %v10382_v59  ;;  %v15452_v59 = vld [vmem:[#allocation13_spill] sm:$0xff] }
 0x482   :  { %1762 = vperm.xlu2 %8854, %v995_v41   ;;  %v15447_v41 = vld [vmem:[#allocation55_spill] sm:$0xff]  ;;  %v10387_v61 = vpop.permute.xlu0 %4835  ;;  %v10389_v43 = vpop.permute.xlu1 %1615 }
 0x483   :  { %v942_v29 = vmul.f32 %v15447_v41, %v10018_v33  ;;  %15448 = vst [vmem:[#allocation27_spill] sm:$0xff] %v10387_v61 }
 0x484   :  { %15449 = vst [vmem:[#allocation55_spill] sm:$0xff] %v10389_v43  ;;  %v15455_v43 = vld [vmem:[#allocation64_spill] sm:$0xff] }
 0x485   :  { %1594 = vperm.xlu0 %9035, %v939_v55   ;;  %v945_v55 = vmul.f32 %v10038_v45, %v10018_v33  ;;  %v948_v58 = vmul.f32 %v15455_v43, %v10018_v33 }
 0x488   :  { %8855 = vset.pattern.permute.xlu1 %v15443_v19  ;;  %v10392_v63 = vpop.permute.xlu2 %1663 }
 0x489   :  { %15450 = vst [vmem:[#allocation183_spill] sm:$0xff] %v10392_v63 }
 0x48a   :  { %8856 = vset.pattern.permute.xlu2 %v15444_v5  ;;  %v10398_v32 = vpop.permute.xlu0 %1201  ;;  %v10400_v41 = vpop.permute.xlu1 %1624 }
 0x48b   :  { %15453 = vst [vmem:[#allocation184_spill] sm:$0xff] %v10398_v32 }
 0x48c   :  { %15454 = vst [vmem:[#allocation185_spill] sm:$0xff] %v10400_v41  ;;  %v15460_v41 = vld [vmem:[#allocation18_spill] sm:$0xff] }
 0x48d   :  { %1603 = vperm.xlu0 %9035, %v942_v29  }
 0x490   :  { %2223 = vperm.xlu1 %8855, %v15446_v24   ;;  %v10405_v29 = vpop.permute.xlu2 %1672 }
 0x491   :  { %15456 = vst [vmem:[#allocation64_spill] sm:$0xff] %v10405_v29 }
 0x492   :  { %2229 = vperm.xlu2 %8856, %v15446_v24   ;;  %v10408_v63 = vpop.permute.xlu0 %1216  ;;  %v10410_v45 = vpop.permute.xlu1 %1633 }
 0x493   :  { %15457 = vst [vmem:[#allocation186_spill] sm:$0xff] %v10408_v63 }
 0x494   :  { %15458 = vst [vmem:[#allocation187_spill] sm:$0xff] %v10410_v45 }
 0x495   :  { %1612 = vperm.xlu0 %9035, %v945_v55   ;;  %v951_v55 = vmul.f32 %v15343_v4, %v10018_v33  ;;  %v15465_v4 = vld [vmem:[#allocation19_spill] sm:$0xff] }
 0x498   :  { %8857 = vset.pattern.permute.xlu1 %v15451_v40  ;;  %v10416_v49 = vpop.permute.xlu2 %1681 }
 0x499   :  { %15461 = vst [vmem:[#allocation188_spill] sm:$0xff] %v10416_v49 }
 0x49a   :  { %8858 = vset.pattern.permute.xlu2 %v15452_v59  ;;  %v10418_v43 = vpop.permute.xlu0 %1225  ;;  %v10420_v29 = vpop.permute.xlu1 %1642 }
 0x49b   :  { %15462 = vst [vmem:[#allocation189_spill] sm:$0xff] %v10418_v43 }
 0x49c   :  { %15463 = vst [vmem:[#allocation190_spill] sm:$0xff] %v10420_v29  ;;  %v15468_v29 = vld [vmem:[#allocation20_spill] sm:$0xff] }
 0x49d   :  { %1621 = vperm.xlu0 %9035, %v948_v58   ;;  %v954_v58 = vmul.f32 %v15348_v7, %v10018_v33  ;;  %v960_v7 = vmul.f32 %v10102_v23, %v10018_v33 }
 0x4a0   :  { %2235 = vperm.xlu1 %8857, %v15446_v24   ;;  %v10426_v45 = vpop.permute.xlu2 %1690 }
 0x4a1   :  { %15464 = vst [vmem:[#allocation191_spill] sm:$0xff] %v10426_v45  ;;  %v15472_v45 = vld [vmem:[#allocation22_spill] sm:$0xff] }
 0x4a2   :  { %2241 = vperm.xlu2 %8858, %v15446_v24   ;;  %v10431_v49 = vpop.permute.xlu0 %1234  ;;  %v10433_v37 = vpop.permute.xlu1 %1651 }
 0x4a3   :  { %15466 = vst [vmem:[#allocation192_spill] sm:$0xff] %v10431_v49 }
 0x4a4   :  { %15467 = vst [vmem:[#allocation193_spill] sm:$0xff] %v10433_v37  ;;  %v963_v37 = vmul.f32 %v15358_v39, %v10018_v33 }
 0x4a5   :  { %1630 = vperm.xlu0 %9035, %v951_v55   ;;  %v957_v55 = vmul.f32 %v15352_v10, %v10018_v33 }
 0x4a8   :  { %8859 = vset.pattern.permute.xlu1 %v15459_v13  ;;  %v10436_v34 = vpop.permute.xlu2 %1699 }
 0x4a9   :  { %15469 = vst [vmem:[#allocation194_spill] sm:$0xff] %v10436_v34  ;;  %v15474_v34 = vld [vmem:[#allocation23_spill] sm:$0xff] }
 0x4aa   :  { %8860 = vset.pattern.permute.xlu2 %v15460_v41  ;;  %v10444_v10 = vpop.permute.xlu1 %1660 }
 0x4ab   :  { %15471 = vst [vmem:[#allocation196_spill] sm:$0xff] %v10444_v10 }
 0x4ad   :  { %1639 = vperm.xlu0 %9035, %v954_v58   ;;  %v10442_v58 = vpop.permute.xlu0 %1243 }
 0x4ae   :  { %15470 = vst [vmem:[#allocation195_spill] sm:$0xff] %v10442_v58 }
 0x4b0   :  { %2253 = vperm.xlu1 %8859, %v15446_v24  }
 0x4b2   :  { %2259 = vperm.xlu2 %8860, %v15446_v24   ;;  %v10454_v23 = vpop.permute.xlu1 %1669 }
 0x4b3   :  { %15476 = vst [vmem:[#allocation199_spill] sm:$0xff] %v10454_v23  ;;  %v15481_v23 = vld [vmem:[#allocation25_spill] sm:$0xff] }
 0x4b5   :  { %1648 = vperm.xlu0 %9035, %v957_v55   ;;  %v10449_v55 = vpop.permute.xlu2 %1708  ;;  %v10452_v38 = vpop.permute.xlu0 %1252 }
 0x4b6   :  { %15473 = vst [vmem:[#allocation197_spill] sm:$0xff] %v10449_v55 }
 0x4b7   :  { %15475 = vst [vmem:[#allocation198_spill] sm:$0xff] %v10452_v38 }
 0x4b8   :  { %8861 = vset.pattern.permute.xlu1 %v15465_v4 }
 0x4ba   :  { %8862 = vset.pattern.permute.xlu2 %v15468_v29  ;;  %v10464_v55 = vpop.permute.xlu1 %1678 }
 0x4bb   :  { %15479 = vst [vmem:[#allocation202_spill] sm:$0xff] %v10464_v55 }
 0x4bd   :  { %1657 = vperm.xlu0 %9035, %v960_v7   ;;  %v966_v7 = vmul.f32 %v15363_v48, %v10018_v33  ;;  %v10460_v10 = vpop.permute.xlu2 %1717  ;;  %v10462_v39 = vpop.permute.xlu0 %1261  ;;  %v972_v48 = vmul.f32 %v15373_v26, %v10018_v33 }
 0x4be   :  { %15477 = vst [vmem:[#allocation200_spill] sm:$0xff] %v10460_v10 }
 0x4bf   :  { %15478 = vst [vmem:[#allocation201_spill] sm:$0xff] %v10462_v39 }
 0x4c0   :  { %2265 = vperm.xlu1 %8861, %v15446_v24  }
 0x4c2   :  { %2271 = vperm.xlu2 %8862, %v15446_v24   ;;  %v10477_v10 = vpop.permute.xlu1 %1687 }
 0x4c3   :  { %15484 = vst [vmem:[#allocation205_spill] sm:$0xff] %v10477_v10 }
 0x4c5   :  { %1666 = vperm.xlu0 %9035, %v963_v37   ;;  %v969_v37 = vmul.f32 %v15368_v8, %v10018_v33  ;;  %v10470_v1 = vpop.permute.xlu2 %1726  ;;  %v15486_v8 = vld [vmem:[#allocation11_spill] sm:$0xff] }
 0x4c6   :  { %15482 = vst [vmem:[#allocation203_spill] sm:$0xff] %v10470_v1 }
 0x4c8   :  { %8863 = vset.pattern.permute.xlu1 %v15472_v45 }
 0x4ca   :  { %8864 = vset.pattern.permute.xlu2 %v15474_v34  ;;  %v10488_v26 = vpop.permute.xlu1 %1696 }
 0x4cb   :  { %15488 = vst [vmem:[#allocation208_spill] sm:$0xff] %v10488_v26 }
 0x4cd   :  { %1675 = vperm.xlu0 %9035, %v966_v7   ;;  %v10475_v7 = vpop.permute.xlu0 %1270  ;;  %v10480_v55 = vpop.permute.xlu2 %1735 }
 0x4ce   :  { %15483 = vst [vmem:[#allocation204_spill] sm:$0xff] %v10475_v7 }
 0x4cf   :  { %15485 = vst [vmem:[#allocation206_spill] sm:$0xff] %v10480_v55 }
 0x4d0   :  { %2283 = vperm.xlu1 %8863, %v15446_v24  }
 0x4d2   :  { %2289 = vperm.xlu2 %8864, %v15446_v24  }
 0x4d5   :  { %1684 = vperm.xlu0 %9035, %v969_v37   ;;  %v975_v37 = vmul.f32 %v10168_v9, %v10018_v33  ;;  %v10486_v1 = vpop.permute.xlu0 %1279  ;;  %v10498_v9 = vpop.permute.xlu1 %1705 }
 0x4d6   :  { %15487 = vst [vmem:[#allocation207_spill] sm:$0xff] %v10486_v1 }
 0x4d7   :  { %15492 = vst [vmem:[#allocation210_spill] sm:$0xff] %v10498_v9 }
 0x4d8   :  { %8865 = vset.pattern.permute.xlu1 %v15480_v52 }
 0x4da   :  { %8866 = vset.pattern.permute.xlu2 %v15481_v23 }
 0x4dd   :  { %1693 = vperm.xlu0 %9035, %v972_v48   ;;  %v10493_v48 = vpop.permute.xlu2 %1744  ;;  %v10496_v55 = vpop.permute.xlu0 %1288 }
 0x4de   :  { %15490 = vst [vmem:[#allocation28_spill] sm:$0xff] %v10493_v48  ;;  %v10508_v48 = vpop.permute.xlu1 %1714 }
 0x4df   :  { %15491 = vst [vmem:[#allocation209_spill] sm:$0xff] %v10496_v55 }
 0x4e0   :  { %2295 = vperm.xlu1 %8865, %v15446_v24   ;;  %15495 = vst [vmem:[#allocation213_spill] sm:$0xff] %v10508_v48 }
 0x4e2   :  { %2301 = vperm.xlu2 %8866, %v15446_v24   ;;  %v978_v24 = vmul.f32 %v15379_v27, %v10018_v33 }
 0x4e5   :  { %1702 = vperm.xlu0 %9035, %v975_v37   ;;  %v981_v37 = vmul.f32 %v15382_v11, %v10018_v33  ;;  %v10504_v26 = vpop.permute.xlu2 %1753  ;;  %v10506_v27 = vpop.permute.xlu0 %1297  ;;  %v15497_v11 = vld [vmem:[#allocation16_spill] sm:$0xff] }
 0x4e6   :  { %15493 = vst [vmem:[#allocation211_spill] sm:$0xff] %v10504_v26  ;;  %v10521_v10 = vpop.permute.xlu1 %1723 }
 0x4e7   :  { %15494 = vst [vmem:[#allocation212_spill] sm:$0xff] %v10506_v27 }
 0x4e8   :  { %8867 = vset.pattern.permute.xlu1 %v15486_v8  ;;  %15499 = vst [vmem:[#allocation216_spill] sm:$0xff] %v10521_v10 }
 0x4ea   :  { %8868 = vset.pattern.permute.xlu2 %v15443_v19 }
 0x4ed   :  { %1711 = vperm.xlu0 %9035, %v978_v24   ;;  %v984_v24 = vmul.f32 %v15385_v36, %v10018_v33  ;;  %v10514_v9 = vpop.permute.xlu2 %1762  ;;  %v10519_v26 = vpop.permute.xlu0 %1306  ;;  %v990_v36 = vmul.f32 %v15392_v54, %v10018_v33 }
 0x4ee   :  { %15496 = vst [vmem:[#allocation214_spill] sm:$0xff] %v10514_v9 }
 0x4ef   :  { %15498 = vst [vmem:[#allocation215_spill] sm:$0xff] %v10519_v26 }
 0x4f0   :  { %2313 = vperm.xlu1 %8867, %v15489_v50  }
 0x4f2   :  { %2319 = vperm.xlu2 %8868, %v15489_v50  }
 0x4f5   :  { %1720 = vperm.xlu0 %9035, %v981_v37   ;;  %v987_v37 = vmul.f32 %v15388_v46, %v10018_v33  ;;  %v10524_v48 = vpop.permute.xlu2 %2229  ;;  %v10532_v46 = vpop.permute.xlu1 %1732 }
 0x4f6   :  { %15501 = vst [vmem:[#allocation218_spill] sm:$0xff] %v10532_v46 }
 0x4f8   :  { %8869 = vset.pattern.permute.xlu1 %v15444_v5 }
 0x4fa   :  { %8870 = vset.pattern.permute.xlu2 %v15451_v40 }
 0x4fd   :  { %1729 = vperm.xlu0 %9035, %v984_v24   ;;  %v10530_v24 = vpop.permute.xlu0 %1315  ;;  %v10534_v9 = vpop.permute.xlu2 %2241 }
 0x4fe   :  { %15500 = vst [vmem:[#allocation217_spill] sm:$0xff] %v10530_v24  ;;  %v10542_v54 = vpop.permute.xlu1 %1741 }
 0x4ff   :  { %15502 = vst [vmem:[#allocation219_spill] sm:$0xff] %v10534_v9 }
 0x500   :  { %2325 = vperm.xlu1 %8869, %v15489_v50   ;;  %15504 = vst [vmem:[#allocation221_spill] sm:$0xff] %v10542_v54  ;;  %v15509_v54 = vld [vmem:[#allocation21_spill] sm:$0xff] }
 0x502   :  { %2331 = vperm.xlu2 %8870, %v15489_v50  }
 0x505   :  { %1738 = vperm.xlu0 %9035, %v987_v37   ;;  %v993_v37 = vmul.f32 %v15395_v30, %v10018_v33  ;;  %v10540_v10 = vpop.permute.xlu0 %1324 }
 0x506   :  { %15503 = vst [vmem:[#allocation220_spill] sm:$0xff] %v10540_v10  ;;  %v15515_v10 = vld [vmem:[#allocation29_spill] sm:$0xff] }
 0x508   :  { %8871 = vset.pattern.permute.xlu1 %v15497_v11 }
 0x50a   :  { %8872 = vset.pattern.permute.xlu2 %v15459_v13 }
 0x50c   :  { %v10544_v44 = vpop.permute.xlu2 %2259 }
 0x50d   :  { %1747 = vperm.xlu0 %9035, %v990_v36   ;;  %15505 = vst [vmem:[#allocation222_spill] sm:$0xff] %v10544_v44  ;;  %v10547_v36 = vperm.slane %v15506_v28, 1  ;;  %v10555_v30 = vpop.permute.xlu0 %1333 }
 0x50e   :  { %15507 = vst [vmem:[#allocation223_spill] sm:$0xff] %v10555_v30 }
 0x50f   :  { %v2889_v46 = vmul.f32 %v10534_v9, %v10547_v36 }
 0x510   :  { %2343 = vperm.xlu1 %8871, %v15489_v50  }
 0x512   :  { %2349 = vperm.xlu2 %8872, %v15489_v50  }
 0x515   :  { %1756 = vperm.xlu0 %9035, %v993_v37   ;;  %v10557_v37 = vpop.permute.xlu1 %1750  ;;  %v10566_v20 = vpop.permute.xlu0 %1342 }
 0x516   :  { %15508 = vst [vmem:[#allocation224_spill] sm:$0xff] %v10557_v37  ;;  %v15512_v37 = vld [vmem:[#allocation120_spill] sm:$0xff] }
 0x517   :  { %15510 = vst [vmem:[#allocation225_spill] sm:$0xff] %v10566_v20  ;;  %v2900_v2 = vmul.f32 %v15512_v37, %v10547_v36 }
 0x518   :  { %8873 = vset.pattern.permute.xlu1 %v15460_v41 }
 0x51a   :  { %8874 = vset.pattern.permute.xlu2 %v15465_v4 }
 0x51c   :  { %v10553_v33 = vpop.permute.xlu2 %2271 }
 0x51d   :  { %3282 = vperm.xlu0 %9035, %v2889_v46   ;;  %v2894_v47 = vmul.f32 %v10553_v33, %v10547_v36  ;;  %v10570_v3 = vpop.permute.xlu1 %1759  ;;  %v10579_v18 = vpop.permute.xlu0 %1351 }
 0x51e   :  { %15511 = vst [vmem:[#allocation226_spill] sm:$0xff] %v10570_v3  ;;  %v15514_v3 = vld [vmem:[#allocation26_spill] sm:$0xff] }
 0x51f   :  { %15513 = vst [vmem:[#allocation120_spill] sm:$0xff] %v10579_v18 }
 0x520   :  { %2355 = vperm.xlu1 %8873, %v15489_v50  }
 0x522   :  { %2361 = vperm.xlu2 %8874, %v15489_v50  }
 0x525   :  { %3297 = vperm.xlu0 %9035, %v2894_v47   ;;  %v10576_v47 = vpop.permute.xlu1 %2223  ;;  %v10615_v20 = vpop.permute.xlu0 %1360 }
 0x526   :  { %15516 = vst [vmem:[#allocation29_spill] sm:$0xff] %v10615_v20 }
 0x528   :  { %8876 = vset.pattern.permute.xlu1 %v15509_v54 }
 0x52a   :  { %8877 = vset.pattern.permute.xlu2 %v15472_v45 }
 0x52c   :  { %v10563_v0 = vpop.permute.xlu2 %2289 }
 0x52d   :  { %v2897_v46 = vmul.f32 %v10563_v0, %v10547_v36  ;;  %v10582_v17 = vpop.permute.xlu1 %2235  ;;  %v10621_v7 = vpop.permute.xlu0 %1369 }
 0x52e   :  { %15517 = vst [vmem:[#allocation227_spill] sm:$0xff] %v10621_v7 }
 0x52f   :  { %3306 = vperm.xlu0 %9035, %v2897_v46  }
 0x530   :  { %2373 = vperm.xlu1 %8876, %v15489_v50  }
 0x532   :  { %2379 = vperm.xlu2 %8877, %v15489_v50  }
 0x535   :  { %v10586_v46 = vpop.permute.xlu1 %2253  ;;  %v10634_v39 = vpop.permute.xlu0 %1378 }
 0x536   :  { %15519 = vst [vmem:[#allocation229_spill] sm:$0xff] %v10634_v39  ;;  %v15521_v39 = vld [vmem:[#allocation46_spill] sm:$0xff] }
 0x537   :  { %3315 = vperm.xlu0 %9035, %v2900_v2   ;;  %v2915_v38 = vmul.f32 %v15521_v39, %v10547_v36 }
 0x538   :  { %8878 = vset.pattern.permute.xlu1 %v15474_v34 }
 0x53a   :  { %8879 = vset.pattern.permute.xlu2 %v15480_v52 }
 0x53c   :  { %v10601_v18 = vpop.permute.xlu2 %2301 }
 0x53d   :  { %v10590_v15 = vpop.permute.xlu1 %2265  ;;  %v10643_v55 = vpop.permute.xlu0 %1387 }
 0x53e   :  { %15520 = vst [vmem:[#allocation230_spill] sm:$0xff] %v10643_v55 }
 0x540   :  { %2385 = vperm.xlu1 %8878, %v15489_v50  }
 0x542   :  { %2391 = vperm.xlu2 %8879, %v15489_v50  }
 0x545   :  { %v10594_v2 = vpop.permute.xlu1 %2283 }
 0x548   :  { %8880 = vset.pattern.permute.xlu1 %v15514_v3 }
 0x54a   :  { %8881 = vset.pattern.permute.xlu2 %v15486_v8 }
 0x54c   :  { %v10607_v24 = vpop.permute.xlu2 %2319 }
 0x550   :  { %2403 = vperm.xlu1 %8880, %v15489_v50  }
 0x552   :  { %2409 = vperm.xlu2 %8881, %v15515_v10   ;;  %v10598_v12 = vpop.permute.xlu1 %2295 }
 0x558   :  { %8882 = vset.pattern.permute.xlu1 %v15443_v19 }
 0x55a   :  { %8883 = vset.pattern.permute.xlu2 %v15444_v5 }
 0x55c   :  { %v10617_v26 = vpop.permute.xlu2 %2331 }
 0x560   :  { %2415 = vperm.xlu1 %8882, %v15515_v10  }
 0x562   :  { %2421 = vperm.xlu2 %8883, %v15515_v10   ;;  %v10604_v50 = vpop.permute.xlu1 %2313 }
 0x568   :  { %8885 = vset.pattern.permute.xlu1 %v15452_v59 }
 0x56a   :  { %8886 = vset.pattern.permute.xlu2 %v15497_v11 }
 0x56c   :  { %v10623_v30 = vpop.permute.xlu2 %2349 }
 0x56d   :  { %15518 = vst [vmem:[#allocation228_spill] sm:$0xff] %v10623_v30 }
 0x570   :  { %2433 = vperm.xlu1 %8885, %v15515_v10  }
 0x572   :  { %v10610_v1 = vpop.permute.xlu1 %2325  ;;  %2439 = vperm.xlu2 %8886, %v15515_v10  }
 0x573   :  { %v2903_v49 = vmul.f32 %v10610_v1, %v10547_v36 }
 0x575   :  { %3324 = vperm.xlu0 %9035, %v2903_v49  }
 0x578   :  { %8887 = vset.pattern.permute.xlu1 %v15459_v13 }
 0x57a   :  { %8888 = vset.pattern.permute.xlu2 %v15460_v41 }
 0x57c   :  { %v10631_v49 = vpop.permute.xlu2 %2361 }
 0x57d   :  { %v2909_v7 = vmul.f32 %v10631_v49, %v10547_v36 }
 0x580   :  { %2445 = vperm.xlu1 %8887, %v15515_v10  }
 0x582   :  { %v10626_v27 = vpop.permute.xlu1 %2343  ;;  %2451 = vperm.xlu2 %8888, %v15515_v10  }
 0x583   :  { %v2906_v20 = vmul.f32 %v10626_v27, %v10547_v36 }
 0x585   :  { %3333 = vperm.xlu0 %9035, %v2906_v20  }
 0x588   :  { %8890 = vset.pattern.permute.xlu1 %v15468_v29 }
 0x58a   :  { %8891 = vset.pattern.permute.xlu2 %v15509_v54 }
 0x58c   :  { %v10639_v43 = vpop.permute.xlu2 %2379 }
 0x58d   :  { %3342 = vperm.xlu0 %9035, %v2909_v7   ;;  %v2912_v20 = vmul.f32 %v10639_v43, %v10547_v36  ;;  %v10651_v7 = vpop.permute.xlu0 %1396 }
 0x58e   :  { %15522 = vst [vmem:[#allocation46_spill] sm:$0xff] %v10651_v7 }
 0x590   :  { %2463 = vperm.xlu1 %8890, %v15515_v10  }
 0x592   :  { %2469 = vperm.xlu2 %8891, %v15515_v10  }
 0x595   :  { %3351 = vperm.xlu0 %9035, %v2912_v20   ;;  %v10658_v20 = vpop.permute.xlu1 %2355  ;;  %v10683_v53 = vpop.permute.xlu0 %1405 }
 0x596   :  { %15523 = vst [vmem:[#allocation231_spill] sm:$0xff] %v10658_v20 }
 0x597   :  { %15530 = vst [vmem:[#allocation236_spill] sm:$0xff] %v10683_v53 }
 0x598   :  { %8892 = vset.pattern.permute.xlu1 %v15472_v45 }
 0x59a   :  { %8893 = vset.pattern.permute.xlu2 %v15474_v34 }
 0x59c   :  { %v10669_v63 = vpop.permute.xlu2 %2391 }
 0x59d   :  { %3360 = vperm.xlu0 %9035, %v2915_v38   ;;  %v15525_v38 = vld [vmem:[#allocation30_spill] sm:$0xff]  ;;  %15527 = vst [vmem:[#allocation233_spill] sm:$0xff] %v10669_v63  ;;  %v10689_v60 = vpop.permute.xlu0 %1414 }
 0x59e   :  { %15532 = vst [vmem:[#allocation238_spill] sm:$0xff] %v10689_v60 }
 0x5a0   :  { %2475 = vperm.xlu1 %8892, %v15515_v10  }
 0x5a2   :  { %2481 = vperm.xlu2 %8893, %v15515_v10   ;;  %v10662_v55 = vpop.permute.xlu1 %2373 }
 0x5a3   :  { %15524 = vst [vmem:[#allocation232_spill] sm:$0xff] %v10662_v55 }
 0x5a5   :  { %v10702_v14 = vpop.permute.xlu0 %1423 }
 0x5a6   :  { %15536 = vst [vmem:[#allocation242_spill] sm:$0xff] %v10702_v14  ;;  %v15539_v14 = vld [vmem:[#allocation35_spill] sm:$0xff] }
 0x5a7   :  { %v2930_v25 = vmul.f32 %v15539_v14, %v10547_v36 }
 0x5a8   :  { %8894 = vset.pattern.permute.xlu1 %v15481_v23 }
 0x5aa   :  { %8895 = vset.pattern.permute.xlu2 %v15514_v3 }
 0x5ad   :  { %v10711_v22 = vpop.permute.xlu0 %1432 }
 0x5ae   :  { %15538 = vst [vmem:[#allocation244_spill] sm:$0xff] %v10711_v22 }
 0x5b0   :  { %2493 = vperm.xlu1 %8894, %v15515_v10  }
 0x5b2   :  { %2499 = vperm.xlu2 %8895, %v15515_v10   ;;  %v10666_v7 = vpop.permute.xlu1 %2385  ;;  %v10675_v10 = vpop.permute.xlu2 %2409 }
 0x5b3   :  { %15526 = vst [vmem:[#allocation30_spill] sm:$0xff] %v10666_v7 }
 0x5b8   :  { %8896 = vset.pattern.permute.xlu1 %v15486_v8 }
 0x5ba   :  { %8897 = vset.pattern.permute.xlu2 %v15443_v19 }
 0x5bc   :  { %v10685_v35 = vpop.permute.xlu2 %2421 }
 0x5bd   :  { %15531 = vst [vmem:[#allocation237_spill] sm:$0xff] %v10685_v35 }
 0x5c0   :  { %2505 = vperm.xlu1 %8896, %v15525_v38  }
 0x5c2   :  { %2511 = vperm.xlu2 %8897, %v15525_v38   ;;  %v10672_v58 = vpop.permute.xlu1 %2403 }
 0x5c3   :  { %15528 = vst [vmem:[#allocation234_spill] sm:$0xff] %v10672_v58 }
 0x5c8   :  { %8899 = vset.pattern.permute.xlu1 %v15451_v40 }
 0x5ca   :  { %8900 = vset.pattern.permute.xlu2 %v15452_v59 }
 0x5cc   :  { %v10691_v56 = vpop.permute.xlu2 %2439 }
 0x5cd   :  { %15533 = vst [vmem:[#allocation239_spill] sm:$0xff] %v10691_v56 }
 0x5d0   :  { %2523 = vperm.xlu1 %8899, %v15525_v38  }
 0x5d2   :  { %v10678_v32 = vpop.permute.xlu1 %2415  ;;  %2529 = vperm.xlu2 %8900, %v15525_v38  }
 0x5d3   :  { %15529 = vst [vmem:[#allocation235_spill] sm:$0xff] %v10678_v32  ;;  %v2918_v61 = vmul.f32 %v10678_v32, %v10547_v36 }
 0x5d5   :  { %3369 = vperm.xlu0 %9035, %v2918_v61  }
 0x5d8   :  { %8901 = vset.pattern.permute.xlu1 %v15497_v11 }
 0x5da   :  { %8902 = vset.pattern.permute.xlu2 %v15459_v13 }
 0x5dc   :  { %v10699_v61 = vpop.permute.xlu2 %2451 }
 0x5dd   :  { %15535 = vst [vmem:[#allocation241_spill] sm:$0xff] %v10699_v61  ;;  %v2924_v60 = vmul.f32 %v10699_v61, %v10547_v36 }
 0x5e0   :  { %2535 = vperm.xlu1 %8901, %v15525_v38  }
 0x5e2   :  { %v10694_v62 = vpop.permute.xlu1 %2433  ;;  %2541 = vperm.xlu2 %8902, %v15525_v38  }
 0x5e3   :  { %15534 = vst [vmem:[#allocation240_spill] sm:$0xff] %v10694_v62  ;;  %v2921_v53 = vmul.f32 %v10694_v62, %v10547_v36 }
 0x5e5   :  { %3378 = vperm.xlu0 %9035, %v2921_v53  }
 0x5e8   :  { %8904 = vset.pattern.permute.xlu1 %v15465_v4 }
 0x5ea   :  { %8905 = vset.pattern.permute.xlu2 %v15468_v29 }
 0x5ec   :  { %v10707_v16 = vpop.permute.xlu2 %2469 }
 0x5ed   :  { %3387 = vperm.xlu0 %9035, %v2924_v60   ;;  %15537 = vst [vmem:[#allocation243_spill] sm:$0xff] %v10707_v16  ;;  %v2927_v53 = vmul.f32 %v10707_v16, %v10547_v36  ;;  %v10719_v60 = vpop.permute.xlu0 %1441 }
 0x5ee   :  { %15540 = vst [vmem:[#allocation245_spill] sm:$0xff] %v10719_v60  ;;  %v15542_v60 = vld [vmem:[#allocation31_spill] sm:$0xff] }
 0x5f0   :  { %2553 = vperm.xlu1 %8904, %v15525_v38  }
 0x5f2   :  { %2559 = vperm.xlu2 %8905, %v15525_v38  }
 0x5f5   :  { %3396 = vperm.xlu0 %9035, %v2927_v53   ;;  %v10726_v53 = vpop.permute.xlu1 %2445 }
 0x5f6   :  { %15541 = vst [vmem:[#allocation246_spill] sm:$0xff] %v10726_v53 }
 0x5f8   :  { %8906 = vset.pattern.permute.xlu1 %v15509_v54 }
 0x5fa   :  { %8907 = vset.pattern.permute.xlu2 %v15472_v45 }
 0x5fc   :  { %v10737_v42 = vpop.permute.xlu2 %2481 }
 0x5fd   :  { %3405 = vperm.xlu0 %9035, %v2930_v25  }
 0x600   :  { %2565 = vperm.xlu1 %8906, %v15525_v38  }
 0x602   :  { %2571 = vperm.xlu2 %8907, %v15525_v38   ;;  %v10730_v22 = vpop.permute.xlu1 %2463 }
 0x608   :  { %8908 = vset.pattern.permute.xlu1 %v15480_v52 }
 0x60a   :  { %8909 = vset.pattern.permute.xlu2 %v15481_v23 }
 0x60c   :  { %v10743_v57 = vpop.permute.xlu2 %2499 }
 0x610   :  { %2583 = vperm.xlu1 %8908, %v15525_v38  }
 0x612   :  { %2589 = vperm.xlu2 %8909, %v15525_v38   ;;  %v10734_v25 = vpop.permute.xlu1 %2475 }
 0x618   :  { %8910 = vset.pattern.permute.xlu1 %v15514_v3 }
 0x61a   :  { %8911 = vset.pattern.permute.xlu2 %v15486_v8  ;;  %v10751_v8 = vpop.permute.xlu0 %1450 }
 0x61b   :  { %15544 = vst [vmem:[#allocation247_spill] sm:$0xff] %v10751_v8 }
 0x61c   :  { %v10753_v9 = vpop.permute.xlu2 %2511 }
 0x620   :  { %2595 = vperm.xlu1 %8910, %v15525_v38  }
 0x622   :  { %2601 = vperm.xlu2 %8911, %v15542_v60   ;;  %v10740_v51 = vpop.permute.xlu1 %2493  ;;  %v10757_v14 = vpop.permute.xlu0 %1459 }
 0x623   :  { %15545 = vst [vmem:[#allocation248_spill] sm:$0xff] %v10757_v14 }
 0x628   :  { %8913 = vset.pattern.permute.xlu1 %v15444_v5 }
 0x62a   :  { %8914 = vset.pattern.permute.xlu2 %v15451_v40 }
 0x62c   :  { %v10759_v16 = vpop.permute.xlu2 %2529 }
 0x630   :  { %2613 = vperm.xlu1 %8913, %v15542_v60  }
 0x632   :  { %v10746_v28 = vpop.permute.xlu1 %2505  ;;  %2619 = vperm.xlu2 %8914, %v15542_v60  }
 0x633   :  { %15543 = vst [vmem:[#allocation31_spill] sm:$0xff] %v10746_v28  ;;  %v2933_v38 = vmul.f32 %v10746_v28, %v10547_v36  ;;  %v10770_v28 = vpop.permute.xlu0 %1468 }
 0x634   :  { %15548 = vst [vmem:[#allocation251_spill] sm:$0xff] %v10770_v28  ;;  %v2945_v28 = vmul.f32 %v10116_v31, %v10547_v36 }
 0x635   :  { %3414 = vperm.xlu0 %9035, %v2933_v38  }
 0x638   :  { %8915 = vset.pattern.permute.xlu1 %v15452_v59 }
 0x63a   :  { %8916 = vset.pattern.permute.xlu2 %v15497_v11 }
 0x63c   :  { %v10767_v38 = vpop.permute.xlu2 %2541 }
 0x63d   :  { %15547 = vst [vmem:[#allocation250_spill] sm:$0xff] %v10767_v38  ;;  %v2939_v14 = vmul.f32 %v10767_v38, %v10547_v36 }
 0x640   :  { %2625 = vperm.xlu1 %8915, %v15542_v60  }
 0x642   :  { %v10762_v61 = vpop.permute.xlu1 %2523  ;;  %2631 = vperm.xlu2 %8916, %v15542_v60  }
 0x643   :  { %15546 = vst [vmem:[#allocation249_spill] sm:$0xff] %v10762_v61  ;;  %v2936_v8 = vmul.f32 %v10762_v61, %v10547_v36  ;;  %v10779_v61 = vpop.permute.xlu0 %1477 }
 0x644   :  { %15550 = vst [vmem:[#allocation253_spill] sm:$0xff] %v10779_v61 }
 0x645   :  { %3423 = vperm.xlu0 %9035, %v2936_v8  }
 0x648   :  { %8919 = vset.pattern.permute.xlu1 %v15460_v41 }
 0x64a   :  { %8920 = vset.pattern.permute.xlu2 %v15465_v4 }
 0x64c   :  { %v10775_v11 = vpop.permute.xlu2 %2559 }
 0x64d   :  { %3432 = vperm.xlu0 %9035, %v2939_v14   ;;  %15549 = vst [vmem:[#allocation252_spill] sm:$0xff] %v10775_v11  ;;  %v2942_v8 = vmul.f32 %v10775_v11, %v10547_v36  ;;  %v10787_v14 = vpop.permute.xlu0 %1486  ;;  %v15552_v11 = vld [vmem:[#allocation32_spill] sm:$0xff] }
 0x64e   :  { %15551 = vst [vmem:[#allocation254_spill] sm:$0xff] %v10787_v14 }
 0x650   :  { %2643 = vperm.xlu1 %8919, %v15542_v60  }
 0x652   :  { %2649 = vperm.xlu2 %8920, %v15542_v60  }
 0x655   :  { %3441 = vperm.xlu0 %9035, %v2942_v8   ;;  %v10794_v8 = vpop.permute.xlu1 %2535 }
 0x658   :  { %8921 = vset.pattern.permute.xlu1 %v15468_v29 }
 0x65a   :  { %8922 = vset.pattern.permute.xlu2 %v15509_v54 }
 0x65c   :  { %v10805_v14 = vpop.permute.xlu2 %2571 }
 0x65d   :  { %3450 = vperm.xlu0 %9035, %v2945_v28  }
 0x660   :  { %2655 = vperm.xlu1 %8921, %v15542_v60  }
 0x662   :  { %2661 = vperm.xlu2 %8922, %v15542_v60   ;;  %v10798_v61 = vpop.permute.xlu1 %2553 }
 0x668   :  { %8923 = vset.pattern.permute.xlu1 %v15474_v34 }
 0x66a   :  { %8924 = vset.pattern.permute.xlu2 %v15480_v52 }
 0x66c   :  { %v10811_v31 = vpop.permute.xlu2 %2589 }
 0x670   :  { %2673 = vperm.xlu1 %8923, %v15542_v60  }
 0x672   :  { %2679 = vperm.xlu2 %8924, %v15542_v60   ;;  %v10802_v28 = vpop.permute.xlu1 %2565 }
 0x678   :  { %8925 = vset.pattern.permute.xlu1 %v15481_v23 }
 0x67a   :  { %8926 = vset.pattern.permute.xlu2 %v15514_v3 }
 0x67c   :  { %v10821_v62 = vpop.permute.xlu2 %2601 }
 0x680   :  { %2685 = vperm.xlu1 %8925, %v15542_v60  }
 0x682   :  { %2691 = vperm.xlu2 %8926, %v15542_v60   ;;  %v10808_v54 = vpop.permute.xlu1 %2583  ;;  %v10819_v60 = vpop.permute.xlu0 %1495 }
 0x683   :  { %15554 = vst [vmem:[#allocation255_spill] sm:$0xff] %v10819_v60 }
 0x688   :  { %8928 = vset.pattern.permute.xlu1 %v15443_v19 }
 0x68a   :  { %8929 = vset.pattern.permute.xlu2 %v15444_v5  ;;  %v10825_v5 = vpop.permute.xlu0 %1504 }
 0x68b   :  { %15555 = vst [vmem:[#allocation256_spill] sm:$0xff] %v10825_v5 }
 0x68c   :  { %v10827_v19 = vpop.permute.xlu2 %2619 }
 0x690   :  { %2703 = vperm.xlu1 %8928, %v15552_v11  }
 0x692   :  { %v10814_v38 = vpop.permute.xlu1 %2595  ;;  %2709 = vperm.xlu2 %8929, %v15552_v11  }
 0x693   :  { %15553 = vst [vmem:[#allocation32_spill] sm:$0xff] %v10814_v38  ;;  %v2948_v3 = vmul.f32 %v10814_v38, %v10547_v36  ;;  %v2892_v38 = vmul.f32 %v10544_v44, %v10547_v36  ;;  %v2896_v44 = vmul.f32 %v10594_v2, %v10547_v36 }
 0x695   :  { %3459 = vperm.xlu0 %9035, %v2948_v3  }
 0x698   :  { %8930 = vset.pattern.permute.xlu1 %v15451_v40  ;;  %v10838_v40 = vpop.permute.xlu0 %1513 }
 0x699   :  { %15558 = vst [vmem:[#allocation259_spill] sm:$0xff] %v10838_v40  ;;  %v2960_v40 = vmul.f32 %v10264_v6, %v10547_v36 }
 0x69a   :  { %8931 = vset.pattern.permute.xlu2 %v15452_v59 }
 0x69c   :  { %v10835_v3 = vpop.permute.xlu2 %2631 }
 0x69d   :  { %15557 = vst [vmem:[#allocation258_spill] sm:$0xff] %v10835_v3  ;;  %v2954_v5 = vmul.f32 %v10835_v3, %v10547_v36  ;;  %v2891_v3 = vmul.f32 %v10586_v46, %v10547_v36 }
 0x6a0   :  { %2715 = vperm.xlu1 %8930, %v15552_v11  }
 0x6a2   :  { %v10830_v32 = vpop.permute.xlu1 %2613  ;;  %2721 = vperm.xlu2 %8931, %v15552_v11  }
 0x6a3   :  { %15556 = vst [vmem:[#allocation257_spill] sm:$0xff] %v10830_v32  ;;  %v2951_v60 = vmul.f32 %v10830_v32, %v10547_v36  ;;  %v10847_v32 = vpop.permute.xlu0 %1522 }
 0x6a4   :  { %15560 = vst [vmem:[#allocation261_spill] sm:$0xff] %v10847_v32 }
 0x6a5   :  { %3468 = vperm.xlu0 %9035, %v2951_v60  }
 0x6a8   :  { %8933 = vset.pattern.permute.xlu1 %v15459_v13  ;;  %v2888_v13 = vmul.f32 %v10582_v17, %v10547_v36 }
 0x6aa   :  { %8934 = vset.pattern.permute.xlu2 %v15460_v41 }
 0x6ac   :  { %v10843_v59 = vpop.permute.xlu2 %2649 }
 0x6ad   :  { %3477 = vperm.xlu0 %9035, %v2954_v5   ;;  %15559 = vst [vmem:[#allocation260_spill] sm:$0xff] %v10843_v59  ;;  %v2957_v60 = vmul.f32 %v10843_v59, %v10547_v36  ;;  %v10855_v5 = vpop.permute.xlu0 %1531 }
 0x6ae   :  { %15561 = vst [vmem:[#allocation262_spill] sm:$0xff] %v10855_v5  ;;  %v15562_v5 = vld [vmem:[#allocation110_spill] sm:$0xff] }
 0x6b0   :  { %2733 = vperm.xlu1 %8933, %v15552_v11  }
 0x6b2   :  { %2739 = vperm.xlu2 %8934, %v15552_v11  }
 0x6b5   :  { %3486 = vperm.xlu0 %9035, %v2957_v60   ;;  %v10862_v60 = vpop.permute.xlu1 %2625 }
 0x6b8   :  { %8935 = vset.pattern.permute.xlu1 %v15465_v4 }
 0x6ba   :  { %8936 = vset.pattern.permute.xlu2 %v15468_v29  ;;  %v15563_v29 = vmov 0  }
 0x6bd   :  { %3495 = vperm.xlu0 %9035, %v2960_v40  }
 0x6c0   :  { %2745 = vperm.xlu1 %8935, %v15552_v11  }
 0x6c2   :  { %2751 = vperm.xlu2 %8936, %v15552_v11   ;;  %v10866_v32 = vpop.permute.xlu1 %2643 }
 0x6c8   :  { %8937 = vset.pattern.permute.xlu1 %v15472_v45  ;;  %v10875_v45 = vpop.permute.xlu2 %2661 }
 0x6ca   :  { %8938 = vset.pattern.permute.xlu2 %v15474_v34  ;;  %v2885_v34 = vmul.f32 %v15562_v5, %v10547_v36 }
 0x6d0   :  { %2763 = vperm.xlu1 %8937, %v15552_v11   ;;  %v10887_v41 = vpop.permute.xlu2 %2679 }
 0x6d2   :  { %2769 = vperm.xlu2 %8938, %v15552_v11   ;;  %v10870_v40 = vpop.permute.xlu1 %2655 }
 0x6d8   :  { %8939 = vset.pattern.permute.xlu1 %v15480_v52  ;;  %v2886_v52 = vmul.f32 %v10576_v47, %v10547_v36 }
 0x6da   :  { %8940 = vset.pattern.permute.xlu2 %v15481_v23  ;;  %v10883_v23 = vpop.permute.xlu0 %1540 }
 0x6db   :  { %15564 = vst [vmem:[#allocation110_spill] sm:$0xff] %v10883_v23 }
 0x6e0   :  { %2775 = vperm.xlu1 %8939, %v15552_v11  }
 0x6e2   :  { %2781 = vperm.xlu2 %8940, %v15552_v11   ;;  %v10880_v4 = vpop.permute.xlu1 %2673  ;;  %v2887_v11 = vmul.f32 %v10524_v48, %v10547_v36  ;;  %v10895_v59 = vpop.permute.xlu0 %1549 }
 0x6e3   :  { %15566 = vst [vmem:[#allocation264_spill] sm:$0xff] %v10895_v59 }
 0x6e8   :  { %8942 = vset.pattern.permute.xlu1 %v15563_v29 }
 0x6e9   :  { %3270 = vperm.xlu1 %8942, %v2885_v34  }
 0x6ea   :  { %8943 = vset.pattern.permute.xlu2 %v15563_v29  ;;  %v10899_v29 = vpop.permute.xlu2 %2691 }
 0x6eb   :  { %3273 = vperm.xlu2 %8943, %v2886_v52   ;;  %v15567_v52 = vld [vmem:[#allocation114_spill] sm:$0xff] }
 0x6ec   :  { %v2890_v23 = vmul.f32 %v15567_v52, %v10547_v36 }
 0x6f1   :  { %3276 = vperm.xlu1 %8942, %v2887_v11   ;;  %v10903_v11 = vpop.permute.xlu0 %1558 }
 0x6f2   :  { %v10891_v6 = vpop.permute.xlu1 %2685  ;;  %15568 = vst [vmem:[#allocation265_spill] sm:$0xff] %v10903_v11 }
 0x6f3   :  { %15565 = vst [vmem:[#allocation263_spill] sm:$0xff] %v10891_v6  ;;  %v2963_v34 = vmul.f32 %v10891_v6, %v10547_v36  ;;  %3279 = vperm.xlu2 %8943, %v2888_v13   ;;  %v10907_v6 = vpop.permute.xlu2 %2709  ;;  %v2893_v13 = vmul.f32 %v10590_v15, %v10547_v36 }
 0x6f5   :  { %3504 = vperm.xlu0 %9035, %v2963_v34  }
 0x6f9   :  { %3285 = vperm.xlu1 %8942, %v2890_v23   ;;  %v15570_v23 = vld [vmem:[#allocation85_spill] sm:$0xff]  ;;  %v10919_v52 = vpop.permute.xlu0 %1567 }
 0x6fa   :  { %15572 = vst [vmem:[#allocation268_spill] sm:$0xff] %v10919_v52 }
 0x6fb   :  { %3288 = vperm.xlu2 %8943, %v2891_v3   ;;  %v2895_v3 = vmul.f32 %v15570_v23, %v10547_v36 }
 0x6fc   :  { %v10917_v11 = vpop.permute.xlu2 %2721 }
 0x6fd   :  { %15571 = vst [vmem:[#allocation267_spill] sm:$0xff] %v10917_v11 }
 0x701   :  { %3291 = vperm.xlu1 %8942, %v2892_v38   ;;  %v2969_v38 = vmul.f32 %v10917_v11, %v10547_v36  ;;  %v10931_v23 = vpop.permute.xlu0 %1576 }
 0x702   :  { %v10911_v34 = vpop.permute.xlu1 %2703  ;;  %15574 = vst [vmem:[#allocation270_spill] sm:$0xff] %v10931_v23 }
 0x703   :  { %15569 = vst [vmem:[#allocation266_spill] sm:$0xff] %v10911_v34  ;;  %v2966_v59 = vmul.f32 %v10911_v34, %v10547_v36  ;;  %3294 = vperm.xlu2 %8943, %v2893_v13   ;;  %v2898_v13 = vmul.f32 %v10598_v12, %v10547_v36  ;;  %v2899_v34 = vmul.f32 %v10601_v18, %v10547_v36 }
 0x705   :  { %3513 = vperm.xlu0 %9035, %v2966_v59  }
 0x709   :  { %3300 = vperm.xlu1 %8942, %v2895_v3   ;;  %v2902_v3 = vmul.f32 %v10607_v24, %v10547_v36  ;;  %v10941_v11 = vpop.permute.xlu0 %1585 }
 0x70a   :  { %15575 = vst [vmem:[#allocation271_spill] sm:$0xff] %v10941_v11 }
 0x70b   :  { %3303 = vperm.xlu2 %8943, %v2896_v44   ;;  %v2901_v44 = vmul.f32 %v10604_v50, %v10547_v36 }
 0x70c   :  { %v10927_v59 = vpop.permute.xlu2 %2739 }
 0x70d   :  { %3522 = vperm.xlu0 %9035, %v2969_v38   ;;  %15573 = vst [vmem:[#allocation269_spill] sm:$0xff] %v10927_v59  ;;  %v2972_v52 = vmul.f32 %v10927_v59, %v10547_v36  ;;  %v2975_v38 = vmul.f32 %v10340_v21, %v10547_v36  ;;  %v2908_v21 = vmul.f32 %v10658_v20, %v10547_v36 }
 0x711   :  { %3309 = vperm.xlu1 %8942, %v2898_v13   ;;  %v2904_v13 = vmul.f32 %v10617_v26, %v10547_v36  ;;  %v10947_v23 = vpop.permute.xlu0 %1594 }
 0x713   :  { %3312 = vperm.xlu2 %8943, %v2899_v34   ;;  %v15576_v34 = vld [vmem:[#allocation38_spill] sm:$0xff] }
 0x714   :  { %15577 = vst [vmem:[#allocation38_spill] sm:$0xff] %v10947_v23 }
 0x715   :  { %3531 = vperm.xlu0 %9035, %v2972_v52   ;;  %v2905_v52 = vmul.f32 %v15576_v34, %v10547_v36 }
 0x719   :  { %3318 = vperm.xlu1 %8942, %v2901_v44   ;;  %v2907_v44 = vmul.f32 %v10623_v30, %v10547_v36  ;;  %v10957_v59 = vpop.permute.xlu0 %1603 }
 0x71a   :  { %15579 = vst [vmem:[#allocation272_spill] sm:$0xff] %v10957_v59 }
 0x71b   :  { %3321 = vperm.xlu2 %8943, %v2902_v3  }
 0x71c   :  { %v10953_v3 = vpop.permute.xlu2 %2751 }
 0x71d   :  { %3540 = vperm.xlu0 %9035, %v2975_v38   ;;  %v15578_v38 = vld [vmem:[#allocation88_spill] sm:$0xff] }
 0x71e   :  { %v2910_v11 = vmul.f32 %v15578_v38, %v10547_v36 }
 0x721   :  { %3327 = vperm.xlu1 %8942, %v2904_v13   ;;  %v2911_v13 = vmul.f32 %v10662_v55, %v10547_v36  ;;  %v10971_v38 = vpop.permute.xlu0 %1612 }
 0x722   :  { %15580 = vst [vmem:[#allocation273_spill] sm:$0xff] %v10971_v38  ;;  %v2919_v38 = vmul.f32 %v10685_v35, %v10547_v36 }
 0x723   :  { %3330 = vperm.xlu2 %8943, %v2905_v52   ;;  %v10961_v52 = vpop.permute.xlu1 %2715 }
 0x729   :  { %3336 = vperm.xlu1 %8942, %v2907_v44   ;;  %v2913_v44 = vmul.f32 %v10666_v7, %v10547_v36  ;;  %v10981_v7 = vpop.permute.xlu0 %1621 }
 0x72a   :  { %15581 = vst [vmem:[#allocation274_spill] sm:$0xff] %v10981_v7  ;;  %v2923_v7 = vmul.f32 %v10726_v53, %v10547_v36 }
 0x72b   :  { %3339 = vperm.xlu2 %8943, %v2908_v21   ;;  %v2914_v21 = vmul.f32 %v10669_v63, %v10547_v36  ;;  %v10969_v20 = vpop.permute.xlu1 %2733 }
 0x72c   :  { %v10963_v23 = vpop.permute.xlu2 %2769 }
 0x731   :  { %3345 = vperm.xlu1 %8942, %v2910_v11   ;;  %v2916_v11 = vmul.f32 %v10672_v58, %v10547_v36 }
 0x733   :  { %3348 = vperm.xlu2 %8943, %v2911_v13   ;;  %v2917_v13 = vmul.f32 %v10675_v10, %v10547_v36  ;;  %v10979_v55 = vpop.permute.xlu1 %2745 }
 0x739   :  { %3354 = vperm.xlu1 %8942, %v2913_v44  }
 0x73b   :  { %3357 = vperm.xlu2 %8943, %v2914_v21   ;;  %v15583_v21 = vld [vmem:[#allocation92_spill] sm:$0xff] }
 0x73c   :  { %v10973_v59 = vpop.permute.xlu2 %2781  ;;  %v2920_v63 = vmul.f32 %v15583_v21, %v10547_v36 }
 0x741   :  { %3363 = vperm.xlu1 %8942, %v2916_v11   ;;  %v10993_v11 = vpop.permute.xlu0 %1630 }
 0x742   :  { %v10989_v30 = vpop.permute.xlu1 %2763  ;;  %15585 = vst [vmem:[#allocation277_spill] sm:$0xff] %v10993_v11  ;;  %v15589_v11 = vld [vmem:[#allocation94_spill] sm:$0xff] }
 0x743   :  { %3366 = vperm.xlu2 %8943, %v2917_v13   ;;  %v2922_v13 = vmul.f32 %v10691_v56, %v10547_v36  ;;  %v2925_v35 = vmul.f32 %v15589_v11, %v10547_v36 }
 0x745   :  { %v10983_v44 = vpop.permute.xlu2 %3273 }
 0x746   :  { %15582 = vst [vmem:[#allocation275_spill] sm:$0xff] %v10983_v44 }
 0x749   :  { %3372 = vperm.xlu1 %8942, %v2919_v38   ;;  %v11010_v56 = vpop.permute.xlu0 %1639 }
 0x74a   :  { %15590 = vst [vmem:[#allocation94_spill] sm:$0xff] %v11010_v56 }
 0x74b   :  { %3375 = vperm.xlu2 %8943, %v2920_v63   ;;  %v15588_v63 = vld [vmem:[#allocation54_spill] sm:$0xff] }
 0x74d   :  { %v10991_v58 = vpop.permute.xlu2 %3279 }
 0x74e   :  { %15584 = vst [vmem:[#allocation276_spill] sm:$0xff] %v10991_v58  ;;  %v11006_v58 = vperm.slane %v15588_v63, 1 }
 0x750   :  { %v2981_v53 = vmul.f32 %v15562_v5, %v11006_v58  ;;  %v2984_v56 = vmul.f32 %v10582_v17, %v11006_v58 }
 0x751   :  { %3381 = vperm.xlu1 %8942, %v2922_v13   ;;  %v2926_v13 = vmul.f32 %v10730_v22, %v10547_v36 }
 0x752   :  { %v10999_v44 = vpop.permute.xlu1 %2775 }
 0x753   :  { %15586 = vst [vmem:[#allocation278_spill] sm:$0xff] %v10999_v44  ;;  %v2978_v21 = vmul.f32 %v10999_v44, %v10547_v36  ;;  %3384 = vperm.xlu2 %8943, %v2923_v7  }
 0x755   :  { %v11003_v38 = vpop.permute.xlu2 %3288  ;;  %3549 = vperm.xlu0 %9035, %v2978_v21   ;;  %v2928_v21 = vmul.f32 %v10734_v25, %v10547_v36 }
 0x756   :  { %15587 = vst [vmem:[#allocation279_spill] sm:$0xff] %v11003_v38  ;;  %v2929_v38 = vmul.f32 %v10737_v42, %v10547_v36 }
 0x759   :  { %3390 = vperm.xlu1 %8942, %v2925_v35   ;;  %v11026_v35 = vpop.permute.xlu0 %1648 }
 0x75a   :  { %15593 = vst [vmem:[#allocation282_spill] sm:$0xff] %v11026_v35 }
 0x75b   :  { %v11016_v44 = vpop.permute.xlu1 %3270  ;;  %3393 = vperm.xlu2 %8943, %v2926_v13   ;;  %v2932_v13 = vmul.f32 %v10743_v57, %v10547_v36 }
 0x75c   :  { %15591 = vst [vmem:[#allocation280_spill] sm:$0xff] %v11016_v44 }
 0x75d   :  { %v11018_v7 = vpop.permute.xlu2 %3294  ;;  %3558 = vperm.xlu0 %9035, %v2981_v53   ;;  %v2931_v53 = vmul.f32 %v10740_v51, %v10547_v36 }
 0x75e   :  { %15592 = vst [vmem:[#allocation281_spill] sm:$0xff] %v11018_v7 }
 0x761   :  { %3399 = vperm.xlu1 %8942, %v2928_v21   ;;  %v2987_v21 = vmul.f32 %v10586_v46, %v11006_v58  ;;  %v11040_v17 = vpop.permute.xlu0 %1657 }
 0x762   :  { %15597 = vst [vmem:[#allocation286_spill] sm:$0xff] %v11040_v17  ;;  %v2938_v17 = vmul.f32 %v10794_v8, %v10547_v36 }
 0x763   :  { %v11028_v63 = vpop.permute.xlu1 %3276  ;;  %3402 = vperm.xlu2 %8943, %v2929_v38   ;;  %v15599_v38 = vld [vmem:[#allocation97_spill] sm:$0xff] }
 0x764   :  { %15594 = vst [vmem:[#allocation283_spill] sm:$0xff] %v11028_v63 }
 0x765   :  { %v11030_v5 = vpop.permute.xlu2 %3303  ;;  %3567 = vperm.xlu0 %9035, %v2984_v56   ;;  %v2934_v56 = vmul.f32 %v10753_v9, %v10547_v36 }
 0x766   :  { %15595 = vst [vmem:[#allocation284_spill] sm:$0xff] %v11030_v5  ;;  %v2935_v5 = vmul.f32 %v15599_v38, %v10547_v36 }
 0x769   :  { %3408 = vperm.xlu1 %8942, %v2931_v53   ;;  %v2990_v53 = vmul.f32 %v10553_v33, %v11006_v58 }
 0x76b   :  { %v11038_v7 = vpop.permute.xlu1 %3285  ;;  %3411 = vperm.xlu2 %8943, %v2932_v13   ;;  %v11054_v13 = vpop.permute.xlu0 %1666 }
 0x76c   :  { %15596 = vst [vmem:[#allocation285_spill] sm:$0xff] %v11038_v7 }
 0x76d   :  { %v11042_v35 = vpop.permute.xlu2 %3312  ;;  %3576 = vperm.xlu0 %9035, %v2987_v21   ;;  %15602 = vst [vmem:[#allocation289_spill] sm:$0xff] %v11054_v13  ;;  %v2937_v21 = vmul.f32 %v10759_v16, %v10547_v36 }
 0x76e   :  { %15598 = vst [vmem:[#allocation287_spill] sm:$0xff] %v11042_v35 }
 0x771   :  { %3417 = vperm.xlu1 %8942, %v2934_v56   ;;  %v2993_v56 = vmul.f32 %v10563_v0, %v11006_v58 }
 0x773   :  { %v11050_v63 = vpop.permute.xlu1 %3291  ;;  %3420 = vperm.xlu2 %8943, %v2935_v5   ;;  %v15605_v5 = vld [vmem:[#allocation99_spill] sm:$0xff]  ;;  %v11068_v13 = vpop.permute.xlu0 %1675 }
 0x774   :  { %15600 = vst [vmem:[#allocation97_spill] sm:$0xff] %v11050_v63 }
 0x775   :  { %v11052_v46 = vpop.permute.xlu2 %3321  ;;  %3585 = vperm.xlu0 %9035, %v2990_v53   ;;  %v2940_v53 = vmul.f32 %v15605_v5, %v10547_v36  ;;  %15606 = vst [vmem:[#allocation99_spill] sm:$0xff] %v11068_v13 }
 0x776   :  { %15601 = vst [vmem:[#allocation288_spill] sm:$0xff] %v11052_v46  ;;  %v2941_v46 = vmul.f32 %v10798_v61, %v10547_v36 }
 0x779   :  { %3426 = vperm.xlu1 %8942, %v2937_v21   ;;  %v2996_v21 = vmul.f32 %v15512_v37, %v11006_v58 }
 0x77b   :  { %v11062_v35 = vpop.permute.xlu1 %3300  ;;  %3429 = vperm.xlu2 %8943, %v2938_v17   ;;  %v2943_v17 = vmul.f32 %v10802_v28, %v10547_v36  ;;  %v11082_v13 = vpop.permute.xlu0 %1684 }
 0x77c   :  { %15603 = vst [vmem:[#allocation290_spill] sm:$0xff] %v11062_v35 }
 0x77d   :  { %v11064_v33 = vpop.permute.xlu2 %3330  ;;  %3594 = vperm.xlu0 %9035, %v2993_v56   ;;  %v2944_v56 = vmul.f32 %v10805_v14, %v10547_v36  ;;  %15609 = vst [vmem:[#allocation294_spill] sm:$0xff] %v11082_v13 }
 0x77e   :  { %15604 = vst [vmem:[#allocation291_spill] sm:$0xff] %v11064_v33 }
 0x781   :  { %3435 = vperm.xlu1 %8942, %v2940_v53   ;;  %v2999_v53 = vmul.f32 %v10610_v1, %v11006_v58 }
 0x783   :  { %v11074_v63 = vpop.permute.xlu1 %3309  ;;  %3438 = vperm.xlu2 %8943, %v2941_v46   ;;  %v2946_v46 = vmul.f32 %v10808_v54, %v10547_v36  ;;  %v11098_v1 = vpop.permute.xlu0 %1693 }
 0x784   :  { %15607 = vst [vmem:[#allocation292_spill] sm:$0xff] %v11074_v63 }
 0x785   :  { %v11076_v0 = vpop.permute.xlu2 %3339  ;;  %3603 = vperm.xlu0 %9035, %v2996_v21   ;;  %v2947_v21 = vmul.f32 %v10811_v31, %v10547_v36  ;;  %15613 = vst [vmem:[#allocation298_spill] sm:$0xff] %v11098_v1  ;;  %v2953_v1 = vmul.f32 %v10862_v60, %v10547_v36 }
 0x786   :  { %15608 = vst [vmem:[#allocation293_spill] sm:$0xff] %v11076_v0 }
 0x789   :  { %3444 = vperm.xlu1 %8942, %v2943_v17   ;;  %v3002_v17 = vmul.f32 %v10626_v27, %v11006_v58 }
 0x78b   :  { %v11086_v33 = vpop.permute.xlu1 %3318  ;;  %3447 = vperm.xlu2 %8943, %v2944_v56   ;;  %v2949_v56 = vmul.f32 %v10821_v62, %v10547_v36 }
 0x78c   :  { %15610 = vst [vmem:[#allocation295_spill] sm:$0xff] %v11086_v33 }
 0x78d   :  { %v11088_v37 = vpop.permute.xlu2 %3348  ;;  %3612 = vperm.xlu0 %9035, %v2999_v53   ;;  %v15615_v53 = vld [vmem:[#allocation102_spill] sm:$0xff] }
 0x78e   :  { %15611 = vst [vmem:[#allocation296_spill] sm:$0xff] %v11088_v37  ;;  %v2950_v37 = vmul.f32 %v15615_v53, %v10547_v36 }
 0x791   :  { %3453 = vperm.xlu1 %8942, %v2946_v46   ;;  %v3005_v46 = vmul.f32 %v10631_v49, %v11006_v58 }
 0x793   :  { %v11096_v13 = vpop.permute.xlu1 %3327  ;;  %3456 = vperm.xlu2 %8943, %v2947_v21   ;;  %v11112_v21 = vpop.permute.xlu0 %1702 }
 0x794   :  { %15612 = vst [vmem:[#allocation297_spill] sm:$0xff] %v11096_v13 }
 0x795   :  { %v11100_v0 = vpop.permute.xlu2 %3357  ;;  %3621 = vperm.xlu0 %9035, %v3002_v17   ;;  %15618 = vst [vmem:[#allocation301_spill] sm:$0xff] %v11112_v21  ;;  %v2952_v17 = vmul.f32 %v10827_v19, %v10547_v36 }
 0x796   :  { %15614 = vst [vmem:[#allocation299_spill] sm:$0xff] %v11100_v0 }
 0x799   :  { %3462 = vperm.xlu1 %8942, %v2949_v56   ;;  %v3008_v56 = vmul.f32 %v10639_v43, %v11006_v58 }
 0x79b   :  { %v11108_v33 = vpop.permute.xlu1 %3336  ;;  %3465 = vperm.xlu2 %8943, %v2950_v37   ;;  %v15621_v37 = vld [vmem:[#allocation106_spill] sm:$0xff]  ;;  %v11126_v21 = vpop.permute.xlu0 %1711 }
 0x79c   :  { %15616 = vst [vmem:[#allocation102_spill] sm:$0xff] %v11108_v33 }
 0x79d   :  { %v11110_v27 = vpop.permute.xlu2 %3366  ;;  %3630 = vperm.xlu0 %9035, %v3005_v46   ;;  %v2955_v46 = vmul.f32 %v15621_v37, %v10547_v36  ;;  %15622 = vst [vmem:[#allocation106_spill] sm:$0xff] %v11126_v21 }
 0x79e   :  { %15617 = vst [vmem:[#allocation300_spill] sm:$0xff] %v11110_v27  ;;  %v2956_v27 = vmul.f32 %v10866_v32, %v10547_v36 }
 0x7a1   :  { %3471 = vperm.xlu1 %8942, %v2952_v17   ;;  %v3011_v17 = vmul.f32 %v15521_v39, %v11006_v58 }
 0x7a3   :  { %v11120_v0 = vpop.permute.xlu1 %3345  ;;  %3474 = vperm.xlu2 %8943, %v2953_v1   ;;  %v2958_v1 = vmul.f32 %v10870_v40, %v10547_v36  ;;  %v11140_v21 = vpop.permute.xlu0 %1720 }
 0x7a4   :  { %15619 = vst [vmem:[#allocation302_spill] sm:$0xff] %v11120_v0 }
 0x7a5   :  { %v11122_v49 = vpop.permute.xlu2 %3375  ;;  %3639 = vperm.xlu0 %9035, %v3008_v56   ;;  %v2959_v56 = vmul.f32 %v10875_v45, %v10547_v36  ;;  %15625 = vst [vmem:[#allocation306_spill] sm:$0xff] %v11140_v21 }
 0x7a6   :  { %15620 = vst [vmem:[#allocation303_spill] sm:$0xff] %v11122_v49 }
 0x7a9   :  { %3480 = vperm.xlu1 %8942, %v2955_v46   ;;  %v15626_v46 = vld [vmem:[#allocation235_spill] sm:$0xff] }
 0x7aa   :  { %v3014_v49 = vmul.f32 %v15626_v46, %v11006_v58 }
 0x7ab   :  { %v11132_v33 = vpop.permute.xlu1 %3354  ;;  %3483 = vperm.xlu2 %8943, %v2956_v27   ;;  %v2961_v27 = vmul.f32 %v10880_v4, %v10547_v36  ;;  %v11156_v46 = vpop.permute.xlu0 %1729 }
 0x7ac   :  { %15623 = vst [vmem:[#allocation304_spill] sm:$0xff] %v11132_v33 }
 0x7ad   :  { %v11134_v43 = vpop.permute.xlu2 %3384  ;;  %3648 = vperm.xlu0 %9035, %v3011_v17   ;;  %v2962_v17 = vmul.f32 %v10887_v41, %v10547_v36  ;;  %15631 = vst [vmem:[#allocation308_spill] sm:$0xff] %v11156_v46  ;;  %v2968_v46 = vmul.f32 %v10961_v52, %v10547_v36 }
 0x7ae   :  { %15624 = vst [vmem:[#allocation305_spill] sm:$0xff] %v11134_v43 }
 0x7b1   :  { %3489 = vperm.xlu1 %8942, %v2958_v1   ;;  %v15629_v1 = vld [vmem:[#allocation240_spill] sm:$0xff] }
 0x7b2   :  { %v3017_v43 = vmul.f32 %v15629_v1, %v11006_v58 }
 0x7b3   :  { %v11144_v0 = vpop.permute.xlu1 %3363  ;;  %3492 = vperm.xlu2 %8943, %v2959_v56   ;;  %v15633_v56 = vld [vmem:[#allocation60_spill] sm:$0xff] }
 0x7b4   :  { %15627 = vst [vmem:[#allocation235_spill] sm:$0xff] %v11144_v0 }
 0x7b5   :  { %v11146_v39 = vpop.permute.xlu2 %3393  ;;  %3657 = vperm.xlu0 %9035, %v3014_v49   ;;  %v2964_v49 = vmul.f32 %v10899_v29, %v10547_v36 }
 0x7b6   :  { %15628 = vst [vmem:[#allocation307_spill] sm:$0xff] %v11146_v39  ;;  %v2965_v39 = vmul.f32 %v15633_v56, %v10547_v36 }
 0x7b9   :  { %3498 = vperm.xlu1 %8942, %v2961_v27   ;;  %v15634_v27 = vld [vmem:[#allocation241_spill] sm:$0xff] }
 0x7ba   :  { %v3020_v33 = vmul.f32 %v15634_v27, %v11006_v58 }
 0x7bb   :  { %v11154_v21 = vpop.permute.xlu1 %3372  ;;  %3501 = vperm.xlu2 %8943, %v2962_v17   ;;  %v11170_v17 = vpop.permute.xlu0 %1738 }
 0x7bc   :  { %15630 = vst [vmem:[#allocation240_spill] sm:$0xff] %v11154_v21 }
 0x7bd   :  { %v11158_v0 = vpop.permute.xlu2 %3402  ;;  %3666 = vperm.xlu0 %9035, %v3017_v43   ;;  %15637 = vst [vmem:[#allocation310_spill] sm:$0xff] %v11170_v17  ;;  %v2967_v43 = vmul.f32 %v10907_v6, %v10547_v36 }
 0x7be   :  { %15632 = vst [vmem:[#allocation309_spill] sm:$0xff] %v11158_v0 }
 0x7c1   :  { %3507 = vperm.xlu1 %8942, %v2964_v49   ;;  %v15638_v49 = vld [vmem:[#allocation243_spill] sm:$0xff] }
 0x7c2   :  { %v3023_v0 = vmul.f32 %v15638_v49, %v11006_v58 }
 0x7c3   :  { %v11166_v13 = vpop.permute.xlu1 %3381  ;;  %3510 = vperm.xlu2 %8943, %v2965_v39   ;;  %v11184_v17 = vpop.permute.xlu0 %1747 }
 0x7c4   :  { %15635 = vst [vmem:[#allocation60_spill] sm:$0xff] %v11166_v13 }
 0x7c5   :  { %v11168_v1 = vpop.permute.xlu2 %3411  ;;  %3675 = vperm.xlu0 %9035, %v3020_v33   ;;  %v15641_v33 = vld [vmem:[#allocation117_spill] sm:$0xff] }
 0x7c6   :  { %15636 = vst [vmem:[#allocation241_spill] sm:$0xff] %v11168_v1  ;;  %v2970_v39 = vmul.f32 %v15641_v33, %v10547_v36  ;;  %v2971_v1 = vmul.f32 %v10969_v20, %v10547_v36 }
 0x7c7   :  { %15642 = vst [vmem:[#allocation117_spill] sm:$0xff] %v11184_v17 }
 0x7c9   :  { %3516 = vperm.xlu1 %8942, %v2967_v43   ;;  %v15643_v43 = vld [vmem:[#allocation35_spill] sm:$0xff] }
 0x7ca   :  { %v3026_v13 = vmul.f32 %v15643_v43, %v11006_v58 }
 0x7cb   :  { %v11178_v21 = vpop.permute.xlu1 %3390  ;;  %3519 = vperm.xlu2 %8943, %v2968_v46   ;;  %v2974_v46 = vmul.f32 %v10953_v3, %v10547_v36  ;;  %v11198_v17 = vpop.permute.xlu0 %1756 }
 0x7cc   :  { %15639 = vst [vmem:[#allocation243_spill] sm:$0xff] %v11178_v21 }
 0x7cd   :  { %v11180_v27 = vpop.permute.xlu2 %3420  ;;  %3684 = vperm.xlu0 %9035, %v3023_v0   ;;  %v2973_v0 = vmul.f32 %v10979_v55, %v10547_v36  ;;  %15646 = vst [vmem:[#allocation313_spill] sm:$0xff] %v11198_v17 }
 0x7ce   :  { %15640 = vst [vmem:[#allocation311_spill] sm:$0xff] %v11180_v27 }
 0x7d1   :  { %3525 = vperm.xlu1 %8942, %v2970_v39   ;;  %v15647_v39 = vld [vmem:[#allocation31_spill] sm:$0xff] }
 0x7d2   :  { %v3029_v27 = vmul.f32 %v15647_v39, %v11006_v58 }
 0x7d3   :  { %v11190_v63 = vpop.permute.xlu1 %3399  ;;  %3528 = vperm.xlu2 %8943, %v2971_v1   ;;  %v2977_v1 = vmul.f32 %v10963_v23, %v10547_v36  ;;  %v11214_v39 = vpop.permute.xlu0 %3282 }
 0x7d4   :  { %15644 = vst [vmem:[#allocation35_spill] sm:$0xff] %v11190_v63 }
 0x7d5   :  { %v11192_v49 = vpop.permute.xlu2 %3429  ;;  %3693 = vperm.xlu0 %9035, %v3026_v13   ;;  %v2976_v13 = vmul.f32 %v10989_v30, %v10547_v36  ;;  %15652 = vst [vmem:[#allocation315_spill] sm:$0xff] %v11214_v39  ;;  %v15849_v39 = vld [vmem:[#allocation37_spill] sm:$0xff] }
 0x7d6   :  { %15645 = vst [vmem:[#allocation312_spill] sm:$0xff] %v11192_v49 }
 0x7d9   :  { %3534 = vperm.xlu1 %8942, %v2973_v0   ;;  %v15650_v0 = vld [vmem:[#allocation249_spill] sm:$0xff] }
 0x7da   :  { %v3032_v49 = vmul.f32 %v15650_v0, %v11006_v58 }
 0x7db   :  { %v11202_v21 = vpop.permute.xlu1 %3408  ;;  %3537 = vperm.xlu2 %8943, %v2974_v46   ;;  %v15654_v46 = vld [vmem:[#allocation122_spill] sm:$0xff] }
 0x7dc   :  { %15648 = vst [vmem:[#allocation31_spill] sm:$0xff] %v11202_v21 }
 0x7dd   :  { %v11204_v43 = vpop.permute.xlu2 %3438  ;;  %3702 = vperm.xlu0 %9035, %v3029_v27   ;;  %v2979_v27 = vmul.f32 %v10973_v59, %v10547_v36 }
 0x7de   :  { %15649 = vst [vmem:[#allocation314_spill] sm:$0xff] %v11204_v43  ;;  %v2980_v43 = vmul.f32 %v15654_v46, %v10547_v36  ;;  %v15659_v36 = vld [vmem:[#allocation252_spill] sm:$0xff] }
 0x7e1   :  { %3543 = vperm.xlu1 %8942, %v2976_v13   ;;  %v15655_v13 = vld [vmem:[#allocation250_spill] sm:$0xff] }
 0x7e2   :  { %v3035_v63 = vmul.f32 %v15655_v13, %v11006_v58 }
 0x7e3   :  { %v11212_v17 = vpop.permute.xlu1 %3417  ;;  %3546 = vperm.xlu2 %8943, %v2977_v1   ;;  %v2982_v1 = vmul.f32 %v10576_v47, %v11006_v58  ;;  %v15663_v47 = vld [vmem:[#allocation114_spill] sm:$0xff] }
 0x7e4   :  { %15651 = vst [vmem:[#allocation249_spill] sm:$0xff] %v11212_v17 }
 0x7e5   :  { %v11216_v21 = vpop.permute.xlu2 %3447  ;;  %3711 = vperm.xlu0 %9035, %v3032_v49   ;;  %v11230_v49 = vpop.permute.xlu0 %3297 }
 0x7e6   :  { %15653 = vst [vmem:[#allocation316_spill] sm:$0xff] %v11216_v21  ;;  %v2983_v21 = vmul.f32 %v10524_v48, %v11006_v58  ;;  %v15665_v48 = vld [vmem:[#allocation153_spill] sm:$0xff] }
 0x7e7   :  { %15658 = vst [vmem:[#allocation317_spill] sm:$0xff] %v11230_v49 }
 0x7e9   :  { %3552 = vperm.xlu1 %8942, %v2979_v27   ;;  %v3038_v27 = vmul.f32 %v15659_v36, %v11006_v58 }
 0x7eb   :  { %v11224_v35 = vpop.permute.xlu1 %3426  ;;  %3555 = vperm.xlu2 %8943, %v2980_v43  }
 0x7ec   :  { %15656 = vst [vmem:[#allocation122_spill] sm:$0xff] %v11224_v35 }
 0x7ed   :  { %v11226_v0 = vpop.permute.xlu2 %3456  ;;  %3720 = vperm.xlu0 %9035, %v3035_v63   ;;  %v15662_v63 = vld [vmem:[#allocation219_spill] sm:$0xff]  ;;  %v11244_v35 = vpop.permute.xlu0 %3306 }
 0x7ee   :  { %15657 = vst [vmem:[#allocation250_spill] sm:$0xff] %v11226_v0  ;;  %v2985_v43 = vmul.f32 %v15662_v63, %v11006_v58  ;;  %v2986_v0 = vmul.f32 %v15663_v47, %v11006_v58  ;;  %v2989_v63 = vmul.f32 %v10590_v15, %v11006_v58 }
 0x7ef   :  { %15664 = vst [vmem:[#allocation219_spill] sm:$0xff] %v11244_v35 }
 0x7f1   :  { %3561 = vperm.xlu1 %8942, %v2982_v1   ;;  %v3041_v1 = vmul.f32 %v15665_v48, %v11006_v58 }
 0x7f3   :  { %v11236_v17 = vpop.permute.xlu1 %3435  ;;  %3564 = vperm.xlu2 %8943, %v2983_v21   ;;  %v15668_v21 = vld [vmem:[#allocation222_spill] sm:$0xff] }
 0x7f4   :  { %15660 = vst [vmem:[#allocation252_spill] sm:$0xff] %v11236_v17 }
 0x7f5   :  { %v11238_v13 = vpop.permute.xlu2 %3465  ;;  %3729 = vperm.xlu0 %9035, %v3038_v27   ;;  %v2988_v27 = vmul.f32 %v15668_v21, %v11006_v58  ;;  %v11256_v47 = vpop.permute.xlu0 %3315  ;;  %v2992_v21 = vmul.f32 %v10594_v2, %v11006_v58 }
 0x7f6   :  { %15661 = vst [vmem:[#allocation318_spill] sm:$0xff] %v11238_v13 }
 0x7f7   :  { %15669 = vst [vmem:[#allocation222_spill] sm:$0xff] %v11256_v47 }
 0x7f9   :  { %3570 = vperm.xlu1 %8942, %v2985_v43   ;;  %v15670_v43 = vld [vmem:[#allocation32_spill] sm:$0xff] }
 0x7fa   :  { %v3044_v13 = vmul.f32 %v15670_v43, %v11006_v58 }
 0x7fb   :  { %v11248_v49 = vpop.permute.xlu1 %3444  ;;  %3573 = vperm.xlu2 %8943, %v2986_v0   ;;  %v15673_v0 = vld [vmem:[#allocation85_spill] sm:$0xff] }
 0x7fc   :  { %15666 = vst [vmem:[#allocation114_spill] sm:$0xff] %v11248_v49 }
 0x7fd   :  { %v11250_v36 = vpop.permute.xlu2 %3474  ;;  %3738 = vperm.xlu0 %9035, %v3041_v1   ;;  %v2991_v1 = vmul.f32 %v15673_v0, %v11006_v58  ;;  %v11268_v15 = vpop.permute.xlu0 %3324  ;;  %v15679_v0 = vld [vmem:[#allocation258_spill] sm:$0xff] }
 0x7fe   :  { %15667 = vst [vmem:[#allocation153_spill] sm:$0xff] %v11250_v36 }
 0x7ff   :  { %15674 = vst [vmem:[#allocation85_spill] sm:$0xff] %v11268_v15 }
 0x801   :  { %3579 = vperm.xlu1 %8942, %v2988_v27   ;;  %v15675_v27 = vld [vmem:[#allocation257_spill] sm:$0xff] }
 0x802   :  { %v3047_v36 = vmul.f32 %v15675_v27, %v11006_v58 }
 0x803   :  { %v11260_v17 = vpop.permute.xlu1 %3453  ;;  %3582 = vperm.xlu2 %8943, %v2989_v63   ;;  %v2995_v63 = vmul.f32 %v10601_v18, %v11006_v58  ;;  %v15682_v18 = vld [vmem:[#allocation260_spill] sm:$0xff] }
 0x804   :  { %15671 = vst [vmem:[#allocation32_spill] sm:$0xff] %v11260_v17 }
 0x805   :  { %v11262_v48 = vpop.permute.xlu2 %3483  ;;  %3747 = vperm.xlu0 %9035, %v3044_v13   ;;  %v2994_v13 = vmul.f32 %v10598_v12, %v11006_v58  ;;  %v11280_v2 = vpop.permute.xlu0 %3333  ;;  %v2998_v12 = vmul.f32 %v10607_v24, %v11006_v58  ;;  %v15686_v24 = vld [vmem:[#allocation34_spill] sm:$0xff] }
 0x806   :  { %15672 = vst [vmem:[#allocation319_spill] sm:$0xff] %v11262_v48 }
 0x807   :  { %15678 = vst [vmem:[#allocation321_spill] sm:$0xff] %v11280_v2 }
 0x809   :  { %3588 = vperm.xlu1 %8942, %v2991_v1   ;;  %v3050_v1 = vmul.f32 %v15679_v0, %v11006_v58 }
 0x80b   :  { %v11272_v49 = vpop.permute.xlu1 %3462  ;;  %3591 = vperm.xlu2 %8943, %v2992_v21   ;;  %v3053_v21 = vmul.f32 %v15682_v18, %v11006_v58 }
 0x80c   :  { %15676 = vst [vmem:[#allocation257_spill] sm:$0xff] %v11272_v49 }
 0x80d   :  { %v11274_v43 = vpop.permute.xlu2 %3492  ;;  %3756 = vperm.xlu0 %9035, %v3047_v36   ;;  %v2997_v36 = vmul.f32 %v10604_v50, %v11006_v58  ;;  %v11296_v0 = vpop.permute.xlu0 %3342  ;;  %v3001_v50 = vmul.f32 %v15576_v34, %v11006_v58  ;;  %v15692_v34 = vld [vmem:[#allocation263_spill] sm:$0xff] }
 0x80e   :  { %15677 = vst [vmem:[#allocation320_spill] sm:$0xff] %v11274_v43 }
 0x80f   :  { %15684 = vst [vmem:[#allocation323_spill] sm:$0xff] %v11296_v0 }
 0x811   :  { %3597 = vperm.xlu1 %8942, %v2994_v13  }
 0x813   :  { %v11284_v48 = vpop.permute.xlu1 %3471  ;;  %3600 = vperm.xlu2 %8943, %v2995_v63   ;;  %v3000_v63 = vmul.f32 %v10617_v26, %v11006_v58  ;;  %v15691_v26 = vld [vmem:[#allocation231_spill] sm:$0xff] }
 0x814   :  { %15680 = vst [vmem:[#allocation258_spill] sm:$0xff] %v11284_v48 }
 0x815   :  { %v11286_v27 = vpop.permute.xlu2 %3501  ;;  %3765 = vperm.xlu0 %9035, %v3050_v1   ;;  %v3056_v1 = vmul.f32 %v15686_v24, %v11006_v58 }
 0x816   :  { %15681 = vst [vmem:[#allocation322_spill] sm:$0xff] %v11286_v27 }
 0x819   :  { %3606 = vperm.xlu1 %8942, %v2997_v36  }
 0x81b   :  { %v11294_v13 = vpop.permute.xlu1 %3480  ;;  %3609 = vperm.xlu2 %8943, %v2998_v12   ;;  %v15689_v12 = vld [vmem:[#allocation228_spill] sm:$0xff] }
 0x81c   :  { %15683 = vst [vmem:[#allocation260_spill] sm:$0xff] %v11294_v13  ;;  %v3003_v27 = vmul.f32 %v15689_v12, %v11006_v58  ;;  %v15696_v12 = vld [vmem:[#allocation232_spill] sm:$0xff] }
 0x81d   :  { %v11298_v43 = vpop.permute.xlu2 %3510  ;;  %3774 = vperm.xlu0 %9035, %v3053_v21   ;;  %v11312_v21 = vpop.permute.xlu0 %3351 }
 0x81e   :  { %15685 = vst [vmem:[#allocation324_spill] sm:$0xff] %v11298_v43  ;;  %v3004_v43 = vmul.f32 %v15691_v26, %v11006_v58 }
 0x81f   :  { %15690 = vst [vmem:[#allocation228_spill] sm:$0xff] %v11312_v21 }
 0x821   :  { %3615 = vperm.xlu1 %8942, %v3000_v63   ;;  %v3059_v63 = vmul.f32 %v15692_v34, %v11006_v58 }
 0x823   :  { %v11306_v36 = vpop.permute.xlu1 %3489  ;;  %3618 = vperm.xlu2 %8943, %v3001_v50   ;;  %v15695_v50 = vld [vmem:[#allocation88_spill] sm:$0xff] }
 0x824   :  { %15687 = vst [vmem:[#allocation34_spill] sm:$0xff] %v11306_v36 }
 0x825   :  { %v11308_v18 = vpop.permute.xlu2 %3519  ;;  %3783 = vperm.xlu0 %9035, %v3056_v1   ;;  %v3006_v1 = vmul.f32 %v15695_v50, %v11006_v58  ;;  %v11326_v36 = vpop.permute.xlu0 %3360  ;;  %v15702_v50 = vld [vmem:[#allocation233_spill] sm:$0xff] }
 0x826   :  { %15688 = vst [vmem:[#allocation325_spill] sm:$0xff] %v11308_v18  ;;  %v3007_v18 = vmul.f32 %v15696_v12, %v11006_v58 }
 0x827   :  { %15697 = vst [vmem:[#allocation88_spill] sm:$0xff] %v11326_v36 }
 0x829   :  { %3624 = vperm.xlu1 %8942, %v3003_v27   ;;  %v15698_v27 = vld [vmem:[#allocation266_spill] sm:$0xff] }
 0x82a   :  { %v3062_v26 = vmul.f32 %v15698_v27, %v11006_v58 }
 0x82b   :  { %v11318_v13 = vpop.permute.xlu1 %3498  ;;  %3627 = vperm.xlu2 %8943, %v3004_v43   ;;  %v15701_v43 = vld [vmem:[#allocation30_spill] sm:$0xff] }
 0x82c   :  { %15693 = vst [vmem:[#allocation231_spill] sm:$0xff] %v11318_v13 }
 0x82d   :  { %v11320_v24 = vpop.permute.xlu2 %3528  ;;  %3792 = vperm.xlu0 %9035, %v3059_v63   ;;  %v3009_v63 = vmul.f32 %v15701_v43, %v11006_v58  ;;  %v11338_v13 = vpop.permute.xlu0 %3369  ;;  %v3013_v43 = vmul.f32 %v10675_v10, %v11006_v58  ;;  %v15714_v10 = vld [vmem:[#allocation175_spill] sm:$0xff] }
 0x82e   :  { %15694 = vst [vmem:[#allocation263_spill] sm:$0xff] %v11320_v24  ;;  %v3010_v24 = vmul.f32 %v15702_v50, %v11006_v58 }
 0x82f   :  { %15703 = vst [vmem:[#allocation30_spill] sm:$0xff] %v11338_v13 }
 0x831   :  { %3633 = vperm.xlu1 %8942, %v3006_v1   ;;  %v15704_v1 = vld [vmem:[#allocation267_spill] sm:$0xff] }
 0x832   :  { %v3065_v12 = vmul.f32 %v15704_v1, %v11006_v58 }
 0x833   :  { %v11330_v48 = vpop.permute.xlu1 %3507  ;;  %3636 = vperm.xlu2 %8943, %v3007_v18   ;;  %v15707_v18 = vld [vmem:[#allocation234_spill] sm:$0xff] }
 0x834   :  { %15699 = vst [vmem:[#allocation232_spill] sm:$0xff] %v11330_v48 }
 0x835   :  { %v11332_v34 = vpop.permute.xlu2 %3537  ;;  %3801 = vperm.xlu0 %9035, %v3062_v26   ;;  %v3012_v26 = vmul.f32 %v15707_v18, %v11006_v58  ;;  %v15713_v18 = vld [vmem:[#allocation92_spill] sm:$0xff] }
 0x836   :  { %15700 = vst [vmem:[#allocation266_spill] sm:$0xff] %v11332_v34  ;;  %v11350_v34 = vpop.permute.xlu0 %3378 }
 0x837   :  { %15708 = vst [vmem:[#allocation234_spill] sm:$0xff] %v11350_v34 }
 0x839   :  { %3642 = vperm.xlu1 %8942, %v3009_v63   ;;  %v15709_v63 = vld [vmem:[#allocation269_spill] sm:$0xff] }
 0x83a   :  { %v3068_v50 = vmul.f32 %v15709_v63, %v11006_v58 }
 0x83b   :  { %v11342_v49 = vpop.permute.xlu1 %3516  ;;  %3645 = vperm.xlu2 %8943, %v3010_v24   ;;  %v15712_v24 = vld [vmem:[#allocation237_spill] sm:$0xff] }
 0x83c   :  { %15705 = vst [vmem:[#allocation233_spill] sm:$0xff] %v11342_v49  ;;  %v3071_v49 = vmul.f32 %v15714_v10, %v11006_v58 }
 0x83d   :  { %v11344_v27 = vpop.permute.xlu2 %3546  ;;  %3810 = vperm.xlu0 %9035, %v3065_v12   ;;  %v3015_v12 = vmul.f32 %v15712_v24, %v11006_v58  ;;  %v15719_v24 = vld [vmem:[#allocation246_spill] sm:$0xff] }
 0x83e   :  { %15706 = vst [vmem:[#allocation267_spill] sm:$0xff] %v11344_v27  ;;  %v3016_v27 = vmul.f32 %v15713_v18, %v11006_v58 }
 0x841   :  { %3651 = vperm.xlu1 %8942, %v3012_v26   ;;  %v11364_v26 = vpop.permute.xlu0 %3387 }
 0x842   :  { %15715 = vst [vmem:[#allocation237_spill] sm:$0xff] %v11364_v26 }
 0x843   :  { %v11354_v48 = vpop.permute.xlu1 %3525  ;;  %3654 = vperm.xlu2 %8943, %v3013_v43   ;;  %v15718_v43 = vld [vmem:[#allocation239_spill] sm:$0xff] }
 0x844   :  { %15710 = vst [vmem:[#allocation269_spill] sm:$0xff] %v11354_v48 }
 0x845   :  { %v11356_v1 = vpop.permute.xlu2 %3555  ;;  %3819 = vperm.xlu0 %9035, %v3068_v50   ;;  %v3018_v50 = vmul.f32 %v15718_v43, %v11006_v58 }
 0x846   :  { %15711 = vst [vmem:[#allocation326_spill] sm:$0xff] %v11356_v1  ;;  %v3019_v1 = vmul.f32 %v15719_v24, %v11006_v58  ;;  %v3025_v24 = vmul.f32 %v10737_v42, %v11006_v58 }
 0x849   :  { %3660 = vperm.xlu1 %8942, %v3015_v12   ;;  %v15720_v12 = vld [vmem:[#allocation278_spill] sm:$0xff]  ;;  %v11378_v10 = vpop.permute.xlu0 %3396 }
 0x84a   :  { %v3074_v18 = vmul.f32 %v15720_v12, %v11006_v58  ;;  %15722 = vst [vmem:[#allocation246_spill] sm:$0xff] %v11378_v10 }
 0x84b   :  { %v11366_v17 = vpop.permute.xlu1 %3534  ;;  %3663 = vperm.xlu2 %8943, %v3016_v27   ;;  %v3022_v27 = vmul.f32 %v10730_v22, %v11006_v58  ;;  %v3027_v22 = vmul.f32 %v10740_v51, %v11006_v58  ;;  %v3033_v51 = vmul.f32 %v10759_v16, %v11006_v58 }
 0x84c   :  { %15716 = vst [vmem:[#allocation92_spill] sm:$0xff] %v11366_v17 }
 0x84d   :  { %v11368_v63 = vpop.permute.xlu2 %3564  ;;  %3828 = vperm.xlu0 %9035, %v3071_v49   ;;  %v3021_v49 = vmul.f32 %v15589_v11, %v11006_v58 }
 0x84e   :  { %15717 = vst [vmem:[#allocation175_spill] sm:$0xff] %v11368_v63 }
 0x851   :  { %3669 = vperm.xlu1 %8942, %v3018_v50  }
 0x853   :  { %v11376_v48 = vpop.permute.xlu1 %3543  ;;  %3672 = vperm.xlu2 %8943, %v3019_v1   ;;  %v3024_v1 = vmul.f32 %v10734_v25, %v11006_v58  ;;  %v3030_v25 = vmul.f32 %v10753_v9, %v11006_v58 }
 0x854   :  { %15721 = vst [vmem:[#allocation239_spill] sm:$0xff] %v11376_v48  ;;  %v15772_v48 = vld [vmem:[#allocation18_spill] sm:$0xff] }
 0x855   :  { %v11380_v17 = vpop.permute.xlu2 %3573  ;;  %3837 = vperm.xlu0 %9035, %v3074_v18   ;;  %v3028_v18 = vmul.f32 %v10743_v57, %v11006_v58  ;;  %v3034_v57 = vmul.f32 %v10794_v8, %v11006_v58  ;;  %v3039_v8 = vmul.f32 %v10802_v28, %v11006_v58  ;;  %v3045_v28 = vmul.f32 %v10821_v62, %v11006_v58 }
 0x856   :  { %15723 = vst [vmem:[#allocation278_spill] sm:$0xff] %v11380_v17 }
 0x859   :  { %3678 = vperm.xlu1 %8942, %v3021_v49  }
 0x85b   :  { %v11386_v43 = vpop.permute.xlu1 %3552  ;;  %3681 = vperm.xlu2 %8943, %v3022_v27   ;;  %v3031_v27 = vmul.f32 %v15599_v38, %v11006_v58  ;;  %v3037_v38 = vmul.f32 %v10798_v61, %v11006_v58  ;;  %v3042_v61 = vmul.f32 %v10808_v54, %v11006_v58  ;;  %v3048_v54 = vmul.f32 %v10827_v19, %v11006_v58 }
 0x85c   :  { %15724 = vst [vmem:[#allocation327_spill] sm:$0xff] %v11386_v43  ;;  %v15771_v43 = vld [vmem:[#allocation17_spill] sm:$0xff] }
 0x85d   :  { %v11388_v50 = vpop.permute.xlu2 %3582 }
 0x85e   :  { %15725 = vst [vmem:[#allocation328_spill] sm:$0xff] %v11388_v50 }
 0x861   :  { %3687 = vperm.xlu1 %8942, %v3024_v1  }
 0x863   :  { %3690 = vperm.xlu2 %8943, %v3025_v24   ;;  %v11394_v12 = vpop.permute.xlu1 %3561 }
 0x864   :  { %15726 = vst [vmem:[#allocation329_spill] sm:$0xff] %v11394_v12 }
 0x865   :  { %v11396_v11 = vpop.permute.xlu2 %3591 }
 0x866   :  { %15727 = vst [vmem:[#allocation330_spill] sm:$0xff] %v11396_v11 }
 0x869   :  { %3696 = vperm.xlu1 %8942, %v3027_v22   ;;  %v3036_v22 = vmul.f32 %v15605_v5, %v11006_v58 }
 0x86b   :  { %3699 = vperm.xlu2 %8943, %v3028_v18   ;;  %v11406_v42 = vpop.permute.xlu1 %3570 }
 0x86c   :  { %15729 = vst [vmem:[#allocation332_spill] sm:$0xff] %v11406_v42 }
 0x86d   :  { %v11402_v49 = vpop.permute.xlu2 %3600 }
 0x86e   :  { %15728 = vst [vmem:[#allocation331_spill] sm:$0xff] %v11402_v49 }
 0x871   :  { %3705 = vperm.xlu1 %8942, %v3030_v25   ;;  %v3040_v25 = vmul.f32 %v10805_v14, %v11006_v58 }
 0x873   :  { %3708 = vperm.xlu2 %8943, %v3031_v27   ;;  %v11416_v24 = vpop.permute.xlu1 %3579 }
 0x874   :  { %15731 = vst [vmem:[#allocation334_spill] sm:$0xff] %v11416_v24 }
 0x875   :  { %v11410_v1 = vpop.permute.xlu2 %3609 }
 0x876   :  { %15730 = vst [vmem:[#allocation333_spill] sm:$0xff] %v11410_v1 }
 0x879   :  { %3714 = vperm.xlu1 %8942, %v3033_v51   ;;  %v3043_v51 = vmul.f32 %v10811_v31, %v11006_v58  ;;  %v3049_v31 = vmul.f32 %v10862_v60, %v11006_v58  ;;  %v3054_v60 = vmul.f32 %v10870_v40, %v11006_v58  ;;  %v3060_v40 = vmul.f32 %v10899_v29, %v11006_v58 }
 0x87b   :  { %3717 = vperm.xlu2 %8943, %v3034_v57   ;;  %v11424_v18 = vpop.permute.xlu1 %3588 }
 0x87c   :  { %15733 = vst [vmem:[#allocation336_spill] sm:$0xff] %v11424_v18 }
 0x87d   :  { %v11418_v9 = vpop.permute.xlu2 %3618 }
 0x87e   :  { %15732 = vst [vmem:[#allocation335_spill] sm:$0xff] %v11418_v9 }
 0x881   :  { %3723 = vperm.xlu1 %8942, %v3036_v22   ;;  %v3046_v22 = vmul.f32 %v15615_v53, %v11006_v58  ;;  %v3052_v53 = vmul.f32 %v10866_v32, %v11006_v58  ;;  %v3057_v32 = vmul.f32 %v10880_v4, %v11006_v58  ;;  %v3063_v4 = vmul.f32 %v10907_v6, %v11006_v58 }
 0x883   :  { %3726 = vperm.xlu2 %8943, %v3037_v38   ;;  %v11432_v27 = vpop.permute.xlu1 %3597 }
 0x884   :  { %15735 = vst [vmem:[#allocation338_spill] sm:$0xff] %v11432_v27 }
 0x885   :  { %v11426_v16 = vpop.permute.xlu2 %3627 }
 0x886   :  { %15734 = vst [vmem:[#allocation337_spill] sm:$0xff] %v11426_v16 }
 0x889   :  { %3732 = vperm.xlu1 %8942, %v3039_v8  }
 0x88b   :  { %3735 = vperm.xlu2 %8943, %v3040_v25   ;;  %v11444_v14 = vpop.permute.xlu1 %3606  ;;  %v3051_v25 = vmul.f32 %v15621_v37, %v11006_v58 }
 0x88c   :  { %15738 = vst [vmem:[#allocation341_spill] sm:$0xff] %v11444_v14 }
 0x88d   :  { %v11434_v5 = vpop.permute.xlu2 %3636 }
 0x88e   :  { %15736 = vst [vmem:[#allocation339_spill] sm:$0xff] %v11434_v5 }
 0x891   :  { %3741 = vperm.xlu1 %8942, %v3042_v61  }
 0x893   :  { %3744 = vperm.xlu2 %8943, %v3043_v51   ;;  %v11454_v8 = vpop.permute.xlu1 %3615  ;;  %v3055_v51 = vmul.f32 %v10875_v45, %v11006_v58 }
 0x894   :  { %15740 = vst [vmem:[#allocation343_spill] sm:$0xff] %v11454_v8 }
 0x895   :  { %v11440_v57 = vpop.permute.xlu2 %3645 }
 0x896   :  { %15737 = vst [vmem:[#allocation340_spill] sm:$0xff] %v11440_v57 }
 0x899   :  { %3750 = vperm.xlu1 %8942, %v3045_v28  }
 0x89b   :  { %3753 = vperm.xlu2 %8943, %v3046_v22   ;;  %v11462_v61 = vpop.permute.xlu1 %3624  ;;  %v3058_v22 = vmul.f32 %v10887_v41, %v11006_v58  ;;  %v3064_v41 = vmul.f32 %v10961_v52, %v11006_v58  ;;  %v3069_v52 = vmul.f32 %v10979_v55, %v11006_v58  ;;  %v3075_v55 = vmul.f32 %v10973_v59, %v11006_v58 }
 0x89c   :  { %15742 = vst [vmem:[#allocation345_spill] sm:$0xff] %v11462_v61 }
 0x89d   :  { %v11448_v38 = vpop.permute.xlu2 %3654 }
 0x89e   :  { %15739 = vst [vmem:[#allocation342_spill] sm:$0xff] %v11448_v38 }
 0x8a1   :  { %3759 = vperm.xlu1 %8942, %v3048_v54  }
 0x8a3   :  { %3762 = vperm.xlu2 %8943, %v3049_v31   ;;  %v11470_v28 = vpop.permute.xlu1 %3633  ;;  %v3061_v31 = vmul.f32 %v15633_v56, %v11006_v58  ;;  %v3067_v56 = vmul.f32 %v10969_v20, %v11006_v58  ;;  %v3072_v20 = vmul.f32 %v10989_v30, %v11006_v58 }
 0x8a4   :  { %15744 = vst [vmem:[#allocation347_spill] sm:$0xff] %v11470_v28 }
 0x8a5   :  { %v11456_v62 = vpop.permute.xlu2 %3663 }
 0x8a6   :  { %15741 = vst [vmem:[#allocation344_spill] sm:$0xff] %v11456_v62 }
 0x8a9   :  { %3768 = vperm.xlu1 %8942, %v3051_v25  }
 0x8ab   :  { %3771 = vperm.xlu2 %8943, %v3052_v53   ;;  %v11482_v45 = vpop.permute.xlu1 %3642 }
 0x8ac   :  { %15747 = vst [vmem:[#allocation350_spill] sm:$0xff] %v11482_v45 }
 0x8ad   :  { %v11464_v19 = vpop.permute.xlu2 %3672 }
 0x8ae   :  { %15743 = vst [vmem:[#allocation346_spill] sm:$0xff] %v11464_v19 }
 0x8b1   :  { %3777 = vperm.xlu1 %8942, %v3054_v60   ;;  %v3066_v60 = vmul.f32 %v15641_v33, %v11006_v58 }
 0x8b3   :  { %3780 = vperm.xlu2 %8943, %v3055_v51   ;;  %v11492_v53 = vpop.permute.xlu1 %3651 }
 0x8b4   :  { %15749 = vst [vmem:[#allocation352_spill] sm:$0xff] %v11492_v53 }
 0x8b5   :  { %v11472_v37 = vpop.permute.xlu2 %3681 }
 0x8b6   :  { %15745 = vst [vmem:[#allocation348_spill] sm:$0xff] %v11472_v37 }
 0x8b9   :  { %3786 = vperm.xlu1 %8942, %v3057_v32   ;;  %v3070_v32 = vmul.f32 %v10953_v3, %v11006_v58 }
 0x8bb   :  { %3789 = vperm.xlu2 %8943, %v3058_v22   ;;  %v11500_v51 = vpop.permute.xlu1 %3660 }
 0x8bc   :  { %15751 = vst [vmem:[#allocation354_spill] sm:$0xff] %v11500_v51 }
 0x8bd   :  { %v11478_v54 = vpop.permute.xlu2 %3690 }
 0x8be   :  { %15746 = vst [vmem:[#allocation349_spill] sm:$0xff] %v11478_v54 }
 0x8c1   :  { %3795 = vperm.xlu1 %8942, %v3060_v40   ;;  %v3073_v40 = vmul.f32 %v10963_v23, %v11006_v58  ;;  %v15760_v23 = vld [vmem:[#allocation12_spill] sm:$0xff] }
 0x8c3   :  { %3798 = vperm.xlu2 %8943, %v3061_v31   ;;  %v11508_v22 = vpop.permute.xlu1 %3669 }
 0x8c4   :  { %15753 = vst [vmem:[#allocation356_spill] sm:$0xff] %v11508_v22 }
 0x8c5   :  { %v11486_v25 = vpop.permute.xlu2 %3699 }
 0x8c6   :  { %15748 = vst [vmem:[#allocation351_spill] sm:$0xff] %v11486_v25 }
 0x8c9   :  { %3804 = vperm.xlu1 %8942, %v3063_v4   ;;  %v3076_v4 = vmul.f32 %v15654_v46, %v11006_v58  ;;  %v15765_v58 = vld [vmem:[#allocation15_spill] sm:$0xff]  ;;  %v15766_v46 = vld [vmem:[#allocation13_spill] sm:$0xff] }
 0x8cb   :  { %3807 = vperm.xlu2 %8943, %v3064_v41   ;;  %v11520_v3 = vpop.permute.xlu1 %3678 }
 0x8cc   :  { %15756 = vst [vmem:[#allocation359_spill] sm:$0xff] %v11520_v3  ;;  %v15808_v3 = vld [vmem:[#allocation21_spill] sm:$0xff] }
 0x8cd   :  { %v11494_v29 = vpop.permute.xlu2 %3708 }
 0x8ce   :  { %15750 = vst [vmem:[#allocation353_spill] sm:$0xff] %v11494_v29 }
 0x8d1   :  { %3813 = vperm.xlu1 %8942, %v3066_v60   ;;  %v15759_v60 = vld [vmem:[#allocation14_spill] sm:$0xff] }
 0x8d3   :  { %3816 = vperm.xlu2 %8943, %v3067_v56   ;;  %v11526_v30 = vpop.permute.xlu1 %3687 }
 0x8d4   :  { %15758 = vst [vmem:[#allocation361_spill] sm:$0xff] %v11526_v30 }
 0x8d5   :  { %v11502_v6 = vpop.permute.xlu2 %3717 }
 0x8d6   :  { %15752 = vst [vmem:[#allocation355_spill] sm:$0xff] %v11502_v6  ;;  %v15782_v6 = vld [vmem:[#allocation23_spill] sm:$0xff] }
 0x8d9   :  { %3822 = vperm.xlu1 %8942, %v3069_v52   ;;  %v15762_v52 = vld [vmem:[#allocation93_spill] sm:$0xff] }
 0x8db   :  { %3825 = vperm.xlu2 %8943, %v3070_v32   ;;  %v11533_v59 = vpop.permute.xlu1 %3696 }
 0x8dc   :  { %15763 = vst [vmem:[#allocation12_spill] sm:$0xff] %v11533_v59 }
 0x8dd   :  { %v11510_v33 = vpop.permute.xlu2 %3726 }
 0x8de   :  { %15754 = vst [vmem:[#allocation357_spill] sm:$0xff] %v11510_v33  ;;  %v15778_v33 = vld [vmem:[#allocation20_spill] sm:$0xff] }
 0x8e1   :  { %3831 = vperm.xlu1 %8942, %v3072_v20  }
 0x8e3   :  { %3834 = vperm.xlu2 %8943, %v3073_v40   ;;  %v11540_v20 = vpop.permute.xlu1 %3705 }
 0x8e4   :  { %15767 = vst [vmem:[#allocation15_spill] sm:$0xff] %v11540_v20  ;;  %v15787_v20 = vld [vmem:[#allocation24_spill] sm:$0xff] }
 0x8e5   :  { %v11516_v31 = vpop.permute.xlu2 %3735 }
 0x8e6   :  { %15755 = vst [vmem:[#allocation358_spill] sm:$0xff] %v11516_v31 }
 0x8e9   :  { %3840 = vperm.xlu1 %8942, %v3075_v55  }
 0x8eb   :  { %3843 = vperm.xlu2 %8943, %v3076_v4   ;;  %v11546_v55 = vpop.permute.xlu1 %3714 }
 0x8ec   :  { %15769 = vst [vmem:[#allocation362_spill] sm:$0xff] %v11546_v55 }
 0x8ed   :  { %v11524_v41 = vpop.permute.xlu2 %3744 }
 0x8ee   :  { %15757 = vst [vmem:[#allocation360_spill] sm:$0xff] %v11524_v41 }
 0x8f1   :  { %8944 = vset.pattern.permute.xlu1 %v15759_v60 }
 0x8f3   :  { %8945 = vset.pattern.permute.xlu2 %v15760_v23 }
 0x8f5   :  { %v11530_v56 = vpop.permute.xlu2 %3753 }
 0x8f6   :  { %15761 = vst [vmem:[#allocation14_spill] sm:$0xff] %v11530_v56 }
 0x8f9   :  { %4271 = vperm.xlu1 %8944, %v15762_v52  }
 0x8fb   :  { %4277 = vperm.xlu2 %8945, %v15762_v52  }
 0x8fd   :  { %v11536_v32 = vpop.permute.xlu2 %3762 }
 0x8fe   :  { %15764 = vst [vmem:[#allocation93_spill] sm:$0xff] %v11536_v32  ;;  %v11552_v32 = vpop.permute.xlu1 %3723 }
 0x8ff   :  { %15773 = vst [vmem:[#allocation17_spill] sm:$0xff] %v11552_v32 }
 0x901   :  { %8946 = vset.pattern.permute.xlu1 %v15765_v58 }
 0x903   :  { %8947 = vset.pattern.permute.xlu2 %v15766_v46 }
 0x905   :  { %v11542_v40 = vpop.permute.xlu2 %3771 }
 0x906   :  { %15768 = vst [vmem:[#allocation13_spill] sm:$0xff] %v11542_v40  ;;  %v15775_v40 = vld [vmem:[#allocation19_spill] sm:$0xff]  ;;  %v11559_v41 = vpop.permute.xlu1 %3732 }
 0x907   :  { %15776 = vst [vmem:[#allocation19_spill] sm:$0xff] %v11559_v41 }
 0x909   :  { %4283 = vperm.xlu1 %8946, %v15762_v52  }
 0x90b   :  { %4289 = vperm.xlu2 %8947, %v15762_v52  }
 0x90d   :  { %v11548_v4 = vpop.permute.xlu2 %3780 }
 0x90e   :  { %15770 = vst [vmem:[#allocation363_spill] sm:$0xff] %v11548_v4  ;;  %v11566_v4 = vpop.permute.xlu1 %3741 }
 0x90f   :  { %15779 = vst [vmem:[#allocation20_spill] sm:$0xff] %v11566_v4  ;;  %v15788_v4 = vld [vmem:[#allocation25_spill] sm:$0xff] }
 0x911   :  { %8948 = vset.pattern.permute.xlu1 %v15771_v43 }
 0x913   :  { %8949 = vset.pattern.permute.xlu2 %v15772_v48 }
 0x915   :  { %v11554_v56 = vpop.permute.xlu2 %3789 }
 0x916   :  { %15774 = vst [vmem:[#allocation18_spill] sm:$0xff] %v11554_v56  ;;  %v15781_v56 = vld [vmem:[#allocation22_spill] sm:$0xff]  ;;  %v11572_v55 = vpop.permute.xlu1 %3750 }
 0x917   :  { %15783 = vst [vmem:[#allocation22_spill] sm:$0xff] %v11572_v55 }
 0x919   :  { %4301 = vperm.xlu1 %8948, %v15762_v52  }
 0x91b   :  { %4307 = vperm.xlu2 %8949, %v15762_v52  }
 0x91d   :  { %v11561_v31 = vpop.permute.xlu2 %3798 }
 0x91e   :  { %15777 = vst [vmem:[#allocation364_spill] sm:$0xff] %v11561_v31  ;;  %v11578_v31 = vpop.permute.xlu1 %3759 }
 0x91f   :  { %15785 = vst [vmem:[#allocation366_spill] sm:$0xff] %v11578_v31 }
 0x921   :  { %8950 = vset.pattern.permute.xlu1 %v15775_v40 }
 0x923   :  { %8951 = vset.pattern.permute.xlu2 %v15778_v33 }
 0x925   :  { %v11568_v32 = vpop.permute.xlu2 %3807 }
 0x926   :  { %15780 = vst [vmem:[#allocation365_spill] sm:$0xff] %v11568_v32  ;;  %v11585_v32 = vpop.permute.xlu1 %3768 }
 0x927   :  { %15789 = vst [vmem:[#allocation24_spill] sm:$0xff] %v11585_v32 }
 0x929   :  { %4313 = vperm.xlu1 %8950, %v15762_v52  }
 0x92b   :  { %4319 = vperm.xlu2 %8951, %v15762_v52  }
 0x92d   :  { %v11574_v29 = vpop.permute.xlu2 %3816 }
 0x92e   :  { %15784 = vst [vmem:[#allocation23_spill] sm:$0xff] %v11574_v29  ;;  %v15791_v29 = vld [vmem:[#allocation11_spill] sm:$0xff]  ;;  %v11592_v55 = vpop.permute.xlu1 %3777 }
 0x92f   :  { %15792 = vst [vmem:[#allocation11_spill] sm:$0xff] %v11592_v55  ;;  %v11611_v55 = vpop.permute.xlu0 %3405 }
 0x930   :  { %15799 = vst [vmem:[#allocation370_spill] sm:$0xff] %v11611_v55 }
 0x931   :  { %8952 = vset.pattern.permute.xlu1 %v15781_v56 }
 0x933   :  { %8953 = vset.pattern.permute.xlu2 %v15782_v6 }
 0x935   :  { %v11580_v41 = vpop.permute.xlu2 %3825 }
 0x936   :  { %15786 = vst [vmem:[#allocation367_spill] sm:$0xff] %v11580_v41  ;;  %v15794_v41 = vld [vmem:[#allocation40_spill] sm:$0xff]  ;;  %v11600_v54 = vpop.permute.xlu1 %3786 }
 0x937   :  { %15796 = vst [vmem:[#allocation369_spill] sm:$0xff] %v11600_v54  ;;  %v15801_v54 = vld [vmem:[#allocation16_spill] sm:$0xff]  ;;  %v11635_v37 = vpop.permute.xlu0 %3414 }
 0x938   :  { %15806 = vst [vmem:[#allocation375_spill] sm:$0xff] %v11635_v37 }
 0x939   :  { %4331 = vperm.xlu1 %8952, %v15762_v52  }
 0x93b   :  { %4337 = vperm.xlu2 %8953, %v15762_v52  }
 0x93d   :  { %v11587_v25 = vpop.permute.xlu2 %3834 }
 0x93e   :  { %15790 = vst [vmem:[#allocation25_spill] sm:$0xff] %v11587_v25  ;;  %v11613_v10 = vpop.permute.xlu1 %3795 }
 0x93f   :  { %15800 = vst [vmem:[#allocation371_spill] sm:$0xff] %v11613_v10  ;;  %v11645_v19 = vpop.permute.xlu0 %3423 }
 0x940   :  { %15809 = vst [vmem:[#allocation21_spill] sm:$0xff] %v11645_v19 }
 0x941   :  { %8954 = vset.pattern.permute.xlu1 %v15787_v20 }
 0x943   :  { %8955 = vset.pattern.permute.xlu2 %v15788_v4 }
 0x945   :  { %v11594_v31 = vpop.permute.xlu2 %3843 }
 0x946   :  { %15793 = vst [vmem:[#allocation368_spill] sm:$0xff] %v11594_v31  ;;  %v11618_v30 = vpop.permute.xlu1 %3804 }
 0x947   :  { %15802 = vst [vmem:[#allocation16_spill] sm:$0xff] %v11618_v30  ;;  %v11655_v22 = vpop.permute.xlu0 %3432 }
 0x949   :  { %4343 = vperm.xlu1 %8954, %v15762_v52  }
 0x94b   :  { %4349 = vperm.xlu2 %8955, %v15762_v52   ;;  %v15797_v52 = vld [vmem:[#allocation73_spill] sm:$0xff] }
 0x94c   :  { %v11605_v25 = vperm.slane %v15797_v52, 2 }
 0x94e   :  { %v11623_v52 = vpop.permute.xlu1 %3813 }
 0x94f   :  { %15803 = vst [vmem:[#allocation372_spill] sm:$0xff] %v11623_v52  ;;  %v11673_v62 = vpop.permute.xlu0 %3441 }
 0x951   :  { %8956 = vset.pattern.permute.xlu1 %v15791_v29 }
 0x953   :  { %8957 = vset.pattern.permute.xlu2 %v15759_v60 }
 0x955   :  { %v11598_v59 = vpop.permute.xlu2 %4277 }
 0x956   :  { %15795 = vst [vmem:[#allocation40_spill] sm:$0xff] %v11598_v59  ;;  %v11633_v30 = vpop.permute.xlu1 %3822 }
 0x957   :  { %15805 = vst [vmem:[#allocation374_spill] sm:$0xff] %v11633_v30  ;;  %v11679_v38 = vpop.permute.xlu0 %3450 }
 0x958   :  { %15817 = vst [vmem:[#allocation378_spill] sm:$0xff] %v11679_v38 }
 0x959   :  { %4361 = vperm.xlu1 %8956, %v15794_v41  }
 0x95b   :  { %4367 = vperm.xlu2 %8957, %v15794_v41  }
 0x95e   :  { %v11639_v52 = vpop.permute.xlu1 %3831 }
 0x95f   :  { %15807 = vst [vmem:[#allocation376_spill] sm:$0xff] %v11639_v52  ;;  %v15811_v52 = vld [vmem:[#allocation180_spill] sm:$0xff] }
 0x960   :  { %v4948_v37 = vmul.f32 %v15811_v52, %v11605_v25  ;;  %15812 = vst [vmem:[#allocation180_spill] sm:$0xff] %v11655_v22  ;;  %v15815_v22 = vld [vmem:[#allocation51_spill] sm:$0xff] }
 0x961   :  { %8958 = vset.pattern.permute.xlu1 %v15760_v23  ;;  %15816 = vst [vmem:[#allocation51_spill] sm:$0xff] %v11673_v62 }
 0x963   :  { %8959 = vset.pattern.permute.xlu2 %v15765_v58 }
 0x965   :  { %v11607_v32 = vpop.permute.xlu2 %4289 }
 0x966   :  { %15798 = vst [vmem:[#allocation73_spill] sm:$0xff] %v11607_v32  ;;  %v4937_v31 = vmul.f32 %v11607_v32, %v11605_v25 }
 0x968   :  { %5330 = vperm.xlu0 %9035, %v4937_v31  }
 0x969   :  { %4373 = vperm.xlu1 %8958, %v15794_v41  }
 0x96b   :  { %4379 = vperm.xlu2 %8959, %v15794_v41  }
 0x971   :  { %8960 = vset.pattern.permute.xlu1 %v15801_v54 }
 0x973   :  { %8961 = vset.pattern.permute.xlu2 %v15771_v43 }
 0x975   :  { %v11625_v55 = vpop.permute.xlu2 %4307 }
 0x976   :  { %15804 = vst [vmem:[#allocation373_spill] sm:$0xff] %v11625_v55 }
 0x979   :  { %4391 = vperm.xlu1 %8960, %v15794_v41  }
 0x97b   :  { %4397 = vperm.xlu2 %8961, %v15794_v41  }
 0x981   :  { %8962 = vset.pattern.permute.xlu1 %v15772_v48 }
 0x983   :  { %8963 = vset.pattern.permute.xlu2 %v15775_v40 }
 0x985   :  { %v11629_v31 = vpop.permute.xlu2 %4319 }
 0x986   :  { %v4942_v10 = vmul.f32 %v11629_v31, %v11605_v25 }
 0x988   :  { %5345 = vperm.xlu0 %9035, %v4942_v10   ;;  %v11650_v10 = vpop.permute.xlu1 %3840 }
 0x989   :  { %4403 = vperm.xlu1 %8962, %v15794_v41   ;;  %15810 = vst [vmem:[#allocation377_spill] sm:$0xff] %v11650_v10  ;;  %v15813_v10 = vld [vmem:[#allocation26_spill] sm:$0xff] }
 0x98b   :  { %4409 = vperm.xlu2 %8963, %v15794_v41  }
 0x990   :  { %v11658_v34 = vpop.permute.xlu1 %4271 }
 0x991   :  { %8966 = vset.pattern.permute.xlu1 %v15808_v3 }
 0x993   :  { %8967 = vset.pattern.permute.xlu2 %v15781_v56 }
 0x995   :  { %v11643_v26 = vpop.permute.xlu2 %4337 }
 0x996   :  { %v4945_v30 = vmul.f32 %v11643_v26, %v11605_v25 }
 0x998   :  { %5354 = vperm.xlu0 %9035, %v4945_v30   ;;  %v11662_v30 = vpop.permute.xlu1 %4283 }
 0x999   :  { %4421 = vperm.xlu1 %8966, %v15794_v41  }
 0x99b   :  { %4427 = vperm.xlu2 %8967, %v15794_v41  }
 0x9a0   :  { %5363 = vperm.xlu0 %9035, %v4948_v37   ;;  %v11666_v19 = vpop.permute.xlu1 %4301 }
 0x9a1   :  { %8968 = vset.pattern.permute.xlu1 %v15782_v6 }
 0x9a3   :  { %8969 = vset.pattern.permute.xlu2 %v15787_v20 }
 0x9a5   :  { %v11687_v36 = vpop.permute.xlu2 %4349 }
 0x9a6   :  { %15819 = vst [vmem:[#allocation380_spill] sm:$0xff] %v11687_v36 }
 0x9a8   :  { %v11670_v37 = vpop.permute.xlu1 %4313 }
 0x9a9   :  { %4433 = vperm.xlu1 %8968, %v15794_v41   ;;  %15814 = vst [vmem:[#allocation26_spill] sm:$0xff] %v11670_v37 }
 0x9ab   :  { %4439 = vperm.xlu2 %8969, %v15794_v41  }
 0x9b0   :  { %v11676_v51 = vpop.permute.xlu1 %4331 }
 0x9b1   :  { %8970 = vset.pattern.permute.xlu1 %v15813_v10 }
 0x9b3   :  { %8971 = vset.pattern.permute.xlu2 %v15791_v29 }
 0x9b5   :  { %v11695_v57 = vpop.permute.xlu2 %4367 }
 0x9b9   :  { %4451 = vperm.xlu1 %8970, %v15794_v41   ;;  %v11685_v41 = vpop.permute.xlu0 %3459 }
 0x9ba   :  { %15818 = vst [vmem:[#allocation379_spill] sm:$0xff] %v11685_v41 }
 0x9bb   :  { %4457 = vperm.xlu2 %8971, %v15815_v22   ;;  %v11682_v13 = vpop.permute.xlu1 %4343 }
 0x9c1   :  { %8972 = vset.pattern.permute.xlu1 %v15759_v60  ;;  %v11693_v53 = vpop.permute.xlu0 %3468 }
 0x9c2   :  { %15820 = vst [vmem:[#allocation381_spill] sm:$0xff] %v11693_v53 }
 0x9c3   :  { %8973 = vset.pattern.permute.xlu2 %v15760_v23 }
 0x9c5   :  { %v11703_v21 = vpop.permute.xlu2 %4379 }
 0x9c6   :  { %15821 = vst [vmem:[#allocation382_spill] sm:$0xff] %v11703_v21 }
 0x9c9   :  { %4463 = vperm.xlu1 %8972, %v15815_v22   ;;  %v11706_v45 = vpop.permute.xlu0 %3477 }
 0x9ca   :  { %15822 = vst [vmem:[#allocation383_spill] sm:$0xff] %v11706_v45 }
 0x9cb   :  { %4469 = vperm.xlu2 %8973, %v15815_v22   ;;  %v11690_v62 = vpop.permute.xlu1 %4361 }
 0x9d1   :  { %8975 = vset.pattern.permute.xlu1 %v15766_v46 }
 0x9d3   :  { %8976 = vset.pattern.permute.xlu2 %v15801_v54 }
 0x9d5   :  { %v11709_v53 = vpop.permute.xlu2 %4397 }
 0x9d6   :  { %15823 = vst [vmem:[#allocation384_spill] sm:$0xff] %v11709_v53 }
 0x9d9   :  { %4481 = vperm.xlu1 %8975, %v15815_v22  }
 0x9db   :  { %v11698_v38 = vpop.permute.xlu1 %4373  ;;  %4487 = vperm.xlu2 %8976, %v15815_v22  }
 0x9dc   :  { %v4951_v41 = vmul.f32 %v11698_v38, %v11605_v25 }
 0x9de   :  { %5372 = vperm.xlu0 %9035, %v4951_v41   ;;  %v11717_v41 = vpop.permute.xlu0 %3486 }
 0x9df   :  { %15824 = vst [vmem:[#allocation385_spill] sm:$0xff] %v11717_v41 }
 0x9e1   :  { %8977 = vset.pattern.permute.xlu1 %v15771_v43 }
 0x9e3   :  { %8978 = vset.pattern.permute.xlu2 %v15772_v48 }
 0x9e5   :  { %v11719_v28 = vpop.permute.xlu2 %4409 }
 0x9e6   :  { %v4957_v45 = vmul.f32 %v11719_v28, %v11605_v25  ;;  %v11725_v16 = vpop.permute.xlu0 %3495 }
 0x9e7   :  { %15825 = vst [vmem:[#allocation386_spill] sm:$0xff] %v11725_v16 }
 0x9e9   :  { %4493 = vperm.xlu1 %8977, %v15815_v22  }
 0x9eb   :  { %v11712_v5 = vpop.permute.xlu1 %4391  ;;  %4499 = vperm.xlu2 %8978, %v15815_v22  }
 0x9ec   :  { %v4954_v0 = vmul.f32 %v11712_v5, %v11605_v25 }
 0x9ee   :  { %5381 = vperm.xlu0 %9035, %v4954_v0   ;;  %v11733_v41 = vpop.permute.xlu0 %3504 }
 0x9ef   :  { %15826 = vst [vmem:[#allocation387_spill] sm:$0xff] %v11733_v41 }
 0x9f1   :  { %8981 = vset.pattern.permute.xlu1 %v15778_v33 }
 0x9f3   :  { %8982 = vset.pattern.permute.xlu2 %v15808_v3 }
 0x9f5   :  { %v11727_v2 = vpop.permute.xlu2 %4427 }
 0x9f6   :  { %5390 = vperm.xlu0 %9035, %v4957_v45   ;;  %v4960_v0 = vmul.f32 %v11727_v2, %v11605_v25  ;;  %v15827_v45 = vld [vmem:[#allocation136_spill] sm:$0xff]  ;;  %v11739_v16 = vpop.permute.xlu0 %3513 }
 0x9f7   :  { %v4963_v61 = vmul.f32 %v15827_v45, %v11605_v25  ;;  %15828 = vst [vmem:[#allocation136_spill] sm:$0xff] %v11739_v16 }
 0x9f9   :  { %4511 = vperm.xlu1 %8981, %v15815_v22  }
 0x9fb   :  { %4517 = vperm.xlu2 %8982, %v15815_v22   ;;  %v11750_v41 = vpop.permute.xlu1 %4403 }
 0x9fc   :  { %15831 = vst [vmem:[#allocation390_spill] sm:$0xff] %v11750_v41 }
 0x9fe   :  { %5399 = vperm.xlu0 %9035, %v4960_v0   ;;  %v11743_v9 = vpop.permute.xlu0 %3522 }
 0x9ff   :  { %15829 = vst [vmem:[#allocation388_spill] sm:$0xff] %v11743_v9  ;;  %v15834_v9 = vld [vmem:[#allocation62_spill] sm:$0xff] }
 0xa01   :  { %8983 = vset.pattern.permute.xlu1 %v15781_v56 }
 0xa03   :  { %8984 = vset.pattern.permute.xlu2 %v15782_v6 }
 0xa06   :  { %5408 = vperm.xlu0 %9035, %v4963_v61   ;;  %v11748_v0 = vpop.permute.xlu0 %3531 }
 0xa07   :  { %15830 = vst [vmem:[#allocation389_spill] sm:$0xff] %v11748_v0  ;;  %v11765_v0 = vpop.permute.xlu2 %4439 }
 0xa08   :  { %15837 = vst [vmem:[#allocation394_spill] sm:$0xff] %v11765_v0 }
 0xa09   :  { %4523 = vperm.xlu1 %8983, %v15815_v22  }
 0xa0b   :  { %4529 = vperm.xlu2 %8984, %v15815_v22   ;;  %v11754_v61 = vpop.permute.xlu1 %4421 }
 0xa0c   :  { %15832 = vst [vmem:[#allocation391_spill] sm:$0xff] %v11754_v61 }
 0xa0e   :  { %v11757_v16 = vpop.permute.xlu0 %3540 }
 0xa0f   :  { %15833 = vst [vmem:[#allocation392_spill] sm:$0xff] %v11757_v16 }
 0xa11   :  { %8985 = vset.pattern.permute.xlu1 %v15788_v4 }
 0xa13   :  { %8986 = vset.pattern.permute.xlu2 %v15813_v10 }
 0xa15   :  { %v11773_v14 = vpop.permute.xlu2 %4457 }
 0xa16   :  { %v11763_v8 = vpop.permute.xlu0 %3549  ;;  %15840 = vst [vmem:[#allocation397_spill] sm:$0xff] %v11773_v14 }
 0xa17   :  { %15836 = vst [vmem:[#allocation393_spill] sm:$0xff] %v11763_v8 }
 0xa19   :  { %4541 = vperm.xlu1 %8985, %v15815_v22  }
 0xa1b   :  { %4547 = vperm.xlu2 %8986, %v15815_v22   ;;  %v11760_v15 = vpop.permute.xlu1 %4433 }
 0xa1c   :  { %15835 = vst [vmem:[#allocation62_spill] sm:$0xff] %v11760_v15 }
 0xa1e   :  { %v11771_v1 = vpop.permute.xlu0 %3558 }
 0xa1f   :  { %15839 = vst [vmem:[#allocation396_spill] sm:$0xff] %v11771_v1 }
 0xa21   :  { %8987 = vset.pattern.permute.xlu1 %v15791_v29 }
 0xa23   :  { %8988 = vset.pattern.permute.xlu2 %v15759_v60 }
 0xa25   :  { %v11783_v49 = vpop.permute.xlu2 %4469 }
 0xa26   :  { %v11781_v47 = vpop.permute.xlu0 %3567  ;;  %15842 = vst [vmem:[#allocation399_spill] sm:$0xff] %v11783_v49 }
 0xa27   :  { %15841 = vst [vmem:[#allocation398_spill] sm:$0xff] %v11781_v47  ;;  %v15857_v47 = vld [vmem:[#allocation79_spill] sm:$0xff] }
 0xa29   :  { %4553 = vperm.xlu1 %8987, %v15834_v9  }
 0xa2b   :  { %4559 = vperm.xlu2 %8988, %v15834_v9   ;;  %v11768_v22 = vpop.permute.xlu1 %4451 }
 0xa2c   :  { %15838 = vst [vmem:[#allocation395_spill] sm:$0xff] %v11768_v22 }
 0xa2e   :  { %v11790_v27 = vpop.permute.xlu0 %3576 }
 0xa2f   :  { %15844 = vst [vmem:[#allocation401_spill] sm:$0xff] %v11790_v27 }
 0xa31   :  { %8990 = vset.pattern.permute.xlu1 %v15765_v58 }
 0xa33   :  { %8991 = vset.pattern.permute.xlu2 %v15766_v46 }
 0xa35   :  { %v11787_v35 = vpop.permute.xlu2 %4487 }
 0xa36   :  { %15843 = vst [vmem:[#allocation400_spill] sm:$0xff] %v11787_v35  ;;  %v11803_v24 = vpop.permute.xlu0 %3585 }
 0xa37   :  { %15846 = vst [vmem:[#allocation403_spill] sm:$0xff] %v11803_v24  ;;  %v4978_v24 = vmul.f32 %v15849_v39, %v11605_v25 }
 0xa39   :  { %4571 = vperm.xlu1 %8990, %v15834_v9  }
 0xa3b   :  { %v11776_v16 = vpop.permute.xlu1 %4463  ;;  %4577 = vperm.xlu2 %8991, %v15834_v9  }
 0xa3c   :  { %v4966_v8 = vmul.f32 %v11776_v16, %v11605_v25 }
 0xa3e   :  { %5417 = vperm.xlu0 %9035, %v4966_v8   ;;  %v11811_v17 = vpop.permute.xlu0 %3594 }
 0xa3f   :  { %15848 = vst [vmem:[#allocation405_spill] sm:$0xff] %v11811_v17 }
 0xa41   :  { %8992 = vset.pattern.permute.xlu1 %v15801_v54 }
 0xa43   :  { %8993 = vset.pattern.permute.xlu2 %v15771_v43 }
 0xa45   :  { %v11797_v18 = vpop.permute.xlu2 %4499 }
 0xa46   :  { %15845 = vst [vmem:[#allocation402_spill] sm:$0xff] %v11797_v18  ;;  %v4972_v50 = vmul.f32 %v11797_v18, %v11605_v25 }
 0xa49   :  { %4583 = vperm.xlu1 %8992, %v15834_v9  }
 0xa4b   :  { %v11792_v11 = vpop.permute.xlu1 %4481  ;;  %4589 = vperm.xlu2 %8993, %v15834_v9  }
 0xa4c   :  { %v4969_v8 = vmul.f32 %v11792_v11, %v11605_v25 }
 0xa4e   :  { %5426 = vperm.xlu0 %9035, %v4969_v8  }
 0xa51   :  { %8996 = vset.pattern.permute.xlu1 %v15775_v40 }
 0xa53   :  { %8997 = vset.pattern.permute.xlu2 %v15778_v33 }
 0xa55   :  { %v11805_v27 = vpop.permute.xlu2 %4517 }
 0xa56   :  { %5435 = vperm.xlu0 %9035, %v4972_v50   ;;  %15847 = vst [vmem:[#allocation404_spill] sm:$0xff] %v11805_v27  ;;  %v4975_v8 = vmul.f32 %v11805_v27, %v11605_v25  ;;  %v11817_v50 = vpop.permute.xlu0 %3603 }
 0xa57   :  { %15850 = vst [vmem:[#allocation406_spill] sm:$0xff] %v11817_v50 }
 0xa59   :  { %4601 = vperm.xlu1 %8996, %v15834_v9  }
 0xa5b   :  { %4607 = vperm.xlu2 %8997, %v15834_v9  }
 0xa5e   :  { %5444 = vperm.xlu0 %9035, %v4975_v8   ;;  %v11822_v7 = vpop.permute.xlu0 %3612  ;;  %v11826_v8 = vpop.permute.xlu1 %4493 }
 0xa5f   :  { %15851 = vst [vmem:[#allocation407_spill] sm:$0xff] %v11822_v7 }
 0xa60   :  { %15852 = vst [vmem:[#allocation408_spill] sm:$0xff] %v11826_v8 }
 0xa61   :  { %8998 = vset.pattern.permute.xlu1 %v15808_v3 }
 0xa63   :  { %8999 = vset.pattern.permute.xlu2 %v15781_v56 }
 0xa65   :  { %v11843_v63 = vpop.permute.xlu2 %4529 }
 0xa66   :  { %5453 = vperm.xlu0 %9035, %v4978_v24   ;;  %v11829_v17 = vpop.permute.xlu0 %3621  ;;  %15859 = vst [vmem:[#allocation413_spill] sm:$0xff] %v11843_v63 }
 0xa67   :  { %15853 = vst [vmem:[#allocation409_spill] sm:$0xff] %v11829_v17 }
 0xa69   :  { %4613 = vperm.xlu1 %8998, %v15834_v9  }
 0xa6b   :  { %4619 = vperm.xlu2 %8999, %v15834_v9   ;;  %v11832_v24 = vpop.permute.xlu1 %4511 }
 0xa6c   :  { %15854 = vst [vmem:[#allocation410_spill] sm:$0xff] %v11832_v24 }
 0xa6e   :  { %v11835_v50 = vpop.permute.xlu0 %3630 }
 0xa6f   :  { %15855 = vst [vmem:[#allocation411_spill] sm:$0xff] %v11835_v50 }
 0xa71   :  { %9000 = vset.pattern.permute.xlu1 %v15787_v20 }
 0xa73   :  { %9001 = vset.pattern.permute.xlu2 %v15788_v4 }
 0xa75   :  { %v11849_v1 = vpop.permute.xlu2 %4547 }
 0xa76   :  { %v11841_v42 = vpop.permute.xlu0 %3639  ;;  %15861 = vst [vmem:[#allocation415_spill] sm:$0xff] %v11849_v1 }
 0xa77   :  { %15858 = vst [vmem:[#allocation79_spill] sm:$0xff] %v11841_v42 }
 0xa79   :  { %4631 = vperm.xlu1 %9000, %v15834_v9  }
 0xa7b   :  { %4637 = vperm.xlu2 %9001, %v15834_v9   ;;  %v11838_v7 = vpop.permute.xlu1 %4523 }
 0xa7c   :  { %15856 = vst [vmem:[#allocation412_spill] sm:$0xff] %v11838_v7 }
 0xa81   :  { %9002 = vset.pattern.permute.xlu1 %v15813_v10 }
 0xa83   :  { %9003 = vset.pattern.permute.xlu2 %v15791_v29  ;;  %v11852_v29 = vpop.permute.xlu0 %3648 }
 0xa84   :  { %15862 = vst [vmem:[#allocation416_spill] sm:$0xff] %v11852_v29 }
 0xa85   :  { %v11859_v50 = vpop.permute.xlu2 %4559 }
 0xa86   :  { %15864 = vst [vmem:[#allocation418_spill] sm:$0xff] %v11859_v50 }
 0xa89   :  { %4643 = vperm.xlu1 %9002, %v15834_v9  }
 0xa8b   :  { %4649 = vperm.xlu2 %9003, %v15857_v47   ;;  %v11846_v17 = vpop.permute.xlu1 %4541  ;;  %v11863_v44 = vpop.permute.xlu0 %3657 }
 0xa8c   :  { %15860 = vst [vmem:[#allocation414_spill] sm:$0xff] %v11846_v17 }
 0xa8d   :  { %15865 = vst [vmem:[#allocation419_spill] sm:$0xff] %v11863_v44 }
 0xa91   :  { %9005 = vset.pattern.permute.xlu1 %v15760_v23 }
 0xa93   :  { %9006 = vset.pattern.permute.xlu2 %v15765_v58 }
 0xa95   :  { %v11865_v12 = vpop.permute.xlu2 %4577 }
 0xa96   :  { %15866 = vst [vmem:[#allocation420_spill] sm:$0xff] %v11865_v12 }
 0xa99   :  { %4661 = vperm.xlu1 %9005, %v15857_v47  }
 0xa9b   :  { %v11854_v9 = vpop.permute.xlu1 %4553  ;;  %4667 = vperm.xlu2 %9006, %v15857_v47  }
 0xa9c   :  { %15863 = vst [vmem:[#allocation417_spill] sm:$0xff] %v11854_v9  ;;  %v4981_v42 = vmul.f32 %v11854_v9, %v11605_v25 }
 0xa9e   :  { %5462 = vperm.xlu0 %9035, %v4981_v42   ;;  %v11873_v42 = vpop.permute.xlu0 %3666 }
 0xa9f   :  { %15868 = vst [vmem:[#allocation422_spill] sm:$0xff] %v11873_v42 }
 0xaa1   :  { %9007 = vset.pattern.permute.xlu1 %v15766_v46 }
 0xaa3   :  { %9008 = vset.pattern.permute.xlu2 %v15801_v54 }
 0xaa5   :  { %v11875_v9 = vpop.permute.xlu2 %4589 }
 0xaa6   :  { %15869 = vst [vmem:[#allocation423_spill] sm:$0xff] %v11875_v9  ;;  %v4987_v54 = vmul.f32 %v11875_v9, %v11605_v25  ;;  %v11881_v44 = vpop.permute.xlu0 %3675 }
 0xaa7   :  { %15870 = vst [vmem:[#allocation424_spill] sm:$0xff] %v11881_v44 }
 0xaa9   :  { %4673 = vperm.xlu1 %9007, %v15857_v47  }
 0xaab   :  { %v11868_v29 = vpop.permute.xlu1 %4571  ;;  %4679 = vperm.xlu2 %9008, %v15857_v47  }
 0xaac   :  { %15867 = vst [vmem:[#allocation421_spill] sm:$0xff] %v11868_v29  ;;  %v4984_v32 = vmul.f32 %v11868_v29, %v11605_v25 }
 0xaae   :  { %5471 = vperm.xlu0 %9035, %v4984_v32   ;;  %v11890_v42 = vpop.permute.xlu0 %3684 }
 0xaaf   :  { %15872 = vst [vmem:[#allocation426_spill] sm:$0xff] %v11890_v42 }
 0xab1   :  { %9011 = vset.pattern.permute.xlu1 %v15772_v48 }
 0xab3   :  { %9012 = vset.pattern.permute.xlu2 %v15775_v40 }
 0xab5   :  { %v11883_v39 = vpop.permute.xlu2 %4607 }
 0xab6   :  { %5480 = vperm.xlu0 %9035, %v4987_v54   ;;  %15871 = vst [vmem:[#allocation425_spill] sm:$0xff] %v11883_v39  ;;  %v4990_v32 = vmul.f32 %v11883_v39, %v11605_v25  ;;  %v15873_v54 = vld [vmem:[#allocation156_spill] sm:$0xff]  ;;  %v11897_v44 = vpop.permute.xlu0 %3693 }
 0xab7   :  { %v4993_v9 = vmul.f32 %v15873_v54, %v11605_v25  ;;  %15874 = vst [vmem:[#allocation427_spill] sm:$0xff] %v11897_v44 }
 0xab9   :  { %4691 = vperm.xlu1 %9011, %v15857_v47  }
 0xabb   :  { %4697 = vperm.xlu2 %9012, %v15857_v47   ;;  %v11904_v42 = vpop.permute.xlu1 %4583 }
 0xabc   :  { %15876 = vst [vmem:[#allocation429_spill] sm:$0xff] %v11904_v42 }
 0xabe   :  { %5489 = vperm.xlu0 %9035, %v4990_v32   ;;  %v11901_v32 = vpop.permute.xlu0 %3702 }
 0xabf   :  { %15875 = vst [vmem:[#allocation428_spill] sm:$0xff] %v11901_v32 }
 0xac1   :  { %9013 = vset.pattern.permute.xlu1 %v15778_v33 }
 0xac3   :  { %9014 = vset.pattern.permute.xlu2 %v15808_v3 }
 0xac5   :  { %v11919_v32 = vpop.permute.xlu2 %4619 }
 0xac6   :  { %5498 = vperm.xlu0 %9035, %v4993_v9   ;;  %v11907_v3 = vpop.permute.xlu0 %3711  ;;  %15881 = vst [vmem:[#allocation434_spill] sm:$0xff] %v11919_v32 }
 0xac7   :  { %15877 = vst [vmem:[#allocation430_spill] sm:$0xff] %v11907_v3 }
 0xac9   :  { %4703 = vperm.xlu1 %9013, %v15857_v47  }
 0xacb   :  { %4709 = vperm.xlu2 %9014, %v15857_v47   ;;  %v11910_v9 = vpop.permute.xlu1 %4601 }
 0xacc   :  { %15878 = vst [vmem:[#allocation431_spill] sm:$0xff] %v11910_v9 }
 0xace   :  { %v11914_v44 = vpop.permute.xlu0 %3720 }
 0xacf   :  { %15879 = vst [vmem:[#allocation432_spill] sm:$0xff] %v11914_v44 }
 0xad1   :  { %9016 = vset.pattern.permute.xlu1 %v15782_v6 }
 0xad3   :  { %9017 = vset.pattern.permute.xlu2 %v15787_v20 }
 0xad5   :  { %v11927_v29 = vpop.permute.xlu2 %4637 }
 0xad6   :  { %v11925_v3 = vpop.permute.xlu0 %3729  ;;  %15884 = vst [vmem:[#allocation437_spill] sm:$0xff] %v11927_v29 }
 0xad7   :  { %15883 = vst [vmem:[#allocation436_spill] sm:$0xff] %v11925_v3 }
 0xad9   :  { %4721 = vperm.xlu1 %9016, %v15857_v47  }
 0xadb   :  { %4727 = vperm.xlu2 %9017, %v15857_v47   ;;  %v11916_v54 = vpop.permute.xlu1 %4613 }
 0xadc   :  { %15880 = vst [vmem:[#allocation433_spill] sm:$0xff] %v11916_v54 }
 0xade   :  { %v11935_v44 = vpop.permute.xlu0 %3738 }
 0xadf   :  { %15887 = vst [vmem:[#allocation438_spill] sm:$0xff] %v11935_v44 }
 0xae1   :  { %9018 = vset.pattern.permute.xlu1 %v15788_v4 }
 0xae3   :  { %9019 = vset.pattern.permute.xlu2 %v15813_v10  ;;  %v15885_v10 = vld [vmem:[#allocation95_spill] sm:$0xff] }
 0xae9   :  { %4733 = vperm.xlu1 %9018, %v15857_v47  }
 0xaeb   :  { %4739 = vperm.xlu2 %9019, %v15857_v47   ;;  %v11922_v39 = vpop.permute.xlu1 %4631 }
 0xaec   :  { %15882 = vst [vmem:[#allocation435_spill] sm:$0xff] %v11922_v39 }
 0xaf1   :  { %9021 = vset.pattern.permute.xlu1 %v15759_v60  ;;  %v11937_v60 = vpop.permute.xlu2 %4649 }
 0xaf2   :  { %15888 = vst [vmem:[#allocation439_spill] sm:$0xff] %v11937_v60 }
 0xaf3   :  { %9022 = vset.pattern.permute.xlu2 %v15760_v23  ;;  %v11941_v23 = vpop.permute.xlu0 %3747 }
 0xaf4   :  { %15889 = vst [vmem:[#allocation440_spill] sm:$0xff] %v11941_v23 }
 0xaf9   :  { %4751 = vperm.xlu1 %9021, %v15885_v10   ;;  %v11943_v3 = vpop.permute.xlu2 %4667 }
 0xafa   :  { %15890 = vst [vmem:[#allocation441_spill] sm:$0xff] %v11943_v3 }
 0xafb   :  { %v11930_v27 = vpop.permute.xlu1 %4643  ;;  %4757 = vperm.xlu2 %9022, %v15885_v10  }
 0xafc   :  { %15886 = vst [vmem:[#allocation95_spill] sm:$0xff] %v11930_v27  ;;  %v4996_v47 = vmul.f32 %v11930_v27, %v11605_v25 }
 0xafe   :  { %5507 = vperm.xlu0 %9035, %v4996_v47  }
 0xb01   :  { %9023 = vset.pattern.permute.xlu1 %v15765_v58  ;;  %v11954_v58 = vpop.permute.xlu0 %3756 }
 0xb02   :  { %15893 = vst [vmem:[#allocation444_spill] sm:$0xff] %v11954_v58 }
 0xb03   :  { %9024 = vset.pattern.permute.xlu2 %v15766_v46 }
 0xb05   :  { %v11951_v44 = vpop.permute.xlu2 %4679 }
 0xb06   :  { %15892 = vst [vmem:[#allocation443_spill] sm:$0xff] %v11951_v44  ;;  %v5002_v46 = vmul.f32 %v11951_v44, %v11605_v25 }
 0xb09   :  { %4763 = vperm.xlu1 %9023, %v15885_v10  }
 0xb0b   :  { %v11946_v18 = vpop.permute.xlu1 %4661  ;;  %4769 = vperm.xlu2 %9024, %v15885_v10  }
 0xb0c   :  { %15891 = vst [vmem:[#allocation442_spill] sm:$0xff] %v11946_v18  ;;  %v4999_v47 = vmul.f32 %v11946_v18, %v11605_v25  ;;  %v11965_v18 = vpop.permute.xlu0 %3765 }
 0xb0d   :  { %15895 = vst [vmem:[#allocation446_spill] sm:$0xff] %v11965_v18 }
 0xb0e   :  { %5516 = vperm.xlu0 %9035, %v4999_v47  }
 0xb11   :  { %9026 = vset.pattern.permute.xlu1 %v15771_v43 }
 0xb13   :  { %9027 = vset.pattern.permute.xlu2 %v15772_v48  ;;  %v15896_v48 = vld [vmem:[#allocation166_spill] sm:$0xff] }
 0xb14   :  { %v5008_v43 = vmul.f32 %v15896_v48, %v11605_v25 }
 0xb15   :  { %v11959_v23 = vpop.permute.xlu2 %4697 }
 0xb16   :  { %5525 = vperm.xlu0 %9035, %v5002_v46   ;;  %15894 = vst [vmem:[#allocation445_spill] sm:$0xff] %v11959_v23  ;;  %v5005_v47 = vmul.f32 %v11959_v23, %v11605_v25  ;;  %v11971_v46 = vpop.permute.xlu0 %3774  ;;  %v4936_v23 = vmul.f32 %v11662_v30, %v11605_v25 }
 0xb17   :  { %15897 = vst [vmem:[#allocation447_spill] sm:$0xff] %v11971_v46 }
 0xb19   :  { %4781 = vperm.xlu1 %9026, %v15885_v10  }
 0xb1b   :  { %4787 = vperm.xlu2 %9027, %v15885_v10  }
 0xb1e   :  { %5534 = vperm.xlu0 %9035, %v5005_v47   ;;  %v11975_v58 = vpop.permute.xlu0 %3783 }
 0xb1f   :  { %15898 = vst [vmem:[#allocation448_spill] sm:$0xff] %v11975_v58 }
 0xb21   :  { %9028 = vset.pattern.permute.xlu1 %v15775_v40 }
 0xb23   :  { %9029 = vset.pattern.permute.xlu2 %v15778_v33  ;;  %v11982_v33 = vpop.permute.xlu1 %4673 }
 0xb24   :  { %15900 = vst [vmem:[#allocation450_spill] sm:$0xff] %v11982_v33 }
 0xb25   :  { %v11999_v46 = vpop.permute.xlu2 %4709 }
 0xb26   :  { %5543 = vperm.xlu0 %9035, %v5008_v43   ;;  %v11980_v40 = vpop.permute.xlu0 %3792 }
 0xb27   :  { %15899 = vst [vmem:[#allocation449_spill] sm:$0xff] %v11980_v40  ;;  %v15905_v40 = vld [vmem:[#allocation168_spill] sm:$0xff] }
 0xb28   :  { %v4933_v58 = vmul.f32 %v15905_v40, %v11605_v25  ;;  %15906 = vst [vmem:[#allocation168_spill] sm:$0xff] %v11999_v46 }
 0xb29   :  { %4793 = vperm.xlu1 %9028, %v15885_v10  }
 0xb2b   :  { %4799 = vperm.xlu2 %9029, %v15885_v10   ;;  %v11986_v47 = vpop.permute.xlu1 %4691 }
 0xb2c   :  { %15901 = vst [vmem:[#allocation451_spill] sm:$0xff] %v11986_v47 }
 0xb2e   :  { %v11989_v43 = vpop.permute.xlu0 %3801 }
 0xb2f   :  { %15902 = vst [vmem:[#allocation452_spill] sm:$0xff] %v11989_v43 }
 0xb31   :  { %9031 = vset.pattern.permute.xlu1 %v15781_v56 }
 0xb33   :  { %9032 = vset.pattern.permute.xlu2 %v15782_v6 }
 0xb35   :  { %v12011_v18 = vpop.permute.xlu2 %4727 }
 0xb36   :  { %v11995_v6 = vpop.permute.xlu0 %3810  ;;  %15910 = vst [vmem:[#allocation457_spill] sm:$0xff] %v12011_v18 }
 0xb37   :  { %15904 = vst [vmem:[#allocation454_spill] sm:$0xff] %v11995_v6 }
 0xb39   :  { %4811 = vperm.xlu1 %9031, %v15885_v10  }
 0xb3b   :  { %4817 = vperm.xlu2 %9032, %v15885_v10   ;;  %v11992_v56 = vpop.permute.xlu1 %4703 }
 0xb3c   :  { %15903 = vst [vmem:[#allocation453_spill] sm:$0xff] %v11992_v56 }
 0xb3e   :  { %v12009_v6 = vpop.permute.xlu0 %3819 }
 0xb3f   :  { %15909 = vst [vmem:[#allocation456_spill] sm:$0xff] %v12009_v6  ;;  %v4939_v6 = vmul.f32 %v11666_v19, %v11605_v25 }
 0xb41   :  { %9033 = vset.pattern.permute.xlu1 %v15787_v20  ;;  %v15907_v20 = vmov 0  }
 0xb43   :  { %9034 = vset.pattern.permute.xlu2 %v15788_v4  ;;  %v4934_v4 = vmul.f32 %v11658_v34, %v11605_v25 }
 0xb45   :  { %v12021_v44 = vpop.permute.xlu2 %4739 }
 0xb46   :  { %15913 = vst [vmem:[#allocation459_spill] sm:$0xff] %v12021_v44  ;;  %v12025_v27 = vpop.permute.xlu0 %3828 }
 0xb47   :  { %15914 = vst [vmem:[#allocation460_spill] sm:$0xff] %v12025_v27 }
 0xb49   :  { %4823 = vperm.xlu1 %9033, %v15885_v10  }
 0xb4b   :  { %4829 = vperm.xlu2 %9034, %v15885_v10   ;;  %v12004_v43 = vpop.permute.xlu1 %4721  ;;  %v4935_v10 = vmul.f32 %v11598_v59, %v11605_v25 }
 0xb4c   :  { %15908 = vst [vmem:[#allocation455_spill] sm:$0xff] %v12004_v43 }
 0xb51   :  { %9036 = vset.pattern.permute.xlu1 %v15907_v20 }
 0xb52   :  { %5318 = vperm.xlu1 %9036, %v4933_v58  }
 0xb53   :  { %9037 = vset.pattern.permute.xlu2 %v15907_v20  ;;  %v15912_v20 = vld [vmem:[#allocation75_spill] sm:$0xff] }
 0xb54   :  { %5321 = vperm.xlu2 %9037, %v4934_v4   ;;  %v4938_v4 = vmul.f32 %v15912_v20, %v11605_v25  ;;  %v12037_v20 = vpop.permute.xlu0 %3837 }
 0xb55   :  { %v12029_v59 = vpop.permute.xlu2 %4757  ;;  %15917 = vst [vmem:[#allocation463_spill] sm:$0xff] %v12037_v20  ;;  %v4947_v20 = vmul.f32 %v11687_v36, %v11605_v25 }
 0xb56   :  { %15915 = vst [vmem:[#allocation461_spill] sm:$0xff] %v12029_v59 }
 0xb5a   :  { %5324 = vperm.xlu1 %9036, %v4935_v10   ;;  %v4940_v10 = vmul.f32 %v11625_v55, %v11605_v25  ;;  %v4944_v55 = vmul.f32 %v11676_v51, %v11605_v25 }
 0xb5b   :  { %v12015_v48 = vpop.permute.xlu1 %4733 }
 0xb5c   :  { %15911 = vst [vmem:[#allocation458_spill] sm:$0xff] %v12015_v48  ;;  %v5011_v58 = vmul.f32 %v12015_v48, %v11605_v25  ;;  %5327 = vperm.xlu2 %9037, %v4936_v23   ;;  %v4941_v23 = vmul.f32 %v11670_v37, %v11605_v25  ;;  %v12047_v37 = vpop.permute.xlu0 %5330 }
 0xb5d   :  { %15920 = vst [vmem:[#allocation464_spill] sm:$0xff] %v12047_v37  ;;  %v15923_v37 = vld [vmem:[#allocation179_spill] sm:$0xff] }
 0xb5e   :  { %5552 = vperm.xlu0 %9035, %v5011_v58  }
 0xb62   :  { %5333 = vperm.xlu1 %9036, %v4938_v4  }
 0xb64   :  { %5336 = vperm.xlu2 %9037, %v4939_v6   ;;  %v15918_v6 = vld [vmem:[#allocation177_spill] sm:$0xff] }
 0xb65   :  { %v4943_v4 = vmul.f32 %v15918_v6, %v11605_v25  ;;  %v12041_v27 = vpop.permute.xlu2 %4769 }
 0xb66   :  { %15919 = vst [vmem:[#allocation177_spill] sm:$0xff] %v12041_v27 }
 0xb6a   :  { %5339 = vperm.xlu1 %9036, %v4940_v10   ;;  %v5017_v10 = vmul.f32 %v12041_v27, %v11605_v25  ;;  %v5023_v27 = vmul.f32 %v15923_v37, %v11605_v25 }
 0xb6b   :  { %v12033_v58 = vpop.permute.xlu1 %4751 }
 0xb6c   :  { %15916 = vst [vmem:[#allocation462_spill] sm:$0xff] %v12033_v58  ;;  %v5014_v48 = vmul.f32 %v12033_v58, %v11605_v25  ;;  %5342 = vperm.xlu2 %9037, %v4941_v23   ;;  %v4946_v23 = vmul.f32 %v11682_v13, %v11605_v25 }
 0xb6e   :  { %5561 = vperm.xlu0 %9035, %v5014_v48  }
 0xb72   :  { %5348 = vperm.xlu1 %9036, %v4943_v4   ;;  %v12057_v4 = vpop.permute.xlu0 %5345 }
 0xb73   :  { %15922 = vst [vmem:[#allocation466_spill] sm:$0xff] %v12057_v4 }
 0xb74   :  { %5351 = vperm.xlu2 %9037, %v4944_v55   ;;  %v4949_v55 = vmul.f32 %v11690_v62, %v11605_v25 }
 0xb75   :  { %v12051_v48 = vpop.permute.xlu2 %4787 }
 0xb76   :  { %5570 = vperm.xlu0 %9035, %v5017_v10   ;;  %15921 = vst [vmem:[#allocation465_spill] sm:$0xff] %v12051_v48  ;;  %v5020_v58 = vmul.f32 %v12051_v48, %v11605_v25  ;;  %v4950_v10 = vmul.f32 %v11695_v57, %v11605_v25  ;;  %v4956_v48 = vmul.f32 %v11750_v41, %v11605_v25 }
 0xb7a   :  { %5357 = vperm.xlu1 %9036, %v4946_v23   ;;  %v12065_v36 = vpop.permute.xlu0 %5354  ;;  %v15925_v23 = vld [vmem:[#allocation127_spill] sm:$0xff] }
 0xb7b   :  { %15924 = vst [vmem:[#allocation467_spill] sm:$0xff] %v12065_v36  ;;  %v15929_v36 = vld [vmem:[#allocation130_spill] sm:$0xff] }
 0xb7c   :  { %5360 = vperm.xlu2 %9037, %v4947_v20   ;;  %v4952_v20 = vmul.f32 %v11703_v21, %v11605_v25  ;;  %v4958_v37 = vmul.f32 %v15929_v36, %v11605_v25 }
 0xb7e   :  { %5579 = vperm.xlu0 %9035, %v5020_v58   ;;  %v4953_v58 = vmul.f32 %v15925_v23, %v11605_v25 }
 0xb82   :  { %5366 = vperm.xlu1 %9036, %v4949_v55   ;;  %v12071_v4 = vpop.permute.xlu0 %5363  ;;  %v4955_v55 = vmul.f32 %v11709_v53, %v11605_v25 }
 0xb83   :  { %15926 = vst [vmem:[#allocation127_spill] sm:$0xff] %v12071_v4 }
 0xb84   :  { %5369 = vperm.xlu2 %9037, %v4950_v10  }
 0xb85   :  { %v12077_v10 = vpop.permute.xlu2 %4799 }
 0xb86   :  { %5588 = vperm.xlu0 %9035, %v5023_v27   ;;  %15927 = vst [vmem:[#allocation468_spill] sm:$0xff] %v12077_v10 }
 0xb8a   :  { %5375 = vperm.xlu1 %9036, %v4952_v20   ;;  %v12079_v27 = vpop.permute.xlu0 %5372  ;;  %v4959_v20 = vmul.f32 %v11754_v61, %v11605_v25 }
 0xb8b   :  { %15928 = vst [vmem:[#allocation469_spill] sm:$0xff] %v12079_v27 }
 0xb8c   :  { %5378 = vperm.xlu2 %9037, %v4953_v58   ;;  %v12085_v58 = vpop.permute.xlu1 %4763 }
 0xb8d   :  { %15930 = vst [vmem:[#allocation130_spill] sm:$0xff] %v12085_v58 }
 0xb92   :  { %5384 = vperm.xlu1 %9036, %v4955_v55   ;;  %v12089_v53 = vpop.permute.xlu0 %5381  ;;  %v4962_v55 = vmul.f32 %v11765_v0, %v11605_v25 }
 0xb93   :  { %15932 = vst [vmem:[#allocation471_spill] sm:$0xff] %v12089_v53  ;;  %v4965_v53 = vmul.f32 %v11773_v14, %v11605_v25  ;;  %v15946_v14 = vld [vmem:[#allocation54_spill] sm:$0xff] }
 0xb94   :  { %5387 = vperm.xlu2 %9037, %v4956_v48   ;;  %v4961_v48 = vmul.f32 %v11760_v15, %v11605_v25  ;;  %v12095_v27 = vpop.permute.xlu1 %4781 }
 0xb95   :  { %v12087_v4 = vpop.permute.xlu2 %4817  ;;  %15933 = vst [vmem:[#allocation472_spill] sm:$0xff] %v12095_v27 }
 0xb96   :  { %15931 = vst [vmem:[#allocation470_spill] sm:$0xff] %v12087_v4 }
 0xb9a   :  { %5393 = vperm.xlu1 %9036, %v4958_v37   ;;  %v4964_v37 = vmul.f32 %v11768_v22, %v11605_v25 }
 0xb9c   :  { %5396 = vperm.xlu2 %9037, %v4959_v20   ;;  %v12101_v20 = vpop.permute.xlu0 %5390  ;;  %v12105_v61 = vpop.permute.xlu1 %4793 }
 0xb9d   :  { %15935 = vst [vmem:[#allocation474_spill] sm:$0xff] %v12101_v20 }
 0xb9e   :  { %15936 = vst [vmem:[#allocation475_spill] sm:$0xff] %v12105_v61 }
 0xba2   :  { %5402 = vperm.xlu1 %9036, %v4961_v48   ;;  %v4967_v48 = vmul.f32 %v11783_v49, %v11605_v25 }
 0xba4   :  { %5405 = vperm.xlu2 %9037, %v4962_v55   ;;  %v15938_v55 = vld [vmem:[#allocation140_spill] sm:$0xff]  ;;  %v12113_v21 = vpop.permute.xlu0 %5399 }
 0xba5   :  { %v12097_v41 = vpop.permute.xlu2 %4829  ;;  %v4968_v0 = vmul.f32 %v15938_v55, %v11605_v25  ;;  %15939 = vst [vmem:[#allocation140_spill] sm:$0xff] %v12113_v21 }
 0xba6   :  { %15934 = vst [vmem:[#allocation473_spill] sm:$0xff] %v12097_v41 }
 0xbaa   :  { %5411 = vperm.xlu1 %9036, %v4964_v37   ;;  %v4970_v37 = vmul.f32 %v11787_v35, %v11605_v25  ;;  %v12134_v35 = vperm.slane %v15946_v14, 2  ;;  %v4977_v14 = vmul.f32 %v11843_v63, %v11605_v25 }
 0xbab   :  { %v12115_v22 = vpop.permute.xlu1 %4811 }
 0xbac   :  { %5414 = vperm.xlu2 %9037, %v4965_v53   ;;  %15940 = vst [vmem:[#allocation477_spill] sm:$0xff] %v12115_v22  ;;  %v4971_v53 = vmul.f32 %v11826_v8, %v11605_v25  ;;  %v5029_v8 = vmul.f32 %v15905_v40, %v12134_v35 }
 0xbae   :  { %v12107_v15 = vpop.permute.xlu2 %5321 }
 0xbaf   :  { %15937 = vst [vmem:[#allocation476_spill] sm:$0xff] %v12107_v15 }
 0xbb2   :  { %5420 = vperm.xlu1 %9036, %v4967_v48   ;;  %v12127_v48 = vpop.permute.xlu0 %5408 }
 0xbb3   :  { %15943 = vst [vmem:[#allocation480_spill] sm:$0xff] %v12127_v48 }
 0xbb4   :  { %5423 = vperm.xlu2 %9037, %v4968_v0   ;;  %v15945_v0 = vld [vmem:[#allocation143_spill] sm:$0xff] }
 0xbb6   :  { %v12117_v20 = vpop.permute.xlu2 %5327 }
 0xbb7   :  { %15941 = vst [vmem:[#allocation478_spill] sm:$0xff] %v12117_v20  ;;  %v4973_v20 = vmul.f32 %v15945_v0, %v11605_v25 }
 0xbba   :  { %5429 = vperm.xlu1 %9036, %v4970_v37   ;;  %v4974_v37 = vmul.f32 %v11832_v24, %v11605_v25  ;;  %v12142_v48 = vpop.permute.xlu0 %5417 }
 0xbbb   :  { %v12123_v15 = vpop.permute.xlu1 %4823 }
 0xbbc   :  { %15942 = vst [vmem:[#allocation479_spill] sm:$0xff] %v12123_v15  ;;  %v5026_v49 = vmul.f32 %v12123_v15, %v11605_v25  ;;  %5432 = vperm.xlu2 %9037, %v4971_v53  }
 0xbbe   :  { %v12129_v21 = vpop.permute.xlu2 %5336  ;;  %5597 = vperm.xlu0 %9035, %v5026_v49   ;;  %v4976_v49 = vmul.f32 %v11838_v7, %v11605_v25 }
 0xbbf   :  { %15944 = vst [vmem:[#allocation481_spill] sm:$0xff] %v12129_v21 }
 0xbc2   :  { %5438 = vperm.xlu1 %9036, %v4973_v20   ;;  %v5032_v20 = vmul.f32 %v11662_v30, %v12134_v35 }
 0xbc4   :  { %5441 = vperm.xlu2 %9037, %v4974_v37   ;;  %v12140_v53 = vpop.permute.xlu1 %5318  ;;  %v12154_v37 = vpop.permute.xlu0 %5426 }
 0xbc5   :  { %15947 = vst [vmem:[#allocation143_spill] sm:$0xff] %v12140_v53 }
 0xbc6   :  { %v12144_v21 = vpop.permute.xlu2 %5342  ;;  %5606 = vperm.xlu0 %9035, %v5029_v8   ;;  %v4979_v8 = vmul.f32 %v11846_v17, %v11605_v25 }
 0xbc7   :  { %15948 = vst [vmem:[#allocation54_spill] sm:$0xff] %v12144_v21  ;;  %v4980_v21 = vmul.f32 %v11849_v1, %v11605_v25 }
 0xbca   :  { %5447 = vperm.xlu1 %9036, %v4976_v49   ;;  %v5035_v49 = vmul.f32 %v11666_v19, %v12134_v35 }
 0xbcc   :  { %5450 = vperm.xlu2 %9037, %v4977_v14   ;;  %v12152_v40 = vpop.permute.xlu1 %5324 }
 0xbcd   :  { %15949 = vst [vmem:[#allocation482_spill] sm:$0xff] %v12152_v40  ;;  %v12168_v40 = vpop.permute.xlu0 %5435 }
 0xbce   :  { %v12156_v53 = vpop.permute.xlu2 %5351  ;;  %5615 = vperm.xlu0 %9035, %v5032_v20   ;;  %v4982_v20 = vmul.f32 %v11859_v50, %v11605_v25  ;;  %v4986_v50 = vmul.f32 %v11904_v42, %v11605_v25 }
 0xbcf   :  { %15950 = vst [vmem:[#allocation483_spill] sm:$0xff] %v12156_v53  ;;  %v15953_v53 = vld [vmem:[#allocation43_spill] sm:$0xff] }
 0xbd0   :  { %v4983_v17 = vmul.f32 %v15953_v53, %v11605_v25 }
 0xbd2   :  { %5456 = vperm.xlu1 %9036, %v4979_v8   ;;  %v5038_v8 = vmul.f32 %v11629_v31, %v12134_v35 }
 0xbd4   :  { %5459 = vperm.xlu2 %9037, %v4980_v21   ;;  %v12164_v30 = vpop.permute.xlu1 %5333 }
 0xbd5   :  { %15951 = vst [vmem:[#allocation484_spill] sm:$0xff] %v12164_v30 }
 0xbd6   :  { %v12166_v14 = vpop.permute.xlu2 %5360  ;;  %5624 = vperm.xlu0 %9035, %v5035_v49   ;;  %v4985_v49 = vmul.f32 %v11865_v12, %v11605_v25  ;;  %v4989_v12 = vmul.f32 %v11910_v9, %v11605_v25 }
 0xbd7   :  { %15952 = vst [vmem:[#allocation485_spill] sm:$0xff] %v12166_v14  ;;  %v12182_v14 = vpop.permute.xlu0 %5444 }
 0xbda   :  { %5465 = vperm.xlu1 %9036, %v4982_v20   ;;  %v5041_v20 = vmul.f32 %v11643_v26, %v12134_v35 }
 0xbdc   :  { %5468 = vperm.xlu2 %9037, %v4983_v17   ;;  %v12176_v19 = vpop.permute.xlu1 %5339 }
 0xbdd   :  { %15954 = vst [vmem:[#allocation43_spill] sm:$0xff] %v12176_v19 }
 0xbde   :  { %v12178_v21 = vpop.permute.xlu2 %5369  ;;  %5633 = vperm.xlu0 %9035, %v5038_v8   ;;  %v15958_v8 = vld [vmem:[#allocation45_spill] sm:$0xff] }
 0xbdf   :  { %15955 = vst [vmem:[#allocation486_spill] sm:$0xff] %v12178_v21  ;;  %v4988_v21 = vmul.f32 %v15958_v8, %v11605_v25  ;;  %v12196_v19 = vpop.permute.xlu0 %5453 }
 0xbe2   :  { %5474 = vperm.xlu1 %9036, %v4985_v49   ;;  %v5044_v49 = vmul.f32 %v15811_v52, %v12134_v35 }
 0xbe4   :  { %5477 = vperm.xlu2 %9037, %v4986_v50   ;;  %v12188_v31 = vpop.permute.xlu1 %5348 }
 0xbe5   :  { %15956 = vst [vmem:[#allocation487_spill] sm:$0xff] %v12188_v31 }
 0xbe6   :  { %v12190_v17 = vpop.permute.xlu2 %5378  ;;  %5642 = vperm.xlu0 %9035, %v5041_v20   ;;  %v4991_v20 = vmul.f32 %v11916_v54, %v11605_v25 }
 0xbe7   :  { %15957 = vst [vmem:[#allocation488_spill] sm:$0xff] %v12190_v17  ;;  %v4992_v17 = vmul.f32 %v11919_v32, %v11605_v25  ;;  %v12208_v9 = vpop.permute.xlu0 %5462 }
 0xbea   :  { %5483 = vperm.xlu1 %9036, %v4988_v21   ;;  %v5047_v21 = vmul.f32 %v11698_v38, %v12134_v35 }
 0xbec   :  { %5486 = vperm.xlu2 %9037, %v4989_v12   ;;  %v12200_v26 = vpop.permute.xlu1 %5357 }
 0xbed   :  { %15959 = vst [vmem:[#allocation45_spill] sm:$0xff] %v12200_v26 }
 0xbee   :  { %v12202_v50 = vpop.permute.xlu2 %5387  ;;  %5651 = vperm.xlu0 %9035, %v5044_v49   ;;  %v4994_v49 = vmul.f32 %v11922_v39, %v11605_v25 }
 0xbef   :  { %15960 = vst [vmem:[#allocation489_spill] sm:$0xff] %v12202_v50  ;;  %v4995_v50 = vmul.f32 %v11927_v29, %v11605_v25  ;;  %v12220_v32 = vpop.permute.xlu0 %5471 }
 0xbf2   :  { %5492 = vperm.xlu1 %9036, %v4991_v20   ;;  %v5050_v20 = vmul.f32 %v11712_v5, %v12134_v35 }
 0xbf4   :  { %5495 = vperm.xlu2 %9037, %v4992_v17   ;;  %v12212_v52 = vpop.permute.xlu1 %5366 }
 0xbf5   :  { %15961 = vst [vmem:[#allocation490_spill] sm:$0xff] %v12212_v52 }
 0xbf6   :  { %v12214_v12 = vpop.permute.xlu2 %5396  ;;  %5660 = vperm.xlu0 %9035, %v5047_v21   ;;  %v4997_v21 = vmul.f32 %v11937_v60, %v11605_v25 }
 0xbf7   :  { %15962 = vst [vmem:[#allocation491_spill] sm:$0xff] %v12214_v12  ;;  %v15965_v12 = vld [vmem:[#allocation53_spill] sm:$0xff]  ;;  %v12236_v5 = vpop.permute.xlu0 %5480 }
 0xbf8   :  { %v4998_v52 = vmul.f32 %v15965_v12, %v11605_v25 }
 0xbfa   :  { %5501 = vperm.xlu1 %9036, %v4994_v49   ;;  %v5053_v49 = vmul.f32 %v11719_v28, %v12134_v35 }
 0xbfc   :  { %5504 = vperm.xlu2 %9037, %v4995_v50   ;;  %v12224_v38 = vpop.permute.xlu1 %5375 }
 0xbfd   :  { %15963 = vst [vmem:[#allocation492_spill] sm:$0xff] %v12224_v38 }
 0xbfe   :  { %v12226_v17 = vpop.permute.xlu2 %5405  ;;  %5669 = vperm.xlu0 %9035, %v5050_v20   ;;  %v5000_v20 = vmul.f32 %v11943_v3, %v11605_v25  ;;  %v5004_v3 = vmul.f32 %v11986_v47, %v11605_v25 }
 0xbff   :  { %15964 = vst [vmem:[#allocation493_spill] sm:$0xff] %v12226_v17  ;;  %v5001_v17 = vmul.f32 %v11982_v33, %v11605_v25 }
 0xc02   :  { %5510 = vperm.xlu1 %9036, %v4997_v21   ;;  %v5056_v21 = vmul.f32 %v11727_v2, %v12134_v35 }
 0xc04   :  { %5513 = vperm.xlu2 %9037, %v4998_v52   ;;  %v12234_v29 = vpop.permute.xlu1 %5384  ;;  %v12246_v52 = vpop.permute.xlu0 %5489 }
 0xc05   :  { %15966 = vst [vmem:[#allocation53_spill] sm:$0xff] %v12234_v29  ;;  %v15968_v29 = vld [vmem:[#allocation50_spill] sm:$0xff] }
 0xc06   :  { %v5415_v50 = vpop.permute.xlu2 %5414  ;;  %5678 = vperm.xlu0 %9035, %v5053_v49   ;;  %v5003_v49 = vmul.f32 %v15968_v29, %v11605_v25 }
 0xc0a   :  { %5519 = vperm.xlu1 %9036, %v5000_v20   ;;  %v5059_v20 = vmul.f32 %v15827_v45, %v12134_v35 }
 0xc0c   :  { %5522 = vperm.xlu2 %9037, %v5001_v17   ;;  %v12244_v60 = vpop.permute.xlu1 %5393  ;;  %v5006_v17 = vmul.f32 %v11992_v56, %v11605_v25  ;;  %v15971_v56 = vlaneseq }
 0xc0d   :  { %15967 = vst [vmem:[#allocation494_spill] sm:$0xff] %v12244_v60  ;;  %v5007_v60 = vmul.f32 %v11999_v46, %v11605_v25 }
 0xc0e   :  { %v5424_v28 = vpop.permute.xlu2 %5423  ;;  %5687 = vperm.xlu0 %9035, %v5056_v21   ;;  %v12260_v21 = vpop.permute.xlu0 %5498 }
 0xc12   :  { %5528 = vperm.xlu1 %9036, %v5003_v49   ;;  %v5062_v49 = vmul.f32 %v11776_v16, %v12134_v35  ;;  %v5065_v16 = vmul.f32 %v11792_v11, %v12134_v35  ;;  %v5012_v11 = vmul.f32 %v12021_v44, %v11605_v25  ;;  %v15973_v44 = vld [vmem:[#allocation402_spill] sm:$0xff] }
 0xc13   :  { %v5068_v39 = vmul.f32 %v15973_v44, %v12134_v35  ;;  %v5015_v44 = vmul.f32 %v12029_v59, %v11605_v25  ;;  %v15975_v59 = vld [vmem:[#allocation91_spill] sm:$0xff] }
 0xc14   :  { %5531 = vperm.xlu2 %9037, %v5004_v3   ;;  %v12254_v33 = vpop.permute.xlu1 %5402  ;;  %v5018_v30 = vmul.f32 %v15975_v59, %v11605_v25 }
 0xc15   :  { %15969 = vst [vmem:[#allocation50_spill] sm:$0xff] %v12254_v33  ;;  %v12275_v33 = vand.u32 127, %v15971_v56 }
 0xc16   :  { %v12256_v2 = vpop.permute.xlu2 %5432  ;;  %5696 = vperm.xlu0 %9035, %v5059_v20   ;;  %v5009_v20 = vmul.f32 %v12004_v43, %v11605_v25  ;;  %v12272_v47 = vpop.permute.xlu0 %5507 }
 0xc17   :  { %v12282_v46 = vadd.s32 4294967280, %v12275_v33  ;;  %v5955_v43 = vperm.slane %v5415_v50, %v12275_v33  ;;  %v15972_v50 = vld [vmem:[#allocation81_spill] sm:$0xff]  ;;  %v12311_v42 = vadd.s32 4294967264, %v12275_v33 }
 0xc18   :  { %v5013_v38 = vmul.f32 %v15972_v50, %v11605_v25 }
 0xc1a   :  { %5537 = vperm.xlu1 %9036, %v5006_v17   ;;  %v5010_v17 = vmul.f32 %v12011_v18, %v11605_v25  ;;  %v12298_v18 = vadd.s32 4294967272, %v12275_v33 }
 0xc1c   :  { %5540 = vperm.xlu2 %9037, %v5007_v60   ;;  %v12266_v45 = vpop.permute.xlu1 %5411  ;;  %v5960_v54 = vperm.slane %v5424_v28, %v12298_v18 }
 0xc1d   :  { %15970 = vst [vmem:[#allocation495_spill] sm:$0xff] %v12266_v45 }
 0xc1e   :  { %v12268_v3 = vpop.permute.xlu2 %5441  ;;  %5705 = vperm.xlu0 %9035, %v5062_v49   ;;  %v12285_v49 = vadd.s32 4294967288, %v12275_v33 }
 0xc22   :  { %5546 = vperm.xlu1 %9036, %v5009_v20   ;;  %v5956_v20 = vperm.slane %v12142_v48, %v12285_v49  ;;  %v12305_v48 = vadd.s32 4294967256, %v12275_v33 }
 0xc24   :  { %5549 = vperm.xlu2 %9037, %v5010_v17   ;;  %v5421_v60 = vpop.permute.xlu1 %5420  ;;  %v12295_v17 = vpop.permute.xlu0 %5516 }
 0xc25   :  { %v5958_v56 = vperm.slane %v5421_v60, %v12282_v46 }
 0xc26   :  { %v12288_v45 = vpop.permute.xlu2 %5450  ;;  %5714 = vperm.xlu0 %9035, %v5065_v16   ;;  %v5957_v16 = vsel %vm1769_vm2, %v5956_v20, %v5955_v43 }
 0xc27   :  { %v5959_v60 = vsel %vm1773_vm3, %v5958_v56, %v5957_v16  ;;  %v5962_v56 = vperm.slane %v12154_v37, %v12311_v42  ;;  %v12336_v16 = vadd.s32 4294967240, %v12275_v33 }
 0xc28   :  { %v5961_v31 = vsel %vm1777_vm4, %v5960_v54, %v5959_v60  ;;  %v5016_v54 = vmul.f32 %v12085_v58, %v11605_v25 }
 0xc29   :  { %v5963_v28 = vsel %vm1781_vm5, %v5962_v56, %v5961_v31  ;;  %v15974_v31 = vld [vmem:[#allocation404_spill] sm:$0xff] }
 0xc2a   :  { %5555 = vperm.xlu1 %9036, %v5012_v11   ;;  %v5071_v60 = vmul.f32 %v15974_v31, %v12134_v35  ;;  %v12358_v31 = vadd.s32 4294967208, %v12275_v33 }
 0xc2c   :  { %5558 = vperm.xlu2 %9037, %v5013_v38   ;;  %v5430_v26 = vpop.permute.xlu1 %5429  ;;  %v12322_v38 = vadd.s32 4294967248, %v12275_v33  ;;  %v12331_v37 = vpop.permute.xlu0 %5525 }
 0xc2d   :  { %v5964_v43 = vperm.slane %v5430_v26, %v12305_v48 }
 0xc2e   :  { %v12315_v20 = vpop.permute.xlu2 %5459  ;;  %5723 = vperm.xlu0 %9035, %v5068_v39   ;;  %v12329_v39 = vadd.s32 4294967232, %v12275_v33  ;;  %v5966_v11 = vperm.slane %v12256_v2, %v12322_v38  ;;  %v12347_v2 = vadd.s32 4294967224, %v12275_v33 }
 0xc2f   :  { %v5965_v26 = vsel %vm1785_vm6, %v5964_v43, %v5963_v28  ;;  %v5968_v28 = vperm.slane %v12168_v40, %v12336_v16 }
 0xc30   :  { %v5967_v43 = vsel %vm1789_vm7, %v5966_v11, %v5965_v26  ;;  %v5019_v11 = vmul.f32 %v12095_v27, %v11605_v25  ;;  %v5972_v40 = vperm.slane %v12268_v3, %v12347_v2  ;;  %v12372_v27 = vadd.s32 4294967200, %v12275_v33 }
 0xc32   :  { %5564 = vperm.xlu1 %9036, %v5015_v44  }
 0xc34   :  { %5567 = vperm.xlu2 %9037, %v5016_v54   ;;  %v5439_v56 = vpop.permute.xlu1 %5438  ;;  %v5969_v54 = vsel %vm1793_vm8, %v5968_v28, %v5967_v43 }
 0xc35   :  { %v5970_v44 = vperm.slane %v5439_v56, %v12329_v39  ;;  %v15976_v56 = vld [vmem:[#allocation37_spill] sm:$0xff] }
 0xc36   :  { %v12344_v58 = vpop.permute.xlu2 %5468  ;;  %5732 = vperm.xlu0 %9035, %v5071_v60   ;;  %v12361_v60 = vadd.s32 4294967216, %v12275_v33  ;;  %v5074_v1 = vmul.f32 %v15976_v56, %v12134_v35 }
 0xc37   :  { %v5971_v26 = vsel %vm1797_vm9, %v5970_v44, %v5969_v54  ;;  %v12368_v54 = vpop.permute.xlu0 %5534 }
 0xc38   :  { %v5973_v43 = vsel %vm1801_vm10, %v5972_v40, %v5971_v26  ;;  %v5974_v28 = vperm.slane %v12182_v14, %v12361_v60  ;;  %v5021_v26 = vmul.f32 %v12105_v61, %v11605_v25  ;;  %v5978_v14 = vperm.slane %v12288_v45, %v12372_v27 }
 0xc39   :  { %v12381_v40 = vadd.s32 4294967192, %v12275_v33 }
 0xc3a   :  { %5573 = vperm.xlu1 %9036, %v5018_v30   ;;  %v5975_v56 = vsel %vm1805_vm11, %v5974_v28, %v5973_v43  ;;  %v12390_v28 = vadd.s32 4294967176, %v12275_v33 }
 0xc3b   :  { %v5980_v45 = vperm.slane %v12196_v19, %v12381_v40  ;;  %v5024_v19 = vmul.f32 %v12115_v22, %v11605_v25 }
 0xc3c   :  { %5576 = vperm.xlu2 %9037, %v5019_v11   ;;  %v5448_v44 = vpop.permute.xlu1 %5447 }
 0xc3d   :  { %v5976_v30 = vperm.slane %v5448_v44, %v12358_v31  ;;  %v12386_v44 = vadd.s32 4294967184, %v12275_v33 }
 0xc3e   :  { %v5478_v3 = vpop.permute.xlu2 %5477  ;;  %5741 = vperm.xlu0 %9035, %v5074_v1   ;;  %v5022_v1 = vmul.f32 %v12077_v10, %v11605_v25 }
 0xc3f   :  { %v5977_v11 = vsel %vm1809_vm12, %v5976_v30, %v5975_v56  ;;  %v15977_v30 = vld [vmem:[#allocation417_spill] sm:$0xff]  ;;  %v12400_v63 = vpop.permute.xlu0 %5543 }
 0xc40   :  { %v5979_v43 = vsel %vm1813_vm13, %v5978_v14, %v5977_v11  ;;  %v5077_v56 = vmul.f32 %v15977_v30, %v12134_v35 }
 0xc41   :  { %v5981_v11 = vsel %vm1817_vm14, %v5980_v45, %v5979_v43  ;;  %v5986_v45 = vperm.slane %v12208_v9, %v12275_v33 }
 0xc42   :  { %5582 = vperm.xlu1 %9036, %v5021_v26   ;;  %v5984_v26 = vperm.slane %v12315_v20, %v12390_v28  ;;  %v15979_v20 = vld [vmem:[#allocation421_spill] sm:$0xff] }
 0xc43   :  { %v5080_v43 = vmul.f32 %v15979_v20, %v12134_v35 }
 0xc44   :  { %5585 = vperm.xlu2 %9037, %v5022_v1   ;;  %v5457_v61 = vpop.permute.xlu1 %5456 }
 0xc45   :  { %v5982_v10 = vperm.slane %v5457_v61, %v12386_v44  ;;  %v5025_v61 = vmul.f32 %v12087_v4, %v11605_v25 }
 0xc46   :  { %v5487_v14 = vpop.permute.xlu2 %5486  ;;  %5750 = vperm.xlu0 %9035, %v5077_v56  }
 0xc47   :  { %v5983_v30 = vsel %vm1821_vm15, %v5982_v10, %v5981_v11  ;;  %v5989_v11 = vperm.slane %v12344_v58, %v12282_v46  ;;  %v15981_v58 = vld [vmem:[#allocation423_spill] sm:$0xff] }
 0xc48   :  { %v12406_v1 = vsel %vm1825_vm0, %v5984_v26, %v5983_v30  ;;  %v5991_v26 = vperm.slane %v12220_v32, %v12298_v18  ;;  %v12419_v30 = vpop.permute.xlu0 %5552 }
 0xc49   :  { %15978 = vst [vmem:[#allocation81_spill] sm:$0xff] %v12406_v1 }
 0xc4a   :  { %5591 = vperm.xlu1 %9036, %v5024_v19  }
 0xc4c   :  { %5594 = vperm.xlu2 %9037, %v5025_v61   ;;  %v5466_v56 = vpop.permute.xlu1 %5465  ;;  %v5027_v61 = vmul.f32 %v12097_v41, %v11605_v25 }
 0xc4d   :  { %v5987_v10 = vperm.slane %v5466_v56, %v12285_v49  ;;  %v15980_v56 = vld [vmem:[#allocation27_spill] sm:$0xff] }
 0xc4e   :  { %v5496_v22 = vpop.permute.xlu2 %5495  ;;  %5759 = vperm.xlu0 %9035, %v5080_v43   ;;  %v5028_v1 = vmul.f32 %v15980_v56, %v11605_v25  ;;  %v5083_v43 = vmul.f32 %v15981_v58, %v12134_v35  ;;  %v5030_v25 = vmul.f32 %v11658_v34, %v12134_v35  ;;  %v6003_v34 = vperm.slane %v12246_v52, %v12347_v2 }
 0xc4f   :  { %v5988_v19 = vsel %vm1769_vm2, %v5987_v10, %v5986_v45  ;;  %v5995_v45 = vperm.slane %v5478_v3, %v12305_v48  ;;  %v15983_v3 = vld [vmem:[#allocation425_spill] sm:$0xff] }
 0xc50   :  { %v5990_v20 = vsel %vm1773_vm3, %v5989_v11, %v5988_v19  ;;  %v5997_v11 = vperm.slane %v12236_v5, %v12322_v38  ;;  %v12434_v19 = vpop.permute.xlu0 %5561  ;;  %v5086_v58 = vmul.f32 %v15983_v3, %v12134_v35 }
 0xc51   :  { %v5992_v9 = vsel %vm1777_vm4, %v5991_v26, %v5990_v20 }
 0xc52   :  { %5600 = vperm.xlu1 %9036, %v5027_v61  }
 0xc54   :  { %v5475_v4 = vpop.permute.xlu1 %5474  ;;  %5603 = vperm.xlu2 %9037, %v5028_v1  }
 0xc55   :  { %v5993_v32 = vperm.slane %v5475_v4, %v12311_v42  ;;  %v15982_v4 = vld [vmem:[#allocation40_spill] sm:$0xff] }
 0xc56   :  { %v5505_v10 = vpop.permute.xlu2 %5504  ;;  %5768 = vperm.xlu0 %9035, %v5083_v43   ;;  %v5031_v20 = vmul.f32 %v15982_v4, %v12134_v35 }
 0xc57   :  { %v5994_v26 = vsel %vm1781_vm5, %v5993_v32, %v5992_v9  ;;  %v6001_v9 = vperm.slane %v5487_v14, %v12329_v39  ;;  %v15986_v14 = vld [vmem:[#allocation156_spill] sm:$0xff] }
 0xc58   :  { %v5996_v61 = vsel %vm1785_vm6, %v5995_v45, %v5994_v26 }
 0xc59   :  { %v5998_v1 = vsel %vm1789_vm7, %v5997_v11, %v5996_v61  ;;  %v15984_v11 = vld [vmem:[#allocation73_spill] sm:$0xff]  ;;  %v12453_v61 = vpop.permute.xlu0 %5570 }
 0xc5a   :  { %5609 = vperm.xlu1 %9036, %v5030_v25   ;;  %v5033_v26 = vmul.f32 %v15984_v11, %v12134_v35 }
 0xc5c   :  { %v5484_v43 = vpop.permute.xlu1 %5483  ;;  %5612 = vperm.xlu2 %9037, %v5031_v20   ;;  %v15985_v20 = vld [vmem:[#allocation75_spill] sm:$0xff] }
 0xc5d   :  { %v5999_v5 = vperm.slane %v5484_v43, %v12336_v16  ;;  %v5034_v3 = vmul.f32 %v15985_v20, %v12134_v35  ;;  %v15988_v20 = vld [vmem:[#allocation26_spill] sm:$0xff] }
 0xc5e   :  { %v5514_v32 = vpop.permute.xlu2 %5513  ;;  %5777 = vperm.xlu0 %9035, %v5086_v58   ;;  %v5089_v58 = vmul.f32 %v15986_v14, %v12134_v35 }
 0xc5f   :  { %v6000_v45 = vsel %vm1793_vm8, %v5999_v5, %v5998_v1  ;;  %v6007_v1 = vperm.slane %v5496_v22, %v12358_v31  ;;  %v15990_v22 = vld [vmem:[#allocation95_spill] sm:$0xff] }
 0xc60   :  { %v6002_v25 = vsel %vm1797_vm9, %v6001_v9, %v6000_v45  ;;  %v6009_v9 = vperm.slane %v12260_v21, %v12372_v27  ;;  %v15987_v45 = vld [vmem:[#allocation373_spill] sm:$0xff] }
 0xc61   :  { %v6004_v4 = vsel %vm1801_vm10, %v6003_v34, %v6002_v25  ;;  %v5036_v11 = vmul.f32 %v15987_v45, %v12134_v35  ;;  %v12471_v14 = vpop.permute.xlu0 %5579 }
 0xc62   :  { %5618 = vperm.xlu1 %9036, %v5033_v26   ;;  %15989 = vst [vmem:[#allocation402_spill] sm:$0xff] %v12471_v14 }
 0xc64   :  { %v5493_v43 = vpop.permute.xlu1 %5492  ;;  %5621 = vperm.xlu2 %9037, %v5034_v3   ;;  %v5037_v3 = vmul.f32 %v15988_v20, %v12134_v35 }
 0xc65   :  { %v6005_v52 = vperm.slane %v5493_v43, %v12361_v60 }
 0xc66   :  { %v5523_v5 = vpop.permute.xlu2 %5522  ;;  %5786 = vperm.xlu0 %9035, %v5089_v58   ;;  %v5092_v58 = vmul.f32 %v15990_v22, %v12134_v35  ;;  %v6020_v22 = vperm.slane %v12295_v17, %v12282_v46 }
 0xc67   :  { %v6006_v34 = vsel %vm1805_vm11, %v6005_v52, %v6004_v4  ;;  %v6013_v4 = vperm.slane %v5505_v10, %v12386_v44  ;;  %v15992_v10 = vld [vmem:[#allocation442_spill] sm:$0xff] }
 0xc68   :  { %v6008_v26 = vsel %vm1809_vm12, %v6007_v1, %v6006_v34  ;;  %v6015_v1 = vperm.slane %v12272_v47, %v12390_v28  ;;  %v5039_v34 = vmul.f32 %v15918_v6, %v12134_v35  ;;  %v5095_v20 = vmul.f32 %v15992_v10, %v12134_v35 }
 0xc69   :  { %v6010_v25 = vsel %vm1813_vm13, %v6009_v9, %v6008_v26  ;;  %v5040_v26 = vmul.f32 %v11676_v51, %v12134_v35  ;;  %v12492_v47 = vpop.permute.xlu0 %5588 }
 0xc6a   :  { %5627 = vperm.xlu1 %9036, %v5036_v11   ;;  %15993 = vst [vmem:[#allocation91_spill] sm:$0xff] %v12492_v47 }
 0xc6c   :  { %v5502_v43 = vpop.permute.xlu1 %5501  ;;  %5630 = vperm.xlu2 %9037, %v5037_v3  }
 0xc6d   :  { %v6011_v21 = vperm.slane %v5502_v43, %v12381_v40  ;;  %v5042_v43 = vmul.f32 %v11682_v13, %v12134_v35  ;;  %v6026_v13 = vperm.slane %v12331_v37, %v12305_v48  ;;  %v5046_v37 = vmul.f32 %v11695_v57, %v12134_v35 }
 0xc6e   :  { %v12477_v52 = vpop.permute.xlu2 %5531  ;;  %5795 = vperm.xlu0 %9035, %v5092_v58   ;;  %v12549_v57 = vmul.f32 %v15958_v8, %v12134_v35  ;;  %v16007_v8 = vld [vmem:[#allocation104_spill] sm:$0xff] }
 0xc6f   :  { %v6012_v9 = vsel %vm1817_vm14, %v6011_v21, %v6010_v25  ;;  %v6018_v25 = vperm.slane %v5514_v32, %v12285_v49  ;;  %v15995_v32 = vld [vmem:[#allocation462_spill] sm:$0xff] }
 0xc70   :  { %v6014_v45 = vsel %vm1821_vm15, %v6013_v4, %v6012_v9  ;;  %v15994_v4 = vld [vmem:[#allocation380_spill] sm:$0xff]  ;;  %v5110_v9 = vmul.f32 %v15995_v32, %v12134_v35  ;;  %v12537_v32 = vmul.f32 %v15938_v55, %v12134_v35  ;;  %16003 = vst [vmem:[#allocation423_spill] sm:$0xff] %v12549_v57  ;;  %v16005_v55 = vld [vmem:[#allocation98_spill] sm:$0xff] }
 0xc71   :  { %v12486_v11 = vsel %vm1825_vm0, %v6015_v1, %v6014_v45  ;;  %v5043_v1 = vmul.f32 %v15994_v4, %v12134_v35  ;;  %v12508_v17 = vpop.permute.xlu0 %5597  ;;  %v15999_v4 = vld [vmem:[#allocation96_spill] sm:$0xff] }
 0xc72   :  { %15991 = vst [vmem:[#allocation404_spill] sm:$0xff] %v12486_v11  ;;  %5636 = vperm.xlu1 %9036, %v5039_v34  }
 0xc73   :  { %15996 = vst [vmem:[#allocation37_spill] sm:$0xff] %v12508_v17 }
 0xc74   :  { %v5511_v3 = vpop.permute.xlu1 %5510  ;;  %5639 = vperm.xlu2 %9037, %v5040_v26   ;;  %v6024_v26 = vperm.slane %v5523_v5, %v12311_v42  ;;  %16000 = vst [vmem:[#allocation417_spill] sm:$0xff] %v12537_v32 }
 0xc75   :  { %v6017_v6 = vperm.slane %v5511_v3, %v12275_v33  ;;  %v15997_v3 = vld [vmem:[#allocation103_spill] sm:$0xff] }
 0xc76   :  { %v12498_v58 = vpop.permute.xlu2 %5540  ;;  %5804 = vperm.xlu0 %9035, %v5095_v20  }
 0xc77   :  { %v6019_v51 = vsel %vm1769_vm2, %v6018_v25, %v6017_v6  ;;  %v1766_v25 = vperm.slane %v15997_v3, %v12275_v33  ;;  %v5045_v6 = vmul.f32 %v11690_v62, %v12134_v35  ;;  %v12533_v62 = vmul.f32 %v15929_v36, %v12134_v35  ;;  %v16004_v36 = vld [vmem:[#allocation443_spill] sm:$0xff] }
 0xc78   :  { %v6021_v21 = vsel %vm1773_vm3, %v6020_v22, %v6019_v51  ;;  %v15998_v51 = vld [vmem:[#allocation105_spill] sm:$0xff] }
 0xc7a   :  { %5645 = vperm.xlu1 %9036, %v5042_v43   ;;  %v1772_v43 = vperm.slane %v15998_v51, %v12282_v46  ;;  %v16009_v51 = vld [vmem:[#allocation184_spill] sm:$0xff] }
 0xc7c   :  { %v5520_v34 = vpop.permute.xlu1 %5519  ;;  %5648 = vperm.xlu2 %9037, %v5043_v1   ;;  %v1768_v1 = vperm.slane %v15999_v4, %v12285_v49  ;;  %v1780_v4 = vperm.slane %v16009_v51, %v12311_v42 }
 0xc7d   :  { %v6022_v45 = vperm.slane %v5520_v34, %v12298_v18  ;;  %v12545_v34 = vmul.f32 %v15953_v53, %v12134_v35 }
 0xc7e   :  { %v12512_v10 = vpop.permute.xlu2 %5549  ;;  %5849 = vperm.xlu0 %9035, %v5110_v9   ;;  %v12541_v9 = vmul.f32 %v15945_v0, %v12134_v35  ;;  %v16006_v0 = vld [vmem:[#allocation101_spill] sm:$0xff] }
 0xc7f   :  { %v6023_v20 = vsel %vm1777_vm4, %v6022_v45, %v6021_v21  ;;  %v5049_v21 = vmul.f32 %v15925_v23, %v12134_v35  ;;  %16002 = vst [vmem:[#allocation27_spill] sm:$0xff] %v12545_v34  ;;  %v1770_v23 = vsel %vm1769_vm2, %v1768_v1, %v1766_v25  ;;  %v5098_v45 = vmul.f32 %v16004_v36, %v12134_v35  ;;  %v16008_v25 = vld [vmem:[#allocation107_spill] sm:$0xff] }
 0xc80   :  { %v6025_v22 = vsel %vm1781_vm5, %v6024_v26, %v6023_v20  ;;  %16001 = vst [vmem:[#allocation421_spill] sm:$0xff] %v12541_v9  ;;  %v1788_v20 = vperm.slane %v16006_v0, %v12322_v38  ;;  %v1774_v53 = vsel %vm1773_vm3, %v1772_v43, %v1770_v23  ;;  %v6030_v1 = vperm.slane %v12477_v52, %v12336_v16  ;;  %v12572_v23 = vpop.permute.xlu0 %5606  ;;  %v16011_v0 = vld [vmem:[#allocation66_spill] sm:$0xff]  ;;  %v16033_v9 = vld [vmem:[#allocation384_spill] sm:$0xff] }
 0xc81   :  { %v6027_v5 = vsel %vm1785_vm6, %v6026_v13, %v6025_v22  ;;  %v1776_v13 = vperm.slane %v16005_v55, %v12298_v18  ;;  %v6032_v36 = vperm.slane %v12368_v54, %v12329_v39  ;;  %v6049_v43 = vperm.slane %v12434_v19, %v12285_v49  ;;  %16010 = vst [vmem:[#allocation40_spill] sm:$0xff] %v12572_v23  ;;  %v16012_v52 = vld [vmem:[#allocation382_spill] sm:$0xff]  ;;  %v16013_v54 = vld [vmem:[#allocation108_spill] sm:$0xff]  ;;  %v16014_v19 = vld [vmem:[#allocation109_spill] sm:$0xff] }
 0xc82   :  { %5654 = vperm.xlu1 %9036, %v5045_v6   ;;  %v1827_v51 = vperm.slane %v16011_v0, %v12275_v33  ;;  %v1784_v11 = vperm.slane %v16013_v54, %v12305_v48  ;;  %v6042_v15 = vperm.slane %v12512_v10, %v12381_v40 }
 0xc83   :  { %v1778_v22 = vsel %vm1777_vm4, %v1776_v13, %v1774_v53  ;;  %v16016_v13 = vld [vmem:[#allocation65_spill] sm:$0xff] }
 0xc84   :  { %v5529_v26 = vpop.permute.xlu1 %5528  ;;  %5657 = vperm.xlu2 %9037, %v5046_v37   ;;  %v1792_v53 = vperm.slane %v16016_v13, %v12336_v16  ;;  %v1782_v0 = vsel %vm1781_vm5, %v1780_v4, %v1778_v22  ;;  %v16022_v13 = vld [vmem:[#allocation116_spill] sm:$0xff]  ;;  %v16023_v22 = vld [vmem:[#allocation118_spill] sm:$0xff]  ;;  %v16028_v4 = vld [vmem:[#allocation57_spill] sm:$0xff] }
 0xc85   :  { %v6028_v3 = vperm.slane %v5529_v26, %v12322_v38 }
 0xc86   :  { %v5559_v37 = vpop.permute.xlu2 %5558  ;;  %5813 = vperm.xlu0 %9035, %v5098_v45   ;;  %v5048_v45 = vmul.f32 %v16012_v52, %v12134_v35  ;;  %v16018_v52 = vld [vmem:[#allocation112_spill] sm:$0xff] }
 0xc87   :  { %v6029_v26 = vsel %vm1789_vm7, %v6028_v3, %v6027_v5  ;;  %v6048_v55 = vperm.slane %v5559_v37, %v12275_v33  ;;  %v12592_v37 = vmul.f32 %v15965_v12, %v12134_v35  ;;  %v16021_v12 = vld [vmem:[#allocation115_spill] sm:$0xff] }
 0xc88   :  { %v6031_v6 = vsel %vm1793_vm8, %v6030_v1, %v6029_v26  ;;  %v16017_v1 = vld [vmem:[#allocation111_spill] sm:$0xff]  ;;  %v12652_v47 = vpop.permute.xlu0 %5615 }
 0xc89   :  { %v12587_v5 = vsel %vm1769_vm2, %v6049_v43, %v6048_v55  ;;  %v6033_v3 = vsel %vm1797_vm9, %v6032_v36, %v6031_v6  ;;  %16015 = vst [vmem:[#allocation425_spill] sm:$0xff] %v12592_v37  ;;  %v1828_v26 = vperm.slane %v16017_v1, %v12285_v49  ;;  %v16019_v43 = vld [vmem:[#allocation113_spill] sm:$0xff]  ;;  %v12605_v6 = vmul.f32 %v15968_v29, %v12134_v35  ;;  %v16026_v36 = vld [vmem:[#allocation195_spill] sm:$0xff] }
 0xc8a   :  { %5663 = vperm.xlu1 %9036, %v5048_v45   ;;  %v1834_v55 = vperm.slane %v16019_v43, %v12311_v42  ;;  %v16024_v45 = vld [vmem:[#allocation177_spill] sm:$0xff]  ;;  %v16025_v43 = vld [vmem:[#allocation68_spill] sm:$0xff]  ;;  %v1830_v57 = vperm.slane %v16026_v36, %v12282_v46  ;;  %16036 = vst [vmem:[#allocation75_spill] sm:$0xff] %v12652_v47 }
 0xc8b   :  { %16020 = vst [vmem:[#allocation73_spill] sm:$0xff] %v12605_v6  ;;  %v1829_v1 = vsel %vm1769_vm2, %v1828_v26, %v1827_v51  ;;  %v5113_v54 = vmul.f32 %v16024_v45, %v12134_v35  ;;  %v1832_v29 = vperm.slane %v16025_v43, %v12298_v18  ;;  %v1786_v6 = vsel %vm1785_vm6, %v1784_v11, %v1782_v0  ;;  %v16027_v51 = vld [vmem:[#allocation119_spill] sm:$0xff]  ;;  %v16029_v45 = vld [vmem:[#allocation121_spill] sm:$0xff]  ;;  %v16030_v11 = vld [vmem:[#allocation166_spill] sm:$0xff] }
 0xc8c   :  { %v5538_v37 = vpop.permute.xlu1 %5537  ;;  %5666 = vperm.xlu2 %9037, %v5049_v21   ;;  %v1858_v23 = vperm.slane %v16029_v45, %v12275_v33  ;;  %v6036_v21 = vperm.slane %v12498_v58, %v12361_v60  ;;  %v12634_v0 = vmul.f32 %v16030_v11, %v12134_v35  ;;  %v6038_v26 = vperm.slane %v12400_v63, %v12358_v31  ;;  %v16032_v45 = vld [vmem:[#allocation123_spill] sm:$0xff]  ;;  %v16034_v11 = vld [vmem:[#allocation124_spill] sm:$0xff]  ;;  %v16035_v36 = vld [vmem:[#allocation125_spill] sm:$0xff] }
 0xc8d   :  { %v6034_v41 = vperm.slane %v5538_v37, %v12347_v2  ;;  %v16031_v37 = vld [vmem:[#allocation41_spill] sm:$0xff]  ;;  %v1790_v58 = vsel %vm1789_vm7, %v1788_v20, %v1786_v6  ;;  %v1831_v63 = vsel %vm1773_vm3, %v1830_v57, %v1829_v1  ;;  %v16038_v6 = vld [vmem:[#allocation128_spill] sm:$0xff]  ;;  %v16041_v57 = vld [vmem:[#allocation47_spill] sm:$0xff] }
 0xc8e   :  { %v12630_v43 = vpop.permute.xlu2 %5567  ;;  %5858 = vperm.xlu0 %9035, %v5113_v54   ;;  %v5051_v54 = vmul.f32 %v16033_v9, %v12134_v35  ;;  %v1861_v1 = vperm.slane %v16041_v57, %v12282_v46  ;;  %v1794_v7 = vsel %vm1793_vm8, %v1792_v53, %v1790_v58  ;;  %v16044_v9 = vld [vmem:[#allocation186_spill] sm:$0xff]  ;;  %v16048_v20 = vld [vmem:[#allocation44_spill] sm:$0xff]  ;;  %v6044_v58 = vperm.slane %v12419_v30, %v12386_v44 }
 0xc8f   :  { %v6035_v34 = vsel %vm1801_vm10, %v6034_v41, %v6033_v3  ;;  %v1800_v47 = vperm.slane %v16044_v9, %v12347_v2  ;;  %v16049_v53 = vld [vmem:[#allocation132_spill] sm:$0xff]  ;;  %v16053_v3 = vperm.slane %v16007_v8, %v12329_v39 }
 0xc90   :  { %v6037_v24 = vsel %vm1805_vm11, %v6036_v21, %v6035_v34  ;;  %v12661_v34 = vmul.f32 %v15972_v50, %v12134_v35  ;;  %v16040_v21 = vld [vmem:[#allocation390_spill] sm:$0xff]  ;;  %v1833_v50 = vsel %vm1777_vm4, %v1832_v29, %v1831_v63  ;;  %v12688_v29 = vmul.f32 %v15975_v59, %v12134_v35 }
 0xc91   :  { %v6039_v41 = vsel %vm1809_vm12, %v6038_v26, %v6037_v24  ;;  %v5052_v17 = vmul.f32 %v16040_v21, %v12134_v35  ;;  %v16043_v26 = vld [vmem:[#allocation49_spill] sm:$0xff]  ;;  %v1835_v59 = vsel %vm1781_vm5, %v1834_v55, %v1833_v50  ;;  %v12738_v55 = vpop.permute.xlu0 %5624 }
 0xc92   :  { %16039 = vst [vmem:[#allocation156_spill] sm:$0xff] %v12661_v34  ;;  %5672 = vperm.xlu1 %9036, %v5051_v54   ;;  %v16045_v34 = vld [vmem:[#allocation198_spill] sm:$0xff]  ;;  %v16046_v54 = vld [vmem:[#allocation445_spill] sm:$0xff] }
 0xc93   :  { %v1836_v21 = vperm.slane %v16045_v34, %v12305_v48  ;;  %v5101_v32 = vmul.f32 %v16046_v54, %v12134_v35  ;;  %16050 = vst [vmem:[#allocation373_spill] sm:$0xff] %v12688_v29 }
 0xc94   :  { %v5547_v57 = vpop.permute.xlu1 %5546  ;;  %5675 = vperm.xlu2 %9037, %v5052_v17   ;;  %v16052_v17 = vld [vmem:[#allocation209_spill] sm:$0xff]  ;;  %16065 = vst [vmem:[#allocation26_spill] sm:$0xff] %v12738_v55  ;;  %v16071_v55 = vld [vmem:[#allocation212_spill] sm:$0xff] }
 0xc95   :  { %v6040_v9 = vperm.slane %v5547_v57, %v12372_v27  ;;  %v1859_v54 = vperm.slane %v16052_v17, %v12285_v49  ;;  %v1798_v57 = vsel %vm1797_vm9, %v16053_v3, %v1794_v7  ;;  %v16054_v17 = vld [vmem:[#allocation134_spill] sm:$0xff]  ;;  %v1837_v63 = vsel %vm1785_vm6, %v1836_v21, %v1835_v59  ;;  %v16056_v7 = vld [vmem:[#allocation137_spill] sm:$0xff] }
 0xc96   :  { %v12696_v24 = vpop.permute.xlu2 %5576  ;;  %5822 = vperm.xlu0 %9035, %v5101_v32   ;;  %v1802_v10 = vsel %vm1801_vm10, %v1800_v47, %v1798_v57  ;;  %v16057_v3 = vld [vmem:[#allocation138_spill] sm:$0xff]  ;;  %v16059_v47 = vld [vmem:[#allocation141_spill] sm:$0xff]  ;;  %v16061_v59 = vperm.slane %v16018_v52, %v12361_v60  ;;  %v16067_v52 = vld [vmem:[#allocation179_spill] sm:$0xff] }
 0xc97   :  { %v6041_v34 = vsel %vm1813_vm13, %v6040_v9, %v6039_v41  ;;  %v1890_v30 = vperm.slane %v16057_v3, %v12285_v49  ;;  %v1860_v21 = vsel %vm1769_vm2, %v1859_v54, %v1858_v23  ;;  %v16063_v9 = vperm.slane %v16028_v4, %v12322_v38  ;;  %v16064_v23 = vld [vmem:[#allocation201_spill] sm:$0xff] }
 0xc98   :  { %v6043_v32 = vsel %vm1817_vm14, %v6042_v15, %v6041_v34  ;;  %v16060_v15 = vld [vmem:[#allocation391_spill] sm:$0xff]  ;;  %v1806_v3 = vsel %vm1805_vm11, %v16061_v59, %v1802_v10  ;;  %v1842_v54 = vperm.slane %v16064_v23, %v12329_v39  ;;  %v12744_v29 = vmul.f32 %v16067_v52, %v12134_v35  ;;  %v16068_v10 = vld [vmem:[#allocation52_spill] sm:$0xff] }
 0xc99   :  { %v6045_v41 = vsel %vm1821_vm15, %v6044_v58, %v6043_v32  ;;  %v5055_v34 = vmul.f32 %v16060_v15, %v12134_v35  ;;  %v16062_v58 = vld [vmem:[#allocation189_spill] sm:$0xff]  ;;  %v1839_v14 = vsel %vm1789_vm7, %v16063_v9, %v1837_v63  ;;  %v16070_v63 = vld [vmem:[#allocation42_spill] sm:$0xff]  ;;  %v1862_v23 = vsel %vm1773_vm3, %v1861_v1, %v1860_v21  ;;  %v16072_v52 = vld [vmem:[#allocation144_spill] sm:$0xff] }
 0xc9a   :  { %5681 = vperm.xlu1 %9036, %v12533_v62   ;;  %v1812_v32 = vperm.slane %v16062_v58, %v12372_v27  ;;  %v16069_v58 = vld [vmem:[#allocation465_spill] sm:$0xff]  ;;  %v1920_v9 = vperm.slane %v16070_v63, %v12275_v33  ;;  %v1865_v15 = vperm.slane %v16071_v55, %v12311_v42  ;;  %v1921_v50 = vperm.slane %v16072_v52, %v12285_v49 }
 0xc9b   :  { %v5116_v4 = vmul.f32 %v16069_v58, %v12134_v35  ;;  %v16074_v58 = vperm.slane %v16008_v25, %v12358_v31  ;;  %v16075_v63 = vperm.slane %v16022_v13, %v12336_v16  ;;  %v16076_v55 = vld [vmem:[#allocation145_spill] sm:$0xff]  ;;  %v16078_v25 = vld [vmem:[#allocation146_spill] sm:$0xff]  ;;  %v16079_v13 = vperm.slane %v16032_v45, %v12298_v18 }
 0xc9c   :  { %v5556_v57 = vpop.permute.xlu1 %5555  ;;  %5684 = vperm.xlu2 %9037, %v5055_v34  }
 0xc9d   :  { %v6046_v62 = vperm.slane %v5556_v57, %v12390_v28  ;;  %v1810_v34 = vsel %vm1809_vm12, %v16074_v58, %v1806_v3  ;;  %v1841_v1 = vsel %vm1793_vm8, %v16075_v63, %v1839_v14  ;;  %v1864_v14 = vsel %vm1777_vm4, %v16079_v13, %v1862_v23  ;;  %v16081_v63 = vld [vmem:[#allocation62_spill] sm:$0xff] }
 0xc9e   :  { %v12768_v21 = vpop.permute.xlu2 %5585  ;;  %5867 = vperm.xlu0 %9035, %v5116_v4   ;;  %v1814_v52 = vsel %vm1813_vm13, %v1812_v32, %v1810_v34  ;;  %v1843_v8 = vsel %vm1797_vm9, %v1842_v54, %v1841_v1  ;;  %v16080_v4 = vld [vmem:[#allocation223_spill] sm:$0xff]  ;;  %v5057_v57 = vmul.f32 %v16081_v63, %v12134_v35  ;;  %v1866_v45 = vsel %vm1781_vm5, %v1865_v15, %v1864_v14  ;;  %v16094_v15 = vld [vmem:[#allocation225_spill] sm:$0xff] }
 0xc9f   :  { %v12775_v59 = vsel %vm1825_vm0, %v6046_v62, %v6045_v41  ;;  %v1889_v58 = vperm.slane %v16080_v4, %v12275_v33  ;;  %v16082_v32 = vld [vmem:[#allocation147_spill] sm:$0xff]  ;;  %v12791_v41 = vmul.f32 %v15980_v56, %v12134_v35  ;;  %v12794_v62 = vsel %vm1769_vm2, %v1921_v50, %v1920_v9  ;;  %v16086_v4 = vld [vmem:[#allocation204_spill] sm:$0xff]  ;;  %v16087_v56 = vld [vmem:[#allocation394_spill] sm:$0xff] }
 0xca0   :  { %16077 = vst [vmem:[#allocation95_spill] sm:$0xff] %v12775_v59  ;;  %v16084_v23 = vperm.slane %v16021_v12, %v12381_v40  ;;  %v16085_v1 = vperm.slane %v16031_v37, %v12347_v2  ;;  %v1848_v63 = vperm.slane %v16086_v4, %v12358_v31  ;;  %v5058_v54 = vmul.f32 %v16087_v56, %v12134_v35  ;;  %v16088_v50 = vld [vmem:[#allocation148_spill] sm:$0xff]  ;;  %v16089_v9 = vld [vmem:[#allocation67_spill] sm:$0xff]  ;;  %v16091_v37 = vld [vmem:[#allocation61_spill] sm:$0xff] }
 0xca1   :  { %16083 = vst [vmem:[#allocation442_spill] sm:$0xff] %v12791_v41  ;;  %v16093_v4 = vld [vmem:[#allocation215_spill] sm:$0xff]  ;;  %v1891_v56 = vsel %vm1769_vm2, %v1890_v30, %v1889_v58  ;;  %v1894_v3 = vperm.slane %v16094_v15, %v12298_v18  ;;  %v16099_v15 = vld [vmem:[#allocation192_spill] sm:$0xff] }
 0xca2   :  { %v1818_v34 = vsel %vm1817_vm14, %v16084_v23, %v1814_v52  ;;  %v1845_v13 = vsel %vm1801_vm10, %v16085_v1, %v1843_v8  ;;  %5690 = vperm.xlu1 %9036, %v5057_v57   ;;  %v16092_v8 = vperm.slane %v16043_v26, %v12305_v48  ;;  %v1871_v57 = vperm.slane %v16093_v4, %v12336_v16  ;;  %v12836_v4 = vpop.permute.xlu0 %5633  ;;  %v16098_v58 = vld [vmem:[#allocation63_spill] sm:$0xff] }
 0xca3   :  { %v16096_v23 = vperm.slane %v16014_v19, %v12386_v44  ;;  %v1824_v59 = vperm.slane %v16099_v15, %v12390_v28  ;;  %v6053_v19 = vperm.slane %v12630_v43, %v12298_v18  ;;  %v7846_v15 = vld [vmem:[#allocation5 + $0x60] sm:$0xf] }
 0xca4   :  { %v1868_v1 = vsel %vm1785_vm6, %v16092_v8, %v1866_v45  ;;  %v5565_v12 = vpop.permute.xlu1 %5564  ;;  %5693 = vperm.xlu2 %9037, %v5058_v54   ;;  %v16097_v45 = vperm.slane %v16023_v22, %v12361_v60  ;;  %v16100_v22 = vperm.slane %v16035_v36, %v12322_v38 }
 0xca5   :  { %v1822_v26 = vsel %vm1821_vm15, %v16096_v23, %v1818_v34  ;;  %v6051_v30 = vperm.slane %v5565_v12, %v12282_v46  ;;  %v16101_v12 = vperm.slane %v16049_v53, %v12282_v46  ;;  %v16119_v53 = vld [vmem:[#allocation89_spill] sm:$0xff] }
 0xca6   :  { %v1847_v8 = vsel %vm1805_vm11, %v16097_v45, %v1845_v13  ;;  %v12846_v34 = vpop.permute.xlu2 %5594  ;;  %5831 = vperm.xlu0 %9035, %v12634_v0   ;;  %v1870_v13 = vsel %vm1789_vm7, %v16100_v22, %v1868_v1  ;;  %v16105_v22 = vld [vmem:[#allocation207_spill] sm:$0xff] }
 0xca7   :  { %v1849_v52 = vsel %vm1809_vm12, %v1848_v63, %v1847_v8  ;;  %v1893_v23 = vsel %vm1773_vm3, %v16101_v12, %v1891_v56  ;;  %v6055_v63 = vperm.slane %v12453_v61, %v12311_v42  ;;  %v6052_v43 = vsel %vm1773_vm3, %v6051_v30, %v12587_v5  ;;  %v16102_v8 = vld [vmem:[#allocation395_spill] sm:$0xff]  ;;  %v16159_v30 = vld [vmem:[#allocation70_spill] sm:$0xff] }
 0xca8   :  { %v1872_v45 = vsel %vm1793_vm8, %v1871_v57, %v1870_v13  ;;  %v1895_v0 = vsel %vm1777_vm4, %v1894_v3, %v1893_v23  ;;  %v5060_v36 = vmul.f32 %v16102_v8, %v12134_v35  ;;  %v6054_v1 = vsel %vm1777_vm4, %v6053_v19, %v6052_v43  ;;  %v16108_v23 = vld [vmem:[#allocation397_spill] sm:$0xff] }
 0xca9   :  { %v16104_v56 = vperm.slane %v16034_v11, %v12372_v27  ;;  %v1854_v5 = vperm.slane %v16105_v22, %v12386_v44  ;;  %v6056_v57 = vsel %vm1781_vm5, %v6055_v63, %v6054_v1  ;;  %v12876_v3 = vsel %vm1825_vm0, %v1824_v59, %v1822_v26  ;;  %v16110_v63 = vld [vmem:[#allocation217_spill] sm:$0xff]  ;;  %v16112_v1 = vld [vmem:[#allocation120_spill] sm:$0xff] }
 0xcaa   :  { %v5061_v43 = vmul.f32 %v16108_v23, %v12134_v35  ;;  %5699 = vperm.xlu1 %9036, %v5060_v36   ;;  %v16109_v11 = vperm.slane %v16048_v20, %v12329_v39  ;;  %v1877_v8 = vperm.slane %v16110_v63, %v12361_v60  ;;  %v16111_v59 = vperm.slane %v16059_v47, %v12311_v42  ;;  %v16141_v22 = vld [vmem:[#allocation417_spill] sm:$0xff]  ;;  %v7894_v36 = vld [vmem:[#allocation5 + $0xc0] sm:$0xf] }
 0xcab   :  { %v1851_v61 = vsel %vm1813_vm13, %v16104_v56, %v1849_v52  ;;  %v1900_v56 = vperm.slane %v16112_v1, %v12322_v38  ;;  %v16115_v20 = vperm.slane %v16027_v51, %v12381_v40  ;;  %v1983_v51 = vperm.slane %v16119_v53, %v12285_v49 }
 0xcac   :  { %v1874_v52 = vsel %vm1797_vm9, %v16109_v11, %v1872_v45  ;;  %v1897_v26 = vsel %vm1781_vm5, %v16111_v59, %v1895_v0  ;;  %v16116_v11 = vld [vmem:[#allocation253_spill] sm:$0xff]  ;;  %v5574_v47 = vpop.permute.xlu1 %5573  ;;  %5702 = vperm.xlu2 %9037, %v5061_v43   ;;  %v16121_v43 = vperm.slane %v16054_v17, %v12305_v48  ;;  %v6059_v12 = vperm.slane %v12696_v24, %v12322_v38 }
 0xcad   :  { %v1853_v45 = vsel %vm1817_vm14, %v16115_v20, %v1851_v61  ;;  %v1982_v63 = vperm.slane %v16116_v11, %v12275_v33  ;;  %v6057_v13 = vperm.slane %v5574_v47, %v12305_v48  ;;  %v16120_v61 = vperm.slane %v16038_v6, %v12347_v2  ;;  %v16122_v6 = vld [vmem:[#allocation402_spill] sm:$0xff] }
 0xcae   :  { %v1855_v23 = vsel %vm1821_vm15, %v1854_v5, %v1853_v45  ;;  %v1899_v11 = vsel %vm1785_vm6, %v16121_v43, %v1897_v26  ;;  %v12924_v59 = vpop.permute.xlu2 %5603  ;;  %5876 = vperm.xlu0 %9035, %v12744_v29   ;;  %v6061_v45 = vperm.slane %v16122_v6, %v12336_v16  ;;  %v16123_v47 = vld [vmem:[#allocation254_spill] sm:$0xff] }
 0xcaf   :  { %v1876_v20 = vsel %vm1801_vm10, %v16120_v61, %v1874_v52  ;;  %v1901_v53 = vsel %vm1789_vm7, %v1900_v56, %v1899_v11  ;;  %v12931_v52 = vpop.permute.xlu0 %5642  ;;  %v6058_v17 = vsel %vm1785_vm6, %v6057_v13, %v6056_v57  ;;  %v1984_v26 = vsel %vm1769_vm2, %v1983_v51, %v1982_v63  ;;  %v16124_v61 = vld [vmem:[#allocation399_spill] sm:$0xff]  ;;  %v16127_v6 = vld [vmem:[#allocation158_spill] sm:$0xff]  ;;  %v16128_v13 = vld [vmem:[#allocation133_spill] sm:$0xff] }
 0xcb0   :  { %v1878_v5 = vsel %vm1805_vm11, %v1877_v8, %v1876_v20  ;;  %v1987_v24 = vperm.slane %v16123_v47, %v12298_v18  ;;  %v5063_v43 = vmul.f32 %v16124_v61, %v12134_v35  ;;  %v6060_v29 = vsel %vm1789_vm7, %v6059_v12, %v6058_v17  ;;  %v16130_v47 = vld [vmem:[#allocation220_spill] sm:$0xff]  ;;  %v16132_v11 = vld [vmem:[#allocation29_spill] sm:$0xff] }
 0xcb1   :  { %v1985_v54 = vperm.slane %v16127_v6, %v12282_v46  ;;  %v6062_v57 = vsel %vm1793_vm8, %v6061_v45, %v6060_v29  ;;  %v16129_v63 = vperm.slane %v16128_v13, %v12358_v31  ;;  %v1883_v61 = vperm.slane %v16130_v47, %v12381_v40  ;;  %v16134_v29 = vld [vmem:[#allocation126_spill] sm:$0xff]  ;;  %v16143_v47 = vld [vmem:[#allocation129_spill] sm:$0xff]  ;;  %v16155_v6 = vld [vmem:[#allocation135_spill] sm:$0xff] }
 0xcb2   :  { %v16131_v12 = vperm.slane %v16068_v10, %v12336_v16  ;;  %v1906_v56 = vperm.slane %v16132_v11, %v12347_v2  ;;  %5708 = vperm.xlu1 %9036, %v5063_v43   ;;  %v16135_v13 = vperm.slane %v16134_v29, %v12390_v28  ;;  %v16140_v45 = vld [vmem:[#allocation458_spill] sm:$0xff] }
 0xcb3   :  { %v1880_v51 = vsel %vm1809_vm12, %v16129_v63, %v1878_v5  ;;  %v1986_v10 = vsel %vm1773_vm3, %v1985_v54, %v1984_v26  ;;  %v5107_v1 = vmul.f32 %v16140_v45, %v12134_v35  ;;  %v16144_v54 = vperm.slane %v16143_v47, %v12372_v27  ;;  %v8594_v45 = vld [vmem:[#allocation5 + $0xec] sm:$0xf0] }
 0xcb4   :  { %v1903_v17 = vsel %vm1793_vm8, %v16131_v12, %v1901_v53  ;;  %v12965_v5 = vsel %vm1825_vm0, %v16135_v13, %v1855_v23  ;;  %v16138_v53 = vld [vmem:[#allocation159_spill] sm:$0xff]  ;;  %v1988_v20 = vsel %vm1777_vm4, %v1987_v24, %v1986_v10  ;;  %v5583_v29 = vpop.permute.xlu1 %5582  ;;  %5711 = vperm.xlu2 %9037, %v16141_v22   ;;  %v16142_v23 = vld [vmem:[#allocation162_spill] sm:$0xff] }
 0xcb5   :  { %16136 = vst [vmem:[#allocation380_spill] sm:$0xff] %v12965_v5  ;;  %v1991_v12 = vperm.slane %v16138_v53, %v12305_v48  ;;  %v1989_v13 = vperm.slane %v16142_v23, %v12311_v42  ;;  %v1882_v26 = vsel %vm1813_vm13, %v16144_v54, %v1880_v51  ;;  %v16145_v53 = vperm.slane %v16056_v7, %v12329_v39  ;;  %v7910_v10 = vld [vmem:[#allocation5 + $0xe0] sm:$0xf]  ;;  %v16146_v7 = vld [vmem:[#allocation255_spill] sm:$0xff] }
 0xcb6   :  { %v6063_v24 = vperm.slane %v5583_v29, %v12329_v39  ;;  %v1884_v11 = vsel %vm1817_vm14, %v1883_v61, %v1882_v26  ;;  %v6065_v23 = vperm.slane %v12768_v21, %v12347_v2  ;;  %v12993_v63 = vpop.permute.xlu2 %5612  ;;  %5840 = vperm.xlu0 %9035, %v5107_v1   ;;  %v7911_v51 = vor.u32 %v8594_v45, %v7910_v10  ;;  %v16147_v29 = vld [vmem:[#allocation91_spill] sm:$0xff]  ;;  %v16148_v61 = vld [vmem:[#allocation160_spill] sm:$0xff]  ;;  %v7798_v5 = vld [vmem:[#allocation5] sm:$0xf] }
 0xcb7   :  { %v1905_v43 = vsel %vm1797_vm9, %v16145_v53, %v1903_v17  ;;  %v1990_v47 = vsel %vm1781_vm5, %v1989_v13, %v1988_v20  ;;  %v1993_v17 = vperm.slane %v16146_v7, %v12322_v38  ;;  %v6067_v54 = vperm.slane %v16147_v29, %v12361_v60  ;;  %v16150_v26 = vld [vmem:[#allocation400_spill] sm:$0xff]  ;;  %v16151_v20 = vld [vmem:[#allocation39_spill] sm:$0xff] }
 0xcb8   :  { %v1907_v22 = vsel %vm1801_vm10, %v1906_v56, %v1905_v43  ;;  %v6064_v53 = vsel %vm1797_vm9, %v6063_v24, %v6062_v57  ;;  %v1997_v56 = vperm.slane %v16148_v61, %v12329_v39  ;;  %v16149_v43 = vld [vmem:[#allocation161_spill] sm:$0xff]  ;;  %v5066_v1 = vmul.f32 %v16150_v26, %v12134_v35  ;;  %7451 = vmatpush.bf16.msra.mxu0 %v7911_v51  ;;  %v16153_v7 = vld [vmem:[#allocation227_spill] sm:$0xff]  ;;  %v16154_v24 = vld [vmem:[#allocation230_spill] sm:$0xff]  ;;  %v13016_v61 = vpop.permute.xlu0 %5651 }
 0xcb9   :  { %v6066_v10 = vsel %vm1801_vm10, %v6065_v23, %v6064_v53  ;;  %v16152_v13 = vperm.slane %v16151_v20, %v12361_v60  ;;  %v1912_v57 = vperm.slane %v16153_v7, %v12372_v27  ;;  %v1923_v29 = vperm.slane %v16154_v24, %v12282_v46  ;;  %v8590_v26 = vld [vmem:[#allocation5 + $0xcc] sm:$0xf0] }
 0xcba   :  { %v6068_v21 = vsel %vm1805_vm11, %v6067_v54, %v6066_v10  ;;  %v16156_v23 = vperm.slane %v16155_v6, %v12386_v44  ;;  %v1992_v53 = vsel %vm1785_vm6, %v1991_v12, %v1990_v47  ;;  %5717 = vperm.xlu1 %9036, %v5066_v1   ;;  %v16158_v7 = vld [vmem:[#allocation84_spill] sm:$0xff]  ;;  %v1995_v54 = vperm.slane %v16159_v30, %v12336_v16  ;;  %v16160_v10 = vld [vmem:[#allocation87_spill] sm:$0xff] }
 0xcbb   :  { %v1909_v45 = vsel %vm1805_vm11, %v16152_v13, %v1907_v22  ;;  %v16157_v22 = vld [vmem:[#allocation408_spill] sm:$0xff]  ;;  %v7895_v13 = vor.u32 %v8590_v26, %v7894_v36  ;;  %v2014_v41 = vperm.slane %v16160_v10, %v12285_v49  ;;  %v1994_v6 = vsel %vm1789_vm7, %v1993_v17, %v1992_v53  ;;  %v16162_v12 = vld [vmem:[#allocation139_spill] sm:$0xff] }
 0xcbc   :  { %v1886_v51 = vsel %vm1821_vm15, %v16156_v23, %v1884_v11  ;;  %v5067_v20 = vmul.f32 %v16157_v22, %v12134_v35  ;;  %v16161_v11 = vld [vmem:[#allocation71_spill] sm:$0xff]  ;;  %v16163_v47 = vperm.slane %v16162_v12, %v12358_v31  ;;  %v5592_v22 = vpop.permute.xlu1 %5591  ;;  %v1924_v53 = vsel %vm1773_vm3, %v1923_v29, %v12794_v62  ;;  %v8586_v12 = vld [vmem:[#allocation5 + $0xac] sm:$0xf0]  ;;  %v7862_v29 = vld [vmem:[#allocation5 + $0x80] sm:$0xf] }
 0xcbd   :  { %v2013_v23 = vperm.slane %v16161_v11, %v12275_v33  ;;  %v16164_v36 = vld [vmem:[#allocation479_spill] sm:$0xff]  ;;  %7452 = vmatpush.bf16.msra.mxu0 %v7895_v13  ;;  %v6069_v11 = vperm.slane %v5592_v22, %v12358_v31 }
 0xcbe   :  { %v1911_v1 = vsel %vm1809_vm12, %v16163_v47, %v1909_v45  ;;  %v5122_v26 = vmul.f32 %v16164_v36, %v12134_v35  ;;  %5720 = vperm.xlu2 %9037, %v5067_v20   ;;  %v16165_v30 = vld [vmem:[#allocation131_spill] sm:$0xff]  ;;  %v7878_v45 = vld [vmem:[#allocation5 + $0xa0] sm:$0xf]  ;;  %v1996_v47 = vsel %vm1793_vm8, %v1995_v54, %v1994_v6  ;;  %v16168_v20 = vld [vmem:[#allocation256_spill] sm:$0xff]  ;;  %v6071_v36 = vperm.slane %v12846_v34, %v12372_v27 }
 0xcbf   :  { %v16166_v24 = vperm.slane %v16165_v30, %v12390_v28  ;;  %v1913_v17 = vsel %vm1813_vm13, %v1912_v57, %v1911_v1  ;;  %v1999_v13 = vperm.slane %v16168_v20, %v12347_v2  ;;  %v13056_v30 = vpop.permute.xlu2 %5621  ;;  %v16169_v57 = vld [vmem:[#allocation69_spill] sm:$0xff]  ;;  %v16170_v62 = vld [vmem:[#allocation83_spill] sm:$0xff]  ;;  %v6070_v54 = vsel %vm1809_vm12, %v6069_v11, %v6068_v21  ;;  %v16172_v6 = vld [vmem:[#allocation36_spill] sm:$0xff] }
 0xcc0   :  { %5885 = vperm.xlu0 %9035, %v5122_v26   ;;  %v16171_v1 = vld [vmem:[#allocation37_spill] sm:$0xff]  ;;  %v16173_v34 = vld [vmem:[#allocation100_spill] sm:$0xff]  ;;  %v13070_v26 = vsel %vm1769_vm2, %v2014_v41, %v2013_v23  ;;  %v16175_v21 = vperm.slane %v16089_v9, %v12298_v18  ;;  %v16176_v23 = vld [vmem:[#allocation46_spill] sm:$0xff]  ;;  %v13097_v20 = vpop.permute.xlu0 %5660 }
 0xcc1   :  { %v13045_v10 = vsel %vm1825_vm0, %v16166_v24, %v1886_v51  ;;  %v7879_v51 = vor.u32 %v8586_v12, %v7878_v45  ;;  %v2001_v24 = vperm.slane %v16169_v57, %v12361_v60  ;;  %v6073_v22 = vperm.slane %v16171_v1, %v12381_v40  ;;  %v8582_v41 = vld [vmem:[#allocation5 + $0x8c] sm:$0xf0]  ;;  %v16179_v9 = vld [vmem:[#allocation163_spill] sm:$0xff] }
 0xcc2   :  { %16167 = vst [vmem:[#allocation462_spill] sm:$0xff] %v13045_v10  ;;  %v6072_v45 = vsel %vm1813_vm13, %v6071_v36, %v6070_v54  ;;  %v16174_v12 = vperm.slane %v16078_v25, %v12381_v40  ;;  %v1926_v11 = vsel %vm1777_vm4, %v16175_v21, %v1924_v53  ;;  %v1998_v1 = vsel %vm1797_vm9, %v1997_v56, %v1996_v47  ;;  %v16177_v25 = vld [vmem:[#allocation410_spill] sm:$0xff]  ;;  %v16180_v56 = vld [vmem:[#allocation164_spill] sm:$0xff]  ;;  %v16182_v21 = vld [vmem:[#allocation167_spill] sm:$0xff] }
 0xcc3   :  { %7453 = vmatpush.bf16.msra.mxu0 %v7879_v51  ;;  %v6074_v19 = vsel %vm1817_vm14, %v6073_v22, %v6072_v45  ;;  %v1929_v36 = vperm.slane %v16176_v23, %v12305_v48  ;;  %v2000_v51 = vsel %vm1801_vm10, %v1999_v13, %v1998_v1  ;;  %v5070_v54 = vmul.f32 %v16177_v25, %v12134_v35  ;;  %v16184_v25 = vld [vmem:[#allocation142_spill] sm:$0xff]  ;;  %v16187_v23 = vld [vmem:[#allocation259_spill] sm:$0xff]  ;;  %v16188_v1 = vld [vmem:[#allocation329_spill] sm:$0xff] }
 0xcc4   :  { %v1915_v57 = vsel %vm1817_vm14, %v16174_v12, %v1913_v17  ;;  %v16178_v17 = vld [vmem:[#allocation421_spill] sm:$0xff]  ;;  %v7863_v12 = vor.u32 %v8582_v41, %v7862_v29  ;;  %v16185_v29 = vperm.slane %v16184_v25, %v12386_v44  ;;  %v5601_v47 = vpop.permute.xlu1 %5600  ;;  %v2002_v45 = vsel %vm1805_vm11, %v2001_v24, %v2000_v51  ;;  %v16214_v13 = vld [vmem:[#allocation476_spill] sm:$0xff] }
 0xcc5   :  { %5726 = vperm.xlu1 %9036, %v16178_v17   ;;  %v16186_v17 = vperm.slane %v16076_v55, %v12311_v42  ;;  %v2005_v10 = vperm.slane %v16187_v23, %v12372_v27  ;;  %v4032_v8 = vperm.slane %v16188_v1, %v12285_v49  ;;  %v6075_v25 = vperm.slane %v5601_v47, %v12386_v44  ;;  %v16189_v55 = vld [vmem:[#allocation280_spill] sm:$0xff]  ;;  %v16190_v51 = vld [vmem:[#allocation229_spill] sm:$0xff]  ;;  %v16191_v1 = vld [vmem:[#allocation283_spill] sm:$0xff] }
 0xcc6   :  { %v1917_v41 = vsel %vm1821_vm15, %v16185_v29, %v1915_v57  ;;  %5729 = vperm.xlu2 %9037, %v5070_v54   ;;  %v8578_v57 = vld [vmem:[#allocation5 + $0x6c] sm:$0xf0]  ;;  %v6077_v54 = vperm.slane %v12924_v59, %v12390_v28  ;;  %v1918_v23 = vperm.slane %v16190_v51, %v12390_v28  ;;  %v16194_v59 = vld [vmem:[#allocation275_spill] sm:$0xff] }
 0xcc7   :  { %v1928_v53 = vsel %vm1781_vm5, %v16186_v17, %v1926_v11  ;;  %7454 = vmatpush.bf16.msra.mxu0 %v7863_v12  ;;  %v3845_v11 = vperm.slane %v16189_v55, %v12275_v33  ;;  %v13120_v12 = vpop.permute.xlu2 %5630  ;;  %v7847_v24 = vor.u32 %v8578_v57, %v7846_v15  ;;  %v3848_v17 = vperm.slane %v16191_v1, %v12282_v46  ;;  %v16192_v47 = vld [vmem:[#allocation396_spill] sm:$0xff]  ;;  %v16197_v1 = vld [vmem:[#allocation169_spill] sm:$0xff] }
 0xcc8   :  { %v1930_v29 = vsel %vm1785_vm6, %v1929_v36, %v1928_v53  ;;  %v4031_v0 = vperm.slane %v16192_v47, %v12275_v33  ;;  %v6076_v36 = vsel %vm1821_vm15, %v6075_v25, %v6074_v19  ;;  %v16193_v53 = vperm.slane %v16149_v43, %v12358_v31  ;;  %v16195_v15 = vld [vmem:[#allocation412_spill] sm:$0xff] }
 0xcc9   :  { %v3846_v14 = vperm.slane %v16194_v59, %v12285_v49  ;;  %v5072_v57 = vmul.f32 %v16195_v15, %v12134_v35  ;;  %v13138_v51 = vsel %vm1825_vm0, %v6077_v54, %v6076_v36  ;;  %v16198_v19 = vperm.slane %v16091_v37, %v12322_v38  ;;  %v8574_v59 = vld [vmem:[#allocation5 + $0x4c] sm:$0xf0]  ;;  %v16199_v54 = vld [vmem:[#allocation175_spill] sm:$0xff] }
 0xcca   :  { %v2004_v55 = vsel %vm1809_vm12, %v16193_v53, %v2002_v45  ;;  %16196 = vst [vmem:[#allocation103_spill] sm:$0xff] %v13138_v51  ;;  %v4033_v25 = vsel %vm1769_vm2, %v4032_v8, %v4031_v0  ;;  %v7830_v53 = vld [vmem:[#allocation5 + $0x40] sm:$0xf]  ;;  %v4034_v36 = vperm.slane %v16199_v54, %v12282_v46  ;;  %v16203_v0 = vld [vmem:[#allocation171_spill] sm:$0xff]  ;;  %v5894_v8 = vperm.slane %v16214_v13, %v12285_v49  ;;  %v16219_v37 = vld [vmem:[#allocation40_spill] sm:$0xff] }
 0xccb   :  { %7455 = vmatpush.bf16.msra.mxu0 %v7847_v24  ;;  %v1932_v43 = vsel %vm1789_vm7, %v16198_v19, %v1930_v29  ;;  %v2006_v45 = vsel %vm1813_vm13, %v2005_v10, %v2004_v55  ;;  %v3847_v15 = vsel %vm1769_vm2, %v3846_v14, %v3845_v11  ;;  %v16200_v24 = vld [vmem:[#allocation413_spill] sm:$0xff]  ;;  %v7831_v47 = vor.u32 %v8574_v59, %v7830_v53  ;;  %v16204_v14 = vld [vmem:[#allocation276_spill] sm:$0xff]  ;;  %v16209_v54 = vld [vmem:[#allocation143_spill] sm:$0xff] }
 0xccc   :  { %v5073_v51 = vmul.f32 %v16200_v24, %v12134_v35  ;;  %v13156_v29 = vsel %vm1825_vm0, %v1918_v23, %v1917_v41  ;;  %v3849_v10 = vsel %vm1773_vm3, %v3848_v17, %v3847_v15  ;;  %v3850_v11 = vperm.slane %v16204_v14, %v12298_v18  ;;  %v16205_v19 = vld [vmem:[#allocation332_spill] sm:$0xff]  ;;  %v5610_v53 = vpop.permute.xlu1 %5609  ;;  %v16208_v15 = vld [vmem:[#allocation398_spill] sm:$0xff]  ;;  %v13180_v24 = vpop.permute.xlu0 %5669 }
 0xccd   :  { %5735 = vperm.xlu1 %9036, %v5072_v57   ;;  %16202 = vst [vmem:[#allocation105_spill] sm:$0xff] %v13156_v29  ;;  %v4035_v55 = vsel %vm1773_vm3, %v4034_v36, %v4033_v25  ;;  %v4038_v57 = vperm.slane %v16205_v19, %v12311_v42  ;;  %v16206_v41 = vperm.slane %v16082_v32, %v12336_v16  ;;  %v16212_v19 = vld [vmem:[#allocation482_spill] sm:$0xff] }
 0xcce   :  { %5738 = vperm.xlu2 %9037, %v5073_v51   ;;  %v16207_v17 = vperm.slane %v16172_v6, %v12381_v40  ;;  %v4036_v25 = vperm.slane %v16208_v15, %v12298_v18  ;;  %v5893_v36 = vperm.slane %v16209_v54, %v12275_v33  ;;  %16210 = vst [vmem:[#allocation96_spill] sm:$0xff] %v13180_v24  ;;  %v7814_v51 = vld [vmem:[#allocation5 + $0x20] sm:$0xf] }
 0xccf   :  { %7456 = vmatpush.bf16.msra.mxu0 %v7831_v47  ;;  %v13170_v23 = vsel %vm1793_vm8, %v16206_v41, %v1932_v43  ;;  %v8570_v47 = vld [vmem:[#allocation5 + $0x2c] sm:$0xf0]  ;;  %v3851_v32 = vsel %vm1777_vm4, %v3850_v11, %v3849_v10  ;;  %v16211_v43 = vld [vmem:[#allocation285_spill] sm:$0xff]  ;;  %v5896_v6 = vperm.slane %v16212_v19, %v12282_v46  ;;  %v13187_v41 = vpop.permute.xlu2 %5639  ;;  %v6080_v29 = vperm.slane %v5610_v53, %v12285_v49  ;;  %v16218_v53 = vld [vmem:[#allocation278_spill] sm:$0xff] }
 0xcd0   :  { %v2008_v59 = vsel %vm1817_vm14, %v16207_v17, %v2006_v45  ;;  %v3854_v14 = vperm.slane %v16211_v43, %v12305_v48  ;;  %v7815_v45 = vor.u32 %v8570_v47, %v7814_v51  ;;  %v16213_v17 = vld [vmem:[#allocation315_spill] sm:$0xff]  ;;  %v4037_v54 = vsel %vm1777_vm4, %v4036_v25, %v4035_v55  ;;  %v16215_v10 = vld [vmem:[#allocation236_spill] sm:$0xff]  ;;  %v16217_v47 = vld [vmem:[#allocation414_spill] sm:$0xff] }
 0xcd1   :  { %v3852_v15 = vperm.slane %v16213_v17, %v12311_v42  ;;  %v16216_v43 = vperm.slane %v16158_v7, %v12386_v44  ;;  %v4039_v51 = vsel %vm1781_vm5, %v4038_v57, %v4037_v54  ;;  %v5075_v17 = vmul.f32 %v16217_v47, %v12134_v35  ;;  %v13204_v55 = vld [vmem:[#allocation2] sm:$0x3f]  ;;  %v16220_v54 = vld [vmem:[#allocation415_spill] sm:$0xff] }
 0xcd2   :  { %v4040_v25 = vperm.slane %v16218_v53, %v12305_v48  ;;  %v5895_v11 = vsel %vm1769_vm2, %v5894_v8, %v5893_v36  ;;  %v6079_v7 = vperm.slane %v16219_v37, %v12275_v33  ;;  %v16222_v8 = vld [vmem:[#allocation478_spill] sm:$0xff] }
 0xcd3   :  { %v2010_v19 = vsel %vm1821_vm15, %v16216_v43, %v2008_v59  ;;  %7457 = vmatpush.bf16.msra.mxu0 %v7815_v45  ;;  %v3853_v13 = vsel %vm1781_vm5, %v3852_v15, %v3851_v32  ;;  %v8566_v59 = vld [vmem:[#allocation5 + $0xc] sm:$0xf0]  ;;  %v5076_v43 = vmul.f32 %v16220_v54, %v12134_v35  ;;  %v5897_v45 = vsel %vm1773_vm3, %v5896_v6, %v5895_v11  ;;  %v16221_v15 = vld [vmem:[#allocation334_spill] sm:$0xff]  ;;  %v16224_v54 = vld [vmem:[#allocation401_spill] sm:$0xff] }
 0xcd4   :  { %v3855_v57 = vsel %vm1785_vm6, %v3854_v14, %v3853_v13  ;;  %v7799_v47 = vor.u32 %v8566_v59, %v7798_v5  ;;  %v4041_v32 = vsel %vm1785_vm6, %v4040_v25, %v4039_v51  ;;  %v4044_v53 = vperm.slane %v16221_v15, %v12336_v16  ;;  %v16223_v14 = vld [vmem:[#allocation97_spill] sm:$0xff]  ;;  %v5619_v11 = vpop.permute.xlu1 %5618  ;;  %v16226_v25 = vld [vmem:[#allocation279_spill] sm:$0xff]  ;;  %v16227_v59 = vld [vmem:[#allocation484_spill] sm:$0xff] }
 0xcd5   :  { %5744 = vperm.xlu1 %9036, %v5075_v17   ;;  %v5898_v36 = vperm.slane %v16222_v8, %v12298_v18  ;;  %v6081_v37 = vsel %vm1769_vm2, %v6080_v29, %v6079_v7  ;;  %v3858_v13 = vperm.slane %v16223_v14, %v12336_v16  ;;  %v4042_v6 = vperm.slane %v16224_v54, %v12322_v38  ;;  %v16225_v51 = vld [vmem:[#allocation261_spill] sm:$0xff]  ;;  %v16228_v14 = vld [vmem:[#allocation464_spill] sm:$0xff] }
 0xcd6   :  { %v6082_v5 = vperm.slane %v12993_v63, %v12282_v46  ;;  %5747 = vperm.xlu2 %9037, %v5076_v43   ;;  %v2011_v17 = vperm.slane %v16225_v51, %v12390_v28  ;;  %v3856_v29 = vperm.slane %v16226_v25, %v12322_v38  ;;  %v5902_v15 = vperm.slane %v16227_v59, %v12305_v48  ;;  %v16229_v51 = vld [vmem:[#allocation262_spill] sm:$0xff] }
 0xcd7   :  { %7458 = vmatpush.bf16.msra.mxu0 %v7799_v47  ;;  %v5899_v7 = vsel %vm1777_vm4, %v5898_v36, %v5897_v45  ;;  %v4043_v8 = vsel %vm1789_vm7, %v4042_v6, %v4041_v32  ;;  %v5900_v54 = vperm.slane %v16228_v14, %v12311_v42  ;;  %v6086_v43 = vperm.slane %v5619_v11, %v12311_v42  ;;  %v13241_v47 = vpop.permute.xlu2 %5648  ;;  %v16230_v36 = vld [vmem:[#allocation75_spill] sm:$0xff]  ;;  %v13249_v32 = vpop.permute.xlu0 %5678  ;;  %v16233_v11 = vld [vmem:[#allocation418_spill] sm:$0xff] }
 0xcd8   :  { %v6083_v63 = vsel %vm1773_vm3, %v6082_v5, %v6081_v37  ;;  %v2016_v22 = vperm.slane %v16229_v51, %v12282_v46  ;;  %v3857_v25 = vsel %vm1789_vm7, %v3856_v29, %v3855_v57  ;;  %v4045_v45 = vsel %vm1793_vm8, %v4044_v53, %v4043_v8  ;;  %16231 = vst [vmem:[#allocation443_spill] sm:$0xff] %v13249_v32  ;;  %v16232_v37 = vld [vmem:[#allocation328_spill] sm:$0xff]  ;;  %v16234_v51 = vld [vmem:[#allocation281_spill] sm:$0xff]  ;;  %v16235_v29 = vld [vmem:[#allocation43_spill] sm:$0xff] }
 0xcd9   :  { %v6084_v59 = vperm.slane %v16230_v36, %v12298_v18  ;;  %v3859_v6 = vsel %vm1793_vm8, %v3858_v13, %v3857_v25  ;;  %v4046_v5 = vperm.slane %v16232_v37, %v12329_v39  ;;  %v5078_v14 = vmul.f32 %v16233_v11, %v12134_v35  ;;  %v16236_v25 = vld [vmem:[#allocation336_spill] sm:$0xff]  ;;  %v16237_v32 = vld [vmem:[#allocation481_spill] sm:$0xff] }
 0xcda   :  { %v5901_v24 = vsel %vm1781_vm5, %v5900_v54, %v5899_v7  ;;  %v3860_v57 = vperm.slane %v16234_v51, %v12329_v39  ;;  %v5906_v8 = vperm.slane %v16235_v29, %v12336_v16  ;;  %v4050_v37 = vperm.slane %v16236_v25, %v12361_v60  ;;  %v16239_v51 = vld [vmem:[#allocation403_spill] sm:$0xff] }
 0xcdb   :  { %v5903_v53 = vsel %vm1785_vm6, %v5902_v15, %v5901_v24  ;;  %v6085_v36 = vsel %vm1777_vm4, %v6084_v59, %v6083_v63  ;;  %v4047_v13 = vsel %vm1797_vm9, %v4046_v5, %v4045_v45  ;;  %v5904_v11 = vperm.slane %v16237_v32, %v12322_v38  ;;  %v16238_v24 = vld [vmem:[#allocation290_spill] sm:$0xff] }
 0xcdc   :  { %v6087_v7 = vsel %vm1781_vm5, %v6086_v43, %v6085_v36  ;;  %v3861_v54 = vsel %vm1797_vm9, %v3860_v57, %v3859_v6  ;;  %v3864_v15 = vperm.slane %v16238_v24, %v12361_v60  ;;  %v4048_v29 = vperm.slane %v16239_v51, %v12347_v2  ;;  %v16240_v43 = vld [vmem:[#allocation317_spill] sm:$0xff]  ;;  %v5628_v5 = vpop.permute.xlu1 %5627 }
 0xcdd   :  { %5753 = vperm.xlu1 %9036, %v5078_v14   ;;  %v6088_v63 = vperm.slane %v13056_v30, %v12305_v48  ;;  %v13277_v45 = vsel %vm1825_vm0, %v2011_v17, %v2010_v19  ;;  %v2017_v59 = vsel %vm1773_vm3, %v2016_v22, %v13070_v26  ;;  %v3862_v32 = vperm.slane %v16240_v43, %v12347_v2  ;;  %v16241_v14 = vld [vmem:[#allocation27_spill] sm:$0xff]  ;;  %v16242_v22 = vld [vmem:[#allocation54_spill] sm:$0xff] }
 0xcde   :  { %v5905_v6 = vsel %vm1789_vm7, %v5904_v11, %v5903_v53  ;;  %5756 = vperm.xlu2 %9037, %v16241_v14   ;;  %v4049_v57 = vsel %vm1801_vm10, %v4048_v29, %v4047_v13  ;;  %v6092_v19 = vperm.slane %v5628_v5, %v12336_v16  ;;  %v5908_v25 = vperm.slane %v16242_v22, %v12329_v39  ;;  %v16243_v53 = vld [vmem:[#allocation26_spill] sm:$0xff] }
 0xcdf   :  { %v5907_v36 = vsel %vm1793_vm8, %v5906_v8, %v5905_v6  ;;  %v6089_v30 = vsel %vm1785_vm6, %v6088_v63, %v6087_v7  ;;  %v3863_v17 = vsel %vm1801_vm10, %v3862_v32, %v3861_v54  ;;  %v4051_v26 = vsel %vm1805_vm11, %v4050_v37, %v4049_v57  ;;  %v13295_v24 = vpop.permute.xlu2 %5657  ;;  %v16245_v7 = vld [vmem:[#allocation284_spill] sm:$0xff]  ;;  %v16246_v37 = vld [vmem:[#allocation330_spill] sm:$0xff]  ;;  %v16248_v6 = vld [vmem:[#allocation487_spill] sm:$0xff]  ;;  %v13317_v22 = vpop.permute.xlu0 %5687 }
 0xce0   :  { %v6090_v11 = vperm.slane %v16243_v53, %v12322_v38  ;;  %v16244_v8 = vperm.slane %v16180_v56, %v12298_v18  ;;  %v3866_v51 = vperm.slane %v16245_v7, %v12358_v31  ;;  %v3865_v54 = vsel %vm1805_vm11, %v3864_v15, %v3863_v17  ;;  %v16247_v63 = vld [vmem:[#allocation420_spill] sm:$0xff]  ;;  %v16249_v14 = vld [vmem:[#allocation338_spill] sm:$0xff] }
 0xce1   :  { %v4052_v29 = vperm.slane %v16246_v37, %v12358_v31  ;;  %v5081_v43 = vmul.f32 %v16247_v63, %v12134_v35  ;;  %v5909_v32 = vsel %vm1797_vm9, %v5908_v25, %v5907_v36  ;;  %v5912_v5 = vperm.slane %v16248_v6, %v12361_v60  ;;  %v16250_v15 = vld [vmem:[#allocation466_spill] sm:$0xff]  ;;  %v16252_v25 = vld [vmem:[#allocation405_spill] sm:$0xff]  ;;  %v16254_v37 = vld [vmem:[#allocation219_spill] sm:$0xff] }
 0xce2   :  { %v2019_v13 = vsel %vm1777_vm4, %v16244_v8, %v2017_v59  ;;  %v6091_v56 = vsel %vm1789_vm7, %v6090_v11, %v6089_v30  ;;  %v4056_v57 = vperm.slane %v16249_v14, %v12381_v40  ;;  %v5910_v17 = vperm.slane %v16250_v15, %v12347_v2  ;;  %v16251_v8 = vld [vmem:[#allocation110_spill] sm:$0xff]  ;;  %v16253_v30 = vld [vmem:[#allocation429_spill] sm:$0xff]  ;;  %v8626_v15 = vld [vmem:[#allocation5 + $0x1ec] sm:$0xf0] }
 0xce3   :  { %v4053_v59 = vsel %vm1809_vm12, %v4052_v29, %v4051_v26  ;;  %v6093_v53 = vsel %vm1793_vm8, %v6092_v19, %v6091_v56  ;;  %v2022_v36 = vperm.slane %v16251_v8, %v12305_v48  ;;  %v4054_v7 = vperm.slane %v16252_v25, %v12372_v27  ;;  %v16255_v19 = vld [vmem:[#allocation292_spill] sm:$0xff]  ;;  %v8038_v14 = vld [vmem:[#allocation5 + $0x1e0] sm:$0xf] }
 0xce4   :  { %v5082_v11 = vmul.f32 %v16253_v30, %v12134_v35  ;;  %v6094_v26 = vperm.slane %v13120_v12, %v12329_v39  ;;  %v3868_v29 = vperm.slane %v16254_v37, %v12372_v27  ;;  %v3867_v63 = vsel %vm1809_vm12, %v3866_v51, %v3865_v54  ;;  %v5637_v12 = vpop.permute.xlu1 %5636  ;;  %v16256_v51 = vld [vmem:[#allocation483_spill] sm:$0xff] }
 0xce5   :  { %5762 = vperm.xlu1 %9036, %v5081_v43   ;;  %v3870_v6 = vperm.slane %v16255_v19, %v12381_v40  ;;  %v5911_v56 = vsel %vm1801_vm10, %v5910_v17, %v5909_v32  ;;  %v4055_v8 = vsel %vm1813_vm13, %v4054_v7, %v4053_v59  ;;  %v8039_v43 = vor.u32 %v8626_v15, %v8038_v14  ;;  %v16258_v17 = vld [vmem:[#allocation287_spill] sm:$0xff]  ;;  %v16260_v14 = vld [vmem:[#allocation45_spill] sm:$0xff]  ;;  %v8022_v15 = vld [vmem:[#allocation5 + $0x1c0] sm:$0xf] }
 0xce6   :  { %v5913_v25 = vsel %vm1805_vm11, %v5912_v5, %v5911_v56  ;;  %v6095_v30 = vsel %vm1797_vm9, %v6094_v26, %v6093_v53  ;;  %5765 = vperm.xlu2 %9037, %v5082_v11   ;;  %v4057_v37 = vsel %vm1817_vm14, %v4056_v57, %v4055_v8  ;;  %v5914_v54 = vperm.slane %v16256_v51, %v12358_v31  ;;  %v16259_v57 = vld [vmem:[#allocation331_spill] sm:$0xff]  ;;  %v8622_v8 = vld [vmem:[#allocation5 + $0x1cc] sm:$0xf0] }
 0xce7   :  { %v6096_v19 = vperm.slane %v12836_v4, %v12347_v2  ;;  %v6098_v32 = vperm.slane %v5637_v12, %v12361_v60  ;;  %v16257_v59 = vperm.slane %v16170_v62, %v12311_v42  ;;  %v3872_v53 = vperm.slane %v16258_v17, %v12386_v44  ;;  %v13352_v26 = vpop.permute.xlu2 %5666  ;;  %7464 = vmatpush.bf16.msra.mxu1 %v8039_v43  ;;  %v16262_v43 = vld [vmem:[#allocation406_spill] sm:$0xff] }
 0xce8   :  { %v3869_v7 = vsel %vm1813_vm13, %v3868_v29, %v3867_v63  ;;  %v4058_v11 = vperm.slane %v16259_v57, %v12386_v44  ;;  %v5915_v56 = vsel %vm1809_vm12, %v5914_v54, %v5913_v25  ;;  %v5918_v62 = vperm.slane %v16260_v14, %v12381_v40  ;;  %v16261_v29 = vld [vmem:[#allocation467_spill] sm:$0xff]  ;;  %v13380_v57 = vpop.permute.xlu0 %5696  ;;  %v16267_v14 = vld [vmem:[#allocation485_spill] sm:$0xff] }
 0xce9   :  { %v2021_v5 = vsel %vm1781_vm5, %v16257_v59, %v2019_v13  ;;  %v3871_v4 = vsel %vm1817_vm14, %v3870_v6, %v3869_v7  ;;  %v6097_v13 = vsel %vm1801_vm10, %v6096_v19, %v6095_v30  ;;  %v5916_v63 = vperm.slane %v16261_v29, %v12372_v27  ;;  %v16263_v19 = vld [vmem:[#allocation431_spill] sm:$0xff] }
 0xcea   :  { %v4059_v12 = vsel %vm1821_vm15, %v4058_v11, %v4057_v37  ;;  %v6099_v51 = vsel %vm1805_vm11, %v6098_v32, %v6097_v13  ;;  %v8023_v59 = vor.u32 %v8622_v8, %v8022_v15  ;;  %v2169_v6 = vsel %vm2168_vm1, %v13277_v45, %v12876_v3  ;;  %v16264_v7 = vld [vmem:[#allocation423_spill] sm:$0xff]  ;;  %v16265_v3 = vld [vmem:[#allocation222_spill] sm:$0xff]  ;;  %v8618_v11 = vld [vmem:[#allocation5 + $0x1ac] sm:$0xf0] }
 0xceb   :  { %v2023_v25 = vsel %vm1785_vm6, %v2022_v36, %v2021_v5  ;;  %v4060_v54 = vperm.slane %v16262_v43, %v12390_v28  ;;  %v6100_v30 = vperm.slane %v13187_v41, %v12358_v31  ;;  %v3873_v37 = vsel %vm1821_vm15, %v3872_v53, %v3871_v4  ;;  %v8006_v53 = vld [vmem:[#allocation5 + $0x1a0] sm:$0xf] }
 0xcec   :  { %v5085_v17 = vmul.f32 %v16263_v19, %v12134_v35  ;;  %v5917_v32 = vsel %vm1813_vm13, %v5916_v63, %v5915_v56  ;;  %7465 = vmatpush.bf16.msra.mxu1 %v8023_v59  ;;  %v3874_v45 = vperm.slane %v16265_v3, %v12390_v28  ;;  %v16266_v4 = vperm.slane %v16215_v10, %v12329_v39  ;;  %v5646_v8 = vpop.permute.xlu1 %5645 }
 0xced   :  { %5771 = vperm.xlu1 %9036, %v16264_v7   ;;  %v4061_v36 = vsel %vm1825_vm0, %v4060_v54, %v4059_v12  ;;  %v5919_v5 = vsel %vm1817_vm14, %v5918_v62, %v5917_v32  ;;  %v6101_v41 = vsel %vm1809_vm12, %v6100_v30, %v6099_v51  ;;  %v5920_v13 = vperm.slane %v16267_v14, %v12386_v44  ;;  %v7990_v32 = vld [vmem:[#allocation5 + $0x180] sm:$0xf]  ;;  %v16272_v7 = vld [vmem:[#allocation264_spill] sm:$0xff] }
 0xcee   :  { %v1936_v56 = vsel %vm1797_vm9, %v16266_v4, %v13170_v23  ;;  %v6102_v15 = vperm.slane %v12931_v52, %v12372_v27  ;;  %5774 = vperm.xlu2 %9037, %v5085_v17   ;;  %v8007_v62 = vor.u32 %v8618_v11, %v8006_v53  ;;  %v16268_v12 = vperm.slane %v13204_v55, 0  ;;  %v16274_v53 = vld [vmem:[#allocation333_spill] sm:$0xff] }
 0xcef   :  { %v16269_v63 = vperm.slane %v16182_v21, %v12322_v38  ;;  %v3875_v10 = vsel %vm1825_vm0, %v3874_v45, %v3873_v37  ;;  %v6104_v23 = vperm.slane %v5646_v8, %v12381_v40  ;;  %v5921_v59 = vsel %vm1821_vm15, %v5920_v13, %v5919_v5  ;;  %v13404_v54 = vpop.permute.xlu2 %5675  ;;  %v16270_v21 = vld [vmem:[#allocation341_spill] sm:$0xff]  ;;  %v16275_v13 = vld [vmem:[#allocation295_spill] sm:$0xff]  ;;  %v16276_v8 = vld [vmem:[#allocation434_spill] sm:$0xff] }
 0xcf0   :  { %v2181_v29 = vadd.f32 %v2169_v6, %v16268_v12  ;;  %v6106_v52 = vperm.slane %v13241_v47, %v12386_v44  ;;  %v6103_v43 = vsel %vm1813_vm13, %v6102_v15, %v6101_v41  ;;  %v4217_v6 = vsel %vm2168_vm1, %v4061_v36, %v3875_v10  ;;  %7466 = vmatpush.bf16.msra.mxu1 %v8007_v62  ;;  %v8614_v47 = vld [vmem:[#allocation5 + $0x18c] sm:$0xf0]  ;;  %v16273_v45 = vld [vmem:[#allocation433_spill] sm:$0xff] }
 0xcf1   :  { %v2025_v51 = vsel %vm1789_vm7, %v16269_v63, %v2023_v25  ;;  %v4062_v30 = vperm.slane %v16270_v21, %v12275_v33  ;;  %v16271_v25 = vld [vmem:[#allocation127_spill] sm:$0xff]  ;;  %v6108_v19 = vperm.slane %v13016_v61, %v12390_v28  ;;  %v6105_v17 = vsel %vm1817_vm14, %v6104_v23, %v6103_v43  ;;  %v16277_v63 = vld [vmem:[#allocation78_spill] sm:$0xff] }
 0xcf2   :  { %v5922_v37 = vperm.slane %v16271_v25, %v12390_v28  ;;  %v2028_v3 = vperm.slane %v16272_v7, %v12329_v39  ;;  %v5087_v36 = vmul.f32 %v16273_v45, %v12134_v35  ;;  %v6107_v5 = vsel %vm1821_vm15, %v6106_v52, %v6105_v17  ;;  %v16279_v21 = vld [vmem:[#allocation82_spill] sm:$0xff]  ;;  %v16281_v17 = vld [vmem:[#allocation407_spill] sm:$0xff] }
 0xcf3   :  { %v7991_v41 = vor.u32 %v8614_v47, %v7990_v32  ;;  %v4063_v11 = vperm.slane %v16274_v53, %v12285_v49  ;;  %v6109_v61 = vsel %vm1825_vm0, %v6108_v19, %v6107_v5  ;;  %v4229_v14 = vadd.f32 %v4217_v6, %v2181_v29  ;;  %v7974_v29 = vld [vmem:[#allocation5 + $0x160] sm:$0xf]  ;;  %v8610_v6 = vld [vmem:[#allocation5 + $0x16c] sm:$0xf0] }
 0xcf4   :  { %v5923_v4 = vsel %vm1825_vm0, %v5922_v37, %v5921_v59  ;;  %v3876_v15 = vperm.slane %v16275_v13, %v12275_v33  ;;  %v5088_v62 = vmul.f32 %v16276_v8, %v12134_v35  ;;  %v16278_v59 = vld [vmem:[#allocation343_spill] sm:$0xff]  ;;  %v2042_v25 = vperm.slane %v16279_v21, %v12390_v28  ;;  %v16280_v37 = vld [vmem:[#allocation288_spill] sm:$0xff]  ;;  %v5655_v47 = vpop.permute.xlu1 %5654 }
 0xcf5   :  { %5780 = vperm.xlu1 %9036, %v5087_v36   ;;  %v6265_v12 = vsel %vm2168_vm1, %v6109_v61, %v5923_v4  ;;  %7467 = vmatpush.bf16.msra.mxu1 %v7991_v41  ;;  %v4064_v23 = vsel %vm1769_vm2, %v4063_v11, %v4062_v30  ;;  %v4067_v52 = vperm.slane %v16278_v59, %v12298_v18  ;;  %v16282_v30 = vld [vmem:[#allocation170_spill] sm:$0xff]  ;;  %v13449_v11 = vpop.permute.xlu0 %5705  ;;  %v16289_v59 = vld [vmem:[#allocation297_spill] sm:$0xff] }
 0xcf6   :  { %v6277_v43 = vadd.f32 %v6265_v12, %v4229_v14  ;;  %v3877_v19 = vperm.slane %v16280_v37, %v12285_v49  ;;  %v4065_v32 = vperm.slane %v16281_v17, %v12282_v46  ;;  %5783 = vperm.xlu2 %9037, %v5088_v62   ;;  %v7975_v7 = vor.u32 %v8610_v6, %v7974_v29  ;;  %v16286_v61 = vld [vmem:[#allocation174_spill] sm:$0xff]  ;;  %v16291_v37 = vld [vmem:[#allocation335_spill] sm:$0xff] }
 0xcf7   :  { %v16283_v36 = vperm.slane %v16098_v58, %v12347_v2  ;;  %v16284_v41 = vperm.slane %v16173_v34, %v12336_v16  ;;  %v13458_v62 = vpop.permute.xlu2 %5684  ;;  %v16287_v34 = vld [vmem:[#allocation172_spill] sm:$0xff]  ;;  %v16292_v17 = vld [vmem:[#allocation435_spill] sm:$0xff] }
 0xcf8   :  { %v13451_v4 = vpack.c.bf16 %v6277_v43, %v6277_v43  ;;  %v3878_v8 = vsel %vm1769_vm2, %v3877_v19, %v3876_v15  ;;  %v4066_v58 = vsel %vm1773_vm3, %v4065_v32, %v4064_v23  ;;  %v3881_v43 = vperm.slane %v16289_v59, %v12298_v18  ;;  %v8606_v15 = vld [vmem:[#allocation5 + $0x14c] sm:$0xf0]  ;;  %v16296_v59 = vld [vmem:[#allocation345_spill] sm:$0xff] }
 0xcf9   :  { %v1938_v5 = vsel %vm1801_vm10, %v16283_v36, %v1936_v56  ;;  %v2027_v53 = vsel %vm1793_vm8, %v16284_v41, %v2025_v51  ;;  %7468 = vmatpush.bf16.msra.mxu1 %v7975_v7  ;;  %v16288_v51 = vld [vmem:[#allocation85_spill] sm:$0xff]  ;;  %v4068_v29 = vsel %vm1777_vm4, %v4067_v52, %v4066_v58  ;;  %v16290_v23 = vperm.slane %v16088_v50, %v12361_v60  ;;  %v16293_v36 = vld [vmem:[#allocation176_spill] sm:$0xff] }
 0xcfa   :  { %16285 = vst [vmem:[#allocation98_spill] sm:$0xff] %v13451_v4  ;;  %v2029_v13 = vsel %vm1797_vm9, %v2028_v3, %v2027_v53  ;;  %v3879_v12 = vperm.slane %v16288_v51, %v12282_v46  ;;  %7459 = vmatmul.bf16.vlgmr.msra.gmra.mxu0 %v13451_v4  ;;  %v7958_v3 = vld [vmem:[#allocation5 + $0x140] sm:$0xf]  ;;  %v4069_v19 = vperm.slane %v16291_v37, %v12311_v42  ;;  %v16295_v50 = vld [vmem:[#allocation265_spill] sm:$0xff] }
 0xcfb   :  { %v13472_v6 = vsel %vm1805_vm11, %v16290_v23, %v1938_v5  ;;  %v5090_v32 = vmul.f32 %v16292_v17, %v12134_v35  ;;  %v7959_v7 = vor.u32 %v8606_v15, %v7958_v3  ;;  %v16294_v41 = vperm.slane %v16197_v1, %v12347_v2  ;;  %v16297_v3 = vld [vmem:[#allocation437_spill] sm:$0xff]  ;;  %v16299_v17 = vld [vmem:[#allocation490_spill] sm:$0xff] }
 0xcfc   :  { %v2034_v58 = vperm.slane %v16295_v50, %v12358_v31  ;;  %v3880_v5 = vsel %vm1773_vm3, %v3879_v12, %v3878_v8  ;;  %v4070_v51 = vsel %vm1781_vm5, %v4069_v19, %v4068_v29  ;;  %v4073_v23 = vperm.slane %v16296_v59, %v12322_v38  ;;  %v16298_v1 = vld [vmem:[#allocation409_spill] sm:$0xff]  ;;  %v7942_v12 = vld [vmem:[#allocation5 + $0x120] sm:$0xf]  ;;  %v8602_v29 = vld [vmem:[#allocation5 + $0x12c] sm:$0xf0] }
 0xcfd   :  { %v2031_v53 = vsel %vm1801_vm10, %v16294_v41, %v2029_v13  ;;  %v5091_v15 = vmul.f32 %v16297_v3, %v12134_v35  ;;  %5789 = vperm.xlu1 %9036, %v5090_v32   ;;  %7469 = vmatpush.bf16.msra.mxu1 %v7959_v7  ;;  %v3882_v37 = vsel %vm1777_vm4, %v3881_v43, %v3880_v5  ;;  %v16300_v19 = vld [vmem:[#allocation173_spill] sm:$0xff]  ;;  %v16302_v43 = vld [vmem:[#allocation291_spill] sm:$0xff]  ;;  %v5664_v5 = vpop.permute.xlu1 %5663 }
 0xcfe   :  { %v4071_v13 = vperm.slane %v16298_v1, %v12305_v48  ;;  %v5924_v41 = vperm.slane %v16299_v17, %v12275_v33  ;;  %v6110_v8 = vperm.slane %v5655_v47, %v12275_v33  ;;  %v16301_v59 = vperm.slane %v16179_v9, %v12361_v60  ;;  %v16303_v17 = vld [vmem:[#allocation486_spill] sm:$0xff]  ;;  %v16304_v9 = vld [vmem:[#allocation321_spill] sm:$0xff] }
 0xcff   :  { %v3883_v7 = vperm.slane %v16302_v43, %v12311_v42  ;;  %5792 = vperm.xlu2 %9037, %v5091_v15   ;;  %v7943_v3 = vor.u32 %v8602_v29, %v7942_v12  ;;  %v5925_v56 = vperm.slane %v16303_v17, %v12285_v49  ;;  %v6111_v50 = vperm.slane %v13295_v24, %v12285_v49  ;;  %v13518_v12 = vpop.permute.xlu2 %5693  ;;  %v13523_v29 = vpop.permute.xlu0 %5714  ;;  %v8166_v17 = vld [vmem:[#allocation5 + $0x2e0] sm:$0xf] }
 0xd00   :  { %v2033_v32 = vsel %vm1805_vm11, %v16301_v59, %v2031_v53  ;;  %v4072_v47 = vsel %vm1785_vm6, %v4071_v13, %v4070_v51  ;;  %v3885_v45 = vperm.slane %v16304_v9, %v12305_v48  ;;  %v16305_v59 = vld [vmem:[#allocation102_spill] sm:$0xff]  ;;  %v16306_v51 = vld [vmem:[#allocation492_spill] sm:$0xff]  ;;  %v16307_v9 = vld [vmem:[#allocation469_spill] sm:$0xff] }
 0xd01   :  { %v2035_v1 = vsel %vm1809_vm12, %v2034_v58, %v2033_v32  ;;  %v3884_v53 = vsel %vm1781_vm5, %v3883_v7, %v3882_v37  ;;  %v3887_v43 = vperm.slane %v16305_v59, %v12322_v38  ;;  %v4074_v15 = vsel %vm1789_vm7, %v4073_v23, %v4072_v47  ;;  %7470 = vmatpush.bf16.msra.mxu1 %v7943_v3  ;;  %v7926_v37 = vld [vmem:[#allocation5 + $0x100] sm:$0xf]  ;;  %v8598_v7 = vld [vmem:[#allocation5 + $0x10c] sm:$0xf0]  ;;  %v16308_v47 = vld [vmem:[#allocation439_spill] sm:$0xff] }
 0xd02   :  { %v5926_v58 = vsel %vm1769_vm2, %v5925_v56, %v5924_v41  ;;  %v5929_v13 = vperm.slane %v16306_v51, %v12298_v18  ;;  %v6112_v24 = vsel %vm1769_vm2, %v6111_v50, %v6110_v8  ;;  %v6115_v32 = vperm.slane %v5664_v5, %v12298_v18  ;;  %v8658_v59 = vld [vmem:[#allocation5 + $0x2ec] sm:$0xf0]  ;;  %v16309_v51 = vld [vmem:[#allocation238_spill] sm:$0xff]  ;;  %v16311_v5 = vld [vmem:[#allocation337_spill] sm:$0xff] }
 0xd03   :  { %v5927_v23 = vperm.slane %v16307_v9, %v12282_v46  ;;  %v5093_v3 = vmul.f32 %v16308_v47, %v12134_v35  ;;  %v6113_v56 = vperm.slane %v13097_v20, %v12282_v46  ;;  %v7927_v41 = vor.u32 %v8598_v7, %v7926_v37 }
 0xd04   :  { %v16310_v8 = vperm.slane %v16203_v0, %v12372_v27  ;;  %v4075_v52 = vperm.slane %v16311_v5, %v12336_v16  ;;  %v8167_v9 = vor.u32 %v8658_v59, %v8166_v17  ;;  %v3886_v14 = vsel %vm1785_vm6, %v3885_v45, %v3884_v53  ;;  %v8150_v17 = vld [vmem:[#allocation5 + $0x2c0] sm:$0xf]  ;;  %v8654_v59 = vld [vmem:[#allocation5 + $0x2cc] sm:$0xf0]  ;;  %v16312_v45 = vld [vmem:[#allocation347_spill] sm:$0xff] }
 0xd05   :  { %v5928_v20 = vsel %vm1773_vm3, %v5927_v23, %v5926_v58  ;;  %v6114_v37 = vsel %vm1773_vm3, %v6113_v56, %v6112_v24  ;;  %5798 = vperm.xlu1 %9036, %v5093_v3   ;;  %7471 = vmatpush.bf16.msra.mxu1 %v7927_v41  ;;  %v3888_v7 = vsel %vm1789_vm7, %v3887_v43, %v3886_v14  ;;  %v16313_v58 = vld [vmem:[#allocation488_spill] sm:$0xff]  ;;  %v5673_v3 = vpop.permute.xlu1 %5672  ;;  %v16314_v14 = vld [vmem:[#allocation425_spill] sm:$0xff]  ;;  %v16318_v5 = vld [vmem:[#allocation411_spill] sm:$0xff] }
 0xd06   :  { %v2037_v50 = vsel %vm1813_vm13, %v16310_v8, %v2035_v1  ;;  %v4076_v0 = vsel %vm1793_vm8, %v4075_v52, %v4074_v15  ;;  %v5930_v1 = vsel %vm1777_vm4, %v5929_v13, %v5928_v20  ;;  %v6116_v8 = vsel %vm1777_vm4, %v6115_v32, %v6114_v37  ;;  %7477 = vmatpush.bf16.msra.mxu2 %v8167_v9  ;;  %v16315_v43 = vld [vmem:[#allocation268_spill] sm:$0xff]  ;;  %v16316_v13 = vld [vmem:[#allocation323_spill] sm:$0xff]  ;;  %v16317_v56 = vld [vmem:[#allocation293_spill] sm:$0xff] }
 0xd07   :  { %v4079_v53 = vperm.slane %v16312_v45, %v12347_v2  ;;  %v5931_v23 = vperm.slane %v16313_v58, %v12311_v42  ;;  %v6117_v24 = vperm.slane %v13352_v26, %v12311_v42  ;;  %5801 = vperm.xlu2 %9037, %v16314_v14   ;;  %v8151_v52 = vor.u32 %v8654_v59, %v8150_v17  ;;  %v16319_v26 = vld [vmem:[#allocation53_spill] sm:$0xff]  ;;  %v13569_v59 = vpop.permute.xlu2 %5702  ;;  %v13589_v10 = vpop.permute.xlu0 %5723 }
 0xd08   :  { %v2040_v15 = vperm.slane %v16315_v43, %v12386_v44  ;;  %v3891_v32 = vperm.slane %v16316_v13, %v12329_v39  ;;  %v3889_v41 = vperm.slane %v16317_v56, %v12336_v16  ;;  %v4077_v9 = vperm.slane %v16318_v5, %v12329_v39  ;;  %v16320_v43 = vld [vmem:[#allocation471_spill] sm:$0xff]  ;;  %v16321_v56 = vld [vmem:[#allocation96_spill] sm:$0xff] }
 0xd09   :  { %v5932_v20 = vsel %vm1781_vm5, %v5931_v23, %v5930_v1  ;;  %v5935_v37 = vperm.slane %v16319_v26, %v12322_v38  ;;  %v6118_v45 = vsel %vm1781_vm5, %v6117_v24, %v6116_v8  ;;  %v6121_v17 = vperm.slane %v5673_v3, %v12322_v38  ;;  %v8134_v1 = vld [vmem:[#allocation5 + $0x2a0] sm:$0xf]  ;;  %v8650_v23 = vld [vmem:[#allocation5 + $0x2ac] sm:$0xf0]  ;;  %v16323_v3 = vld [vmem:[#allocation441_spill] sm:$0xff] }
 0xd0a   :  { %v3890_v58 = vsel %vm1793_vm8, %v3889_v41, %v3888_v7  ;;  %v4078_v14 = vsel %vm1797_vm9, %v4077_v9, %v4076_v0  ;;  %v5933_v13 = vperm.slane %v16320_v43, %v12305_v48  ;;  %v6119_v5 = vperm.slane %v16321_v56, %v12305_v48  ;;  %7478 = vmatpush.bf16.msra.mxu2 %v8151_v52  ;;  %v16322_v26 = vld [vmem:[#allocation302_spill] sm:$0xff]  ;;  %v16324_v41 = vld [vmem:[#allocation33_spill] sm:$0xff]  ;;  %v16326_v43 = vld [vmem:[#allocation339_spill] sm:$0xff] }
 0xd0b   :  { %v3893_v8 = vperm.slane %v16322_v26, %v12347_v2  ;;  %v4080_v24 = vsel %vm1801_vm10, %v4079_v53, %v4078_v14  ;;  %v5096_v47 = vmul.f32 %v16323_v3, %v12134_v35  ;;  %v8135_v7 = vor.u32 %v8650_v23, %v8134_v1  ;;  %v16327_v3 = vld [vmem:[#allocation350_spill] sm:$0xff] }
 0xd0c   :  { %v16325_v0 = vperm.slane %v16324_v41, %v12381_v40  ;;  %v4081_v56 = vperm.slane %v16326_v43, %v12361_v60  ;;  %v5934_v52 = vsel %vm1785_vm6, %v5933_v13, %v5932_v20  ;;  %v6120_v26 = vsel %vm1785_vm6, %v6119_v5, %v6118_v45  ;;  %v16328_v20 = vld [vmem:[#allocation489_spill] sm:$0xff]  ;;  %v8646_v5 = vld [vmem:[#allocation5 + $0x28c] sm:$0xf0] }
 0xd0d   :  { %v3892_v14 = vsel %vm1797_vm9, %v3891_v32, %v3890_v58  ;;  %v5936_v1 = vsel %vm1789_vm7, %v5935_v37, %v5934_v52  ;;  %v6122_v23 = vsel %vm1789_vm7, %v6121_v17, %v6120_v26  ;;  %5807 = vperm.xlu1 %9036, %v5096_v47   ;;  %v4085_v41 = vperm.slane %v16327_v3, %v12372_v27  ;;  %v16329_v32 = vld [vmem:[#allocation296_spill] sm:$0xff]  ;;  %v16330_v47 = vld [vmem:[#allocation79_spill] sm:$0xff] }
 0xd0e   :  { %v2039_v9 = vsel %vm1817_vm14, %v16325_v0, %v2037_v50  ;;  %v4082_v50 = vsel %vm1805_vm11, %v4081_v56, %v4080_v24  ;;  %v5937_v13 = vperm.slane %v16328_v20, %v12336_v16  ;;  %v6123_v45 = vperm.slane %v13404_v54, %v12336_v16  ;;  %7479 = vmatpush.bf16.msra.mxu2 %v8135_v7  ;;  %v5682_v24 = vpop.permute.xlu1 %5681  ;;  %v16331_v0 = vld [vmem:[#allocation156_spill] sm:$0xff]  ;;  %v16332_v56 = vld [vmem:[#allocation494_spill] sm:$0xff]  ;;  %v16334_v20 = vld [vmem:[#allocation443_spill] sm:$0xff] }
 0xd0f   :  { %v2041_v53 = vsel %vm1821_vm15, %v2040_v15, %v2039_v9  ;;  %v8118_v15 = vld [vmem:[#allocation5 + $0x280] sm:$0xf]  ;;  %v3895_v37 = vperm.slane %v16329_v32, %v12361_v60  ;;  %v3894_v17 = vsel %vm1801_vm10, %v3893_v8, %v3892_v14  ;;  %v4083_v58 = vperm.slane %v16330_v47, %v12358_v31  ;;  %5846 = vperm.xlu2 %9037, %v16331_v0  }
 0xd10   :  { %v8119_v9 = vor.u32 %v8646_v5, %v8118_v15  ;;  %v5938_v43 = vsel %vm1793_vm8, %v5937_v13, %v5936_v1  ;;  %v5941_v54 = vperm.slane %v16332_v56, %v12347_v2  ;;  %v6124_v7 = vsel %vm1793_vm8, %v6123_v45, %v6122_v23  ;;  %v16333_v14 = vld [vmem:[#allocation474_spill] sm:$0xff]  ;;  %v13623_v13 = vpop.permute.xlu2 %5711  ;;  %v16335_v15 = vld [vmem:[#allocation228_spill] sm:$0xff] }
 0xd11   :  { %v6127_v52 = vperm.slane %v5682_v24, %v12347_v2  ;;  %v2043_v8 = vsel %vm1825_vm0, %v2042_v25, %v2041_v53  ;;  %v4084_v26 = vsel %vm1809_vm12, %v4083_v58, %v4082_v50  ;;  %v5939_v3 = vperm.slane %v16333_v14, %v12329_v39  ;;  %v16336_v5 = vld [vmem:[#allocation304_spill] sm:$0xff]  ;;  %v8102_v53 = vld [vmem:[#allocation5 + $0x260] sm:$0xf] }
 0xd12   :  { %v6125_v1 = vperm.slane %v16334_v20, %v12329_v39  ;;  %v3897_v23 = vperm.slane %v16335_v15, %v12358_v31  ;;  %v3896_v45 = vsel %vm1805_vm11, %v3895_v37, %v3894_v17  ;;  %v3899_v21 = vperm.slane %v16336_v5, %v12372_v27  ;;  %7480 = vmatpush.bf16.msra.mxu2 %v8119_v9  ;;  %v8642_v50 = vld [vmem:[#allocation5 + $0x26c] sm:$0xf0]  ;;  %v16337_v32 = vld [vmem:[#allocation450_spill] sm:$0xff] }
 0xd13   :  { %v4086_v25 = vsel %vm1813_vm13, %v4085_v41, %v4084_v26  ;;  %v5097_v47 = vmul.f32 %v16337_v32, %v12134_v35  ;;  %v5940_v58 = vsel %vm1797_vm9, %v5939_v3, %v5938_v43  ;;  %v8103_v0 = vor.u32 %v8642_v50, %v8102_v53  ;;  %v16338_v56 = vld [vmem:[#allocation270_spill] sm:$0xff]  ;;  %v16339_v37 = vld [vmem:[#allocation340_spill] sm:$0xff]  ;;  %v16340_v26 = vld [vmem:[#allocation461_spill] sm:$0xff] }
 0xd14   :  { %v6126_v24 = vsel %vm1797_vm9, %v6125_v1, %v6124_v7  ;;  %v2045_v14 = vperm.slane %v16338_v56, %v12285_v49  ;;  %v4087_v17 = vperm.slane %v16339_v37, %v12381_v40  ;;  %v5942_v20 = vsel %vm1801_vm10, %v5941_v54, %v5940_v58  ;;  %v16341_v43 = vld [vmem:[#allocation491_spill] sm:$0xff]  ;;  %v16343_v54 = vld [vmem:[#allocation416_spill] sm:$0xff]  ;;  %v8086_v50 = vld [vmem:[#allocation5 + $0x240] sm:$0xf] }
 0xd15   :  { %v6128_v41 = vsel %vm1801_vm10, %v6127_v52, %v6126_v24  ;;  %v3898_v9 = vsel %vm1809_vm12, %v3897_v23, %v3896_v45  ;;  %v5111_v15 = vmul.f32 %v16340_v26, %v12134_v35  ;;  %v5943_v3 = vperm.slane %v16341_v43, %v12361_v60  ;;  %5810 = vperm.xlu1 %9036, %v5097_v47   ;;  %v16342_v1 = vld [vmem:[#allocation299_spill] sm:$0xff]  ;;  %v13654_v45 = vpop.permute.xlu0 %5732  ;;  %v8638_v32 = vld [vmem:[#allocation5 + $0x24c] sm:$0xf0] }
 0xd16   :  { %v6129_v7 = vperm.slane %v13458_v62, %v12361_v60  ;;  %v3901_v5 = vperm.slane %v16342_v1, %v12381_v40  ;;  %v3900_v53 = vsel %vm1813_vm13, %v3899_v21, %v3898_v9  ;;  %v4089_v52 = vperm.slane %v16343_v54, %v12386_v44  ;;  %7481 = vmatpush.bf16.msra.mxu2 %v8103_v0  ;;  %v16344_v62 = vld [vmem:[#allocation50_spill] sm:$0xff]  ;;  %v5691_v56 = vpop.permute.xlu1 %5690  ;;  %v16345_v37 = vld [vmem:[#allocation352_spill] sm:$0xff] }
 0xd17   :  { %v4088_v23 = vsel %vm1817_vm14, %v4087_v17, %v4086_v25  ;;  %v5944_v58 = vsel %vm1805_vm11, %v5943_v3, %v5942_v20  ;;  %v5947_v47 = vperm.slane %v16344_v62, %v12372_v27  ;;  %5852 = vperm.xlu2 %9037, %v5111_v15   ;;  %v8087_v21 = vor.u32 %v8638_v32, %v8086_v50  ;;  %v16346_v25 = vld [vmem:[#allocation140_spill] sm:$0xff]  ;;  %v16351_v32 = vld [vmem:[#allocation235_spill] sm:$0xff] }
 0xd18   :  { %v6130_v24 = vsel %vm1805_vm11, %v6129_v7, %v6128_v41  ;;  %v4091_v9 = vperm.slane %v16345_v37, %v12390_v28  ;;  %v5945_v17 = vperm.slane %v16346_v25, %v12358_v31  ;;  %v6131_v0 = vperm.slane %v13317_v22, %v12358_v31  ;;  %v16347_v20 = vld [vmem:[#allocation380_spill] sm:$0xff]  ;;  %v13676_v50 = vpop.permute.xlu2 %5720  ;;  %v8070_v37 = vld [vmem:[#allocation5 + $0x220] sm:$0xf] }
 0xd19   :  { %v6133_v26 = vperm.slane %v5691_v56, %v12372_v27  ;;  %v2170_v43 = vsel %vm2168_vm1, %v2043_v8, %v16347_v20  ;;  %v16348_v3 = vld [vmem:[#allocation72_spill] sm:$0xff]  ;;  %v3902_v54 = vsel %vm1817_vm14, %v3901_v5, %v3900_v53  ;;  %v3905_v22 = vperm.slane %v16351_v32, %v12390_v28 }
 0xd1a   :  { %v16349_v41 = vperm.slane %v16348_v3, %v12275_v33  ;;  %v16350_v7 = vld [vmem:[#allocation88_spill] sm:$0xff]  ;;  %v4090_v62 = vsel %vm1821_vm15, %v4089_v52, %v4088_v23  ;;  %v5946_v56 = vsel %vm1809_vm12, %v5945_v17, %v5944_v58  ;;  %v6132_v8 = vsel %vm1809_vm12, %v6131_v0, %v6130_v24  ;;  %7482 = vmatpush.bf16.msra.mxu2 %v8087_v21  ;;  %v16354_v58 = vld [vmem:[#allocation493_spill] sm:$0xff]  ;;  %v16356_v0 = vld [vmem:[#allocation271_spill] sm:$0xff] }
 0xd1b   :  { %v3903_v1 = vperm.slane %v16350_v7, %v12386_v44  ;;  %v8634_v25 = vld [vmem:[#allocation5 + $0x22c] sm:$0xf0]  ;;  %v5948_v3 = vsel %vm1813_vm13, %v5947_v47, %v5946_v56  ;;  %v6134_v5 = vsel %vm1813_vm13, %v6133_v26, %v6132_v8  ;;  %v4092_v23 = vsel %vm1825_vm0, %v4091_v9, %v4090_v62 }
 0xd1c   :  { %v2046_v15 = vsel %vm1769_vm2, %v2045_v14, %v16349_v41  ;;  %v16352_v14 = vld [vmem:[#allocation130_spill] sm:$0xff]  ;;  %v8071_v53 = vor.u32 %v8634_v25, %v8070_v37  ;;  %v16353_v41 = vperm.slane %v16309_v51, %v12358_v31  ;;  %v5949_v24 = vperm.slane %v16354_v58, %v12381_v40  ;;  %v8630_v56 = vld [vmem:[#allocation5 + $0x20c] sm:$0xf0] }
 0xd1d   :  { %v5112_v20 = vmul.f32 %v16352_v14, %v12134_v35  ;;  %v6135_v21 = vperm.slane %v13518_v12, %v12381_v40  ;;  %v16355_v47 = vperm.slane %v16286_v61, %v12282_v46  ;;  %v2051_v26 = vperm.slane %v16356_v0, %v12311_v42  ;;  %v16358_v12 = vld [vmem:[#allocation495_spill] sm:$0xff]  ;;  %v8592_v25 = vld [vmem:[#allocation5 + $0xe4] sm:$0xf]  ;;  %v7912_v14 = vld [vmem:[#allocation5 + $0xf0] sm:$0xf0] }
 0xd1e   :  { %v13692_v52 = vsel %vm1809_vm12, %v16353_v41, %v13472_v6  ;;  %v3904_v51 = vsel %vm1821_vm15, %v3903_v1, %v3902_v54  ;;  %v16357_v6 = vperm.slane %v13204_v55, 1  ;;  %v5950_v32 = vsel %vm1817_vm14, %v5949_v24, %v5948_v3  ;;  %7483 = vmatpush.bf16.msra.mxu2 %v8071_v53  ;;  %v16359_v1 = vld [vmem:[#allocation480_spill] sm:$0xff]  ;;  %v13723_v41 = vpop.permute.xlu0 %5741 }
 0xd1f   :  { %v2048_v17 = vsel %vm1773_vm3, %v16355_v47, %v2046_v15  ;;  %5855 = vperm.xlu1 %9036, %v5112_v20   ;;  %v3906_v9 = vsel %vm1825_vm0, %v3905_v22, %v3904_v51  ;;  %v5953_v62 = vperm.slane %v16358_v12, %v12390_v28  ;;  %v6136_v61 = vsel %vm1817_vm14, %v6135_v21, %v6134_v5  ;;  %v8054_v15 = vld [vmem:[#allocation5 + $0x200] sm:$0xf]  ;;  %v16360_v22 = vld [vmem:[#allocation73_spill] sm:$0xff]  ;;  %v16362_v5 = vld [vmem:[#allocation300_spill] sm:$0xff] }
 0xd20   :  { %v2182_v7 = vadd.f32 %v2170_v43, %v16357_v6  ;;  %v4218_v8 = vsel %vm2168_vm1, %v4092_v23, %v3906_v9  ;;  %v5951_v54 = vperm.slane %v16359_v1, %v12386_v44  ;;  %v6137_v55 = vperm.slane %v13380_v57, %v12386_v44  ;;  %v5700_v43 = vpop.permute.xlu1 %5699  ;;  %5816 = vperm.xlu2 %9037, %v16360_v22   ;;  %v16361_v20 = vld [vmem:[#allocation30_spill] sm:$0xff]  ;;  %v16363_v24 = vld [vmem:[#allocation240_spill] sm:$0xff]  ;;  %v13732_v6 = vpop.permute.xlu2 %5729 }
 0xd21   :  { %v8055_v37 = vor.u32 %v8630_v56, %v8054_v15  ;;  %v3908_v3 = vperm.slane %v16361_v20, %v12285_v49  ;;  %v3907_v53 = vperm.slane %v16362_v5, %v12275_v33  ;;  %v6139_v23 = vperm.slane %v5700_v43, %v12390_v28  ;;  %v16364_v21 = vld [vmem:[#allocation342_spill] sm:$0xff]  ;;  %v16366_v43 = vld [vmem:[#allocation165_spill] sm:$0xff] }
 0xd22   :  { %v7915_v58 = vor.u32 %v8592_v25, %v7912_v14  ;;  %v3910_v57 = vperm.slane %v16363_v24, %v12282_v46  ;;  %v4093_v47 = vperm.slane %v16364_v21, %v12275_v33  ;;  %v5952_v0 = vsel %vm1821_vm15, %v5951_v54, %v5950_v32  ;;  %v16365_v12 = vld [vmem:[#allocation354_spill] sm:$0xff]  ;;  %v16368_v32 = vld [vmem:[#allocation419_spill] sm:$0xff]  ;;  %v7896_v14 = vld [vmem:[#allocation5 + $0xd0] sm:$0xf0] }
 0xd23   :  { %v6138_v51 = vsel %vm1821_vm15, %v6137_v55, %v6136_v61  ;;  %v4230_v9 = vadd.f32 %v4218_v8, %v2182_v7  ;;  %v4096_v15 = vperm.slane %v16365_v12, %v12282_v46  ;;  %v5954_v56 = vsel %vm1825_vm0, %v5953_v62, %v5952_v0  ;;  %7484 = vmatpush.bf16.msra.mxu2 %v8055_v37  ;;  %v16369_v61 = vld [vmem:[#allocation451_spill] sm:$0xff]  ;;  %v8588_v8 = vld [vmem:[#allocation5 + $0xc4] sm:$0xf] }
 0xd24   :  { %v6140_v1 = vsel %vm1825_vm0, %v6139_v23, %v6138_v51  ;;  %v16367_v22 = vperm.slane %v16366_v43, %v12298_v18  ;;  %v4094_v54 = vperm.slane %v16368_v32, %v12285_v49  ;;  %v5100_v55 = vmul.f32 %v16369_v61, %v12134_v35  ;;  %v16370_v23 = vld [vmem:[#allocation178_spill] sm:$0xff]  ;;  %v16378_v32 = vld [vmem:[#allocation373_spill] sm:$0xff]  ;;  %v7880_v61 = vld [vmem:[#allocation5 + $0xb0] sm:$0xf0] }
 0xd25   :  { %v6266_v7 = vsel %vm2168_vm1, %v6140_v1, %v5954_v56  ;;  %v3909_v37 = vsel %vm1769_vm2, %v3908_v3, %v3907_v53  ;;  %v7899_v5 = vor.u32 %v8588_v8, %v7896_v14  ;;  %v16371_v24 = vld [vmem:[#allocation90_spill] sm:$0xff] }
 0xd26   :  { %v2050_v25 = vsel %vm1777_vm4, %v16367_v22, %v2048_v17  ;;  %v6278_v20 = vadd.f32 %v6266_v7, %v4230_v9  ;;  %v2059_v17 = vperm.slane %v16370_v23, %v12329_v39  ;;  %v2078_v21 = vperm.slane %v16371_v24, %v12282_v46  ;;  %v16438_v24 = vld [vmem:[#allocation187_spill] sm:$0xff] }
 0xd27   :  { %7529 = vmatpush.bf16.msrb.mxu2 %v7915_v58  ;;  %v2052_v62 = vsel %vm1781_vm5, %v2051_v26, %v2050_v25  ;;  %v3911_v0 = vsel %vm1773_vm3, %v3910_v57, %v3909_v37  ;;  %v4095_v51 = vsel %vm1769_vm2, %v4094_v54, %v4093_v47  ;;  %5819 = vperm.xlu1 %9036, %v5100_v55   ;;  %v16372_v58 = vld [vmem:[#allocation244_spill] sm:$0xff]  ;;  %v16373_v26 = vld [vmem:[#allocation303_spill] sm:$0xff]  ;;  %v16376_v57 = vld [vmem:[#allocation38_spill] sm:$0xff] }
 0xd28   :  { %v1952_v12 = vperm.slane %v16372_v58, %v12285_v49  ;;  %v3912_v56 = vperm.slane %v16373_v26, %v12298_v18  ;;  %v4097_v3 = vsel %vm1773_vm3, %v4096_v15, %v4095_v51  ;;  %v13760_v53 = vpack.c.bf16 %v6278_v20, %v6278_v20  ;;  %v16377_v47 = vld [vmem:[#allocation344_spill] sm:$0xff]  ;;  %v5709_v25 = vpop.permute.xlu1 %5708  ;;  %5861 = vperm.xlu2 %9037, %v16378_v32   ;;  %v8584_v54 = vld [vmem:[#allocation5 + $0xa4] sm:$0xf]  ;;  %v16379_v15 = vld [vmem:[#allocation181_spill] sm:$0xff]  ;;  %v13784_v58 = vpop.permute.xlu2 %5738 }
 0xd29   :  { %v16375_v9 = vperm.slane %v16293_v36, %v12305_v48  ;;  %v2057_v43 = vperm.slane %v16376_v57, %v12336_v16  ;;  %v4098_v22 = vperm.slane %v16377_v47, %v12298_v18  ;;  %v2065_v55 = vperm.slane %v16379_v15, %v12358_v31  ;;  %v16380_v36 = vld [vmem:[#allocation60_spill] sm:$0xff] }
 0xd2a   :  { %16374 = vst [vmem:[#allocation101_spill] sm:$0xff] %v13760_v53  ;;  %v3913_v7 = vsel %vm1777_vm4, %v3912_v56, %v3911_v0  ;;  %v3916_v8 = vperm.slane %v16380_v36, %v12305_v48  ;;  %7472 = vmatmul.bf16.vlgmr.msra.gmra.mxu1 %v13760_v53  ;;  %v7883_v14 = vor.u32 %v8584_v54, %v7880_v61  ;;  %v16383_v0 = vld [vmem:[#allocation150_spill] sm:$0xff]  ;;  %v16387_v61 = vld [vmem:[#allocation472_spill] sm:$0xff] }
 0xd2b   :  { %v2054_v1 = vsel %vm1785_vm6, %v16375_v9, %v2052_v62  ;;  %7530 = vmatpush.bf16.msrb.mxu2 %v7899_v5  ;;  %v16381_v62 = vld [vmem:[#allocation234_spill] sm:$0xff]  ;;  %v4099_v20 = vsel %vm1777_vm4, %v4098_v22, %v4097_v3  ;;  %v16382_v5 = vld [vmem:[#allocation356_spill] sm:$0xff]  ;;  %v6141_v51 = vperm.slane %v13569_v59, %v12275_v33  ;;  %v16384_v26 = vperm.slane %v16383_v0, %v12275_v33  ;;  %v13796_v22 = vpop.permute.xlu0 %5750 }
 0xd2c   :  { %v3914_v37 = vperm.slane %v16381_v62, %v12311_v42  ;;  %v4102_v23 = vperm.slane %v16382_v5, %v12305_v48  ;;  %v16385_v9 = vperm.slane %v16277_v63, %v12322_v38  ;;  %v16386_v3 = vld [vmem:[#allocation422_spill] sm:$0xff]  ;;  %v6144_v32 = vperm.slane %v5709_v25, %v12282_v46  ;;  %v16388_v5 = vld [vmem:[#allocation305_spill] sm:$0xff] }
 0xd2d   :  { %v1953_v56 = vsel %vm1769_vm2, %v1952_v12, %v16384_v26  ;;  %v4100_v47 = vperm.slane %v16386_v3, %v12311_v42  ;;  %v5115_v36 = vmul.f32 %v16387_v61, %v12134_v35  ;;  %v6142_v12 = vperm.slane %v13449_v11, %v12285_v49  ;;  %v8294_v63 = vld [vmem:[#allocation5 + $0x3e0] sm:$0xf]  ;;  %v8580_v62 = vld [vmem:[#allocation5 + $0x84] sm:$0xf]  ;;  %v16390_v61 = vld [vmem:[#allocation272_spill] sm:$0xff] }
 0xd2e   :  { %v2056_v57 = vsel %vm1789_vm7, %v16385_v9, %v2054_v1  ;;  %v3915_v54 = vsel %vm1781_vm5, %v3914_v37, %v3913_v7  ;;  %v8690_v1 = vld [vmem:[#allocation5 + $0x3ec] sm:$0xf0]  ;;  %v3918_v0 = vperm.slane %v16388_v5, %v12322_v38  ;;  %v7864_v9 = vld [vmem:[#allocation5 + $0x90] sm:$0xf0]  ;;  %v16389_v37 = vld [vmem:[#allocation453_spill] sm:$0xff]  ;;  %v2063_v5 = vperm.slane %v16390_v61, %v12361_v60 }
 0xd2f   :  { %v2058_v59 = vsel %vm1793_vm8, %v2057_v43, %v2056_v57  ;;  %7531 = vmatpush.bf16.msrb.mxu2 %v7883_v14  ;;  %v3917_v26 = vsel %vm1785_vm6, %v3916_v8, %v3915_v54  ;;  %v4101_v25 = vsel %vm1781_vm5, %v4100_v47, %v4099_v20  ;;  %v8295_v43 = vor.u32 %v8690_v1, %v8294_v63  ;;  %v16391_v8 = vld [vmem:[#allocation346_spill] sm:$0xff]  ;;  %v16392_v47 = vld [vmem:[#allocation243_spill] sm:$0xff]  ;;  %v16393_v1 = vld [vmem:[#allocation237_spill] sm:$0xff] }
 0xd30   :  { %v4103_v7 = vsel %vm1785_vm6, %v4102_v23, %v4101_v25  ;;  %v5102_v57 = vmul.f32 %v16389_v37, %v12134_v35  ;;  %v6143_v11 = vsel %vm1769_vm2, %v6142_v12, %v6141_v51  ;;  %5864 = vperm.xlu1 %9036, %v5115_v36   ;;  %v7867_v14 = vor.u32 %v8580_v62, %v7864_v9  ;;  %v5718_v36 = vpop.permute.xlu1 %5717  ;;  %v8576_v12 = vld [vmem:[#allocation5 + $0x64] sm:$0xf]  ;;  %v16394_v25 = vld [vmem:[#allocation359_spill] sm:$0xff]  ;;  %v16395_v9 = vld [vmem:[#allocation424_spill] sm:$0xff] }
 0xd31   :  { %v2060_v3 = vsel %vm1797_vm9, %v2059_v17, %v2058_v59  ;;  %v4104_v54 = vperm.slane %v16391_v8, %v12322_v38  ;;  %v6145_v20 = vsel %vm1773_vm3, %v6144_v32, %v6143_v11  ;;  %7490 = vmatpush.bf16.msra.mxu3 %v8295_v43  ;;  %v3919_v23 = vsel %vm1789_vm7, %v3918_v0, %v3917_v26  ;;  %v8278_v17 = vld [vmem:[#allocation5 + $0x3c0] sm:$0xf]  ;;  %v8686_v59 = vld [vmem:[#allocation5 + $0x3cc] sm:$0xf0]  ;;  %v7848_v43 = vld [vmem:[#allocation5 + $0x70] sm:$0xf0]  ;;  %v13833_v11 = vpop.permute.xlu2 %5747 }
 0xd32   :  { %v3922_v63 = vperm.slane %v16392_v47, %v12329_v39  ;;  %v6146_v51 = vperm.slane %v13623_v13, %v12298_v18  ;;  %5825 = vperm.xlu2 %9037, %v5102_v57   ;;  %v3920_v62 = vperm.slane %v16393_v1, %v12336_v16  ;;  %v4108_v0 = vperm.slane %v16394_v25, %v12329_v39  ;;  %v16396_v61 = vld [vmem:[#allocation48_spill] sm:$0xff]  ;;  %v8262_v1 = vld [vmem:[#allocation5 + $0x3a0] sm:$0xf]  ;;  %v8572_v25 = vld [vmem:[#allocation5 + $0x44] sm:$0xf] }
 0xd33   :  { %7532 = vmatpush.bf16.msrb.mxu2 %v7867_v14  ;;  %v4105_v32 = vsel %vm1789_vm7, %v4104_v54, %v4103_v7  ;;  %v8279_v26 = vor.u32 %v8686_v59, %v8278_v17  ;;  %v4106_v37 = vperm.slane %v16395_v9, %v12336_v16  ;;  %v6150_v57 = vperm.slane %v5718_v36, %v12305_v48  ;;  %v16402_v9 = vld [vmem:[#allocation475_spill] sm:$0xff] }
 0xd34   :  { %v6147_v13 = vsel %vm1777_vm4, %v6146_v51, %v6145_v20  ;;  %v7851_v14 = vor.u32 %v8576_v12, %v7848_v43  ;;  %v16397_v8 = vperm.slane %v16396_v61, %v12282_v46  ;;  %v16398_v54 = vperm.slane %v16282_v30, %v12347_v2  ;;  %v8682_v30 = vld [vmem:[#allocation5 + $0x3ac] sm:$0xf0] }
 0xd35   :  { %v3921_v17 = vsel %vm1793_vm8, %v3920_v62, %v3919_v23  ;;  %v6148_v20 = vperm.slane %v13523_v29, %v12311_v42  ;;  %7491 = vmatpush.bf16.msra.mxu3 %v8279_v26  ;;  %v4107_v59 = vsel %vm1793_vm8, %v4106_v37, %v4105_v32  ;;  %v13856_v29 = vpop.permute.xlu0 %5759  ;;  %v8263_v26 = vor.u32 %v8682_v30, %v8262_v1  ;;  %v16401_v32 = vld [vmem:[#allocation348_spill] sm:$0xff] }
 0xd36   :  { %v13839_v7 = vsel %vm1773_vm3, %v16397_v8, %v1953_v56  ;;  %v2062_v47 = vsel %vm1801_vm10, %v16398_v54, %v2060_v3  ;;  %v3923_v36 = vsel %vm1797_vm9, %v3922_v63, %v3921_v17  ;;  %v16399_v56 = vld [vmem:[#allocation168_spill] sm:$0xff]  ;;  %v16400_v3 = vld [vmem:[#allocation307_spill] sm:$0xff]  ;;  %v4109_v62 = vsel %vm1797_vm9, %v4108_v0, %v4107_v59  ;;  %v16403_v8 = vld [vmem:[#allocation273_spill] sm:$0xff] }
 0xd37   :  { %v2064_v51 = vsel %vm1805_vm11, %v2063_v5, %v2062_v47  ;;  %v5103_v12 = vmul.f32 %v16399_v56, %v12134_v35  ;;  %7533 = vmatpush.bf16.msrb.mxu2 %v7851_v14  ;;  %v3924_v23 = vperm.slane %v16400_v3, %v12347_v2  ;;  %v6149_v5 = vsel %vm1781_vm5, %v6148_v20, %v6147_v13  ;;  %v7832_v63 = vld [vmem:[#allocation5 + $0x50] sm:$0xf0]  ;;  %v16404_v17 = vld [vmem:[#allocation35_spill] sm:$0xff]  ;;  %v16405_v59 = vld [vmem:[#allocation361_spill] sm:$0xff] }
 0xd38   :  { %v4110_v43 = vperm.slane %v16401_v32, %v12347_v2  ;;  %v5117_v37 = vmul.f32 %v16402_v9, %v12134_v35  ;;  %v6151_v14 = vsel %vm1785_vm6, %v6150_v57, %v6149_v5  ;;  %v7835_v61 = vor.u32 %v8572_v25, %v7832_v63  ;;  %v5727_v15 = vpop.permute.xlu1 %5726  ;;  %v7816_v3 = vld [vmem:[#allocation5 + $0x30] sm:$0xf0]  ;;  %v16408_v5 = vld [vmem:[#allocation246_spill] sm:$0xff]  ;;  %v16409_v9 = vld [vmem:[#allocation55_spill] sm:$0xff] }
 0xd39   :  { %5828 = vperm.xlu1 %9036, %v5103_v12   ;;  %v2066_v0 = vsel %vm1809_vm12, %v2065_v55, %v2064_v51  ;;  %v2069_v13 = vperm.slane %v16403_v8, %v12381_v40  ;;  %v3925_v54 = vsel %vm1801_vm10, %v3924_v23, %v3923_v36  ;;  %v6152_v47 = vperm.slane %v13676_v50, %v12322_v38  ;;  %v8246_v55 = vld [vmem:[#allocation5 + $0x380] sm:$0xf]  ;;  %v8678_v51 = vld [vmem:[#allocation5 + $0x38c] sm:$0xf0]  ;;  %v8568_v12 = vld [vmem:[#allocation5 + $0x24] sm:$0xf]  ;;  %v13890_v32 = vpop.permute.xlu2 %5756 }
 0xd3a   :  { %7492 = vmatpush.bf16.msra.mxu3 %v8263_v26  ;;  %v3928_v20 = vperm.slane %v16404_v17, %v12358_v31  ;;  %v4111_v57 = vsel %vm1801_vm10, %v4110_v43, %v4109_v62  ;;  %v4114_v56 = vperm.slane %v16405_v59, %v12358_v31  ;;  %5870 = vperm.xlu2 %9037, %v5117_v37   ;;  %v16406_v36 = vld [vmem:[#allocation426_spill] sm:$0xff] }
 0xd3b   :  { %7534 = vmatpush.bf16.msrb.mxu2 %v7835_v61  ;;  %v4112_v1 = vperm.slane %v16406_v36, %v12361_v60  ;;  %v6153_v50 = vsel %vm1789_vm7, %v6152_v47, %v6151_v14  ;;  %v6156_v30 = vperm.slane %v5727_v15, %v12329_v39  ;;  %v8247_v25 = vor.u32 %v8678_v51, %v8246_v55  ;;  %v16410_v14 = vld [vmem:[#allocation245_spill] sm:$0xff]  ;;  %v8230_v15 = vld [vmem:[#allocation5 + $0x360] sm:$0xf]  ;;  %v8674_v55 = vld [vmem:[#allocation5 + $0x36c] sm:$0xf0] }
 0xd3c   :  { %v16407_v23 = vperm.slane %v16287_v34, %v12372_v27  ;;  %v3926_v26 = vperm.slane %v16408_v5, %v12361_v60  ;;  %v6154_v63 = vperm.slane %v13589_v10, %v12336_v16  ;;  %v7819_v43 = vor.u32 %v8568_v12, %v7816_v3  ;;  %v16411_v10 = vld [vmem:[#allocation468_spill] sm:$0xff]  ;;  %v8564_v51 = vld [vmem:[#allocation5 + $0x4] sm:$0xf]  ;;  %v16414_v3 = vld [vmem:[#allocation455_spill] sm:$0xff] }
 0xd3d   :  { %v2071_v37 = vperm.slane %v16409_v9, %v12386_v44  ;;  %v1958_v61 = vperm.slane %v16410_v14, %v12311_v42  ;;  %v4113_v34 = vsel %vm1805_vm11, %v4112_v1, %v4111_v57  ;;  %v5118_v17 = vmul.f32 %v16411_v10, %v12134_v35  ;;  %v13922_v14 = vpop.permute.xlu0 %5768 }
 0xd3e   :  { %v2068_v62 = vsel %vm1813_vm13, %v16407_v23, %v2066_v0  ;;  %7493 = vmatpush.bf16.msra.mxu3 %v8247_v25  ;;  %v3927_v0 = vsel %vm1805_vm11, %v3926_v26, %v3925_v54  ;;  %v4115_v47 = vsel %vm1809_vm12, %v4114_v56, %v4113_v34  ;;  %v6155_v59 = vsel %vm1793_vm8, %v6154_v63, %v6153_v50  ;;  %v7800_v54 = vld [vmem:[#allocation5 + $0x10] sm:$0xf0]  ;;  %v16413_v56 = vld [vmem:[#allocation309_spill] sm:$0xff]  ;;  %v16418_v34 = vld [vmem:[#allocation427_spill] sm:$0xff] }
 0xd3f   :  { %v2070_v8 = vsel %vm1817_vm14, %v2069_v13, %v2068_v62  ;;  %7535 = vmatpush.bf16.msrb.mxu2 %v7819_v43  ;;  %v3929_v12 = vsel %vm1809_vm12, %v3928_v20, %v3927_v0  ;;  %v16412_v13 = vld [vmem:[#allocation349_spill] sm:$0xff]  ;;  %v6157_v57 = vsel %vm1797_vm9, %v6156_v30, %v6155_v59  ;;  %v8231_v1 = vor.u32 %v8674_v55, %v8230_v15  ;;  %v16415_v20 = vld [vmem:[#allocation151_spill] sm:$0xff]  ;;  %v16417_v43 = vld [vmem:[#allocation12_spill] sm:$0xff] }
 0xd40   :  { %v4116_v36 = vperm.slane %v16412_v13, %v12372_v27  ;;  %v3930_v25 = vperm.slane %v16413_v56, %v12372_v27  ;;  %v5105_v23 = vmul.f32 %v16414_v3, %v12134_v35  ;;  %v6158_v50 = vperm.slane %v13732_v6, %v12347_v2 }
 0xd41   :  { %5873 = vperm.xlu1 %9036, %v5118_v17   ;;  %v7803_v62 = vor.u32 %v8564_v51, %v7800_v54  ;;  %v16416_v5 = vperm.slane %v16415_v20, %v12298_v18  ;;  %v2072_v30 = vsel %vm1821_vm15, %v2071_v37, %v2070_v8  ;;  %v4120_v9 = vperm.slane %v16417_v43, %v12386_v44  ;;  %v5736_v17 = vpop.permute.xlu1 %5735  ;;  %v8670_v37 = vld [vmem:[#allocation5 + $0x34c] sm:$0xf0]  ;;  %v16419_v8 = vld [vmem:[#allocation31_spill] sm:$0xff]  ;;  %v13939_v54 = vpop.permute.xlu2 %5765  ;;  %v16426_v43 = vld [vmem:[#allocation185_spill] sm:$0xff] }
 0xd42   :  { %v4117_v63 = vsel %vm1813_vm13, %v4116_v36, %v4115_v47  ;;  %7494 = vmatpush.bf16.msra.mxu3 %v8231_v1  ;;  %v3931_v6 = vsel %vm1813_vm13, %v3930_v25, %v3929_v12  ;;  %v4118_v0 = vperm.slane %v16418_v34, %v12381_v40  ;;  %v6159_v10 = vsel %vm1801_vm10, %v6158_v50, %v6157_v57  ;;  %v16420_v51 = vld [vmem:[#allocation56_spill] sm:$0xff]  ;;  %v16421_v36 = vld [vmem:[#allocation370_spill] sm:$0xff] }
 0xd43   :  { %v1957_v26 = vsel %vm1777_vm4, %v16416_v5, %v13839_v7  ;;  %5834 = vperm.xlu2 %9037, %v5105_v23   ;;  %7536 = vmatpush.bf16.msrb.mxu2 %v7803_v62  ;;  %v8214_v7 = vld [vmem:[#allocation5 + $0x340] sm:$0xf]  ;;  %v3934_v47 = vperm.slane %v16419_v8, %v12386_v44  ;;  %v6160_v59 = vperm.slane %v13654_v45, %v12361_v60  ;;  %v16424_v62 = vld [vmem:[#allocation351_spill] sm:$0xff]  ;;  %v16425_v5 = vld [vmem:[#allocation457_spill] sm:$0xff] }
 0xd44   :  { %v6162_v15 = vperm.slane %v5736_v17, %v12358_v31  ;;  %v8215_v55 = vor.u32 %v8670_v37, %v8214_v7  ;;  %v2084_v12 = vperm.slane %v16420_v51, %v12305_v48  ;;  %v1959_v13 = vsel %vm1781_vm5, %v1958_v61, %v1957_v26  ;;  %v16423_v25 = vld [vmem:[#allocation274_spill] sm:$0xff]  ;;  %v16428_v37 = vld [vmem:[#allocation477_spill] sm:$0xff] }
 0xd45   :  { %v3932_v57 = vperm.slane %v16421_v36, %v12381_v40  ;;  %v4119_v1 = vsel %vm1817_vm14, %v4118_v0, %v4117_v63  ;;  %v16422_v56 = vperm.slane %v16300_v19, %v12390_v28  ;;  %v2075_v3 = vperm.slane %v16423_v25, %v12275_v33  ;;  %v8198_v63 = vld [vmem:[#allocation5 + $0x320] sm:$0xf] }
 0xd46   :  { %v4121_v23 = vsel %vm1821_vm15, %v4120_v9, %v4119_v1  ;;  %v6161_v50 = vsel %vm1805_vm11, %v6160_v59, %v6159_v10  ;;  %7495 = vmatpush.bf16.msra.mxu3 %v8215_v55  ;;  %v4122_v20 = vperm.slane %v16424_v62, %v12390_v28  ;;  %v5106_v26 = vmul.f32 %v16425_v5, %v12134_v35  ;;  %v13965_v59 = vld [vmem:[#allocation2] sm:$0x3f]  ;;  %v16429_v55 = vld [vmem:[#allocation58_spill] sm:$0xff] }
 0xd47   :  { %v2074_v45 = vsel %vm1825_vm0, %v16422_v56, %v2072_v30  ;;  %v3933_v61 = vsel %vm1817_vm14, %v3932_v57, %v3931_v6  ;;  %v6163_v19 = vsel %vm1809_vm12, %v6162_v15, %v6161_v50  ;;  %v8666_v30 = vld [vmem:[#allocation5 + $0x32c] sm:$0xf0]  ;;  %v2076_v34 = vperm.slane %v16426_v43, %v12285_v49  ;;  %v16427_v6 = vld [vmem:[#allocation241_spill] sm:$0xff]  ;;  %v16430_v36 = vld [vmem:[#allocation74_spill] sm:$0xff] }
 0xd48   :  { %v3935_v9 = vsel %vm1821_vm15, %v3934_v47, %v3933_v61  ;;  %v6164_v0 = vperm.slane %v13784_v58, %v12372_v27  ;;  %v8199_v10 = vor.u32 %v8666_v30, %v8198_v63  ;;  %v3936_v17 = vperm.slane %v16427_v6, %v12390_v28  ;;  %v16432_v56 = vld [vmem:[#allocation462_spill] sm:$0xff]  ;;  %v16433_v50 = vld [vmem:[#allocation277_spill] sm:$0xff]  ;;  %v16434_v63 = vld [vmem:[#allocation15_spill] sm:$0xff]  ;;  %v13986_v30 = vpop.permute.xlu0 %5777 }
 0xd49   :  { %v4123_v7 = vsel %vm1825_vm0, %v4122_v20, %v4121_v23  ;;  %v5120_v8 = vmul.f32 %v16428_v37, %v12134_v35  ;;  %5837 = vperm.xlu1 %9036, %v5106_v26   ;;  %v93_v15 = vperm.slane %v13965_v59, 2  ;;  %v2090_v47 = vperm.slane %v16429_v55, %v12329_v39  ;;  %v5745_v5 = vpop.permute.xlu1 %5744  ;;  %v8182_v26 = vld [vmem:[#allocation5 + $0x300] sm:$0xf]  ;;  %v16435_v37 = vld [vmem:[#allocation249_spill] sm:$0xff]  ;;  %v16470_v55 = vld [vmem:[#allocation196_spill] sm:$0xff] }
 0xd4a   :  { %v16431_v58 = vperm.slane %v16430_v36, %v12305_v48  ;;  %v6165_v1 = vsel %vm1813_vm13, %v6164_v0, %v6163_v19  ;;  %v2171_v25 = vsel %vm2168_vm1, %v2074_v45, %v16432_v56  ;;  %7496 = vmatpush.bf16.msra.mxu3 %v8199_v10  ;;  %v2077_v23 = vsel %vm1769_vm2, %v2076_v34, %v2075_v3  ;;  %v8624_v34 = vld [vmem:[#allocation5 + $0x1e4] sm:$0xf]  ;;  %v8040_v0 = vld [vmem:[#allocation5 + $0x1f0] sm:$0xf0]  ;;  %v13992_v10 = vpop.permute.xlu2 %5774 }
 0xd4b   :  { %v2080_v61 = vperm.slane %v16433_v50, %v12298_v18  ;;  %v3937_v62 = vsel %vm1825_vm0, %v3936_v17, %v3935_v9  ;;  %v6166_v20 = vperm.slane %v13723_v41, %v12381_v40  ;;  %5879 = vperm.xlu2 %9037, %v5120_v8   ;;  %v4125_v45 = vperm.slane %v16434_v63, %v12285_v49  ;;  %v16436_v36 = vld [vmem:[#allocation428_spill] sm:$0xff]  ;;  %v16441_v63 = vld [vmem:[#allocation353_spill] sm:$0xff] }
 0xd4c   :  { %v1961_v57 = vsel %vm1785_vm6, %v16431_v58, %v1959_v13  ;;  %v8662_v13 = vld [vmem:[#allocation5 + $0x30c] sm:$0xf0]  ;;  %v4219_v19 = vsel %vm2168_vm1, %v4123_v7, %v3937_v62  ;;  %v6168_v3 = vperm.slane %v5745_v5, %v12386_v44  ;;  %v6170_v9 = vperm.slane %v13833_v11, %v12390_v28  ;;  %v16440_v5 = vld [vmem:[#allocation81_spill] sm:$0xff] }
 0xd4d   :  { %v8183_v43 = vor.u32 %v8662_v13, %v8182_v26  ;;  %v6167_v41 = vsel %vm1817_vm14, %v6166_v20, %v6165_v1  ;;  %v2183_v6 = vadd.f32 %v2171_v25, %v93_v15  ;;  %v8043_v17 = vor.u32 %v8624_v34, %v8040_v0  ;;  %v16437_v1 = vld [vmem:[#allocation470_spill] sm:$0xff] }
 0xd4e   :  { %v2079_v7 = vsel %vm1773_vm3, %v2078_v21, %v2077_v23  ;;  %v3939_v8 = vperm.slane %v16435_v37, %v12285_v49  ;;  %v4124_v58 = vperm.slane %v16436_v36, %v12275_v33  ;;  %v6169_v56 = vsel %vm1821_vm15, %v6168_v3, %v6167_v41  ;;  %v16439_v23 = vld [vmem:[#allocation375_spill] sm:$0xff]  ;;  %v8620_v13 = vld [vmem:[#allocation5 + $0x1c4] sm:$0xf] }
 0xd4f   :  { %7497 = vmatpush.bf16.msra.mxu3 %v8183_v43  ;;  %v2081_v11 = vsel %vm1777_vm4, %v2080_v61, %v2079_v7  ;;  %v5121_v15 = vmul.f32 %v16437_v1, %v12134_v35  ;;  %v6171_v25 = vsel %vm1825_vm0, %v6170_v9, %v6169_v56  ;;  %v4231_v50 = vadd.f32 %v4219_v19, %v2183_v6  ;;  %v8024_v61 = vld [vmem:[#allocation5 + $0x1d0] sm:$0xf0]  ;;  %v16442_v43 = vld [vmem:[#allocation459_spill] sm:$0xff]  ;;  %v16443_v41 = vld [vmem:[#allocation94_spill] sm:$0xff] }
 0xd50   :  { %v2082_v21 = vperm.slane %v16438_v24, %v12311_v42  ;;  %v3938_v62 = vperm.slane %v16439_v23, %v12275_v33  ;;  %v4126_v20 = vsel %vm1769_vm2, %v4125_v45, %v4124_v58  ;;  %v6267_v26 = vsel %vm2168_vm1, %v6171_v25, %v16440_v5  ;;  %v16444_v45 = vld [vmem:[#allocation311_spill] sm:$0xff]  ;;  %v16445_v36 = vld [vmem:[#allocation362_spill] sm:$0xff]  ;;  %v8008_v5 = vld [vmem:[#allocation5 + $0x1b0] sm:$0xf0]  ;;  %v14055_v51 = vpop.permute.xlu0 %5786 }
 0xd51   :  { %v4127_v3 = vperm.slane %v16441_v63, %v12282_v46  ;;  %v5108_v19 = vmul.f32 %v16442_v43, %v12134_v35  ;;  %5882 = vperm.xlu1 %9036, %v5121_v15   ;;  %v6279_v34 = vadd.f32 %v6267_v26, %v4231_v50  ;;  %v8027_v0 = vor.u32 %v8620_v13, %v8024_v61  ;;  %v5754_v56 = vpop.permute.xlu1 %5753  ;;  %v16448_v25 = vld [vmem:[#allocation154_spill] sm:$0xff] }
 0xd52   :  { %v2083_v9 = vsel %vm1781_vm5, %v2082_v21, %v2081_v11  ;;  %v2086_v6 = vperm.slane %v16443_v41, %v12322_v38  ;;  %v3940_v7 = vsel %vm1769_vm2, %v3939_v8, %v3938_v62  ;;  %v4131_v58 = vperm.slane %v16445_v36, %v12311_v42  ;;  %v16447_v11 = vld [vmem:[#allocation182_spill] sm:$0xff]  ;;  %v16450_v8 = vld [vmem:[#allocation247_spill] sm:$0xff]  ;;  %v16456_v36 = vld [vmem:[#allocation473_spill] sm:$0xff] }
 0xd53   :  { %7542 = vmatpush.bf16.msrb.mxu3 %v8043_v17  ;;  %v3941_v17 = vperm.slane %v16444_v45, %v12282_v46  ;;  %v4128_v37 = vsel %vm1773_vm3, %v4127_v3, %v4126_v20  ;;  %5843 = vperm.xlu2 %9037, %v5108_v19   ;;  %v14027_v1 = vpack.c.bf16 %v6279_v34, %v6279_v34  ;;  %v16451_v23 = vld [vmem:[#allocation430_spill] sm:$0xff]  ;;  %v16453_v19 = vld [vmem:[#allocation21_spill] sm:$0xff] }
 0xd54   :  { %v2096_v15 = vperm.slane %v16447_v11, %v12358_v31  ;;  %v16449_v50 = vperm.slane %v16448_v25, %v12322_v38  ;;  %v4129_v62 = vperm.slane %v16451_v23, %v12298_v18  ;;  %v8616_v20 = vld [vmem:[#allocation5 + $0x1a4] sm:$0xf]  ;;  %v2085_v26 = vsel %vm1785_vm6, %v2084_v12, %v2083_v9  ;;  %v16454_v9 = vld [vmem:[#allocation183_spill] sm:$0xff]  ;;  %v16457_v25 = vld [vmem:[#allocation64_spill] sm:$0xff] }
 0xd55   :  { %16446 = vst [vmem:[#allocation104_spill] sm:$0xff] %v14027_v1  ;;  %v3942_v13 = vsel %vm1773_vm3, %v3941_v17, %v3940_v7  ;;  %v16452_v61 = vld [vmem:[#allocation122_spill] sm:$0xff]  ;;  %7485 = vmatmul.bf16.vlgmr.msra.gmra.mxu2 %v14027_v1  ;;  %v8011_v3 = vor.u32 %v8616_v20, %v8008_v5  ;;  %v2087_v43 = vsel %vm1789_vm7, %v2086_v6, %v2085_v26  ;;  %v16458_v23 = vld [vmem:[#allocation355_spill] sm:$0xff]  ;;  %v7992_v5 = vld [vmem:[#allocation5 + $0x190] sm:$0xf0] }
 0xd56   :  { %v14035_v24 = vsel %vm1789_vm7, %v16449_v50, %v1961_v57  ;;  %v3945_v63 = vperm.slane %v16452_v61, %v12311_v42  ;;  %v14048_v57 = vpop.permute.xlu2 %5783  ;;  %v3943_v34 = vperm.slane %v16453_v19, %v12298_v18  ;;  %v6173_v12 = vperm.slane %v5754_v56, %v12285_v49  ;;  %v16455_v45 = vld [vmem:[#allocation190_spill] sm:$0xff]  ;;  %v16459_v26 = vld [vmem:[#allocation193_spill] sm:$0xff]  ;;  %v16460_v19 = vld [vmem:[#allocation312_spill] sm:$0xff] }
 0xd57   :  { %7543 = vmatpush.bf16.msrb.mxu3 %v8027_v0  ;;  %v4130_v0 = vsel %vm1777_vm4, %v4129_v62, %v4128_v37  ;;  %v2102_v41 = vperm.slane %v16454_v9, %v12386_v44  ;;  %v2088_v17 = vperm.slane %v16455_v45, %v12336_v16  ;;  %v5123_v6 = vmul.f32 %v16456_v36, %v12134_v35  ;;  %v8612_v20 = vld [vmem:[#allocation5 + $0x184] sm:$0xf]  ;;  %v8691_v1 = vld [vmem:[#allocation5 + $0x3f4] sm:$0xf0] }
 0xd58   :  { %v4132_v7 = vsel %vm1781_vm5, %v4131_v58, %v4130_v0  ;;  %v2107_v50 = vperm.slane %v16457_v25, %v12285_v49  ;;  %v3944_v37 = vsel %vm1777_vm4, %v3943_v34, %v3942_v13  ;;  %v4133_v56 = vperm.slane %v16458_v23, %v12305_v48  ;;  %v16461_v0 = vld [vmem:[#allocation17_spill] sm:$0xff]  ;;  %v16462_v36 = vld [vmem:[#allocation282_spill] sm:$0xff]  ;;  %v16463_v23 = vld [vmem:[#allocation432_spill] sm:$0xff] }
 0xd59   :  { %v6172_v62 = vperm.slane %v13796_v22, %v12275_v33  ;;  %v2094_v58 = vperm.slane %v16459_v26, %v12361_v60  ;;  %v2089_v61 = vsel %vm1793_vm8, %v2088_v17, %v2087_v43  ;;  %v3946_v35 = vsel %vm1781_vm5, %v3945_v63, %v3944_v37  ;;  %5888 = vperm.xlu1 %9036, %v5123_v6   ;;  %v5763_v17 = vpop.permute.xlu1 %5762  ;;  %v16464_v6 = vld [vmem:[#allocation442_spill] sm:$0xff] }
 0xd5a   :  { %v3947_v13 = vperm.slane %v16460_v19, %v12305_v48  ;;  %v4134_v34 = vsel %vm1785_vm6, %v4133_v56, %v4132_v7  ;;  %v4137_v45 = vperm.slane %v16461_v0, %v12336_v16  ;;  %v2092_v25 = vperm.slane %v16462_v36, %v12347_v2  ;;  %v16465_v7 = vld [vmem:[#allocation188_spill] sm:$0xff]  ;;  %v8608_v26 = vld [vmem:[#allocation5 + $0x164] sm:$0xf] }
 0xd5b   :  { %7544 = vmatpush.bf16.msrb.mxu3 %v8011_v3  ;;  %v7995_v3 = vor.u32 %v8612_v20, %v7992_v5  ;;  %v6174_v22 = vsel %vm1769_vm2, %v6173_v12, %v6172_v62  ;;  %v4135_v43 = vperm.slane %v16463_v23, %v12322_v38  ;;  %v6175_v63 = vperm.slane %v13890_v32, %v12282_v46  ;;  %v16466_v56 = vld [vmem:[#allocation180_spill] sm:$0xff]  ;;  %v16480_v11 = vld [vmem:[#allocation358_spill] sm:$0xff] }
 0xd5c   :  { %5891 = vperm.xlu2 %9037, %v16464_v6   ;;  %v2113_v37 = vperm.slane %v16465_v7, %v12311_v42  ;;  %v3949_v20 = vperm.slane %v16466_v56, %v12322_v38  ;;  %v3948_v12 = vsel %vm1785_vm6, %v3947_v13, %v3946_v35  ;;  %v16467_v62 = vld [vmem:[#allocation252_spill] sm:$0xff]  ;;  %v6179_v36 = vperm.slane %v5763_v17, %v12311_v42  ;;  %v16468_v6 = vld [vmem:[#allocation199_spill] sm:$0xff]  ;;  %v16469_v56 = vld [vmem:[#allocation357_spill] sm:$0xff] }
 0xd5d   :  { %v3951_v5 = vperm.slane %v16467_v62, %v12336_v16  ;;  %v7976_v19 = vld [vmem:[#allocation5 + $0x170] sm:$0xf0]  ;;  %v4136_v0 = vsel %vm1789_vm7, %v4135_v43, %v4134_v34  ;;  %v6176_v32 = vsel %vm1773_vm3, %v6175_v63, %v6174_v22  ;;  %v2106_v21 = vperm.slane %v16468_v6, %v12275_v33  ;;  %v8604_v43 = vld [vmem:[#allocation5 + $0x144] sm:$0xf] }
 0xd5e   :  { %v7979_v23 = vor.u32 %v8608_v26, %v7976_v19  ;;  %v2091_v35 = vsel %vm1797_vm9, %v2090_v47, %v2089_v61  ;;  %v4138_v13 = vsel %vm1793_vm8, %v4137_v45, %v4136_v0  ;;  %v6177_v34 = vperm.slane %v13856_v29, %v12298_v18  ;;  %v7960_v22 = vld [vmem:[#allocation5 + $0x150] sm:$0xf0]  ;;  %v16471_v47 = vld [vmem:[#allocation191_spill] sm:$0xff]  ;;  %v14119_v29 = vpop.permute.xlu0 %5795 }
 0xd5f   :  { %7545 = vmatpush.bf16.msrb.mxu3 %v7995_v3  ;;  %v14099_v3 = vpop.permute.xlu2 %5792  ;;  %v2093_v63 = vsel %vm1801_vm10, %v2092_v25, %v2091_v35  ;;  %v3950_v17 = vsel %vm1789_vm7, %v3949_v20, %v3948_v12  ;;  %v4139_v62 = vperm.slane %v16469_v56, %v12329_v39  ;;  %v7963_v26 = vor.u32 %v8604_v43, %v7960_v22  ;;  %v16472_v25 = vld [vmem:[#allocation314_spill] sm:$0xff] }
 0xd60   :  { %v2100_v19 = vperm.slane %v16470_v55, %v12381_v40  ;;  %v3952_v45 = vsel %vm1793_vm8, %v3951_v5, %v3950_v17  ;;  %v6178_v0 = vsel %vm1777_vm4, %v6177_v34, %v6176_v32  ;;  %v3953_v20 = vperm.slane %v16472_v25, %v12329_v39  ;;  %v16474_v22 = vld [vmem:[#allocation286_spill] sm:$0xff]  ;;  %v16475_v5 = vld [vmem:[#allocation436_spill] sm:$0xff] }
 0xd61   :  { %v4140_v12 = vsel %vm1797_vm9, %v4139_v62, %v4138_v13  ;;  %v6180_v35 = vsel %vm1781_vm5, %v6179_v36, %v6178_v0  ;;  %v2095_v43 = vsel %vm1805_vm11, %v2094_v58, %v2093_v63  ;;  %v2098_v56 = vperm.slane %v16474_v22, %v12372_v27  ;;  %v16476_v13 = vld [vmem:[#allocation202_spill] sm:$0xff]  ;;  %v5772_v58 = vpop.permute.xlu1 %5771  ;;  %v16478_v63 = vld [vmem:[#allocation51_spill] sm:$0xff] }
 0xd62   :  { %v4141_v17 = vperm.slane %v16475_v5, %v12347_v2  ;;  %v6181_v32 = vperm.slane %v13939_v54, %v12305_v48  ;;  %v2108_v34 = vsel %vm1769_vm2, %v2107_v50, %v2106_v21  ;;  %v2111_v62 = vperm.slane %v16476_v13, %v12298_v18  ;;  %v16477_v36 = vld [vmem:[#allocation114_spill] sm:$0xff]  ;;  %v7944_v50 = vld [vmem:[#allocation5 + $0x130] sm:$0xf0] }
 0xd63   :  { %7546 = vmatpush.bf16.msrb.mxu3 %v7979_v23  ;;  %v16473_v23 = vld [vmem:[#allocation19_spill] sm:$0xff]  ;;  %v3954_v55 = vsel %vm1797_vm9, %v3953_v20, %v3952_v45  ;;  %v3957_v0 = vperm.slane %v16477_v36, %v12361_v60  ;;  %v3955_v25 = vperm.slane %v16478_v63, %v12347_v2  ;;  %v6185_v54 = vperm.slane %v5772_v58, %v12336_v16  ;;  %v8600_v21 = vld [vmem:[#allocation5 + $0x124] sm:$0xf] }
 0xd64   :  { %v4143_v6 = vperm.slane %v16473_v23, %v12361_v60  ;;  %v4142_v23 = vsel %vm1801_vm10, %v4141_v17, %v4140_v12  ;;  %v6182_v22 = vsel %vm1785_vm6, %v6181_v32, %v6180_v35  ;;  %v2097_v45 = vsel %vm1809_vm12, %v2096_v15, %v2095_v43  ;;  %v16479_v17 = vld [vmem:[#allocation99_spill] sm:$0xff]  ;;  %v8596_v43 = vld [vmem:[#allocation5 + $0x104] sm:$0xf] }
 0xd65   :  { %7537 = vmatmul.bf16.vlgmr.msrb.gmra.mxu2 %v13451_v4  ;;  %v7947_v12 = vor.u32 %v8600_v21, %v7944_v50  ;;  %v2099_v35 = vsel %vm1813_vm13, %v2098_v56, %v2097_v45  ;;  %v2109_v32 = vperm.slane %v16479_v17, %v12282_v46  ;;  %v3956_v13 = vsel %vm1801_vm10, %v3955_v25, %v3954_v55  ;;  %v16481_v56 = vld [vmem:[#allocation316_spill] sm:$0xff]  ;;  %v16483_v17 = vld [vmem:[#allocation289_spill] sm:$0xff]  ;;  %v16556_v4 = vld [vmem:[#allocation386_spill] sm:$0xff] }
 0xd66   :  { %v4144_v20 = vsel %vm1805_vm11, %v4143_v6, %v4142_v23  ;;  %v4145_v15 = vperm.slane %v16480_v11, %v12358_v31  ;;  %v7928_v6 = vld [vmem:[#allocation5 + $0x110] sm:$0xf0]  ;;  %v94_v36 = vperm.slane %v13965_v59, 3  ;;  %v3959_v23 = vperm.slane %v16481_v56, %v12358_v31  ;;  %v16486_v56 = vld [vmem:[#allocation378_spill] sm:$0xff] }
 0xd67   :  { %7547 = vmatpush.bf16.msrb.mxu3 %v7963_v26  ;;  %v6183_v26 = vperm.slane %v13922_v14, %v12322_v38  ;;  %v14153_v5 = vpop.permute.xlu2 %5801  ;;  %v3958_v14 = vsel %vm1805_vm11, %v3957_v0, %v3956_v13  ;;  %v7931_v63 = vor.u32 %v8596_v43, %v7928_v6  ;;  %v16482_v55 = vld [vmem:[#allocation20_spill] sm:$0xff]  ;;  %v2101_v45 = vsel %vm1817_vm14, %v2100_v19, %v2099_v35  ;;  %v16484_v0 = vld [vmem:[#allocation438_spill] sm:$0xff]  ;;  %v14182_v19 = vpop.permute.xlu0 %5804 }
 0xd68   :  { %v4146_v21 = vsel %vm1809_vm12, %v4145_v15, %v4144_v20  ;;  %v4149_v25 = vperm.slane %v16482_v55, %v12381_v40  ;;  %v2104_v11 = vperm.slane %v16483_v17, %v12390_v28  ;;  %v8722_v13 = vld [vmem:[#allocation5 + $0x4ec] sm:$0xf0]  ;;  %v8720_v43 = vld [vmem:[#allocation5 + $0x4e4] sm:$0xf]  ;;  %v2110_v20 = vsel %vm1773_vm3, %v2109_v32, %v2108_v34 }
 0xd69   :  { %v6184_v58 = vsel %vm1789_vm7, %v6183_v26, %v6182_v22  ;;  %v4147_v22 = vperm.slane %v16484_v0, %v12372_v27  ;;  %v6187_v26 = vperm.slane %v13992_v10, %v12329_v39  ;;  %v3960_v15 = vsel %vm1809_vm12, %v3959_v23, %v3958_v14  ;;  %v5781_v0 = vpop.permute.xlu1 %5780 }
 0xd6a   :  { %v6186_v50 = vsel %vm1793_vm8, %v6185_v54, %v6184_v58  ;;  %v16485_v54 = vld [vmem:[#allocation32_spill] sm:$0xff]  ;;  %v3961_v55 = vperm.slane %v16486_v56, %v12372_v27  ;;  %v2103_v34 = vsel %vm1821_vm15, %v2102_v41, %v2101_v45  ;;  %v6189_v14 = vperm.slane %v13986_v30, %v12347_v2  ;;  %v8406_v41 = vld [vmem:[#allocation5 + $0x4c0] sm:$0xf]  ;;  %v8716_v45 = vld [vmem:[#allocation5 + $0x4c4] sm:$0xf] }
 0xd6b   :  { %7548 = vmatpush.bf16.msrb.mxu3 %v7947_v12  ;;  %v8422_v12 = vld [vmem:[#allocation5 + $0x4e0] sm:$0xf]  ;;  %v3963_v6 = vperm.slane %v16485_v54, %v12381_v40  ;;  %v8424_v58 = vld [vmem:[#allocation5 + $0x4f0] sm:$0xf0]  ;;  %v4148_v17 = vsel %vm1813_vm13, %v4147_v22, %v4146_v21  ;;  %v6188_v10 = vsel %vm1797_vm9, %v6187_v26, %v6186_v50  ;;  %v6191_v23 = vperm.slane %v5781_v0, %v12361_v60 }
 0xd6c   :  { %v8423_v35 = vor.u32 %v8722_v13, %v8422_v12  ;;  %v8427_v61 = vor.u32 %v8720_v43, %v8424_v58  ;;  %v4150_v32 = vsel %vm1817_vm14, %v4149_v25, %v4148_v17  ;;  %v2112_v21 = vsel %vm1777_vm4, %v2111_v62, %v2110_v20  ;;  %v16487_v50 = vld [vmem:[#allocation294_spill] sm:$0xff]  ;;  %v16488_v26 = vld [vmem:[#allocation360_spill] sm:$0xff] }
 0xd6d   :  { %v2115_v22 = vperm.slane %v16487_v50, %v12305_v48  ;;  %v4151_v9 = vperm.slane %v16488_v26, %v12386_v44  ;;  %v8718_v25 = vld [vmem:[#allocation5 + $0x4cc] sm:$0xf0]  ;;  %v2105_v30 = vsel %vm1825_vm0, %v2104_v11, %v2103_v34  ;;  %v6190_v62 = vsel %vm1801_vm10, %v6189_v14, %v6188_v10  ;;  %v8408_v20 = vld [vmem:[#allocation5 + $0x4d0] sm:$0xf0]  ;;  %v16489_v54 = vld [vmem:[#allocation250_spill] sm:$0xff] }
 0xd6e   :  { %7503 = vmatpush.bf16.msrb.mxu0 %v8423_v35  ;;  %7581 = vmatpush.bf16.msra.mxu2 %v8427_v61  ;;  %v8407_v43 = vor.u32 %v8718_v25, %v8406_v41  ;;  %v6192_v58 = vsel %vm1805_vm11, %v6191_v23, %v6190_v62  ;;  %v8411_v56 = vor.u32 %v8716_v45, %v8408_v20  ;;  %v16490_v11 = vld [vmem:[#allocation306_spill] sm:$0xff]  ;;  %v16492_v0 = vld [vmem:[#allocation200_spill] sm:$0xff]  ;;  %v16495_v45 = vld [vmem:[#allocation205_spill] sm:$0xff] }
 0xd6f   :  { %7549 = vmatpush.bf16.msrb.mxu3 %v7931_v63  ;;  %v3962_v63 = vsel %vm1813_vm13, %v3961_v55, %v3960_v15  ;;  %v14202_v12 = vpop.permute.xlu2 %5846  ;;  %v3965_v15 = vperm.slane %v16489_v54, %v12386_v44  ;;  %v4152_v35 = vsel %vm1821_vm15, %v4151_v9, %v4150_v32  ;;  %v2114_v61 = vsel %vm1781_vm5, %v2113_v37, %v2112_v21  ;;  %v16491_v55 = vld [vmem:[#allocation440_spill] sm:$0xff]  ;;  %v16493_v32 = vld [vmem:[#allocation105_spill] sm:$0xff]  ;;  %v8390_v23 = vld [vmem:[#allocation5 + $0x4a0] sm:$0xf] }
 0xd70   :  { %v3964_v13 = vsel %vm1817_vm14, %v3963_v6, %v3962_v63  ;;  %v2138_v6 = vperm.slane %v16490_v11, %v12285_v49  ;;  %v4153_v17 = vperm.slane %v16491_v55, %v12390_v28  ;;  %v6193_v10 = vperm.slane %v14048_v57, %v12358_v31  ;;  %v8714_v21 = vld [vmem:[#allocation5 + $0x4ac] sm:$0xf0]  ;;  %v8712_v50 = vld [vmem:[#allocation5 + $0x4a4] sm:$0xf]  ;;  %v16494_v63 = vld [vmem:[#allocation379_spill] sm:$0xff] }
 0xd71   :  { %v2137_v34 = vperm.slane %v16492_v0, %v12275_v33  ;;  %v2172_v14 = vsel %vm2168_vm1, %v2105_v30, %v16493_v32  ;;  %v2116_v7 = vsel %vm1785_vm6, %v2115_v22, %v2114_v61  ;;  %v3966_v37 = vsel %vm1821_vm15, %v3965_v15, %v3964_v13  ;;  %v8392_v25 = vld [vmem:[#allocation5 + $0x4b0] sm:$0xf0]  ;;  %v16497_v0 = vld [vmem:[#allocation298_spill] sm:$0xff] }
 0xd72   :  { %7504 = vmatpush.bf16.msrb.mxu0 %v8407_v43  ;;  %7582 = vmatpush.bf16.msra.mxu2 %v8411_v56  ;;  %v3967_v26 = vperm.slane %v16494_v63, %v12390_v28  ;;  %v4154_v57 = vsel %vm1825_vm0, %v4153_v17, %v4152_v35  ;;  %v6194_v9 = vsel %vm1809_vm12, %v6193_v10, %v6192_v58  ;;  %v16496_v22 = vld [vmem:[#allocation216_spill] sm:$0xff]  ;;  %v5790_v43 = vpop.permute.xlu1 %5789  ;;  %v14241_v58 = vpop.permute.xlu0 %5849  ;;  %v8708_v10 = vld [vmem:[#allocation5 + $0x484] sm:$0xf] }
 0xd73   :  { %v8391_v41 = vor.u32 %v8714_v21, %v8390_v23  ;;  %v2117_v30 = vperm.slane %v16495_v45, %v12322_v38  ;;  %v2140_v62 = vperm.slane %v16496_v22, %v12282_v46  ;;  %v6195_v13 = vperm.slane %v14055_v51, %v12372_v27  ;;  %v8710_v17 = vld [vmem:[#allocation5 + $0x48c] sm:$0xf0]  ;;  %v8552_v22 = vld [vmem:[#allocation5 + $0x5f0] sm:$0xf0] }
 0xd74   :  { %v8395_v20 = vor.u32 %v8712_v50, %v8392_v25  ;;  %v2184_v54 = vadd.f32 %v2172_v14, %v94_v36  ;;  %v2139_v15 = vsel %vm1769_vm2, %v2138_v6, %v2137_v34  ;;  %v3968_v35 = vsel %vm1825_vm0, %v3967_v26, %v3966_v37  ;;  %v8374_v6 = vld [vmem:[#allocation5 + $0x480] sm:$0xf]  ;;  %v16498_v23 = vld [vmem:[#allocation308_spill] sm:$0xff] }
 0xd75   :  { %v6197_v56 = vperm.slane %v5790_v43, %v12381_v40  ;;  %v2118_v61 = vsel %vm1789_vm7, %v2117_v30, %v2116_v7  ;;  %v6199_v11 = vperm.slane %v14099_v3, %v12386_v44  ;;  %v6196_v51 = vsel %vm1813_vm13, %v6195_v13, %v6194_v9  ;;  %v8376_v3 = vld [vmem:[#allocation5 + $0x490] sm:$0xf0]  ;;  %v8550_v26 = vld [vmem:[#allocation5 + $0x5e0] sm:$0xf]  ;;  %v16499_v9 = vld [vmem:[#allocation203_spill] sm:$0xff] }
 0xd76   :  { %7505 = vmatpush.bf16.msrb.mxu0 %v8391_v41  ;;  %v4220_v36 = vsel %vm2168_vm1, %v4154_v57, %v3968_v35  ;;  %7583 = vmatpush.bf16.msra.mxu2 %v8395_v20  ;;  %v2121_v34 = vperm.slane %v16497_v0, %v12329_v39  ;;  %v6201_v32 = vperm.slane %v14119_v29, %v12390_v28  ;;  %v8754_v57 = vld [vmem:[#allocation5 + $0x5ec] sm:$0xf0]  ;;  %v8752_v30 = vld [vmem:[#allocation5 + $0x5e4] sm:$0xf] }
 0xd77   :  { %v14248_v55 = vpop.permute.xlu2 %5852  ;;  %v6198_v14 = vsel %vm1817_vm14, %v6197_v56, %v6196_v51  ;;  %v8375_v7 = vor.u32 %v8710_v17, %v8374_v6  ;;  %v2141_v37 = vsel %vm1773_vm3, %v2140_v62, %v2139_v15  ;;  %v2144_v21 = vperm.slane %v16498_v23, %v12311_v42  ;;  %v16500_v62 = vld [vmem:[#allocation152_spill] sm:$0xff]  ;;  %v8358_v51 = vld [vmem:[#allocation5 + $0x460] sm:$0xf]  ;;  %v8704_v6 = vld [vmem:[#allocation5 + $0x464] sm:$0xf] }
 0xd78   :  { %v6200_v50 = vsel %vm1821_vm15, %v6199_v11, %v6198_v14  ;;  %v8379_v63 = vor.u32 %v8708_v10, %v8376_v3  ;;  %v2142_v41 = vperm.slane %v16499_v9, %v12298_v18  ;;  %v4232_v29 = vadd.f32 %v4220_v36, %v2184_v54  ;;  %v16504_v56 = vld [vmem:[#allocation404_spill] sm:$0xff]  ;;  %v14286_v14 = vpop.f32.mrf.mxu0  ;;  %v16506_v23 = vld [vmem:[#allocation149_spill] sm:$0xff] }
 0xd79   :  { %v6202_v25 = vsel %vm1825_vm0, %v6201_v32, %v6200_v50  ;;  %v8551_v45 = vor.u32 %v8754_v57, %v8550_v26  ;;  %v16501_v13 = vperm.slane %v16500_v62, %v12372_v27  ;;  %v16502_v20 = vperm.slane %v16450_v8, %v12336_v16  ;;  %v8706_v36 = vld [vmem:[#allocation5 + $0x46c] sm:$0xf0]  ;;  %v16510_v57 = vld [vmem:[#allocation218_spill] sm:$0xff]  ;;  %v16513_v62 = vld [vmem:[#allocation301_spill] sm:$0xff] }
 0xd7a   :  { %7506 = vmatpush.bf16.msrb.mxu0 %v8375_v7  ;;  %v16503_v35 = vperm.slane %v16471_v47, %v12336_v16  ;;  %v6268_v11 = vsel %vm2168_vm1, %v6202_v25, %v16504_v56  ;;  %7584 = vmatpush.bf16.msra.mxu2 %v8379_v63  ;;  %v2143_v17 = vsel %vm1777_vm4, %v2142_v41, %v2141_v37  ;;  %v16505_v0 = vld [vmem:[#allocation208_spill] sm:$0xff]  ;;  %v14284_v32 = vpop.permute.xlu1 %5798  ;;  %v8534_v41 = vld [vmem:[#allocation5 + $0x5c0] sm:$0xf] }
 0xd7b   :  { %v1944_v43 = vsel %vm1813_vm13, %v16501_v13, %v13692_v52  ;;  %v1965_v15 = vsel %vm1793_vm8, %v16502_v20, %v14035_v24  ;;  %v6280_v10 = vadd.f32 %v6268_v11, %v4232_v29  ;;  %7516 = vmatpush.bf16.msrb.mxu1 %v8551_v45  ;;  %v8359_v8 = vor.u32 %v8706_v36, %v8358_v51  ;;  %v8360_v24 = vld [vmem:[#allocation5 + $0x470] sm:$0xf0]  ;;  %v8750_v25 = vld [vmem:[#allocation5 + $0x5cc] sm:$0xf0]  ;;  %v8748_v29 = vld [vmem:[#allocation5 + $0x5c4] sm:$0xf] }
 0xd7c   :  { %v2120_v54 = vsel %vm1793_vm8, %v16503_v35, %v2118_v61  ;;  %v2123_v47 = vperm.slane %v16505_v0, %v12347_v2  ;;  %v2145_v61 = vsel %vm1781_vm5, %v2144_v21, %v2143_v17  ;;  %v8555_v7 = vor.u32 %v8752_v30, %v8552_v22  ;;  %v16508_v50 = vld [vmem:[#allocation76_spill] sm:$0xff]  ;;  %v16512_v45 = vld [vmem:[#allocation194_spill] sm:$0xff]  ;;  %v16515_v51 = vld [vmem:[#allocation257_spill] sm:$0xff] }
 0xd7d   :  { %v2122_v52 = vsel %vm1797_vm9, %v2121_v34, %v2120_v54  ;;  %v8363_v3 = vor.u32 %v8704_v6, %v8360_v24  ;;  %v16507_v34 = vperm.slane %v16506_v23, %v12381_v40  ;;  %v16509_v63 = vperm.slane %v16508_v50, %v12329_v39  ;;  %v8536_v20 = vld [vmem:[#allocation5 + $0x5d0] sm:$0xf0]  ;;  %v8702_v35 = vld [vmem:[#allocation5 + $0x44c] sm:$0xf0]  ;;  %v16514_v56 = vld [vmem:[#allocation310_spill] sm:$0xff]  ;;  %v14312_v6 = vpop.permute.xlu0 %5813 }
 0xd7e   :  { %v2146_v21 = vperm.slane %v16510_v57, %v12305_v48  ;;  %v14300_v9 = vpack.c.bf16 %v6280_v10, %v6280_v10  ;;  %7507 = vmatpush.bf16.msrb.mxu0 %v8359_v8  ;;  %v2125_v30 = vperm.slane %v16512_v45, %v12361_v60  ;;  %v2124_v22 = vsel %vm1801_vm10, %v2123_v47, %v2122_v52  ;;  %v8700_v17 = vld [vmem:[#allocation5 + $0x444] sm:$0xf]  ;;  %v8344_v10 = vld [vmem:[#allocation5 + $0x450] sm:$0xf0]  ;;  %v8746_v23 = vld [vmem:[#allocation5 + $0x5ac] sm:$0xf0] }
 0xd7f   :  { %v14292_v37 = vsel %vm1817_vm14, %v16507_v34, %v1944_v43  ;;  %v1967_v26 = vsel %vm1797_vm9, %v16509_v63, %v1965_v15  ;;  %v2127_v13 = vperm.slane %v16513_v62, %v12358_v31  ;;  %7585 = vmatpush.bf16.msra.mxu2 %v8363_v3  ;;  %v8535_v43 = vor.u32 %v8750_v25, %v8534_v41  ;;  %v8342_v15 = vld [vmem:[#allocation5 + $0x440] sm:$0xf]  ;;  %v14317_v0 = vpop.permute.xlu2 %5816  ;;  %v16518_v63 = vld [vmem:[#allocation248_spill] sm:$0xff]  ;;  %v8744_v45 = vld [vmem:[#allocation5 + $0x5a4] sm:$0xf] }
 0xd80   :  { %16511 = vst [vmem:[#allocation107_spill] sm:$0xff] %v14300_v9  ;;  %v2147_v54 = vsel %vm1785_vm6, %v2146_v21, %v2145_v61  ;;  %v2150_v11 = vperm.slane %v16514_v56, %v12336_v16  ;;  %v3969_v36 = vperm.slane %v16515_v51, %v12275_v33  ;;  %7498 = vmatmul.bf16.vlgmr.msra.gmra.mxu3 %v14300_v9  ;;  %v16516_v8 = vld [vmem:[#allocation206_spill] sm:$0xff]  ;;  %v8520_v62 = vld [vmem:[#allocation5 + $0x5b0] sm:$0xf0]  ;;  %v8302_v9 = vld [vmem:[#allocation5 + $0x3e8] sm:$0xf] }
 0xd81   :  { %v8343_v52 = vor.u32 %v8702_v35, %v8342_v15  ;;  %v2148_v24 = vperm.slane %v16516_v8, %v12322_v38  ;;  %7594 = vmatpush.bf16.msra.mxu3 %v8555_v7  ;;  %7517 = vmatpush.bf16.msrb.mxu1 %v8535_v43  ;;  %v8539_v47 = vor.u32 %v8748_v29, %v8536_v20  ;;  %v8518_v3 = vld [vmem:[#allocation5 + $0x5a0] sm:$0xf]  ;;  %v16520_v15 = vld [vmem:[#allocation155_spill] sm:$0xff] }
 0xd82   :  { %v8347_v61 = vor.u32 %v8700_v17, %v8344_v10  ;;  %v16517_v34 = vld [vmem:[#allocation242_spill] sm:$0xff]  ;;  %v1970_v57 = vperm.slane %v16518_v63, %v12361_v60  ;;  %v8519_v25 = vor.u32 %v8746_v23, %v8518_v3  ;;  %v16521_v7 = vperm.slane %v16520_v15, %v12347_v2  ;;  %v8698_v17 = vld [vmem:[#allocation5 + $0x42c] sm:$0xf0] }
 0xd83   :  { %v1947_v50 = vperm.slane %v16517_v34, %v12386_v44  ;;  %v16519_v21 = vld [vmem:[#allocation318_spill] sm:$0xff]  ;;  %7508 = vmatpush.bf16.msrb.mxu0 %v8343_v52  ;;  %v2126_v35 = vsel %vm1805_vm11, %v2125_v30, %v2124_v22  ;;  %v2149_v56 = vsel %vm1789_vm7, %v2148_v24, %v2147_v54  ;;  %v8328_v34 = vld [vmem:[#allocation5 + $0x430] sm:$0xf0]  ;;  %v7462_v30 = vpop.f32.mrf.mxu0  ;;  %v8523_v22 = vor.u32 %v8744_v45, %v8520_v62 }
 0xd84   :  { %v3970_v41 = vperm.slane %v16519_v21, %v12285_v49  ;;  %v1969_v29 = vsel %vm1801_vm10, %v16521_v7, %v1967_v26  ;;  %v16522_v43 = vld [vmem:[#allocation210_spill] sm:$0xff]  ;;  %7586 = vmatpush.bf16.msra.mxu2 %v8347_v61  ;;  %v2128_v52 = vsel %vm1809_vm12, %v2127_v13, %v2126_v35  ;;  %v2151_v8 = vsel %vm1793_vm8, %v2150_v11, %v2149_v56  ;;  %v14338_v21 = vpop.permute.xlu1 %5807  ;;  %v16524_v13 = vld [vmem:[#allocation197_spill] sm:$0xff]  ;;  %v8504_v56 = vld [vmem:[#allocation5 + $0x590] sm:$0xf0] }
 0xd85   :  { %v2129_v20 = vperm.slane %v16522_v43, %v12372_v27  ;;  %v8326_v51 = vld [vmem:[#allocation5 + $0x420] sm:$0xf]  ;;  %v8696_v10 = vld [vmem:[#allocation5 + $0x424] sm:$0xf]  ;;  %7595 = vmatpush.bf16.msra.mxu3 %v8539_v47  ;;  %7518 = vmatpush.bf16.msrb.mxu1 %v8519_v25  ;;  %v1971_v24 = vsel %vm1805_vm11, %v1970_v57, %v1969_v29  ;;  %v2131_v61 = vperm.slane %v16524_v13, %v12381_v40  ;;  %v16525_v11 = vld [vmem:[#allocation221_spill] sm:$0xff] }
 0xd86   :  { %v3971_v3 = vsel %vm1769_vm2, %v3970_v41, %v3969_v36  ;;  %v8327_v23 = vor.u32 %v8698_v17, %v8326_v51  ;;  %v16523_v26 = vld [vmem:[#allocation258_spill] sm:$0xff]  ;;  %v8331_v54 = vor.u32 %v8696_v10, %v8328_v34  ;;  %v2152_v36 = vperm.slane %v16525_v11, %v12329_v39  ;;  %v16526_v41 = vld [vmem:[#allocation381_spill] sm:$0xff]  ;;  %v8742_v43 = vld [vmem:[#allocation5 + $0x58c] sm:$0xf0] }
 0xd87   :  { %v3974_v63 = vperm.slane %v16523_v26, %v12298_v18  ;;  %v3972_v15 = vperm.slane %v16526_v41, %v12282_v46  ;;  %v8502_v7 = vld [vmem:[#allocation5 + $0x580] sm:$0xf]  ;;  %v8740_v35 = vld [vmem:[#allocation5 + $0x584] sm:$0xf]  ;;  %v16527_v47 = vld [vmem:[#allocation28_spill] sm:$0xff]  ;;  %v2130_v45 = vsel %vm1813_vm13, %v2129_v20, %v2128_v52 }
 0xd88   :  { %7509 = vmatpush.bf16.msrb.mxu0 %v8327_v23  ;;  %v2154_v25 = vperm.slane %v16527_v47, %v12347_v2  ;;  %v16528_v57 = vld [vmem:[#allocation106_spill] sm:$0xff]  ;;  %7587 = vmatpush.bf16.msra.mxu2 %v8331_v54  ;;  %v8503_v29 = vor.u32 %v8742_v43, %v8502_v7  ;;  %v8694_v17 = vld [vmem:[#allocation5 + $0x40c] sm:$0xf0]  ;;  %v2153_v10 = vsel %vm1797_vm9, %v2152_v36, %v2151_v8  ;;  %v16529_v23 = vld [vmem:[#allocation117_spill] sm:$0xff] }
 0xd89   :  { %v2133_v62 = vperm.slane %v16528_v57, %v12386_v44  ;;  %v8310_v51 = vld [vmem:[#allocation5 + $0x400] sm:$0xf]  ;;  %v2156_v34 = vperm.slane %v16529_v23, %v12361_v60  ;;  %v3973_v26 = vsel %vm1773_vm3, %v3972_v15, %v3971_v3  ;;  %v8692_v13 = vld [vmem:[#allocation5 + $0x404] sm:$0xf]  ;;  %v8312_v11 = vld [vmem:[#allocation5 + $0x410] sm:$0xf0]  ;;  %7596 = vmatpush.bf16.msra.mxu3 %v8523_v22  ;;  %v8507_v52 = vor.u32 %v8740_v35, %v8504_v56  ;;  %v14361_v3 = vpop.permute.xlu0 %5858 }
 0xd8a   :  { %v8311_v30 = vor.u32 %v8694_v17, %v8310_v51  ;;  %v8656_v41 = vld [vmem:[#allocation5 + $0x2e4] sm:$0xf]  ;;  %v3975_v20 = vsel %vm1777_vm4, %v3974_v63, %v3973_v26  ;;  %7519 = vmatpush.bf16.msrb.mxu1 %v8503_v29  ;;  %v8315_v54 = vor.u32 %v8692_v13, %v8312_v11  ;;  %v8168_v7 = vld [vmem:[#allocation5 + $0x2f0] sm:$0xf0]  ;;  %v8174_v43 = vld [vmem:[#allocation5 + $0x2e8] sm:$0xf]  ;;  %v1948_v8 = vsel %vm1821_vm15, %v1947_v50, %v14292_v37  ;;  %v14369_v50 = vpop.permute.xlu2 %5861 }
 0xd8b   :  { %v8659_v47 = vld [vmem:[#allocation5 + $0x2f4] sm:$0xf0]  ;;  %16531 = vst [vmem:[#allocation184_spill] sm:$0xff] %v14361_v3  ;;  %v8171_v15 = vor.u32 %v8656_v41, %v8168_v7  ;;  %v8486_v17 = vld [vmem:[#allocation5 + $0x560] sm:$0xf]  ;;  %v16532_v29 = vld [vmem:[#allocation59_spill] sm:$0xff]  ;;  %v2132_v23 = vsel %vm1817_vm14, %v2131_v61, %v2130_v45  ;;  %v2155_v37 = vsel %vm1801_vm10, %v2154_v25, %v2153_v10 }
 0xd8c   :  { %v16530_v36 = vld [vmem:[#allocation153_spill] sm:$0xff]  ;;  %7510 = vmatpush.bf16.msrb.mxu0 %v8311_v30  ;;  %v8175_v51 = vor.u32 %v8659_v47, %v8174_v43  ;;  %v8738_v63 = vld [vmem:[#allocation5 + $0x56c] sm:$0xf0]  ;;  %v8736_v22 = vld [vmem:[#allocation5 + $0x564] sm:$0xf]  ;;  %v16533_v35 = vperm.slane %v16532_v29, %v12358_v31  ;;  %16534 = vst [vmem:[#allocation66_spill] sm:$0xff] %v14369_v50  ;;  %7588 = vmatpush.bf16.msra.mxu2 %v8315_v54  ;;  %v14376_v25 = vpop.permute.xlu1 %5810 }
 0xd8d   :  { %v3976_v57 = vperm.slane %v16530_v36, %v12311_v42  ;;  %v8487_v26 = vor.u32 %v8738_v63, %v8486_v17  ;;  %v8488_v13 = vld [vmem:[#allocation5 + $0x570] sm:$0xf0]  ;;  %v2134_v30 = vsel %vm1821_vm15, %v2133_v62, %v2132_v23  ;;  %v2157_v11 = vsel %vm1805_vm11, %v2156_v34, %v2155_v37  ;;  %v8652_v7 = vld [vmem:[#allocation5 + $0x2c4] sm:$0xf]  ;;  %7597 = vmatpush.bf16.msra.mxu3 %v8507_v52  ;;  %v8655_v47 = vld [vmem:[#allocation5 + $0x2d4] sm:$0xf0] }
 0xd8e   :  { %v1973_v56 = vsel %vm1809_vm12, %v16533_v35, %v1971_v24  ;;  %v8152_v43 = vld [vmem:[#allocation5 + $0x2d0] sm:$0xf0]  ;;  %v8158_v24 = vld [vmem:[#allocation5 + $0x2c8] sm:$0xf]  ;;  %v8491_v10 = vor.u32 %v8736_v22, %v8488_v13  ;;  %v16536_v62 = vld [vmem:[#allocation213_spill] sm:$0xff] }
 0xd8f   :  { %v3977_v41 = vsel %vm1781_vm5, %v3976_v57, %v3975_v20  ;;  %v16535_v61 = vld [vmem:[#allocation260_spill] sm:$0xff]  ;;  %7520 = vmatpush.bf16.msrb.mxu1 %v8487_v26  ;;  %v8155_v54 = vor.u32 %v8652_v7, %v8152_v43  ;;  %v2135_v34 = vperm.slane %v16536_v62, %v12390_v28  ;;  %v16538_v57 = vld [vmem:[#allocation383_spill] sm:$0xff]  ;;  %v8470_v17 = vld [vmem:[#allocation5 + $0x540] sm:$0xf] }
 0xd90   :  { %7555 = vmatpush.bf16.msra.mxu0 %v8171_v15  ;;  %7633 = vmatpush.bf16.msrb.mxu2 %v8175_v51  ;;  %v3980_v45 = vperm.slane %v16535_v61, %v12322_v38  ;;  %v16537_v20 = vld [vmem:[#allocation224_spill] sm:$0xff]  ;;  %v3978_v15 = vperm.slane %v16538_v57, %v12305_v48  ;;  %v8159_v51 = vor.u32 %v8655_v47, %v8158_v24  ;;  %v8732_v29 = vld [vmem:[#allocation5 + $0x544] sm:$0xf]  ;;  %v16539_v35 = vld [vmem:[#allocation77_spill] sm:$0xff] }
 0xd91   :  { %v2158_v36 = vperm.slane %v16537_v20, %v12358_v31  ;;  %v8734_v63 = vld [vmem:[#allocation5 + $0x54c] sm:$0xf0]  ;;  %v16540_v52 = vperm.slane %v16539_v35, %v12390_v28  ;;  %v16543_v13 = vld [vmem:[#allocation251_spill] sm:$0xff]  ;;  %v8472_v61 = vld [vmem:[#allocation5 + $0x550] sm:$0xf0]  ;;  %v2136_v24 = vsel %vm1825_vm0, %v2135_v34, %v2134_v30  ;;  %7550 = vmatmul.bf16.vlgmr.msrb.gmra.mxu3 %v13760_v53 }
 0xd92   :  { %v16541_v23 = vld [vmem:[#allocation80_spill] sm:$0xff]  ;;  %v1976_v7 = vperm.slane %v16543_v13, %v12381_v40  ;;  %v8471_v43 = vor.u32 %v8734_v63, %v8470_v17  ;;  %v3979_v62 = vsel %vm1785_vm6, %v3978_v15, %v3977_v41  ;;  %v8142_v57 = vld [vmem:[#allocation5 + $0x2a8] sm:$0xf]  ;;  %7598 = vmatpush.bf16.msra.mxu3 %v8491_v10  ;;  %v8475_v17 = vor.u32 %v8732_v29, %v8472_v61  ;;  %v16545_v41 = vld [vmem:[#allocation313_spill] sm:$0xff] }
 0xd93   :  { %v1950_v22 = vsel %vm1825_vm0, %v16540_v52, %v1948_v8  ;;  %v16542_v37 = vperm.slane %v16541_v23, %v12372_v27  ;;  %v2159_v47 = vsel %vm1809_vm12, %v2158_v36, %v2157_v11  ;;  %v8648_v8 = vld [vmem:[#allocation5 + $0x2a4] sm:$0xf]  ;;  %v8136_v20 = vld [vmem:[#allocation5 + $0x2b0] sm:$0xf0]  ;;  %v3981_v35 = vsel %vm1789_vm7, %v3980_v45, %v3979_v62  ;;  %v8651_v52 = vld [vmem:[#allocation5 + $0x2b4] sm:$0xf0] }
 0xd94   :  { %7556 = vmatpush.bf16.msra.mxu0 %v8155_v54  ;;  %7634 = vmatpush.bf16.msrb.mxu2 %v8159_v51  ;;  %v8139_v63 = vor.u32 %v8648_v8, %v8136_v20  ;;  %v16544_v30 = vld [vmem:[#allocation211_spill] sm:$0xff]  ;;  %v2162_v34 = vperm.slane %v16545_v41, %v12381_v40  ;;  %v8143_v15 = vor.u32 %v8651_v52, %v8142_v57  ;;  %v8454_v23 = vld [vmem:[#allocation5 + $0x520] sm:$0xf]  ;;  %v8730_v45 = vld [vmem:[#allocation5 + $0x52c] sm:$0xf0] }
 0xd95   :  { %v1975_v26 = vsel %vm1813_vm13, %v16542_v37, %v1973_v56  ;;  %v95_v56 = vperm.slane %v13965_v59, 4  ;;  %v2160_v11 = vperm.slane %v16544_v30, %v12372_v27  ;;  %v16546_v54 = vld [vmem:[#allocation319_spill] sm:$0xff]  ;;  %7521 = vmatpush.bf16.msrb.mxu1 %v8471_v43  ;;  %v8728_v37 = vld [vmem:[#allocation5 + $0x524] sm:$0xf]  ;;  %v2173_v29 = vsel %vm2168_vm1, %v2136_v24, %v1950_v22  ;;  %v8456_v61 = vld [vmem:[#allocation5 + $0x530] sm:$0xf0]  ;;  %v14418_v30 = vpop.permute.xlu0 %5822 }
 0xd96   :  { %v3982_v36 = vperm.slane %v16546_v54, %v12336_v16  ;;  %v14407_v59 = vsel %vm1817_vm14, %v1976_v7, %v1975_v26  ;;  %v8455_v13 = vor.u32 %v8730_v45, %v8454_v23  ;;  %v16550_v57 = vld [vmem:[#allocation34_spill] sm:$0xff]  ;;  %v8120_v7 = vld [vmem:[#allocation5 + $0x290] sm:$0xf0]  ;;  %v8126_v41 = vld [vmem:[#allocation5 + $0x288] sm:$0xf]  ;;  %v14422_v54 = vpop.permute.xlu2 %5825  ;;  %v14424_v23 = vpop.permute.xlu1 %5855  ;;  %7599 = vmatpush.bf16.msra.mxu3 %v8475_v17  ;;  %v3990_v17 = vperm.slane %v16556_v4, %v12358_v31 }
 0xd97   :  { %16547 = vst [vmem:[#allocation382_spill] sm:$0xff] %v14407_v59  ;;  %v2161_v20 = vsel %vm1813_vm13, %v2160_v11, %v2159_v47  ;;  %v3986_v52 = vperm.slane %v16550_v57, %v12347_v2  ;;  %v8644_v26 = vld [vmem:[#allocation5 + $0x284] sm:$0xf]  ;;  %v8459_v47 = vor.u32 %v8728_v37, %v8456_v61  ;;  %v8647_v11 = vld [vmem:[#allocation5 + $0x294] sm:$0xf0]  ;;  %v14431_v57 = vadd.f32 %v2173_v29, %v95_v56  ;;  %v16559_v56 = vld [vmem:[#allocation320_spill] sm:$0xff] }
 0xd98   :  { %v3983_v43 = vsel %vm1793_vm8, %v3982_v36, %v3981_v35  ;;  %7557 = vmatpush.bf16.msra.mxu0 %v8139_v63  ;;  %v16551_v22 = vld [vmem:[#allocation22_spill] sm:$0xff]  ;;  %16552 = vst [vmem:[#allocation108_spill] sm:$0xff] %v14422_v54  ;;  %7635 = vmatpush.bf16.msrb.mxu2 %v8143_v15  ;;  %v8123_v35 = vor.u32 %v8644_v26, %v8120_v7  ;;  %v16554_v63 = vld [vmem:[#allocation385_spill] sm:$0xff]  ;;  %v8726_v8 = vld [vmem:[#allocation5 + $0x50c] sm:$0xf0] }
 0xd99   :  { %v4155_v24 = vperm.slane %v16551_v22, %v12275_v33  ;;  %v14427_v36 = vsel %vm1817_vm14, %v2162_v34, %v2161_v20  ;;  %v3984_v45 = vperm.slane %v16554_v63, %v12329_v39  ;;  %16555 = vst [vmem:[#allocation65_spill] sm:$0xff] %v14431_v57  ;;  %7522 = vmatpush.bf16.msrb.mxu1 %v8455_v13  ;;  %v8438_v22 = vld [vmem:[#allocation5 + $0x500] sm:$0xf]  ;;  %v8724_v53 = vld [vmem:[#allocation5 + $0x504] sm:$0xf]  ;;  %v16557_v15 = vld [vmem:[#allocation387_spill] sm:$0xff] }
 0xd9a   :  { %16553 = vst [vmem:[#allocation109_spill] sm:$0xff] %v14427_v36  ;;  %v8127_v51 = vor.u32 %v8647_v11, %v8126_v41  ;;  %v16558_v61 = vld [vmem:[#allocation14_spill] sm:$0xff]  ;;  %v8439_v20 = vor.u32 %v8726_v8, %v8438_v22  ;;  %v8440_v26 = vld [vmem:[#allocation5 + $0x510] sm:$0xf0]  ;;  %v3988_v29 = vperm.slane %v16559_v56, %v12361_v60  ;;  %7600 = vmatpush.bf16.msra.mxu3 %v8459_v47  ;;  %v8110_v59 = vld [vmem:[#allocation5 + $0x268] sm:$0xf] }
 0xd9b   :  { %v4156_v34 = vperm.slane %v16558_v61, %v12285_v49  ;;  %v8688_v7 = vld [vmem:[#allocation5 + $0x3e4] sm:$0xf]  ;;  %v8296_v63 = vld [vmem:[#allocation5 + $0x3f0] sm:$0xf0]  ;;  %v3985_v11 = vsel %vm1797_vm9, %v3984_v45, %v3983_v43  ;;  %v8443_v22 = vor.u32 %v8724_v53, %v8440_v26  ;;  %v8643_v56 = vld [vmem:[#allocation5 + $0x274] sm:$0xf0]  ;;  %v8303_v43 = vor.u32 %v8691_v1, %v8302_v9 }
 0xd9c   :  { %v16560_v13 = vld [vmem:[#allocation324_spill] sm:$0xff]  ;;  %7558 = vmatpush.bf16.msra.mxu0 %v8123_v35  ;;  %v8299_v4 = vor.u32 %v8688_v7, %v8296_v63  ;;  %v8640_v37 = vld [vmem:[#allocation5 + $0x264] sm:$0xf]  ;;  %v3987_v10 = vsel %vm1801_vm10, %v3986_v52, %v3985_v11  ;;  %7636 = vmatpush.bf16.msrb.mxu2 %v8127_v51  ;;  %v8111_v45 = vor.u32 %v8643_v56, %v8110_v59  ;;  %v8687_v56 = vld [vmem:[#allocation5 + $0x3d4] sm:$0xf0] }
 0xd9d   :  { %v4000_v41 = vperm.slane %v16560_v13, %v12275_v33  ;;  %v4157_v8 = vsel %vm1769_vm2, %v4156_v34, %v4155_v24  ;;  %v8104_v61 = vld [vmem:[#allocation5 + $0x270] sm:$0xf0]  ;;  %v16561_v62 = vld [vmem:[#allocation366_spill] sm:$0xff]  ;;  %7523 = vmatpush.bf16.msrb.mxu1 %v8439_v20  ;;  %v16564_v24 = vld [vmem:[#allocation389_spill] sm:$0xff]  ;;  %v3989_v59 = vsel %vm1805_vm11, %v3988_v29, %v3987_v10 }
 0xd9e   :  { %v4160_v13 = vperm.slane %v16561_v62, %v12298_v18  ;;  %v8107_v35 = vor.u32 %v8640_v37, %v8104_v61  ;;  %v16562_v7 = vld [vmem:[#allocation136_spill] sm:$0xff]  ;;  %v8684_v34 = vld [vmem:[#allocation5 + $0x3c4] sm:$0xf]  ;;  %v8286_v62 = vld [vmem:[#allocation5 + $0x3c8] sm:$0xf]  ;;  %v14464_v36 = vpop.permute.xlu1 %5819  ;;  %7601 = vmatpush.bf16.msra.mxu3 %v8443_v22 }
 0xd9f   :  { %v4001_v63 = vperm.slane %v16562_v7, %v12285_v49  ;;  %v16563_v52 = vld [vmem:[#allocation388_spill] sm:$0xff]  ;;  %v16567_v37 = vld [vmem:[#allocation231_spill] sm:$0xff]  ;;  %v8636_v7 = vld [vmem:[#allocation5 + $0x244] sm:$0xf] }
 0xda0   :  { %v16565_v53 = vld [vmem:[#allocation444_spill] sm:$0xff]  ;;  %v3992_v20 = vperm.slane %v16567_v37, %v12372_v27  ;;  %7559 = vmatpush.bf16.msra.mxu0 %v8107_v35  ;;  %v16568_v11 = vld [vmem:[#allocation322_spill] sm:$0xff]  ;;  %7637 = vmatpush.bf16.msrb.mxu2 %v8111_v45  ;;  %v8094_v57 = vld [vmem:[#allocation5 + $0x248] sm:$0xf] }
 0xda1   :  { %v4158_v47 = vperm.slane %v16565_v53, %v12282_v46  ;;  %7568 = vmatpush.bf16.msra.mxu1 %v8299_v4  ;;  %v8280_v26 = vld [vmem:[#allocation5 + $0x3d0] sm:$0xf0]  ;;  %v3994_v53 = vperm.slane %v16568_v11, %v12381_v40  ;;  %v8639_v10 = vld [vmem:[#allocation5 + $0x254] sm:$0xf0]  ;;  %v4002_v29 = vsel %vm1769_vm2, %v4001_v63, %v4000_v41  ;;  %v8680_v41 = vld [vmem:[#allocation5 + $0x3a4] sm:$0xf] }
 0xda2   :  { %v8283_v61 = vor.u32 %v8684_v34, %v8280_v26  ;;  %v8088_v51 = vld [vmem:[#allocation5 + $0x250] sm:$0xf0]  ;;  %v14468_v34 = vpop.permute.xlu0 %5867  ;;  %7646 = vmatpush.bf16.msrb.mxu3 %v8303_v43  ;;  %v8287_v26 = vor.u32 %v8687_v56, %v8286_v62  ;;  %v8095_v37 = vor.u32 %v8639_v10, %v8094_v57  ;;  %v16570_v11 = vld [vmem:[#allocation325_spill] sm:$0xff]  ;;  %v8270_v63 = vld [vmem:[#allocation5 + $0x3a8] sm:$0xf] }
 0xda3   :  { %v4159_v4 = vsel %vm1773_vm3, %v4158_v47, %v4157_v8  ;;  %v8091_v9 = vor.u32 %v8636_v7, %v8088_v51  ;;  %16569 = vst [vmem:[#allocation111_spill] sm:$0xff] %v14468_v34  ;;  %v3991_v8 = vsel %vm1809_vm12, %v3990_v17, %v3989_v59  ;;  %v16571_v22 = vld [vmem:[#allocation233_spill] sm:$0xff]  ;;  %v14477_v7 = vpop.permute.xlu2 %5870  ;;  %v16574_v57 = vld [vmem:[#allocation446_spill] sm:$0xff]  ;;  %v16575_v56 = vld [vmem:[#allocation364_spill] sm:$0xff] }
 0xda4   :  { %v4161_v35 = vsel %vm1777_vm4, %v4160_v13, %v4159_v4  ;;  %v4003_v45 = vperm.slane %v16571_v22, %v12282_v46  ;;  %v16572_v51 = vld [vmem:[#allocation93_spill] sm:$0xff]  ;;  %16573 = vst [vmem:[#allocation112_spill] sm:$0xff] %v14477_v7  ;;  %v8264_v13 = vld [vmem:[#allocation5 + $0x3b0] sm:$0xf0]  ;;  %v3993_v43 = vsel %vm1813_vm13, %v3992_v20, %v3991_v8  ;;  %v4164_v62 = vperm.slane %v16574_v57, %v12305_v48  ;;  %v8632_v10 = vld [vmem:[#allocation5 + $0x224] sm:$0xf] }
 0xda5   :  { %v4162_v47 = vperm.slane %v16572_v51, %v12311_v42  ;;  %7569 = vmatpush.bf16.msra.mxu1 %v8283_v61  ;;  %v4186_v17 = vperm.slane %v16575_v56, %v12275_v33  ;;  %7560 = vmatpush.bf16.msra.mxu0 %v8091_v9  ;;  %v8267_v59 = vor.u32 %v8680_v41, %v8264_v13  ;;  %v8683_v4 = vld [vmem:[#allocation5 + $0x3b4] sm:$0xf0]  ;;  %v8072_v22 = vld [vmem:[#allocation5 + $0x230] sm:$0xf0]  ;;  %v8078_v8 = vld [vmem:[#allocation5 + $0x228] sm:$0xf] }
 0xda6   :  { %v16576_v61 = vld [vmem:[#allocation24_spill] sm:$0xff]  ;;  %7638 = vmatpush.bf16.msrb.mxu2 %v8095_v37  ;;  %v8075_v20 = vor.u32 %v8632_v10, %v8072_v22  ;;  %v8635_v57 = vld [vmem:[#allocation5 + $0x234] sm:$0xf0]  ;;  %v6203_v9 = vperm.slane %v14284_v32, %v12275_v33  ;;  %7647 = vmatpush.bf16.msrb.mxu3 %v8287_v26  ;;  %v3995_v13 = vsel %vm1817_vm14, %v3994_v53, %v3993_v43  ;;  %v16579_v37 = vld [vmem:[#allocation263_spill] sm:$0xff] }
 0xda7   :  { %v4163_v51 = vsel %vm1781_vm5, %v4162_v47, %v4161_v35  ;;  %v4166_v1 = vperm.slane %v16576_v61, %v12322_v38  ;;  %v16577_v7 = vld [vmem:[#allocation16_spill] sm:$0xff]  ;;  %v8271_v47 = vor.u32 %v8683_v4, %v8270_v63  ;;  %v8079_v41 = vor.u32 %v8635_v57, %v8078_v8  ;;  %v16580_v22 = vld [vmem:[#allocation13_spill] sm:$0xff]  ;;  %v8676_v61 = vld [vmem:[#allocation5 + $0x384] sm:$0xf]  ;;  %v14508_v57 = vpop.permute.xlu1 %5864 }
 0xda8   :  { %v4189_v34 = vperm.slane %v16577_v7, %v12282_v46  ;;  %v16578_v50 = vld [vmem:[#allocation452_spill] sm:$0xff]  ;;  %v4011_v7 = vperm.slane %v16579_v37, %v12322_v38  ;;  %v4004_v10 = vsel %vm1773_vm3, %v4003_v45, %v4002_v29  ;;  %v8254_v3 = vld [vmem:[#allocation5 + $0x388] sm:$0xf]  ;;  %v4165_v54 = vsel %vm1785_vm6, %v4164_v62, %v4163_v51  ;;  %v8679_v43 = vld [vmem:[#allocation5 + $0x394] sm:$0xf0] }
 0xda9   :  { %v4187_v56 = vperm.slane %v16578_v50, %v12285_v49  ;;  %v6481_v35 = vld [vmem:[%s14802_s4] sm:$0xf]  ;;  %v4168_v50 = vperm.slane %v16580_v22, %v12336_v16  ;;  %7570 = vmatpush.bf16.msra.mxu1 %v8267_v59  ;;  %v6204_v63 = vperm.slane %v14153_v5, %v12285_v49  ;;  %7561 = vmatpush.bf16.msra.mxu0 %v8075_v20  ;;  %v8628_v4 = vld [vmem:[#allocation5 + $0x204] sm:$0xf]  ;;  %v8062_v62 = vld [vmem:[#allocation5 + $0x208] sm:$0xf] }
 0xdaa   :  { %v8248_v32 = vld [vmem:[#allocation5 + $0x390] sm:$0xf0]  ;;  %v4167_v29 = vsel %vm1789_vm7, %v4166_v1, %v4165_v54  ;;  %v6483_v59 = vperm.slane %v6481_v35, 0  ;;  %7639 = vmatpush.bf16.msrb.mxu2 %v8079_v41  ;;  %v8631_v51 = vld [vmem:[#allocation5 + $0x214] sm:$0xf0]  ;;  %v6208_v5 = vperm.slane %v14338_v21, %v12298_v18  ;;  %7648 = vmatpush.bf16.msrb.mxu3 %v8271_v47  ;;  %v8255_v20 = vor.u32 %v8679_v43, %v8254_v3 }
 0xdab   :  { %v4188_v26 = vsel %vm1769_vm2, %v4187_v56, %v4186_v17  ;;  %v8251_v53 = vor.u32 %v8676_v61, %v8248_v32  ;;  %v8056_v8 = vld [vmem:[#allocation5 + $0x210] sm:$0xf0]  ;;  %v6205_v17 = vsel %vm1769_vm2, %v6204_v63, %v6203_v9  ;;  %v8063_v56 = vor.u32 %v8631_v51, %v8062_v62  ;;  %v8675_v62 = vld [vmem:[#allocation5 + $0x374] sm:$0xf0] }
 0xdac   :  { %v4190_v45 = vsel %vm1773_vm3, %v4189_v34, %v4188_v26  ;;  %v8059_v22 = vor.u32 %v8628_v4, %v8056_v8  ;;  %v16581_v54 = vperm.slane %v16557_v15, %v12386_v44  ;;  %v16582_v34 = vld [vmem:[#allocation365_spill] sm:$0xff]  ;;  %v6206_v41 = vperm.slane %v14182_v19, %v12282_v46  ;;  %v14534_v26 = vpop.permute.xlu0 %5831  ;;  %v8672_v19 = vld [vmem:[#allocation5 + $0x364] sm:$0xf]  ;;  %v8232_v63 = vld [vmem:[#allocation5 + $0x370] sm:$0xf0]  ;;  %v14540_v4 = vpop.permute.xlu2 %5834 }
 0xdad   :  { %v4191_v35 = vperm.slane %v16582_v34, %v12298_v18  ;;  %v6210_v9 = vperm.slane %v14376_v25, %v12311_v42  ;;  %7571 = vmatpush.bf16.msra.mxu1 %v8251_v53  ;;  %v16583_v21 = vperm.slane %v16570_v11, %v12298_v18  ;;  %v16584_v15 = vld [vmem:[#allocation269_spill] sm:$0xff]  ;;  %v4169_v32 = vsel %vm1793_vm8, %v4168_v50, %v4167_v29  ;;  %v8238_v25 = vld [vmem:[#allocation5 + $0x368] sm:$0xf]  ;;  %v16587_v50 = vld [vmem:[#allocation372_spill] sm:$0xff] }
 0xdae   :  { %v14517_v1 = vsel %vm1821_vm15, %v16581_v54, %v3995_v13  ;;  %v4009_v47 = vperm.slane %v16584_v15, %v12305_v48  ;;  %v16585_v13 = vld [vmem:[#allocation447_spill] sm:$0xff]  ;;  %7562 = vmatpush.bf16.msra.mxu0 %v8059_v22  ;;  %7640 = vmatpush.bf16.msrb.mxu2 %v8063_v56  ;;  %v8235_v8 = vor.u32 %v8672_v19, %v8232_v63  ;;  %v16588_v34 = vld [vmem:[#allocation232_spill] sm:$0xff]  ;;  %v16590_v56 = vld [vmem:[#allocation454_spill] sm:$0xff]  ;;  %v7473_v15 = vpop.f32.mrf.mxu1 }
 0xdaf   :  { %v4006_v3 = vsel %vm1777_vm4, %v16583_v21, %v4004_v10  ;;  %v4170_v61 = vperm.slane %v16585_v13, %v12329_v39  ;;  %v16586_v53 = vld [vmem:[#allocation11_spill] sm:$0xff]  ;;  %v4192_v11 = vsel %vm1777_vm4, %v4191_v35, %v4190_v45  ;;  %v6207_v10 = vsel %vm1773_vm3, %v6206_v41, %v6205_v17  ;;  %7649 = vmatpush.bf16.msrb.mxu3 %v8255_v20  ;;  %v8668_v13 = vld [vmem:[#allocation5 + $0x344] sm:$0xf] }
 0xdb0   :  { %v4172_v43 = vperm.slane %v16586_v53, %v12347_v2  ;;  %v4195_v29 = vperm.slane %v16587_v50, %v12305_v48  ;;  %v7461_v22 = vadd.f32 %v14286_v14, %v6483_v59  ;;  %v6209_v51 = vsel %vm1777_vm4, %v6208_v5, %v6207_v10  ;;  %v8222_v19 = vld [vmem:[#allocation5 + $0x348] sm:$0xf]  ;;  %v14565_v53 = vpop.permute.xlu1 %5828  ;;  %v8671_v10 = vld [vmem:[#allocation5 + $0x354] sm:$0xf0] }
 0xdb1   :  { %v8239_v54 = vor.u32 %v8675_v62, %v8238_v25  ;;  %v3998_v21 = vperm.slane %v16588_v34, %v12390_v28  ;;  %v16589_v45 = vperm.slane %v16563_v52, %v12311_v42  ;;  %v4193_v35 = vperm.slane %v16590_v56, %v12311_v42  ;;  %7572 = vmatpush.bf16.msra.mxu1 %v8235_v8  ;;  %v8216_v52 = vld [vmem:[#allocation5 + $0x350] sm:$0xf0]  ;;  %v16593_v50 = vld [vmem:[#allocation23_spill] sm:$0xff]  ;;  %v8664_v56 = vld [vmem:[#allocation5 + $0x324] sm:$0xf] }
 0xdb2   :  { %v6211_v41 = vsel %vm1781_vm5, %v6210_v9, %v6209_v51  ;;  %v4171_v59 = vsel %vm1797_vm9, %v4170_v61, %v4169_v32  ;;  %v6212_v5 = vperm.slane %v14312_v6, %v12305_v48  ;;  %v14559_v20 = vadd.f32 %v7473_v15, %v7461_v22  ;;  %v16594_v51 = vld [vmem:[#allocation448_spill] sm:$0xff]  ;;  %v16610_v34 = vld [vmem:[#allocation267_spill] sm:$0xff] }
 0xdb3   :  { %v4008_v17 = vsel %vm1781_vm5, %v16589_v45, %v4006_v3  ;;  %v16591_v3 = vld [vmem:[#allocation363_spill] sm:$0xff]  ;;  %v4173_v25 = vsel %vm1801_vm10, %v4172_v43, %v4171_v59  ;;  %v4194_v9 = vsel %vm1781_vm5, %v4193_v35, %v4192_v11  ;;  %v6216_v32 = vperm.slane %v14464_v36, %v12336_v16  ;;  %7650 = vmatpush.bf16.msrb.mxu3 %v8239_v54  ;;  %v16592_v11 = vld [vmem:[#allocation92_spill] sm:$0xff] }
 0xdb4   :  { %v4010_v14 = vsel %vm1785_vm6, %v4009_v47, %v4008_v17  ;;  %v4174_v63 = vperm.slane %v16591_v3, %v12361_v60  ;;  %v8219_v47 = vor.u32 %v8668_v13, %v8216_v52  ;;  %v4196_v61 = vsel %vm1785_vm6, %v4195_v29, %v4194_v9  ;;  %v16595_v54 = vld [vmem:[#allocation456_spill] sm:$0xff]  ;;  %v16597_v13 = vld [vmem:[#allocation374_spill] sm:$0xff] }
 0xdb5   :  { %v6213_v6 = vsel %vm1785_vm6, %v6212_v5, %v6211_v41  ;;  %v8223_v8 = vor.u32 %v8671_v10, %v8222_v19  ;;  %v4012_v43 = vsel %vm1789_vm7, %v4011_v7, %v4010_v14  ;;  %v4015_v62 = vperm.slane %v16592_v11, %v12329_v39  ;;  %v16596_v7 = vld [vmem:[#allocation369_spill] sm:$0xff]  ;;  %v8200_v35 = vld [vmem:[#allocation5 + $0x330] sm:$0xf0]  ;;  %v8206_v41 = vld [vmem:[#allocation5 + $0x328] sm:$0xf]  ;;  %v14594_v19 = vpop.permute.xlu0 %5876  ;;  %v14606_v10 = vpop.permute.xlu2 %5879 }
 0xdb6   :  { %v4197_v22 = vperm.slane %v16593_v50, %v12322_v38  ;;  %v6214_v29 = vperm.slane %v14317_v0, %v12322_v38  ;;  %7573 = vmatpush.bf16.msra.mxu1 %v8219_v47  ;;  %v4176_v36 = vperm.slane %v16594_v51, %v12358_v31  ;;  %v4199_v45 = vperm.slane %v16595_v54, %v12336_v16  ;;  %v8667_v5 = vld [vmem:[#allocation5 + $0x334] sm:$0xf0]  ;;  %v8190_v11 = vld [vmem:[#allocation5 + $0x308] sm:$0xf] }
 0xdb7   :  { %v4175_v37 = vsel %vm1805_vm11, %v4174_v63, %v4173_v25  ;;  %v4178_v17 = vperm.slane %v16596_v7, %v12372_v27  ;;  %v6234_v0 = vperm.slane %v14202_v12, %v12275_v33  ;;  %v8203_v59 = vor.u32 %v8664_v56, %v8200_v35  ;;  %7651 = vmatpush.bf16.msrb.mxu3 %v8223_v8  ;;  %v8184_v8 = vld [vmem:[#allocation5 + $0x310] sm:$0xf0] }
 0xdb8   :  { %v4198_v15 = vsel %vm1789_vm7, %v4197_v22, %v4196_v61  ;;  %v6215_v14 = vsel %vm1789_vm7, %v6214_v29, %v6213_v6  ;;  %v4201_v52 = vperm.slane %v16597_v13, %v12329_v39  ;;  %v6237_v3 = vperm.slane %v14248_v55, %v12282_v46  ;;  %v7475_v61 = vpop.f32.mrf.mxu1  ;;  %v16599_v6 = vld [vmem:[#allocation18_spill] sm:$0xff]  ;;  %v8663_v22 = vld [vmem:[#allocation5 + $0x314] sm:$0xf0] }
 0xdb9   :  { %v6217_v63 = vsel %vm1793_vm8, %v6216_v32, %v6215_v14  ;;  %v8207_v25 = vor.u32 %v8667_v5, %v8206_v41  ;;  %v4177_v9 = vsel %vm1809_vm12, %v4176_v36, %v4175_v37  ;;  %v6235_v33 = vperm.slane %v14241_v58, %v12285_v49  ;;  %v16600_v36 = vld [vmem:[#allocation108_spill] sm:$0xff]  ;;  %v16601_v37 = vld [vmem:[#allocation266_spill] sm:$0xff]  ;;  %v16605_v13 = vld [vmem:[#allocation449_spill] sm:$0xff] }
 0xdba   :  { %v6218_v12 = vperm.slane %v14418_v30, %v12329_v39  ;;  %v6239_v47 = vperm.slane %v14424_v23, %v12298_v18  ;;  %7574 = vmatpush.bf16.msra.mxu1 %v8203_v59  ;;  %v16598_v46 = vperm.slane %v16564_v24, %v12336_v16  ;;  %v4180_v32 = vperm.slane %v16599_v6, %v12381_v40  ;;  %v8660_v30 = vld [vmem:[#allocation5 + $0x304] sm:$0xf]  ;;  %v14620_v24 = vpop.permute.xlu1 %5873  ;;  %v16604_v14 = vld [vmem:[#allocation184_spill] sm:$0xff] }
 0xdbb   :  { %v4179_v49 = vsel %vm1813_vm13, %v4178_v17, %v4177_v9  ;;  %v4200_v58 = vsel %vm1793_vm8, %v4199_v45, %v4198_v15  ;;  %v6236_v18 = vsel %vm1769_vm2, %v6235_v33, %v6234_v0  ;;  %v6222_v50 = vperm.slane %v14565_v53, %v12361_v60  ;;  %7652 = vmatpush.bf16.msrb.mxu3 %v8207_v25  ;;  %v16602_v53 = vld [vmem:[#allocation367_spill] sm:$0xff]  ;;  %v16607_v9 = vld [vmem:[#allocation460_spill] sm:$0xff]  ;;  %v16608_v6 = vld [vmem:[#allocation66_spill] sm:$0xff] }
 0xdbc   :  { %v4014_v55 = vsel %vm1793_vm8, %v16598_v46, %v4012_v43  ;;  %v6219_v23 = vsel %vm1797_vm9, %v6218_v12, %v6217_v63  ;;  %v8187_v43 = vor.u32 %v8660_v30, %v8184_v8  ;;  %v4202_v29 = vsel %vm1797_vm9, %v4201_v52, %v4200_v58  ;;  %v16603_v15 = vld [vmem:[#allocation371_spill] sm:$0xff] }
 0xdbd   :  { %v6238_v51 = vsel %vm1773_vm3, %v6237_v3, %v6236_v18  ;;  %v6220_v54 = vperm.slane %v16600_v36, %v12347_v2  ;;  %v8191_v45 = vor.u32 %v8663_v22, %v8190_v11  ;;  %v4017_v7 = vperm.slane %v16601_v37, %v12347_v2  ;;  %v16606_v3 = vld [vmem:[#allocation376_spill] sm:$0xff]  ;;  %v5844_v11 = vpop.permute.xlu2 %5843  ;;  %v16613_v22 = vld [vmem:[#allocation25_spill] sm:$0xff] }
 0xdbe   :  { %v4016_v17 = vsel %vm1797_vm9, %v4015_v62, %v4014_v55  ;;  %v4203_v56 = vperm.slane %v16602_v53, %v12347_v2  ;;  %v6240_v35 = vsel %vm1777_vm4, %v6239_v47, %v6238_v51  ;;  %7575 = vmatpush.bf16.msra.mxu1 %v8187_v43  ;;  %v4181_v41 = vsel %vm1817_vm14, %v4180_v32, %v4179_v49 }
 0xdbf   :  { %v4184_v0 = vperm.slane %v16603_v15, %v12390_v28  ;;  %v6241_v59 = vperm.slane %v16604_v14, %v12311_v42  ;;  %v6221_v5 = vsel %vm1801_vm10, %v6220_v54, %v6219_v23  ;;  %v4182_v52 = vperm.slane %v16605_v13, %v12386_v44  ;;  %7653 = vmatpush.bf16.msrb.mxu3 %v8191_v45  ;;  %v16611_v23 = vld [vmem:[#allocation392_spill] sm:$0xff] }
 0xdc0   :  { %v4204_v62 = vsel %vm1801_vm10, %v4203_v56, %v4202_v29  ;;  %v4207_v63 = vperm.slane %v16606_v3, %v12358_v31  ;;  %v6223_v25 = vsel %vm1805_vm11, %v6222_v50, %v6221_v5  ;;  %v4205_v33 = vperm.slane %v16607_v9, %v12361_v60  ;;  %v16616_v5 = vld [vmem:[#allocation463_spill] sm:$0xff]  ;;  %v16618_v3 = vld [vmem:[#allocation112_spill] sm:$0xff]  ;;  %v8595_v9 = vld [vmem:[#allocation5 + $0xf4] sm:$0xf0] }
 0xdc1   :  { %v6224_v12 = vperm.slane %v14534_v26, %v12358_v31  ;;  %v6242_v42 = vsel %vm1781_vm5, %v6241_v59, %v6240_v35  ;;  %v6245_v47 = vperm.slane %v14508_v57, %v12322_v38  ;;  %v3999_v61 = vsel %vm1825_vm0, %v3998_v21, %v14517_v1  ;;  %v16609_v26 = vld [vmem:[#allocation239_spill] sm:$0xff]  ;;  %v5841_v57 = vpop.permute.xlu0 %5840 }
 0xdc2   :  { %v4018_v46 = vsel %vm1801_vm10, %v4017_v7, %v4016_v17  ;;  %v4183_v55 = vsel %vm1821_vm15, %v4182_v52, %v4181_v41  ;;  %v6243_v32 = vperm.slane %v16608_v6, %v12305_v48  ;;  %v4021_v49 = vperm.slane %v16609_v26, %v12358_v31  ;;  %v5838_v18 = vpop.permute.xlu1 %5837  ;;  %v16615_v41 = vld [vmem:[#allocation377_spill] sm:$0xff]  ;;  %v7918_v59 = vld [vmem:[#allocation5 + $0xe8] sm:$0xf] }
 0xdc3   :  { %v4185_v58 = vsel %vm1825_vm0, %v4184_v0, %v4183_v55  ;;  %v4206_v38 = vsel %vm1805_vm11, %v4205_v33, %v4204_v62  ;;  %v6225_v30 = vsel %vm1809_vm12, %v6224_v12, %v6223_v25  ;;  %v4023_v1 = vperm.slane %v16610_v34, %v12372_v27  ;;  %v16617_v52 = vld [vmem:[#allocation65_spill] sm:$0xff]  ;;  %v8593_v33 = vld [vmem:[#allocation5 + $0xec] sm:$0xf] }
 0xdc4   :  { %v4208_v21 = vsel %vm1809_vm12, %v4207_v63, %v4206_v38  ;;  %v6226_v8 = vperm.slane %v14540_v4, %v12372_v27  ;;  %v6244_v48 = vsel %vm1785_vm6, %v6243_v32, %v6242_v42  ;;  %v16612_v50 = vperm.slane %v16611_v23, %v12361_v60  ;;  %v16614_v4 = vld [vmem:[#allocation111_spill] sm:$0xff]  ;;  %v7920_v12 = vld [vmem:[#allocation5 + $0xf8] sm:$0xf0] }
 0xdc5   :  { %v4209_v29 = vperm.slane %v16613_v22, %v12372_v27  ;;  %v6246_v51 = vsel %vm1789_vm7, %v6245_v47, %v6244_v48  ;;  %v6228_v36 = vperm.slane %v5838_v18, %v12381_v40  ;;  %v4221_v54 = vsel %vm2168_vm1, %v4185_v58, %v3999_v61  ;;  %v16619_v42 = vld [vmem:[#allocation109_spill] sm:$0xff]  ;;  %v16620_v47 = vld [vmem:[#allocation226_spill] sm:$0xff]  ;;  %v16623_v6 = vld [vmem:[#allocation95_spill] sm:$0xff] }
 0xdc6   :  { %v4020_v43 = vsel %vm1805_vm11, %v16612_v50, %v4018_v46  ;;  %v6247_v45 = vperm.slane %v16614_v4, %v12336_v16  ;;  %v6230_v37 = vperm.slane %v5841_v57, %v12386_v44  ;;  %v6227_v7 = vsel %vm1813_vm13, %v6226_v8, %v6225_v30  ;;  %v16622_v46 = vld [vmem:[#allocation327_spill] sm:$0xff] }
 0xdc7   :  { %v4022_v17 = vsel %vm1809_vm12, %v4021_v49, %v4020_v43  ;;  %v4210_v53 = vsel %vm1813_vm13, %v4209_v29, %v4208_v21  ;;  %v6232_v56 = vperm.slane %v5844_v11, %v12390_v28  ;;  %v6229_v35 = vsel %vm1817_vm14, %v6228_v36, %v6227_v7  ;;  %v7902_v8 = vld [vmem:[#allocation5 + $0xc8] sm:$0xf]  ;;  %v16625_v11 = vld [vmem:[#allocation368_spill] sm:$0xff]  ;;  %v8591_v43 = vld [vmem:[#allocation5 + $0xd4] sm:$0xf0] }
 0xdc8   :  { %v4213_v15 = vperm.slane %v16615_v41, %v12386_v44  ;;  %v6248_v0 = vsel %vm1793_vm8, %v6247_v45, %v6246_v51  ;;  %v6251_v16 = vperm.slane %v14620_v24, %v12347_v2  ;;  %v6231_v14 = vsel %vm1821_vm15, %v6230_v37, %v6229_v35  ;;  %v8589_v22 = vld [vmem:[#allocation5 + $0xcc] sm:$0xf]  ;;  %v7904_v29 = vld [vmem:[#allocation5 + $0xd8] sm:$0xf0]  ;;  %v16626_v51 = vld [vmem:[#allocation382_spill] sm:$0xff] }
 0xdc9   :  { %v4211_v13 = vperm.slane %v16616_v5, %v12381_v40  ;;  %v4233_v62 = vadd.f32 %v4221_v54, %v16617_v52  ;;  %v6249_v63 = vperm.slane %v16618_v3, %v12329_v39  ;;  %v6233_v25 = vsel %vm1825_vm0, %v6232_v56, %v6231_v14  ;;  %v16624_v39 = vld [vmem:[#allocation393_spill] sm:$0xff]  ;;  %v16627_v36 = vld [vmem:[#allocation86_spill] sm:$0xff]  ;;  %v8585_v3 = vld [vmem:[#allocation5 + $0xac] sm:$0xf] }
 0xdca   :  { %v16621_v2 = vperm.slane %v16620_v47, %v12386_v44  ;;  %v4024_v61 = vsel %vm1813_vm13, %v4023_v1, %v4022_v17  ;;  %v4027_v55 = vperm.slane %v16622_v46, %v12386_v44  ;;  %v6269_v32 = vsel %vm2168_vm1, %v6233_v25, %v16623_v6  ;;  %v5883_v34 = vpop.permute.xlu1 %5882  ;;  %v16629_v45 = vld [vmem:[#allocation214_spill] sm:$0xff]  ;;  %v9041_v14 = vld [vmem:[#allocation2] sm:$0x3f]  ;;  %v8581_v6 = vld [vmem:[#allocation5 + $0x8c] sm:$0xf] }
 0xdcb   :  { %v4025_v26 = vperm.slane %v16624_v39, %v12381_v40  ;;  %v4212_v49 = vsel %vm1817_vm14, %v4211_v13, %v4210_v53  ;;  %v6250_v58 = vsel %vm1797_vm9, %v6249_v63, %v6248_v0  ;;  %v6281_v38 = vadd.f32 %v6269_v32, %v4233_v62  ;;  %v16631_v17 = vld [vmem:[#allocation326_spill] sm:$0xff]  ;;  %v16632_v5 = vld [vmem:[#allocation157_spill] sm:$0xff] }
 0xdcc   :  { %v2165_v24 = vsel %vm1821_vm15, %v16621_v2, %v16619_v42  ;;  %v4214_v57 = vsel %vm1821_vm15, %v4213_v15, %v4212_v49  ;;  %v6252_v30 = vsel %vm1801_vm10, %v6251_v16, %v6250_v58  ;;  %v7919_v1 = vor.u32 %v8595_v9, %v7918_v59  ;;  %v7886_v16 = vld [vmem:[#allocation5 + $0xa8] sm:$0xf]  ;;  %v8587_v62 = vld [vmem:[#allocation5 + $0xb4] sm:$0xf0]  ;;  %v7888_v63 = vld [vmem:[#allocation5 + $0xb8] sm:$0xf0] }
 0xdcd   :  { %v7923_v21 = vor.u32 %v8593_v33, %v7920_v12  ;;  %v4026_v48 = vsel %vm1817_vm14, %v4025_v26, %v4024_v61  ;;  %v4215_v18 = vperm.slane %v16625_v11, %v12390_v28  ;;  %v6253_v23 = vperm.slane %v14594_v19, %v12361_v60  ;;  %v5892_v33 = vpop.permute.xlu2 %5891  ;;  %v7870_v61 = vld [vmem:[#allocation5 + $0x88] sm:$0xf]  ;;  %v7872_v32 = vld [vmem:[#allocation5 + $0x98] sm:$0xf0] }
 0xdce   :  { %v14721_v50 = vpack.c.bf16 %v6281_v38, %v6281_v38  ;;  %v16628_v54 = vperm.slane %v16627_v36, %v12386_v44  ;;  %v16630_v37 = vperm.slane %v16629_v45, %v12390_v28  ;;  %v4029_v53 = vperm.slane %v16631_v17, %v12390_v28  ;;  %v7854_v11 = vld [vmem:[#allocation5 + $0x68] sm:$0xf]  ;;  %v8032_v45 = vld [vmem:[#allocation5 + $0x1d8] sm:$0xf0] }
 0xdcf   :  { %v4028_v60 = vsel %vm1821_vm15, %v4027_v55, %v4026_v48  ;;  %v4216_v19 = vsel %vm1825_vm0, %v4215_v18, %v4214_v57  ;;  %v6254_v56 = vsel %vm1805_vm11, %v6253_v23, %v6252_v30  ;;  %v6257_v35 = vperm.slane %v5883_v34, %v12372_v27  ;;  %v5886_v27 = vpop.permute.xlu0 %5885  ;;  %v8583_v55 = vld [vmem:[#allocation5 + $0x94] sm:$0xf0]  ;;  %v8577_v23 = vld [vmem:[#allocation5 + $0x6c] sm:$0xf]  ;;  %v7838_v17 = vld [vmem:[#allocation5 + $0x48] sm:$0xf] }
 0xdd0   :  { %v1979_v4 = vsel %vm1821_vm15, %v16628_v54, %v16626_v51  ;;  %v2167_v7 = vsel %vm1825_vm0, %v16630_v37, %v2165_v24  ;;  %7511 = vmatmul.bf16.vlgmr.msrb.gmra.mxu0 %v14721_v50  ;;  %7589 = vmatmul.bf16.vlgmr.msra.gmra.mxu2 %v14721_v50  ;;  %v6255_v41 = vperm.slane %v14606_v10, %v12358_v31  ;;  %v96_v59 = vperm.slane %v9041_v14, 5  ;;  %v8579_v18 = vld [vmem:[#allocation5 + $0x74] sm:$0xf0]  ;;  %v8030_v51 = vld [vmem:[#allocation5 + $0x1c8] sm:$0xf] }
 0xdd1   :  { %7607 = vmatpush.bf16.msrb.mxu0 %v7919_v1  ;;  %7685 = vmatpush.bf16.msra.mxu2 %v7923_v21  ;;  %v7903_v15 = vor.u32 %v8591_v43, %v7902_v8  ;;  %v7907_v0 = vor.u32 %v8589_v22, %v7904_v29  ;;  %v16633_v13 = vperm.slane %v16632_v5, %v12390_v28  ;;  %v8627_v1 = vld [vmem:[#allocation5 + $0x1f4] sm:$0xf0]  ;;  %v8048_v21 = vld [vmem:[#allocation5 + $0x1f8] sm:$0xf0]  ;;  %v16634_v8 = vld [vmem:[#allocation103_spill] sm:$0xff]  ;;  %vm7770_vm2 = vcmask 1041408  }
 0xdd2   :  { %v4030_v25 = vsel %vm1825_vm0, %v4029_v53, %v4028_v60  ;;  %v6256_v31 = vsel %vm1809_vm12, %v6255_v41, %v6254_v56  ;;  %v6259_v42 = vperm.slane %v5886_v27, %v12381_v40  ;;  %v5889_v47 = vpop.permute.xlu1 %5888  ;;  %v7887_v2 = vor.u32 %v8587_v62, %v7886_v16  ;;  %v8046_v40 = vld [vmem:[#allocation5 + $0x1e8] sm:$0xf]  ;;  %v7856_v43 = vld [vmem:[#allocation5 + $0x78] sm:$0xf0]  ;;  %v8623_v54 = vld [vmem:[#allocation5 + $0x1d4] sm:$0xf0] }
 0xdd3   :  { %v1981_v52 = vsel %vm1825_vm0, %v16633_v13, %v1979_v4  ;;  %v4222_v9 = vsel %vm2168_vm1, %v4216_v19, %v4030_v25  ;;  %v6258_v12 = vsel %vm1813_vm13, %v6257_v35, %v6256_v31  ;;  %v7891_v24 = vor.u32 %v8585_v3, %v7888_v63  ;;  %v8621_v4 = vld [vmem:[#allocation5 + $0x1cc] sm:$0xf]  ;;  %v8575_v53 = vld [vmem:[#allocation5 + $0x54] sm:$0xf0]  ;;  %v7840_v19 = vld [vmem:[#allocation5 + $0x58] sm:$0xf0] }
 0xdd4   :  { %v2174_v10 = vsel %vm2168_vm1, %v2167_v7, %v1981_v52  ;;  %v6261_v46 = vperm.slane %v5889_v47, %v12386_v44  ;;  %v6263_v26 = vperm.slane %v5892_v33, %v12390_v28  ;;  %v6260_v49 = vsel %vm1817_vm14, %v6259_v42, %v6258_v12  ;;  %v8625_v44 = vld [vmem:[#allocation5 + $0x1ec] sm:$0xf]  ;;  %v8014_v41 = vld [vmem:[#allocation5 + $0x1a8] sm:$0xf]  ;;  %v8016_v14 = vld [vmem:[#allocation5 + $0x1b8] sm:$0xf0] }
 0xdd5   :  { %7608 = vmatpush.bf16.msrb.mxu0 %v7903_v15  ;;  %7686 = vmatpush.bf16.msra.mxu2 %v7907_v0  ;;  %v2186_v39 = vadd.f32 %v2174_v10, %v96_v59  ;;  %v7871_v30 = vor.u32 %v8583_v55, %v7870_v61  ;;  %v7875_v34 = vor.u32 %v8581_v6, %v7872_v32  ;;  %v8573_v60 = vld [vmem:[#allocation5 + $0x4c] sm:$0xf]  ;;  %v16635_v15 = vld [vmem:[#allocation104_spill] sm:$0xff]  ;;  %v8619_v0 = vld [vmem:[#allocation5 + $0x1b4] sm:$0xf0]  ;;  %vm7772_vm3 = vcmask 1045508  }
 0xdd6   :  { %v6262_v58 = vsel %vm1821_vm15, %v6261_v46, %v6260_v49  ;;  %v8047_v22 = vor.u32 %v8627_v1, %v8046_v40  ;;  %v8051_v29 = vor.u32 %v8625_v44, %v8048_v21  ;;  %v7855_v37 = vor.u32 %v8579_v18, %v7854_v11  ;;  %v8617_v16 = vld [vmem:[#allocation5 + $0x1ac] sm:$0xf]  ;;  %v7822_v52 = vld [vmem:[#allocation5 + $0x28] sm:$0xf]  ;;  %v8571_v62 = vld [vmem:[#allocation5 + $0x34] sm:$0xf0] }
 0xdd7   :  { %v4234_v38 = vadd.f32 %v4222_v9, %v2186_v39  ;;  %v6264_v57 = vsel %vm1825_vm0, %v6263_v26, %v6262_v58  ;;  %v7859_v7 = vor.u32 %v8577_v23, %v7856_v43  ;;  %v8031_v56 = vor.u32 %v8623_v54, %v8030_v51  ;;  %v8569_v3 = vld [vmem:[#allocation5 + $0x2c] sm:$0xf]  ;;  %v7824_v63 = vld [vmem:[#allocation5 + $0x38] sm:$0xf0]  ;;  %v7998_v10 = vld [vmem:[#allocation5 + $0x188] sm:$0xf] }
 0xdd8   :  { %v6270_v48 = vsel %vm2168_vm1, %v6264_v57, %v16634_v8  ;;  %v8035_v35 = vor.u32 %v8621_v4, %v8032_v45  ;;  %v7486_v59 = vpop.f32.mrf.mxu2  ;;  %v7839_v5 = vor.u32 %v8575_v53, %v7838_v17  ;;  %v7843_v13 = vor.u32 %v8573_v60, %v7840_v19  ;;  %v8615_v9 = vld [vmem:[#allocation5 + $0x194] sm:$0xf0]  ;;  %v8613_v33 = vld [vmem:[#allocation5 + $0x18c] sm:$0xf]  ;;  %v8000_v12 = vld [vmem:[#allocation5 + $0x198] sm:$0xf0] }
 0xdd9   :  { %7609 = vmatpush.bf16.msrb.mxu0 %v7887_v2  ;;  %7687 = vmatpush.bf16.msra.mxu2 %v7891_v24  ;;  %v6282_v28 = vadd.f32 %v6270_v48, %v4234_v38  ;;  %v14766_v27 = vadd.f32 %v7486_v59, %v14559_v20  ;;  %v8015_v25 = vor.u32 %v8619_v0, %v8014_v41  ;;  %v7806_v2 = vld [vmem:[#allocation5 + $0x8] sm:$0xf]  ;;  %v8567_v24 = vld [vmem:[#allocation5 + $0x14] sm:$0xf0]  ;;  %v8565_v61 = vld [vmem:[#allocation5 + $0xc] sm:$0xf] }
 0xdda   :  { %v8019_v31 = vor.u32 %v8617_v16, %v8016_v14  ;;  %v7823_v42 = vor.u32 %v8571_v62, %v7822_v52  ;;  %v7827_v47 = vor.u32 %v8569_v3, %v7824_v63  ;;  %v7808_v20 = vld [vmem:[#allocation5 + $0x18] sm:$0xf0]  ;;  %v8430_v46 = vld [vmem:[#allocation5 + $0x4e8] sm:$0xf]  ;;  %v7999_v55 = vor.u32 %v8615_v9, %v7998_v10  ;;  %v8723_v32 = vld [vmem:[#allocation5 + $0x4f4] sm:$0xf0] }
 0xddb   :  { %v14759_v36 = vpack.c.bf16 %v6282_v28, %v6282_v28  ;;  %v8003_v6 = vor.u32 %v8613_v33, %v8000_v12  ;;  %v8721_v39 = vld [vmem:[#allocation5 + $0x4ec] sm:$0xf]  ;;  %v8432_v26 = vld [vmem:[#allocation5 + $0x4f8] sm:$0xf0]  ;;  %v7982_v49 = vld [vmem:[#allocation5 + $0x168] sm:$0xf]  ;;  %v7807_v38 = vor.u32 %v8567_v24, %v7806_v2  ;;  %v7811_v40 = vor.u32 %v8565_v61, %v7808_v20 }
 0xddc   :  { %v8611_v57 = vld [vmem:[#allocation5 + $0x174] sm:$0xf0]  ;;  %v8431_v1 = vor.u32 %v8723_v32, %v8430_v46  ;;  %v8435_v44 = vor.u32 %v8721_v39, %v8432_v26  ;;  %v8414_v21 = vld [vmem:[#allocation5 + $0x4c8] sm:$0xf]  ;;  %v8717_v48 = vld [vmem:[#allocation5 + $0x4cc] sm:$0xf] }
 0xddd   :  { %7610 = vmatpush.bf16.msrb.mxu0 %v7871_v30  ;;  %7688 = vmatpush.bf16.msra.mxu2 %v7875_v34  ;;  %v8609_v30 = vld [vmem:[#allocation5 + $0x16c] sm:$0xf]  ;;  %v7984_v34 = vld [vmem:[#allocation5 + $0x178] sm:$0xf0]  ;;  %v8719_v8 = vld [vmem:[#allocation5 + $0x4d4] sm:$0xf0]  ;;  %v7983_v28 = vor.u32 %v8611_v57, %v7982_v49 }
 0xdde   :  { %7524 = vmatmul.bf16.vlgmr.msrb.gmra.mxu1 %v14759_v36  ;;  %7602 = vmatmul.bf16.vlgmr.msra.gmra.mxu3 %v14759_v36  ;;  %v8416_v11 = vld [vmem:[#allocation5 + $0x4d8] sm:$0xf0]  ;;  %v7987_v18 = vor.u32 %v8609_v30, %v7984_v34  ;;  %v7966_v23 = vld [vmem:[#allocation5 + $0x148] sm:$0xf]  ;;  %v8607_v43 = vld [vmem:[#allocation5 + $0x154] sm:$0xf0]  ;;  %v8415_v51 = vor.u32 %v8719_v8, %v8414_v21 }
 0xddf   :  { %7620 = vmatpush.bf16.msrb.mxu1 %v8047_v22  ;;  %7698 = vmatpush.bf16.msra.mxu3 %v8051_v29  ;;  %v8605_v22 = vld [vmem:[#allocation5 + $0x14c] sm:$0xf]  ;;  %v7968_v29 = vld [vmem:[#allocation5 + $0x158] sm:$0xf0]  ;;  %v8419_v54 = vor.u32 %v8717_v48, %v8416_v11  ;;  %v8398_v4 = vld [vmem:[#allocation5 + $0x4a8] sm:$0xf]  ;;  %v7967_v53 = vor.u32 %v8607_v43, %v7966_v23 }
 0xde0   :  { %7563 = vmatmul.bf16.vlgmr.msra.gmra.mxu0 %v16635_v15  ;;  %7641 = vmatmul.bf16.vlgmr.msrb.gmra.mxu2 %v16635_v15  ;;  %v7488_v58 = vpop.f32.mrf.mxu2  ;;  %v16636_v45 = vld [vmem:[#allocation107_spill] sm:$0xff]  ;;  %v8400_v17 = vld [vmem:[#allocation5 + $0x4b8] sm:$0xf0]  ;;  %v7971_v60 = vor.u32 %v8605_v22, %v7968_v29  ;;  %v8603_v41 = vld [vmem:[#allocation5 + $0x134] sm:$0xf0]  ;;  %vm7774_vm4 = vcmask 1043456  }
 0xde1   :  { %7611 = vmatpush.bf16.msrb.mxu0 %v7855_v37  ;;  %7689 = vmatpush.bf16.msra.mxu2 %v7859_v7  ;;  %v8715_v37 = vld [vmem:[#allocation5 + $0x4b4] sm:$0xf0]  ;;  %v8713_v7 = vld [vmem:[#allocation5 + $0x4ac] sm:$0xf]  ;;  %v7950_v19 = vld [vmem:[#allocation5 + $0x128] sm:$0xf] }
 0xde2   :  { %v8601_v0 = vld [vmem:[#allocation5 + $0x12c] sm:$0xf]  ;;  %v7952_v16 = vld [vmem:[#allocation5 + $0x138] sm:$0xf0]  ;;  %v8399_v14 = vor.u32 %v8715_v37, %v8398_v4  ;;  %v8403_v59 = vor.u32 %v8713_v7, %v8400_v17  ;;  %v7951_v3 = vor.u32 %v8603_v41, %v7950_v19  ;;  %v8558_v33 = vld [vmem:[#allocation5 + $0x5e8] sm:$0xf] }
 0xde3   :  { %7621 = vmatpush.bf16.msrb.mxu1 %v8031_v56  ;;  %7699 = vmatpush.bf16.msra.mxu3 %v8035_v35  ;;  %v16637_v56 = vld [vmem:[#allocation98_spill] sm:$0xff]  ;;  %v8709_v52 = vld [vmem:[#allocation5 + $0x48c] sm:$0xf]  ;;  %v8384_v62 = vld [vmem:[#allocation5 + $0x498] sm:$0xf0]  ;;  %v7955_v63 = vor.u32 %v8601_v0, %v7952_v16 }
 0xde4   :  { %v8597_v10 = vld [vmem:[#allocation5 + $0x10c] sm:$0xf]  ;;  %v7936_v9 = vld [vmem:[#allocation5 + $0x118] sm:$0xf0]  ;;  %v8755_v12 = vld [vmem:[#allocation5 + $0x5f4] sm:$0xf0] }
 0xde5   :  { %7612 = vmatpush.bf16.msrb.mxu0 %v7839_v5  ;;  %7690 = vmatpush.bf16.msra.mxu2 %v7843_v13  ;;  %v8382_v5 = vld [vmem:[#allocation5 + $0x488] sm:$0xf]  ;;  %v8711_v13 = vld [vmem:[#allocation5 + $0x494] sm:$0xf0]  ;;  %v8753_v2 = vld [vmem:[#allocation5 + $0x5ec] sm:$0xf]  ;;  %v7939_v32 = vor.u32 %v8597_v10, %v7936_v9  ;;  %v8559_v26 = vor.u32 %v8755_v12, %v8558_v33 }
 0xde6   :  { %v8560_v24 = vld [vmem:[#allocation5 + $0x5f8] sm:$0xf0]  ;;  %v8366_v61 = vld [vmem:[#allocation5 + $0x468] sm:$0xf]  ;;  %v8707_v20 = vld [vmem:[#allocation5 + $0x474] sm:$0xf0] }
 0xde7   :  { %7622 = vmatpush.bf16.msrb.mxu1 %v8015_v25  ;;  %7700 = vmatpush.bf16.msra.mxu3 %v8019_v31  ;;  %v7934_v25 = vld [vmem:[#allocation5 + $0x108] sm:$0xf]  ;;  %v8599_v31 = vld [vmem:[#allocation5 + $0x114] sm:$0xf0]  ;;  %v8705_v46 = vld [vmem:[#allocation5 + $0x46c] sm:$0xf]  ;;  %v8563_v49 = vor.u32 %v8753_v2, %v8560_v24 }
 0xde8   :  { %v14772_v35 = vpop.f32.mrf.mxu2  ;;  %v8542_v58 = vld [vmem:[#allocation5 + $0x5c8] sm:$0xf]  ;;  %v8749_v30 = vld [vmem:[#allocation5 + $0x5cc] sm:$0xf]  ;;  %v8544_v34 = vld [vmem:[#allocation5 + $0x5d8] sm:$0xf0] }
 0xde9   :  { %7613 = vmatpush.bf16.msrb.mxu0 %v7823_v42  ;;  %7691 = vmatpush.bf16.msra.mxu2 %v7827_v47  ;;  %v8383_v42 = vor.u32 %v8711_v13, %v8382_v5  ;;  %v8387_v47 = vor.u32 %v8709_v52, %v8384_v62  ;;  %v8701_v21 = vld [vmem:[#allocation5 + $0x44c] sm:$0xf]  ;;  %v8352_v8 = vld [vmem:[#allocation5 + $0x458] sm:$0xf0]  ;;  %v8547_v11 = vor.u32 %v8749_v30, %v8544_v34  ;;  %v8699_v4 = vld [vmem:[#allocation5 + $0x434] sm:$0xf0] }
 0xdea   :  { %v8355_v43 = vor.u32 %v8701_v21, %v8352_v8  ;;  %v8745_v22 = vld [vmem:[#allocation5 + $0x5ac] sm:$0xf]  ;;  %v8528_v29 = vld [vmem:[#allocation5 + $0x5b8] sm:$0xf0]  ;;  %v8743_v19 = vld [vmem:[#allocation5 + $0x594] sm:$0xf0] }
 0xdeb   :  { %7623 = vmatpush.bf16.msrb.mxu1 %v7999_v55  ;;  %7701 = vmatpush.bf16.msra.mxu3 %v8003_v6  ;;  %v8368_v55 = vld [vmem:[#allocation5 + $0x478] sm:$0xf0]  ;;  %v7935_v6 = vor.u32 %v8599_v31, %v7934_v25  ;;  %v8697_v37 = vld [vmem:[#allocation5 + $0x42c] sm:$0xf]  ;;  %v8494_v10 = vld [vmem:[#allocation5 + $0x568] sm:$0xf] }
 0xdec   :  { %v8371_v57 = vor.u32 %v8705_v46, %v8368_v55  ;;  %v8336_v7 = vld [vmem:[#allocation5 + $0x438] sm:$0xf0]  ;;  %v8741_v0 = vld [vmem:[#allocation5 + $0x58c] sm:$0xf]  ;;  %v8739_v9 = vld [vmem:[#allocation5 + $0x574] sm:$0xf0] }
 0xded   :  { %7614 = vmatpush.bf16.msrb.mxu0 %v7807_v38  ;;  %7692 = vmatpush.bf16.msra.mxu2 %v7811_v40  ;;  %v8751_v38 = vld [vmem:[#allocation5 + $0x5d4] sm:$0xf0]  ;;  %v8367_v40 = vor.u32 %v8707_v20, %v8366_v61  ;;  %v8339_v41 = vor.u32 %v8697_v37, %v8336_v7  ;;  %v8512_v16 = vld [vmem:[#allocation5 + $0x598] sm:$0xf0]  ;;  %v8693_v5 = vld [vmem:[#allocation5 + $0x40c] sm:$0xf]  ;;  %v8495_v24 = vor.u32 %v8739_v9, %v8494_v10 }
 0xdee   :  { %7576 = vmatmul.bf16.vlgmr.msra.gmra.mxu1 %v16636_v45  ;;  %7654 = vmatmul.bf16.vlgmr.msrb.gmra.mxu3 %v16636_v45  ;;  %v8543_v48 = vor.u32 %v8751_v38, %v8542_v58  ;;  %v8320_v13 = vld [vmem:[#allocation5 + $0x418] sm:$0xf0]  ;;  %v8657_v52 = vld [vmem:[#allocation5 + $0x2ec] sm:$0xf]  ;;  %v8478_v46 = vld [vmem:[#allocation5 + $0x548] sm:$0xf] }
 0xdef   :  { %7624 = vmatpush.bf16.msrb.mxu1 %v7983_v28  ;;  %7702 = vmatpush.bf16.msra.mxu3 %v7987_v18  ;;  %v8526_v28 = vld [vmem:[#allocation5 + $0x5a8] sm:$0xf]  ;;  %v8747_v18 = vld [vmem:[#allocation5 + $0x5b4] sm:$0xf0]  ;;  %v8176_v62 = vld [vmem:[#allocation5 + $0x2f8] sm:$0xf0]  ;;  %v8323_v31 = vor.u32 %v8693_v5, %v8320_v13 }
 0xdf0   :  { %7615 = vmatmul.bf16.vlgmr.msrb.gmra.mxu0 %v16637_v56  ;;  %7693 = vmatmul.bf16.vlgmr.msra.gmra.mxu2 %v16637_v56  ;;  %v7540_v39 = vpop.f32.mrf.mxu2  ;;  %v8527_v17 = vor.u32 %v8747_v18, %v8526_v28  ;;  %v8179_v33 = vor.u32 %v8657_v52, %v8176_v62  ;;  %v8737_v12 = vld [vmem:[#allocation5 + $0x56c] sm:$0xf]  ;;  %v8160_v2 = vld [vmem:[#allocation5 + $0x2d8] sm:$0xf0]  ;;  %v8735_v55 = vld [vmem:[#allocation5 + $0x554] sm:$0xf0] }
 0xdf1   :  { %7659 = vmatpush.bf16.msra.mxu0 %v8431_v1  ;;  %7737 = vmatpush.bf16.msrb.mxu2 %v8435_v44  ;;  %v8350_v1 = vld [vmem:[#allocation5 + $0x448] sm:$0xf]  ;;  %v8703_v44 = vld [vmem:[#allocation5 + $0x454] sm:$0xf0]  ;;  %v8733_v39 = vld [vmem:[#allocation5 + $0x54c] sm:$0xf]  ;;  %v8479_v38 = vor.u32 %v8735_v55, %v8478_v46 }
 0xdf2   :  { %v8351_v23 = vor.u32 %v8703_v44, %v8350_v1  ;;  %v8144_v58 = vld [vmem:[#allocation5 + $0x2b8] sm:$0xf0]  ;;  %v8731_v30 = vld [vmem:[#allocation5 + $0x534] sm:$0xf0]  ;;  %v8729_v1 = vld [vmem:[#allocation5 + $0x52c] sm:$0xf] }
 0xdf3   :  { %7625 = vmatpush.bf16.msrb.mxu1 %v7967_v53  ;;  %7703 = vmatpush.bf16.msra.mxu3 %v7971_v60  ;;  %v8531_v53 = vor.u32 %v8745_v22, %v8528_v29  ;;  %v8510_v60 = vld [vmem:[#allocation5 + $0x588] sm:$0xf]  ;;  %v8645_v44 = vld [vmem:[#allocation5 + $0x28c] sm:$0xf]  ;;  %v8128_v21 = vld [vmem:[#allocation5 + $0x298] sm:$0xf0] }
 0xdf4   :  { %v8446_v28 = vld [vmem:[#allocation5 + $0x508] sm:$0xf]  ;;  %v8727_v18 = vld [vmem:[#allocation5 + $0x514] sm:$0xf0]  ;;  %v8689_v22 = vld [vmem:[#allocation5 + $0x3ec] sm:$0xf] }
 0xdf5   :  { %7660 = vmatpush.bf16.msra.mxu0 %v8415_v51  ;;  %7738 = vmatpush.bf16.msrb.mxu2 %v8419_v54  ;;  %v8334_v51 = vld [vmem:[#allocation5 + $0x428] sm:$0xf]  ;;  %v16638_v54 = vld [vmem:[#allocation101_spill] sm:$0xff]  ;;  %v8447_v7 = vor.u32 %v8727_v18, %v8446_v28  ;;  %v8681_v52 = vld [vmem:[#allocation5 + $0x3ac] sm:$0xf] }
 0xdf6   :  { %v8335_v56 = vor.u32 %v8699_v4, %v8334_v51  ;;  %v8304_v29 = vld [vmem:[#allocation5 + $0x3f8] sm:$0xf0]  ;;  %v8641_v51 = vld [vmem:[#allocation5 + $0x26c] sm:$0xf]  ;;  %v14784_v4 = vld [vmem:[%s14802_s4] sm:$0xf] }
 0xdf7   :  { %7626 = vmatpush.bf16.msrb.mxu1 %v7951_v3  ;;  %7704 = vmatpush.bf16.msra.mxu3 %v7955_v63  ;;  %v8511_v3 = vor.u32 %v8743_v19, %v8510_v60  ;;  %v8515_v63 = vor.u32 %v8741_v0, %v8512_v16  ;;  %v6484_v37 = vperm.slane %v14784_v4, 1  ;;  %v8685_v19 = vld [vmem:[#allocation5 + $0x3cc] sm:$0xf]  ;;  %v8096_v0 = vld [vmem:[#allocation5 + $0x258] sm:$0xf0]  ;;  %s9127_s4 = smov [#allocation7]  }
 0xdf8   :  { %v8272_v62 = vld [vmem:[#allocation5 + $0x3b8] sm:$0xf0]  ;;  %v8629_v9 = vld [vmem:[#allocation5 + $0x20c] sm:$0xf]  ;;  %s7783_s15 = sshll.u32 %s9127_s4, 4  ;;  %s7784_s15 = int_to_ptr.vmem [resolvable:$true] %s7783_s15 }
 0xdf9   :  { %7661 = vmatpush.bf16.msra.mxu0 %v8399_v14  ;;  %7739 = vmatpush.bf16.msrb.mxu2 %v8403_v59  ;;  %v8318_v14 = vld [vmem:[#allocation5 + $0x408] sm:$0xf]  ;;  %v8695_v59 = vld [vmem:[#allocation5 + $0x414] sm:$0xf0]  ;;  %v7539_v16 = vadd.f32 %v14772_v35, %v6484_v37  ;;  %v8256_v10 = vld [vmem:[#allocation5 + $0x398] sm:$0xf0] }
 0xdfa   :  { %v8319_v25 = vor.u32 %v8695_v59, %v8318_v14  ;;  %v8665_v55 = vld [vmem:[#allocation5 + $0x32c] sm:$0xf] }
 0xdfb   :  { %7627 = vmatpush.bf16.msrb.mxu1 %v7935_v6  ;;  %7705 = vmatpush.bf16.msra.mxu3 %v7939_v32 }
 0xdfd   :  { %7662 = vmatpush.bf16.msra.mxu0 %v8383_v42  ;;  %7740 = vmatpush.bf16.msrb.mxu2 %v8387_v47  ;;  %v8496_v42 = vld [vmem:[#allocation5 + $0x578] sm:$0xf0]  ;;  %v8653_v47 = vld [vmem:[#allocation5 + $0x2cc] sm:$0xf] }
 0xdfe   :  { %7628 = vmatmul.bf16.vlgmr.msrb.gmra.mxu1 %v16638_v54  ;;  %7706 = vmatmul.bf16.vlgmr.msra.gmra.mxu3 %v16638_v54  ;;  %v8499_v20 = vor.u32 %v8737_v12, %v8496_v42  ;;  %v8163_v32 = vor.u32 %v8653_v47, %v8160_v2  ;;  %v8112_v54 = vld [vmem:[#allocation5 + $0x278] sm:$0xf0]  ;;  %v8673_v2 = vld [vmem:[#allocation5 + $0x36c] sm:$0xf] }
 0xdff   :  { %7672 = vmatpush.bf16.msra.mxu1 %v8559_v26  ;;  %7750 = vmatpush.bf16.msrb.mxu3 %v8563_v49  ;;  %v8480_v26 = vld [vmem:[#allocation5 + $0x558] sm:$0xf0]  ;;  %v8649_v49 = vld [vmem:[#allocation5 + $0x2ac] sm:$0xf]  ;;  %v8115_v60 = vor.u32 %v8641_v51, %v8112_v54 }
 0xe00   :  { %v8147_v34 = vor.u32 %v8649_v49, %v8144_v58  ;;  %v8192_v49 = vld [vmem:[#allocation5 + $0x318] sm:$0xf0] }
 0xe01   :  { %7663 = vmatpush.bf16.msra.mxu0 %v8367_v40  ;;  %7741 = vmatpush.bf16.msrb.mxu2 %v8371_v57  ;;  %v8483_v40 = vor.u32 %v8733_v39, %v8480_v26  ;;  %v8462_v57 = vld [vmem:[#allocation5 + $0x528] sm:$0xf]  ;;  %v8661_v26 = vld [vmem:[#allocation5 + $0x30c] sm:$0xf] }
 0xe02   :  { %v8463_v8 = vor.u32 %v8731_v30, %v8462_v57  ;;  %v8195_v58 = vor.u32 %v8661_v26, %v8192_v49 }
 0xe03   :  { %7673 = vmatpush.bf16.msra.mxu1 %v8543_v48  ;;  %7751 = vmatpush.bf16.msrb.mxu3 %v8547_v11  ;;  %v7499_v61 = vpop.f32.mrf.mxu3 }
 0xe04   :  { %v14777_v6 = vadd.f32 %v7499_v61, %v14766_v27  ;;  %v8464_v27 = vld [vmem:[#allocation5 + $0x538] sm:$0xf0] }
 0xe05   :  { %7664 = vmatpush.bf16.msra.mxu0 %v8351_v23  ;;  %7742 = vmatpush.bf16.msrb.mxu2 %v8355_v43  ;;  %v8467_v11 = vor.u32 %v8729_v1, %v8464_v27  ;;  %v8725_v23 = vld [vmem:[#allocation5 + $0x50c] sm:$0xf]  ;;  %v8448_v43 = vld [vmem:[#allocation5 + $0x518] sm:$0xf0] }
 0xe07   :  { %7674 = vmatpush.bf16.msra.mxu1 %v8527_v17  ;;  %7752 = vmatpush.bf16.msrb.mxu3 %v8531_v53  ;;  %v8451_v17 = vor.u32 %v8725_v23, %v8448_v43  ;;  %v8307_v53 = vor.u32 %v8689_v22, %v8304_v29 }
 0xe09   :  { %7665 = vmatpush.bf16.msra.mxu0 %v8335_v56  ;;  %7743 = vmatpush.bf16.msrb.mxu2 %v8339_v41  ;;  %v8288_v56 = vld [vmem:[#allocation5 + $0x3d8] sm:$0xf0]  ;;  %v8637_v41 = vld [vmem:[#allocation5 + $0x24c] sm:$0xf] }
 0xe0a   :  { %v8291_v59 = vor.u32 %v8685_v19, %v8288_v56  ;;  %v8099_v13 = vor.u32 %v8637_v41, %v8096_v0 }
 0xe0b   :  { %7675 = vmatpush.bf16.msra.mxu1 %v8511_v3  ;;  %7753 = vmatpush.bf16.msrb.mxu3 %v8515_v63  ;;  %v7501_v48 = vpop.f32.mrf.mxu3  ;;  %v8633_v3 = vld [vmem:[#allocation5 + $0x22c] sm:$0xf]  ;;  %v8080_v63 = vld [vmem:[#allocation5 + $0x238] sm:$0xf0] }
 0xe0c   :  { %v8083_v35 = vor.u32 %v8633_v3, %v8080_v63 }
 0xe0d   :  { %7666 = vmatpush.bf16.msra.mxu0 %v8319_v25  ;;  %7744 = vmatpush.bf16.msrb.mxu2 %v8323_v31  ;;  %v8275_v25 = vor.u32 %v8681_v52, %v8272_v62  ;;  %v8677_v31 = vld [vmem:[#allocation5 + $0x38c] sm:$0xf] }
 0xe0e   :  { %v8259_v42 = vor.u32 %v8677_v31, %v8256_v10 }
 0xe0f   :  { %7676 = vmatpush.bf16.msra.mxu1 %v8495_v24  ;;  %7754 = vmatpush.bf16.msrb.mxu3 %v8499_v20  ;;  %v8240_v24 = vld [vmem:[#allocation5 + $0x378] sm:$0xf0]  ;;  %v8669_v20 = vld [vmem:[#allocation5 + $0x34c] sm:$0xf] }
 0xe10   :  { %7667 = vmatmul.bf16.vlgmr.msra.gmra.mxu0 %v14721_v50  ;;  %7745 = vmatmul.bf16.vlgmr.msrb.gmra.mxu2 %v14721_v50  ;;  %v8131_v50 = vor.u32 %v8645_v44, %v8128_v21  ;;  %v8243_v61 = vor.u32 %v8673_v2, %v8240_v24 }
 0xe11   :  { %7711 = vmatpush.bf16.msrb.mxu0 %v8179_v33  ;;  %v8064_v33 = vld [vmem:[#allocation5 + $0x218] sm:$0xf0] }
 0xe12   :  { %v8067_v47 = vor.u32 %v8629_v9, %v8064_v33  ;;  %v6486_v9 = vperm.slane %v14784_v4, 3 }
 0xe13   :  { %7677 = vmatpush.bf16.msra.mxu1 %v8479_v38  ;;  %7755 = vmatpush.bf16.msrb.mxu3 %v8483_v40 }
 0xe14   :  { %v7551_v14 = vpop.f32.mrf.mxu3 }
 0xe15   :  { %7712 = vmatpush.bf16.msrb.mxu0 %v8163_v32  ;;  %v7552_v5 = vadd.f32 %v7551_v14, %v7539_v16  ;;  %v8208_v32 = vld [vmem:[#allocation5 + $0x338] sm:$0xf0] }
 0xe16   :  { %v8211_v39 = vor.u32 %v8665_v55, %v8208_v32 }
 0xe17   :  { %7678 = vmatpush.bf16.msra.mxu1 %v8463_v8  ;;  %7756 = vmatpush.bf16.msrb.mxu3 %v8467_v11 }
 0xe19   :  { %7713 = vmatpush.bf16.msrb.mxu0 %v8147_v34 }
 0xe1b   :  { %7679 = vmatpush.bf16.msra.mxu1 %v8447_v7  ;;  %7757 = vmatpush.bf16.msrb.mxu3 %v8451_v17  ;;  %v6485_v17 = vperm.slane %v14784_v4, 2 }
 0xe1c   :  { %v7553_v12 = vpop.f32.mrf.mxu3 }
 0xe1d   :  { %7714 = vmatpush.bf16.msrb.mxu0 %v8131_v50 }
 0xe1e   :  { %7680 = vmatmul.bf16.vlgmr.msra.gmra.mxu1 %v14759_v36  ;;  %7758 = vmatmul.bf16.vlgmr.msrb.gmra.mxu3 %v14759_v36  ;;  %v8224_v36 = vld [vmem:[#allocation5 + $0x358] sm:$0xf0] }
 0xe1f   :  { %7724 = vmatpush.bf16.msrb.mxu1 %v8307_v53  ;;  %v8227_v46 = vor.u32 %v8669_v20, %v8224_v36 }
 0xe21   :  { %7715 = vmatpush.bf16.msrb.mxu0 %v8115_v60 }
 0xe23   :  { %7725 = vmatpush.bf16.msrb.mxu1 %v8291_v59 }
 0xe25   :  { %7716 = vmatpush.bf16.msrb.mxu0 %v8099_v13 }
 0xe27   :  { %7726 = vmatpush.bf16.msrb.mxu1 %v8275_v25 }
 0xe29   :  { %7717 = vmatpush.bf16.msrb.mxu0 %v8083_v35 }
 0xe2b   :  { %7727 = vmatpush.bf16.msrb.mxu1 %v8259_v42 }
 0xe2d   :  { %7718 = vmatpush.bf16.msrb.mxu0 %v8067_v47 }
 0xe2f   :  { %7728 = vmatpush.bf16.msrb.mxu1 %v8243_v61 }
 0xe30   :  { %7719 = vmatmul.bf16.vlgmr.msrb.gmra.mxu0 %v16635_v15 }
 0xe33   :  { %7729 = vmatpush.bf16.msrb.mxu1 %v8227_v46 }
 0xe37   :  { %7730 = vmatpush.bf16.msrb.mxu1 %v8211_v39 }
 0xe3b   :  { %7731 = vmatpush.bf16.msrb.mxu1 %v8195_v58 }
 0xe3e   :  { %7732 = vmatmul.bf16.vlgmr.msrb.gmra.mxu1 %v16636_v45 }
 0xe4d   :  { %v7512_v38 = vpop.f32.mrf.mxu0 }
 0xe4e   :  { %v7513_v40 = vadd.f32 %v7512_v38, %v14777_v6 }
 0xe53   :  { %v7590_v57 = vpop.f32.mrf.mxu2 }
 0xe55   :  { %v7514_v30 = vpop.f32.mrf.mxu0 }
 0xe5b   :  { %v7592_v34 = vpop.f32.mrf.mxu2  ;;  %v7525_v15 = vpop.f32.mrf.mxu1 }
 0xe5c   :  { %v7526_v1 = vadd.f32 %v7525_v15, %v7513_v40 }
 0xe5d   :  { %v7564_v27 = vpop.f32.mrf.mxu0 }
 0xe5e   :  { %v7565_v44 = vadd.f32 %v7564_v27, %v7552_v5 }
 0xe61   :  { %v7603_v21 = vpop.f32.mrf.mxu3 }
 0xe63   :  { %v7642_v8 = vpop.f32.mrf.mxu2  ;;  %v7527_v48 = vpop.f32.mrf.mxu1 }
 0xe65   :  { %v7566_v11 = vpop.f32.mrf.mxu0 }
 0xe69   :  { %v7605_v28 = vpop.f32.mrf.mxu3 }
 0xe6b   :  { %v7644_v18 = vpop.f32.mrf.mxu2  ;;  %v7577_v23 = vpop.f32.mrf.mxu1 }
 0xe6c   :  { %v7578_v50 = vadd.f32 %v7577_v23, %v7565_v44 }
 0xe6d   :  { %v7616_v43 = vpop.f32.mrf.mxu0 }
 0xe6e   :  { %v7591_v45 = vadd.f32 %v7590_v57, %v7578_v50  ;;  %v7617_v60 = vadd.f32 %v7616_v43, %v6485_v17 }
 0xe70   :  { %v7604_v22 = vadd.f32 %v7603_v21, %v7591_v45 }
 0xe71   :  { %v7655_v29 = vpop.f32.mrf.mxu3 }
 0xe72   :  { %v7767_v6 = vrot.slane %v7604_v22, 6 }
 0xe73   :  { %v7694_v51 = vpop.f32.mrf.mxu2  ;;  %v7579_v54 = vpop.f32.mrf.mxu1 }
 0xe74   :  { %v7771_v37 = vsel %vm7770_vm2, %v7526_v1, %v7767_v6  ;;  %v7695_v12 = vadd.f32 %v7694_v51, %v6486_v9 }
 0xe75   :  { %v7618_v7 = vpop.f32.mrf.mxu0 }
 0xe79   :  { %v7657_v53 = vpop.f32.mrf.mxu3 }
 0xe7b   :  { %v7696_v19 = vpop.f32.mrf.mxu2  ;;  %v7629_v56 = vpop.f32.mrf.mxu1 }
 0xe7c   :  { %v7630_v41 = vadd.f32 %v7629_v56, %v7617_v60 }
 0xe7e   :  { %v7643_v0 = vadd.f32 %v7642_v8, %v7630_v41 }
 0xe80   :  { %v7656_v16 = vadd.f32 %v7655_v29, %v7643_v0 }
 0xe81   :  { %v7707_v14 = vpop.f32.mrf.mxu3 }
 0xe82   :  { %v7708_v42 = vadd.f32 %v7707_v14, %v7695_v12 }
 0xe83   :  { %v7631_v59 = vpop.f32.mrf.mxu1 }
 0xe89   :  { %v7709_v13 = vpop.f32.mrf.mxu3 }
 0xe8d   :  { %v7668_v5 = vpop.f32.mrf.mxu0 }
 0xe8e   :  { %v7669_v24 = vadd.f32 %v7668_v5, %v7656_v16 }
 0xe93   :  { %v7746_v52 = vpop.f32.mrf.mxu2 }
 0xe95   :  { %v7670_v62 = vpop.f32.mrf.mxu0 }
 0xe9b   :  { %v7748_v3 = vpop.f32.mrf.mxu2  ;;  %v7681_v63 = vpop.f32.mrf.mxu1 }
 0xe9c   :  { %v7682_v20 = vadd.f32 %v7681_v63, %v7669_v24 }
 0xe9e   :  { %v7768_v55 = vrot.slane %v7682_v20, 4 }
 0xea1   :  { %v7759_v25 = vpop.f32.mrf.mxu3 }
 0xea3   :  { %v7683_v35 = vpop.f32.mrf.mxu1 }
 0xea9   :  { %v7761_v10 = vpop.f32.mrf.mxu3 }
 0xead   :  { %v7720_v31 = vpop.f32.mrf.mxu0 }
 0xeae   :  { %v7721_v47 = vadd.f32 %v7720_v31, %v7708_v42 }
 0xeb5   :  { %v7722_v33 = vpop.f32.mrf.mxu0 }
 0xebb   :  { %v7733_v2 = vpop.f32.mrf.mxu1 }
 0xebc   :  { %v7734_v61 = vadd.f32 %v7733_v2, %v7721_v47 }
 0xebe   :  { %v7747_v36 = vadd.f32 %v7746_v52, %v7734_v61 }
 0xec0   :  { %v7760_v46 = vadd.f32 %v7759_v25, %v7747_v36 }
 0xec2   :  { %v7769_v32 = vrot.slane %v7760_v46, 2 }
 0xec3   :  { %v7735_v4 = vpop.f32.mrf.mxu1 }
 0xec4   :  { %v7773_v39 = vsel %vm7772_vm3, %v7768_v55, %v7769_v32 }
 0xec5   :  { %v7775_v26 = vsel %vm7774_vm4, %v7771_v37, %v7773_v39 }
 0xec6   :  { %7777 = vst [vmem:[#allocation7] sm:$0xff] %v7775_v26 }
 0xec7   :  { %7788 = dma.vmem_to_hbm [thread:$0]  %s7784_s15, 128, %s7786_s18, [#allocation4]  }
 0xec8   :  { %9119 = dma.done.wait [#allocation4], 128  }
 0xec9   :  { %9120 = vsyncadd [#allocation4], 4294967168 }
 0xeca   :  { %7793 = vsyncpa [#allocation3], 1 }
 0xecb   :  { %7794 = vsyncpa [#allocation6], 1 }
 0xecc   :  { %7795 = vsyncpa [#allocation4], 1 }

</bundles_post_ra>
